<compile_context>
chip_gen: v7x
topology: tpu7x:2x2x1
jax: 0.10.0
libtpu: 0.0.40
codegen_flags: <defaults>
</compile_context>

<pallas_src>
import jax
import jax.numpy as jnp
from jax.experimental import pallas as pl
from jax.experimental.pallas import tpu as pltpu


# ----------------------------- Pallas kernel -------------------------------

def _conv_bn_relu_pool(x, xp_ref, w_ref, b_ref):
    """3x3 conv (pad 1) + folded-BN bias + ReLU + 2x2 max-pool.

    x:      (N, H, W, Cin) f32 value (VMEM resident)
    xp_ref: (N, H+2, W+2, Cin) VMEM scratch (padded im2col source)
    w_ref:  (9*Cin, Cout)  conv weights with BN scale folded in
    b_ref:  (1, Cout)      folded conv-bias + BN shift
    returns (N, H//2, W//2, Cout) f32 value
    """
    n, h, w, cin = x.shape
    cout = b_ref.shape[-1]
    m = n * h * w

    # zero-pad H and W by 1 into the scratch ref (in-kernel, stays in VMEM)
    xp_ref[...] = jnp.zeros(xp_ref.shape, xp_ref.dtype)
    xp_ref[:, 1:h + 1, 1:w + 1, :] = x

    # 3x3 conv as 9 shifted-tap multiply-accumulates
    acc = jnp.zeros((m, cout), jnp.float32)
    for k in range(9):
        dy, dx = k // 3, k % 3
        tap = xp_ref[:, dy:dy + h, dx:dx + w, :].reshape(m, cin)
        wk = w_ref[k * cin:(k + 1) * cin, :]                 # (Cin, Cout)
        if cin == 1:
            acc = acc + tap * wk                             # VPU outer product (block1)
        else:
            acc = acc + jnp.dot(tap, wk, preferred_element_type=jnp.float32)

    y = jnp.maximum(acc + b_ref[...], 0.0)                   # BN bias + ReLU

    # 2x2 max-pool; rows of y are ordered (n, h, w)
    wh, hh = w // 2, h // 2
    yw = y.reshape(m // 2, 2, cout)                          # pair neighbours along W
    yw = jnp.maximum(yw[:, 0, :], yw[:, 1, :])               # (n*h*wh, cout)
    yh = yw.reshape(n * hh, 2, wh, cout)                     # pair neighbours along H
    yh = jnp.maximum(yh[:, 0], yh[:, 1])                     # (n*hh, wh, cout)
    return yh.reshape(n, hh, wh, cout)


def audio_cnn_kernel(x_ref, w1_ref, b1_ref, w2_ref, b2_ref, w3_ref, b3_ref,
                     fw1_ref, fb1_ref, fw2_ref, fb2_ref, o_ref,
                     xp1_ref, xp2_ref, xp3_ref, feat_ref):
    x = _conv_bn_relu_pool(x_ref[...], xp1_ref, w1_ref, b1_ref)   # (N, H/2, W/2, 16)
    x = _conv_bn_relu_pool(x, xp2_ref, w2_ref, b2_ref)            # (N, H/4, W/4, 32)
    x = _conv_bn_relu_pool(x, xp3_ref, w3_ref, b3_ref)            # (N, H/8, W/8, 64)

    # flatten in (h, w, c) order; fc1 columns were pre-permuted to match, so
    # this reproduces PyTorch's NCHW x.view(batch, -1) semantics exactly.
    _, hh, wh, c = x.shape
    for hi in range(hh):
        for wi in range(wh):
            off = (hi * wh + wi) * c
            feat_ref[:, off:off + c] = x[:, hi, wi, :]
    feats = feat_ref[...]

    h1 = jnp.dot(feats, fw1_ref[...], preferred_element_type=jnp.float32) + fb1_ref[...]
    h1 = jnp.maximum(h1, 0.0)
    # dropout: inference (eval) mode -> identity
    o_ref[...] = jnp.dot(h1, fw2_ref[...], preferred_element_type=jnp.float32) + fb2_ref[...]


# ------------------------------ JAX wrapper --------------------------------

def _vmem():
    return pl.BlockSpec(memory_space=pltpu.MemorySpace.VMEM)


def prepare_params(params, h=16, w=16, eps=1e-5):
    """One-time parameter prep: fold BN into conv weights, permute/transposed FC."""
    def fold(p):
        cout, cin = p["w"].shape[0], p["w"].shape[1]
        scale = p["gamma"] / jnp.sqrt(p["var"] + eps)                       # (cout,)
        w_mat = jnp.transpose(p["w"], (2, 3, 1, 0)).reshape(9 * cin, cout)  # tap-major rows
        w_mat = (w_mat * scale[None, :]).astype(jnp.float32)                # fold BN scale
        bias = (((p["b"] - p["mean"]) * scale) + p["beta"]).reshape(1, cout)
        return w_mat, bias.astype(jnp.float32)

    w1, b1 = fold(params["block1"])
    w2, b2 = fold(params["block2"])
    w3, b3 = fold(params["block3"])

    # fc1: permute input features from NCHW-flatten (c,h,w) to kernel (h,w,c) order
    c3 = params["block3"]["w"].shape[0]
    hh, wh = h // 8, w // 8
    fw1 = params["fc1"]["w"]                                   # (128, c3*hh*wh)
    n_hidden = fw1.shape[0]
    fw1 = (fw1.reshape(n_hidden, c3, hh, wh)
              .transpose(0, 2, 3, 1)
              .reshape(n_hidden, -1).T).astype(jnp.float32)    # (fc_in, 128)
    fb1 = params["fc1"]["b"].reshape(1, -1).astype(jnp.float32)
    fw2 = params["fc2"]["w"].T.astype(jnp.float32)             # (128, num_classes)
    fb2 = params["fc2"]["b"].reshape(1, -1).astype(jnp.float32)
    return (w1, b1, w2, b2, w3, b3, fw1, fb1, fw2, fb2)


@jax.jit
def audio_cnn_forward(prepared, x_nchw):
    (w1, b1, w2, b2, w3, b3, fw1, fb1, fw2, fb2) = prepared
    n, _, h, w = x_nchw.shape
    num_classes = fw2.shape[1]
    x_nhwc = jnp.transpose(x_nchw, (0, 2, 3, 1))               # NCHW -> NHWC (Cin=1)

    scratch = [
        pltpu.VMEM((n, h + 2, w + 2, 1), jnp.float32),                     # padded block1 in
        pltpu.VMEM((n, h // 2 + 2, w // 2 + 2, w1.shape[1]), jnp.float32), # padded block2 in
        pltpu.VMEM((n, h // 4 + 2, w // 4 + 2, w2.shape[1]), jnp.float32), # padded block3 in
        pltpu.VMEM((n, fw1.shape[0]), jnp.float32),                        # flattened feats
    ]
    return pl.pallas_call(
        audio_cnn_kernel,
        out_shape=jax.ShapeDtypeStruct((n, num_classes), jnp.float32),
        in_specs=[_vmem()] * 11,
        out_specs=_vmem(),
        scratch_shapes=scratch,
    )(x_nhwc, w1, b1, w2, b2, w3, b3, fw1, fb1, fw2, fb2)


# --------------------------- Parameter init --------------------------------

def init_params(key, num_classes=3, h=16, w=16):
    fc_in = 64 * (h // 8) * (w // 8)

    def conv_bn(k, cout, cin):
        k1, k2, k3, k4, k5, k6 = jax.random.split(k, 6)
        return dict(
            w=0.1 * jax.random.normal(k1, (cout, cin, 3, 3), jnp.float32),
            b=0.1 * jax.random.normal(k2, (cout,), jnp.float32),
            gamma=1.0 + 0.1 * jax.random.normal(k3, (cout,), jnp.float32),
            beta=0.1 * jax.random.normal(k4, (cout,), jnp.float32),
            mean=0.1 * jax.random.normal(k5, (cout,), jnp.float32),
            var=jax.random.uniform(k6, (cout,), jnp.float32, 0.5, 1.5),
        )

    def linear(k, cout, cin):
        k1, k2 = jax.random.split(k)
        return dict(
            w=0.05 * jax.random.normal(k1, (cout, cin), jnp.float32),
            b=0.05 * jax.random.normal(k2, (cout,), jnp.float32),
        )

    k1, k2, k3, k4, k5 = jax.random.split(key, 5)
    return dict(
        block1=conv_bn(k1, 16, 1),
        block2=conv_bn(k2, 32, 16),
        block3=conv_bn(k3, 64, 32),
        fc1=linear(k4, 128, fc_in),
        fc2=linear(k5, num_classes, 128),
    )


if __name__ == "__main__":
    key = jax.random.PRNGKey(0)
    pkey, xkey = jax.random.split(key)
    params = init_params(pkey, num_classes=3, h=16, w=16)
    prepared = prepare_params(params, h=16, w=16)
    x = jax.random.normal(xkey, (2, 1, 16, 16), jnp.float32)   # NCHW, like PyTorch

    logits = audio_cnn_forward(prepared, x)
    jax.block_until_ready(logits)
    assert logits.shape == (2, 3) and logits.dtype == jnp.float32
    print("KERNEL_OK")
</pallas_src>

<mosaic_0001>
module attributes {stable_mosaic.version = 11 : i64} {
  func.func @audio_cnn_kernel(%arg0: memref<2x16x16x1xf32, #tpu.memory_space<vmem>>, %arg1: memref<9x16xf32, #tpu.memory_space<vmem>>, %arg2: memref<1x16xf32, #tpu.memory_space<vmem>>, %arg3: memref<144x32xf32, #tpu.memory_space<vmem>>, %arg4: memref<1x32xf32, #tpu.memory_space<vmem>>, %arg5: memref<288x64xf32, #tpu.memory_space<vmem>>, %arg6: memref<1x64xf32, #tpu.memory_space<vmem>>, %arg7: memref<256x128xf32, #tpu.memory_space<vmem>>, %arg8: memref<1x128xf32, #tpu.memory_space<vmem>>, %arg9: memref<128x3xf32, #tpu.memory_space<vmem>>, %arg10: memref<1x3xf32, #tpu.memory_space<vmem>>, %arg11: memref<2x3xf32, #tpu.memory_space<vmem>>, %arg12: memref<2x18x18x1xf32, #tpu.memory_space<vmem>>, %arg13: memref<2x10x10x16xf32, #tpu.memory_space<vmem>>, %arg14: memref<2x6x6x32xf32, #tpu.memory_space<vmem>>, %arg15: memref<2x256xf32, #tpu.memory_space<vmem>>) attributes {dimension_semantics = [], scalar_prefetch = 0 : i64, scratch_operands = 4 : i64, tpu.core_type = #tpu.core_type<tc>} {
    %c0 = arith.constant 0 : index
    %c0_0 = arith.constant 0 : index
    %c0_1 = arith.constant 0 : index
    %c0_2 = arith.constant 0 : index
    %0 = vector.load %arg0[%c0, %c0_0, %c0_1, %c0_2] : memref<2x16x16x1xf32, #tpu.memory_space<vmem>>, vector<2x16x16x1xf32>
    %cst = arith.constant 0.000000e+00 : f32
    %1 = vector.broadcast %cst : f32 to vector<2x18x18x1xf32>
    %c0_3 = arith.constant 0 : index
    %c0_4 = arith.constant 0 : index
    %c0_5 = arith.constant 0 : index
    %c0_6 = arith.constant 0 : index
    %2 = vector.load %arg12[%c0_3, %c0_4, %c0_5, %c0_6] : memref<2x18x18x1xf32, #tpu.memory_space<vmem>>, vector<2x18x18x1xf32>
    tpu.vector_store %arg12[%c0_3, %c0_4, %c0_5, %c0_6], %1 {strides = array<i32>} : memref<2x18x18x1xf32, #tpu.memory_space<vmem>>, vector<2x18x18x1xf32>,
    %c0_7 = arith.constant 0 : index
    %c1 = arith.constant 1 : index
    %c1_8 = arith.constant 1 : index
    %c0_9 = arith.constant 0 : index
    %3 = vector.load %arg12[%c0_7, %c1, %c1_8, %c0_9] : memref<2x18x18x1xf32, #tpu.memory_space<vmem>>, vector<2x16x16x1xf32>
    tpu.vector_store %arg12[%c0_7, %c1, %c1_8, %c0_9], %0 {strides = array<i32>} : memref<2x18x18x1xf32, #tpu.memory_space<vmem>>, vector<2x16x16x1xf32>,
    %cst_10 = arith.constant 0.000000e+00 : f32
    %4 = vector.broadcast %cst_10 : f32 to vector<512x16xf32>
    %c0_11 = arith.constant 0 : index
    %c0_12 = arith.constant 0 : index
    %c0_13 = arith.constant 0 : index
    %c0_14 = arith.constant 0 : index
    %5 = vector.load %arg12[%c0_11, %c0_12, %c0_13, %c0_14] : memref<2x18x18x1xf32, #tpu.memory_space<vmem>>, vector<2x16x16x1xf32>
    %6 = vector.shape_cast %5 : vector<2x16x16x1xf32> to vector<512x1xf32>
    %c0_15 = arith.constant 0 : index
    %c0_16 = arith.constant 0 : index
    %7 = vector.load %arg1[%c0_15, %c0_16] : memref<9x16xf32, #tpu.memory_space<vmem>>, vector<1x16xf32>
    %8 = vector.broadcast %6 : vector<512x1xf32> to vector<512x16xf32>
    %9 = vector.broadcast %7 : vector<1x16xf32> to vector<512x16xf32>
    %10 = arith.mulf %8, %9 : vector<512x16xf32>
    %11 = arith.addf %4, %10 : vector<512x16xf32>
    %c0_17 = arith.constant 0 : index
    %c0_18 = arith.constant 0 : index
    %c1_19 = arith.constant 1 : index
    %c0_20 = arith.constant 0 : index
    %12 = vector.load %arg12[%c0_17, %c0_18, %c1_19, %c0_20] : memref<2x18x18x1xf32, #tpu.memory_space<vmem>>, vector<2x16x16x1xf32>
    %13 = vector.shape_cast %12 : vector<2x16x16x1xf32> to vector<512x1xf32>
    %c1_21 = arith.constant 1 : index
    %c0_22 = arith.constant 0 : index
    %14 = vector.load %arg1[%c1_21, %c0_22] : memref<9x16xf32, #tpu.memory_space<vmem>>, vector<1x16xf32>
    %15 = vector.broadcast %13 : vector<512x1xf32> to vector<512x16xf32>
    %16 = vector.broadcast %14 : vector<1x16xf32> to vector<512x16xf32>
    %17 = arith.mulf %15, %16 : vector<512x16xf32>
    %18 = arith.addf %11, %17 : vector<512x16xf32>
    %c0_23 = arith.constant 0 : index
    %c0_24 = arith.constant 0 : index
    %c2 = arith.constant 2 : index
    %c0_25 = arith.constant 0 : index
    %19 = vector.load %arg12[%c0_23, %c0_24, %c2, %c0_25] : memref<2x18x18x1xf32, #tpu.memory_space<vmem>>, vector<2x16x16x1xf32>
    %20 = vector.shape_cast %19 : vector<2x16x16x1xf32> to vector<512x1xf32>
    %c2_26 = arith.constant 2 : index
    %c0_27 = arith.constant 0 : index
    %21 = vector.load %arg1[%c2_26, %c0_27] : memref<9x16xf32, #tpu.memory_space<vmem>>, vector<1x16xf32>
    %22 = vector.broadcast %20 : vector<512x1xf32> to vector<512x16xf32>
    %23 = vector.broadcast %21 : vector<1x16xf32> to vector<512x16xf32>
    %24 = arith.mulf %22, %23 : vector<512x16xf32>
    %25 = arith.addf %18, %24 : vector<512x16xf32>
    %c0_28 = arith.constant 0 : index
    %c1_29 = arith.constant 1 : index
    %c0_30 = arith.constant 0 : index
    %c0_31 = arith.constant 0 : index
    %26 = vector.load %arg12[%c0_28, %c1_29, %c0_30, %c0_31] : memref<2x18x18x1xf32, #tpu.memory_space<vmem>>, vector<2x16x16x1xf32>
    %27 = vector.shape_cast %26 : vector<2x16x16x1xf32> to vector<512x1xf32>
    %c3 = arith.constant 3 : index
    %c0_32 = arith.constant 0 : index
    %28 = vector.load %arg1[%c3, %c0_32] : memref<9x16xf32, #tpu.memory_space<vmem>>, vector<1x16xf32>
    %29 = vector.broadcast %27 : vector<512x1xf32> to vector<512x16xf32>
    %30 = vector.broadcast %28 : vector<1x16xf32> to vector<512x16xf32>
    %31 = arith.mulf %29, %30 : vector<512x16xf32>
    %32 = arith.addf %25, %31 : vector<512x16xf32>
    %c0_33 = arith.constant 0 : index
    %c1_34 = arith.constant 1 : index
    %c1_35 = arith.constant 1 : index
    %c0_36 = arith.constant 0 : index
    %33 = vector.load %arg12[%c0_33, %c1_34, %c1_35, %c0_36] : memref<2x18x18x1xf32, #tpu.memory_space<vmem>>, vector<2x16x16x1xf32>
    %34 = vector.shape_cast %33 : vector<2x16x16x1xf32> to vector<512x1xf32>
    %c4 = arith.constant 4 : index
    %c0_37 = arith.constant 0 : index
    %35 = vector.load %arg1[%c4, %c0_37] : memref<9x16xf32, #tpu.memory_space<vmem>>, vector<1x16xf32>
    %36 = vector.broadcast %34 : vector<512x1xf32> to vector<512x16xf32>
    %37 = vector.broadcast %35 : vector<1x16xf32> to vector<512x16xf32>
    %38 = arith.mulf %36, %37 : vector<512x16xf32>
    %39 = arith.addf %32, %38 : vector<512x16xf32>
    %c0_38 = arith.constant 0 : index
    %c1_39 = arith.constant 1 : index
    %c2_40 = arith.constant 2 : index
    %c0_41 = arith.constant 0 : index
    %40 = vector.load %arg12[%c0_38, %c1_39, %c2_40, %c0_41] : memref<2x18x18x1xf32, #tpu.memory_space<vmem>>, vector<2x16x16x1xf32>
    %41 = vector.shape_cast %40 : vector<2x16x16x1xf32> to vector<512x1xf32>
    %c5 = arith.constant 5 : index
    %c0_42 = arith.constant 0 : index
    %42 = vector.load %arg1[%c5, %c0_42] : memref<9x16xf32, #tpu.memory_space<vmem>>, vector<1x16xf32>
    %43 = vector.broadcast %41 : vector<512x1xf32> to vector<512x16xf32>
    %44 = vector.broadcast %42 : vector<1x16xf32> to vector<512x16xf32>
    %45 = arith.mulf %43, %44 : vector<512x16xf32>
    %46 = arith.addf %39, %45 : vector<512x16xf32>
    %c0_43 = arith.constant 0 : index
    %c2_44 = arith.constant 2 : index
    %c0_45 = arith.constant 0 : index
    %c0_46 = arith.constant 0 : index
    %47 = vector.load %arg12[%c0_43, %c2_44, %c0_45, %c0_46] : memref<2x18x18x1xf32, #tpu.memory_space<vmem>>, vector<2x16x16x1xf32>
    %48 = vector.shape_cast %47 : vector<2x16x16x1xf32> to vector<512x1xf32>
    %c6 = arith.constant 6 : index
    %c0_47 = arith.constant 0 : index
    %49 = vector.load %arg1[%c6, %c0_47] : memref<9x16xf32, #tpu.memory_space<vmem>>, vector<1x16xf32>
    %50 = vector.broadcast %48 : vector<512x1xf32> to vector<512x16xf32>
    %51 = vector.broadcast %49 : vector<1x16xf32> to vector<512x16xf32>
    %52 = arith.mulf %50, %51 : vector<512x16xf32>
    %53 = arith.addf %46, %52 : vector<512x16xf32>
    %c0_48 = arith.constant 0 : index
    %c2_49 = arith.constant 2 : index
    %c1_50 = arith.constant 1 : index
    %c0_51 = arith.constant 0 : index
    %54 = vector.load %arg12[%c0_48, %c2_49, %c1_50, %c0_51] : memref<2x18x18x1xf32, #tpu.memory_space<vmem>>, vector<2x16x16x1xf32>
    %55 = vector.shape_cast %54 : vector<2x16x16x1xf32> to vector<512x1xf32>
    %c7 = arith.constant 7 : index
    %c0_52 = arith.constant 0 : index
    %56 = vector.load %arg1[%c7, %c0_52] : memref<9x16xf32, #tpu.memory_space<vmem>>, vector<1x16xf32>
    %57 = vector.broadcast %55 : vector<512x1xf32> to vector<512x16xf32>
    %58 = vector.broadcast %56 : vector<1x16xf32> to vector<512x16xf32>
    %59 = arith.mulf %57, %58 : vector<512x16xf32>
    %60 = arith.addf %53, %59 : vector<512x16xf32>
    %c0_53 = arith.constant 0 : index
    %c2_54 = arith.constant 2 : index
    %c2_55 = arith.constant 2 : index
    %c0_56 = arith.constant 0 : index
    %61 = vector.load %arg12[%c0_53, %c2_54, %c2_55, %c0_56] : memref<2x18x18x1xf32, #tpu.memory_space<vmem>>, vector<2x16x16x1xf32>
    %62 = vector.shape_cast %61 : vector<2x16x16x1xf32> to vector<512x1xf32>
    %c8 = arith.constant 8 : index
    %c0_57 = arith.constant 0 : index
    %63 = vector.load %arg1[%c8, %c0_57] : memref<9x16xf32, #tpu.memory_space<vmem>>, vector<1x16xf32>
    %64 = vector.broadcast %62 : vector<512x1xf32> to vector<512x16xf32>
    %65 = vector.broadcast %63 : vector<1x16xf32> to vector<512x16xf32>
    %66 = arith.mulf %64, %65 : vector<512x16xf32>
    %67 = arith.addf %60, %66 : vector<512x16xf32>
    %c0_58 = arith.constant 0 : index
    %c0_59 = arith.constant 0 : index
    %68 = vector.load %arg2[%c0_58, %c0_59] : memref<1x16xf32, #tpu.memory_space<vmem>>, vector<1x16xf32>
    %69 = vector.broadcast %68 : vector<1x16xf32> to vector<512x16xf32>
    %70 = arith.addf %67, %69 : vector<512x16xf32>
    %cst_60 = arith.constant 0.000000e+00 : f32
    %71 = vector.broadcast %cst_60 : f32 to vector<512x16xf32>
    %72 = arith.maximumf %70, %71 : vector<512x16xf32>
    %73 = vector.shape_cast %72 : vector<512x16xf32> to vector<256x2x16xf32>
    %74 = vector.extract_strided_slice %73 {offsets = [0, 0, 0], sizes = [256, 1, 16], strides = [1, 1, 1]} : vector<256x2x16xf32> to vector<256x1x16xf32>
    %75 = vector.shape_cast %74 : vector<256x1x16xf32> to vector<256x16xf32>
    %76 = vector.extract_strided_slice %73 {offsets = [0, 1, 0], sizes = [256, 1, 16], strides = [1, 1, 1]} : vector<256x2x16xf32> to vector<256x1x16xf32>
    %77 = vector.shape_cast %76 : vector<256x1x16xf32> to vector<256x16xf32>
    %78 = arith.maximumf %75, %77 : vector<256x16xf32>
    %79 = vector.shape_cast %78 : vector<256x16xf32> to vector<16x2x8x16xf32>
    %80 = vector.extract_strided_slice %79 {offsets = [0, 0, 0, 0], sizes = [16, 1, 8, 16], strides = [1, 1, 1, 1]} : vector<16x2x8x16xf32> to vector<16x1x8x16xf32>
    %81 = vector.shape_cast %80 : vector<16x1x8x16xf32> to vector<16x8x16xf32>
    %82 = vector.extract_strided_slice %79 {offsets = [0, 1, 0, 0], sizes = [16, 1, 8, 16], strides = [1, 1, 1, 1]} : vector<16x2x8x16xf32> to vector<16x1x8x16xf32>
    %83 = vector.shape_cast %82 : vector<16x1x8x16xf32> to vector<16x8x16xf32>
    %84 = arith.maximumf %81, %83 : vector<16x8x16xf32>
    %85 = vector.shape_cast %84 : vector<16x8x16xf32> to vector<2x8x8x16xf32>
    %cst_61 = arith.constant 0.000000e+00 : f32
    %86 = vector.broadcast %cst_61 : f32 to vector<2x10x10x16xf32>
    %c0_62 = arith.constant 0 : index
    %c0_63 = arith.constant 0 : index
    %c0_64 = arith.constant 0 : index
    %c0_65 = arith.constant 0 : index
    %87 = vector.load %arg13[%c0_62, %c0_63, %c0_64, %c0_65] : memref<2x10x10x16xf32, #tpu.memory_space<vmem>>, vector<2x10x10x16xf32>
    tpu.vector_store %arg13[%c0_62, %c0_63, %c0_64, %c0_65], %86 {strides = array<i32>} : memref<2x10x10x16xf32, #tpu.memory_space<vmem>>, vector<2x10x10x16xf32>,
    %c0_66 = arith.constant 0 : index
    %c1_67 = arith.constant 1 : index
    %c1_68 = arith.constant 1 : index
    %c0_69 = arith.constant 0 : index
    %88 = vector.load %arg13[%c0_66, %c1_67, %c1_68, %c0_69] : memref<2x10x10x16xf32, #tpu.memory_space<vmem>>, vector<2x8x8x16xf32>
    tpu.vector_store %arg13[%c0_66, %c1_67, %c1_68, %c0_69], %85 {strides = array<i32>} : memref<2x10x10x16xf32, #tpu.memory_space<vmem>>, vector<2x8x8x16xf32>,
    %cst_70 = arith.constant 0.000000e+00 : f32
    %89 = vector.broadcast %cst_70 : f32 to vector<128x32xf32>
    %c0_71 = arith.constant 0 : index
    %c0_72 = arith.constant 0 : index
    %c0_73 = arith.constant 0 : index
    %c0_74 = arith.constant 0 : index
    %90 = vector.load %arg13[%c0_71, %c0_72, %c0_73, %c0_74] : memref<2x10x10x16xf32, #tpu.memory_space<vmem>>, vector<2x8x8x16xf32>
    %91 = vector.shape_cast %90 : vector<2x8x8x16xf32> to vector<128x16xf32>
    %c0_75 = arith.constant 0 : index
    %c0_76 = arith.constant 0 : index
    %92 = vector.load %arg3[%c0_75, %c0_76] : memref<144x32xf32, #tpu.memory_space<vmem>>, vector<16x32xf32>
    %cst_77 = arith.constant dense<0.000000e+00> : vector<128x32xf32>
    %93 = tpu.matmul %91, %92, %cst_77 {dimension_numbers = #tpu.dot_dimension_numbers<[1], [0], [0], [1], [0, 0, 1, 1], [], []>} : vector<128x16xf32>, vector<16x32xf32>, vector<128x32xf32> -> vector<128x32xf32>
    %94 = arith.addf %89, %93 : vector<128x32xf32>
    %c0_78 = arith.constant 0 : index
    %c0_79 = arith.constant 0 : index
    %c1_80 = arith.constant 1 : index
    %c0_81 = arith.constant 0 : index
    %95 = vector.load %arg13[%c0_78, %c0_79, %c1_80, %c0_81] : memref<2x10x10x16xf32, #tpu.memory_space<vmem>>, vector<2x8x8x16xf32>
    %96 = vector.shape_cast %95 : vector<2x8x8x16xf32> to vector<128x16xf32>
    %c16 = arith.constant 16 : index
    %c0_82 = arith.constant 0 : index
    %97 = vector.load %arg3[%c16, %c0_82] : memref<144x32xf32, #tpu.memory_space<vmem>>, vector<16x32xf32>
    %cst_83 = arith.constant dense<0.000000e+00> : vector<128x32xf32>
    %98 = tpu.matmul %96, %97, %cst_83 {dimension_numbers = #tpu.dot_dimension_numbers<[1], [0], [0], [1], [0, 0, 1, 1], [], []>} : vector<128x16xf32>, vector<16x32xf32>, vector<128x32xf32> -> vector<128x32xf32>
    %99 = arith.addf %94, %98 : vector<128x32xf32>
    %c0_84 = arith.constant 0 : index
    %c0_85 = arith.constant 0 : index
    %c2_86 = arith.constant 2 : index
    %c0_87 = arith.constant 0 : index
    %100 = vector.load %arg13[%c0_84, %c0_85, %c2_86, %c0_87] : memref<2x10x10x16xf32, #tpu.memory_space<vmem>>, vector<2x8x8x16xf32>
    %101 = vector.shape_cast %100 : vector<2x8x8x16xf32> to vector<128x16xf32>
    %c32 = arith.constant 32 : index
    %c0_88 = arith.constant 0 : index
    %102 = vector.load %arg3[%c32, %c0_88] : memref<144x32xf32, #tpu.memory_space<vmem>>, vector<16x32xf32>
    %cst_89 = arith.constant dense<0.000000e+00> : vector<128x32xf32>
    %103 = tpu.matmul %101, %102, %cst_89 {dimension_numbers = #tpu.dot_dimension_numbers<[1], [0], [0], [1], [0, 0, 1, 1], [], []>} : vector<128x16xf32>, vector<16x32xf32>, vector<128x32xf32> -> vector<128x32xf32>
    %104 = arith.addf %99, %103 : vector<128x32xf32>
    %c0_90 = arith.constant 0 : index
    %c1_91 = arith.constant 1 : index
    %c0_92 = arith.constant 0 : index
    %c0_93 = arith.constant 0 : index
    %105 = vector.load %arg13[%c0_90, %c1_91, %c0_92, %c0_93] : memref<2x10x10x16xf32, #tpu.memory_space<vmem>>, vector<2x8x8x16xf32>
    %106 = vector.shape_cast %105 : vector<2x8x8x16xf32> to vector<128x16xf32>
    %c48 = arith.constant 48 : index
    %c0_94 = arith.constant 0 : index
    %107 = vector.load %arg3[%c48, %c0_94] : memref<144x32xf32, #tpu.memory_space<vmem>>, vector<16x32xf32>
    %cst_95 = arith.constant dense<0.000000e+00> : vector<128x32xf32>
    %108 = tpu.matmul %106, %107, %cst_95 {dimension_numbers = #tpu.dot_dimension_numbers<[1], [0], [0], [1], [0, 0, 1, 1], [], []>} : vector<128x16xf32>, vector<16x32xf32>, vector<128x32xf32> -> vector<128x32xf32>
    %109 = arith.addf %104, %108 : vector<128x32xf32>
    %c0_96 = arith.constant 0 : index
    %c1_97 = arith.constant 1 : index
    %c1_98 = arith.constant 1 : index
    %c0_99 = arith.constant 0 : index
    %110 = vector.load %arg13[%c0_96, %c1_97, %c1_98, %c0_99] : memref<2x10x10x16xf32, #tpu.memory_space<vmem>>, vector<2x8x8x16xf32>
    %111 = vector.shape_cast %110 : vector<2x8x8x16xf32> to vector<128x16xf32>
    %c64 = arith.constant 64 : index
    %c0_100 = arith.constant 0 : index
    %112 = vector.load %arg3[%c64, %c0_100] : memref<144x32xf32, #tpu.memory_space<vmem>>, vector<16x32xf32>
    %cst_101 = arith.constant dense<0.000000e+00> : vector<128x32xf32>
    %113 = tpu.matmul %111, %112, %cst_101 {dimension_numbers = #tpu.dot_dimension_numbers<[1], [0], [0], [1], [0, 0, 1, 1], [], []>} : vector<128x16xf32>, vector<16x32xf32>, vector<128x32xf32> -> vector<128x32xf32>
    %114 = arith.addf %109, %113 : vector<128x32xf32>
    %c0_102 = arith.constant 0 : index
    %c1_103 = arith.constant 1 : index
    %c2_104 = arith.constant 2 : index
    %c0_105 = arith.constant 0 : index
    %115 = vector.load %arg13[%c0_102, %c1_103, %c2_104, %c0_105] : memref<2x10x10x16xf32, #tpu.memory_space<vmem>>, vector<2x8x8x16xf32>
    %116 = vector.shape_cast %115 : vector<2x8x8x16xf32> to vector<128x16xf32>
    %c80 = arith.constant 80 : index
    %c0_106 = arith.constant 0 : index
    %117 = vector.load %arg3[%c80, %c0_106] : memref<144x32xf32, #tpu.memory_space<vmem>>, vector<16x32xf32>
    %cst_107 = arith.constant dense<0.000000e+00> : vector<128x32xf32>
    %118 = tpu.matmul %116, %117, %cst_107 {dimension_numbers = #tpu.dot_dimension_numbers<[1], [0], [0], [1], [0, 0, 1, 1], [], []>} : vector<128x16xf32>, vector<16x32xf32>, vector<128x32xf32> -> vector<128x32xf32>
    %119 = arith.addf %114, %118 : vector<128x32xf32>
    %c0_108 = arith.constant 0 : index
    %c2_109 = arith.constant 2 : index
    %c0_110 = arith.constant 0 : index
    %c0_111 = arith.constant 0 : index
    %120 = vector.load %arg13[%c0_108, %c2_109, %c0_110, %c0_111] : memref<2x10x10x16xf32, #tpu.memory_space<vmem>>, vector<2x8x8x16xf32>
    %121 = vector.shape_cast %120 : vector<2x8x8x16xf32> to vector<128x16xf32>
    %c96 = arith.constant 96 : index
    %c0_112 = arith.constant 0 : index
    %122 = vector.load %arg3[%c96, %c0_112] : memref<144x32xf32, #tpu.memory_space<vmem>>, vector<16x32xf32>
    %cst_113 = arith.constant dense<0.000000e+00> : vector<128x32xf32>
    %123 = tpu.matmul %121, %122, %cst_113 {dimension_numbers = #tpu.dot_dimension_numbers<[1], [0], [0], [1], [0, 0, 1, 1], [], []>} : vector<128x16xf32>, vector<16x32xf32>, vector<128x32xf32> -> vector<128x32xf32>
    %124 = arith.addf %119, %123 : vector<128x32xf32>
    %c0_114 = arith.constant 0 : index
    %c2_115 = arith.constant 2 : index
    %c1_116 = arith.constant 1 : index
    %c0_117 = arith.constant 0 : index
    %125 = vector.load %arg13[%c0_114, %c2_115, %c1_116, %c0_117] : memref<2x10x10x16xf32, #tpu.memory_space<vmem>>, vector<2x8x8x16xf32>
    %126 = vector.shape_cast %125 : vector<2x8x8x16xf32> to vector<128x16xf32>
    %c112 = arith.constant 112 : index
    %c0_118 = arith.constant 0 : index
    %127 = vector.load %arg3[%c112, %c0_118] : memref<144x32xf32, #tpu.memory_space<vmem>>, vector<16x32xf32>
    %cst_119 = arith.constant dense<0.000000e+00> : vector<128x32xf32>
    %128 = tpu.matmul %126, %127, %cst_119 {dimension_numbers = #tpu.dot_dimension_numbers<[1], [0], [0], [1], [0, 0, 1, 1], [], []>} : vector<128x16xf32>, vector<16x32xf32>, vector<128x32xf32> -> vector<128x32xf32>
    %129 = arith.addf %124, %128 : vector<128x32xf32>
    %c0_120 = arith.constant 0 : index
    %c2_121 = arith.constant 2 : index
    %c2_122 = arith.constant 2 : index
    %c0_123 = arith.constant 0 : index
    %130 = vector.load %arg13[%c0_120, %c2_121, %c2_122, %c0_123] : memref<2x10x10x16xf32, #tpu.memory_space<vmem>>, vector<2x8x8x16xf32>
    %131 = vector.shape_cast %130 : vector<2x8x8x16xf32> to vector<128x16xf32>
    %c128 = arith.constant 128 : index
    %c0_124 = arith.constant 0 : index
    %132 = vector.load %arg3[%c128, %c0_124] : memref<144x32xf32, #tpu.memory_space<vmem>>, vector<16x32xf32>
    %cst_125 = arith.constant dense<0.000000e+00> : vector<128x32xf32>
    %133 = tpu.matmul %131, %132, %cst_125 {dimension_numbers = #tpu.dot_dimension_numbers<[1], [0], [0], [1], [0, 0, 1, 1], [], []>} : vector<128x16xf32>, vector<16x32xf32>, vector<128x32xf32> -> vector<128x32xf32>
    %134 = arith.addf %129, %133 : vector<128x32xf32>
    %c0_126 = arith.constant 0 : index
    %c0_127 = arith.constant 0 : index
    %135 = vector.load %arg4[%c0_126, %c0_127] : memref<1x32xf32, #tpu.memory_space<vmem>>, vector<1x32xf32>
    %136 = vector.broadcast %135 : vector<1x32xf32> to vector<128x32xf32>
    %137 = arith.addf %134, %136 : vector<128x32xf32>
    %cst_128 = arith.constant 0.000000e+00 : f32
    %138 = vector.broadcast %cst_128 : f32 to vector<128x32xf32>
    %139 = arith.maximumf %137, %138 : vector<128x32xf32>
    %140 = vector.shape_cast %139 : vector<128x32xf32> to vector<64x2x32xf32>
    %141 = vector.extract_strided_slice %140 {offsets = [0, 0, 0], sizes = [64, 1, 32], strides = [1, 1, 1]} : vector<64x2x32xf32> to vector<64x1x32xf32>
    %142 = vector.shape_cast %141 : vector<64x1x32xf32> to vector<64x32xf32>
    %143 = vector.extract_strided_slice %140 {offsets = [0, 1, 0], sizes = [64, 1, 32], strides = [1, 1, 1]} : vector<64x2x32xf32> to vector<64x1x32xf32>
    %144 = vector.shape_cast %143 : vector<64x1x32xf32> to vector<64x32xf32>
    %145 = arith.maximumf %142, %144 : vector<64x32xf32>
    %146 = vector.shape_cast %145 : vector<64x32xf32> to vector<8x2x4x32xf32>
    %147 = vector.extract_strided_slice %146 {offsets = [0, 0, 0, 0], sizes = [8, 1, 4, 32], strides = [1, 1, 1, 1]} : vector<8x2x4x32xf32> to vector<8x1x4x32xf32>
    %148 = vector.shape_cast %147 : vector<8x1x4x32xf32> to vector<8x4x32xf32>
    %149 = vector.extract_strided_slice %146 {offsets = [0, 1, 0, 0], sizes = [8, 1, 4, 32], strides = [1, 1, 1, 1]} : vector<8x2x4x32xf32> to vector<8x1x4x32xf32>
    %150 = vector.shape_cast %149 : vector<8x1x4x32xf32> to vector<8x4x32xf32>
    %151 = arith.maximumf %148, %150 : vector<8x4x32xf32>
    %152 = vector.shape_cast %151 : vector<8x4x32xf32> to vector<2x4x4x32xf32>
    %cst_129 = arith.constant 0.000000e+00 : f32
    %153 = vector.broadcast %cst_129 : f32 to vector<2x6x6x32xf32>
    %c0_130 = arith.constant 0 : index
    %c0_131 = arith.constant 0 : index
    %c0_132 = arith.constant 0 : index
    %c0_133 = arith.constant 0 : index
    %154 = vector.load %arg14[%c0_130, %c0_131, %c0_132, %c0_133] : memref<2x6x6x32xf32, #tpu.memory_space<vmem>>, vector<2x6x6x32xf32>
    tpu.vector_store %arg14[%c0_130, %c0_131, %c0_132, %c0_133], %153 {strides = array<i32>} : memref<2x6x6x32xf32, #tpu.memory_space<vmem>>, vector<2x6x6x32xf32>,
    %c0_134 = arith.constant 0 : index
    %c1_135 = arith.constant 1 : index
    %c1_136 = arith.constant 1 : index
    %c0_137 = arith.constant 0 : index
    %155 = vector.load %arg14[%c0_134, %c1_135, %c1_136, %c0_137] : memref<2x6x6x32xf32, #tpu.memory_space<vmem>>, vector<2x4x4x32xf32>
    tpu.vector_store %arg14[%c0_134, %c1_135, %c1_136, %c0_137], %152 {strides = array<i32>} : memref<2x6x6x32xf32, #tpu.memory_space<vmem>>, vector<2x4x4x32xf32>,
    %cst_138 = arith.constant 0.000000e+00 : f32
    %156 = vector.broadcast %cst_138 : f32 to vector<32x64xf32>
    %c0_139 = arith.constant 0 : index
    %c0_140 = arith.constant 0 : index
    %c0_141 = arith.constant 0 : index
    %c0_142 = arith.constant 0 : index
    %157 = vector.load %arg14[%c0_139, %c0_140, %c0_141, %c0_142] : memref<2x6x6x32xf32, #tpu.memory_space<vmem>>, vector<2x4x4x32xf32>
    %158 = vector.shape_cast %157 : vector<2x4x4x32xf32> to vector<32x32xf32>
    %c0_143 = arith.constant 0 : index
    %c0_144 = arith.constant 0 : index
    %159 = vector.load %arg5[%c0_143, %c0_144] : memref<288x64xf32, #tpu.memory_space<vmem>>, vector<32x64xf32>
    %cst_145 = arith.constant dense<0.000000e+00> : vector<32x64xf32>
    %160 = tpu.matmul %158, %159, %cst_145 {dimension_numbers = #tpu.dot_dimension_numbers<[1], [0], [0], [1], [0, 0, 1, 1], [], []>} : vector<32x32xf32>, vector<32x64xf32>, vector<32x64xf32> -> vector<32x64xf32>
    %161 = arith.addf %156, %160 : vector<32x64xf32>
    %c0_146 = arith.constant 0 : index
    %c0_147 = arith.constant 0 : index
    %c1_148 = arith.constant 1 : index
    %c0_149 = arith.constant 0 : index
    %162 = vector.load %arg14[%c0_146, %c0_147, %c1_148, %c0_149] : memref<2x6x6x32xf32, #tpu.memory_space<vmem>>, vector<2x4x4x32xf32>
    %163 = vector.shape_cast %162 : vector<2x4x4x32xf32> to vector<32x32xf32>
    %c32_150 = arith.constant 32 : index
    %c0_151 = arith.constant 0 : index
    %164 = vector.load %arg5[%c32_150, %c0_151] : memref<288x64xf32, #tpu.memory_space<vmem>>, vector<32x64xf32>
    %cst_152 = arith.constant dense<0.000000e+00> : vector<32x64xf32>
    %165 = tpu.matmul %163, %164, %cst_152 {dimension_numbers = #tpu.dot_dimension_numbers<[1], [0], [0], [1], [0, 0, 1, 1], [], []>} : vector<32x32xf32>, vector<32x64xf32>, vector<32x64xf32> -> vector<32x64xf32>
    %166 = arith.addf %161, %165 : vector<32x64xf32>
    %c0_153 = arith.constant 0 : index
    %c0_154 = arith.constant 0 : index
    %c2_155 = arith.constant 2 : index
    %c0_156 = arith.constant 0 : index
    %167 = vector.load %arg14[%c0_153, %c0_154, %c2_155, %c0_156] : memref<2x6x6x32xf32, #tpu.memory_space<vmem>>, vector<2x4x4x32xf32>
    %168 = vector.shape_cast %167 : vector<2x4x4x32xf32> to vector<32x32xf32>
    %c64_157 = arith.constant 64 : index
    %c0_158 = arith.constant 0 : index
    %169 = vector.load %arg5[%c64_157, %c0_158] : memref<288x64xf32, #tpu.memory_space<vmem>>, vector<32x64xf32>
    %cst_159 = arith.constant dense<0.000000e+00> : vector<32x64xf32>
    %170 = tpu.matmul %168, %169, %cst_159 {dimension_numbers = #tpu.dot_dimension_numbers<[1], [0], [0], [1], [0, 0, 1, 1], [], []>} : vector<32x32xf32>, vector<32x64xf32>, vector<32x64xf32> -> vector<32x64xf32>
    %171 = arith.addf %166, %170 : vector<32x64xf32>
    %c0_160 = arith.constant 0 : index
    %c1_161 = arith.constant 1 : index
    %c0_162 = arith.constant 0 : index
    %c0_163 = arith.constant 0 : index
    %172 = vector.load %arg14[%c0_160, %c1_161, %c0_162, %c0_163] : memref<2x6x6x32xf32, #tpu.memory_space<vmem>>, vector<2x4x4x32xf32>
    %173 = vector.shape_cast %172 : vector<2x4x4x32xf32> to vector<32x32xf32>
    %c96_164 = arith.constant 96 : index
    %c0_165 = arith.constant 0 : index
    %174 = vector.load %arg5[%c96_164, %c0_165] : memref<288x64xf32, #tpu.memory_space<vmem>>, vector<32x64xf32>
    %cst_166 = arith.constant dense<0.000000e+00> : vector<32x64xf32>
    %175 = tpu.matmul %173, %174, %cst_166 {dimension_numbers = #tpu.dot_dimension_numbers<[1], [0], [0], [1], [0, 0, 1, 1], [], []>} : vector<32x32xf32>, vector<32x64xf32>, vector<32x64xf32> -> vector<32x64xf32>
    %176 = arith.addf %171, %175 : vector<32x64xf32>
    %c0_167 = arith.constant 0 : index
    %c1_168 = arith.constant 1 : index
    %c1_169 = arith.constant 1 : index
    %c0_170 = arith.constant 0 : index
    %177 = vector.load %arg14[%c0_167, %c1_168, %c1_169, %c0_170] : memref<2x6x6x32xf32, #tpu.memory_space<vmem>>, vector<2x4x4x32xf32>
    %178 = vector.shape_cast %177 : vector<2x4x4x32xf32> to vector<32x32xf32>
    %c128_171 = arith.constant 128 : index
    %c0_172 = arith.constant 0 : index
    %179 = vector.load %arg5[%c128_171, %c0_172] : memref<288x64xf32, #tpu.memory_space<vmem>>, vector<32x64xf32>
    %cst_173 = arith.constant dense<0.000000e+00> : vector<32x64xf32>
    %180 = tpu.matmul %178, %179, %cst_173 {dimension_numbers = #tpu.dot_dimension_numbers<[1], [0], [0], [1], [0, 0, 1, 1], [], []>} : vector<32x32xf32>, vector<32x64xf32>, vector<32x64xf32> -> vector<32x64xf32>
    %181 = arith.addf %176, %180 : vector<32x64xf32>
    %c0_174 = arith.constant 0 : index
    %c1_175 = arith.constant 1 : index
    %c2_176 = arith.constant 2 : index
    %c0_177 = arith.constant 0 : index
    %182 = vector.load %arg14[%c0_174, %c1_175, %c2_176, %c0_177] : memref<2x6x6x32xf32, #tpu.memory_space<vmem>>, vector<2x4x4x32xf32>
    %183 = vector.shape_cast %182 : vector<2x4x4x32xf32> to vector<32x32xf32>
    %c160 = arith.constant 160 : index
    %c0_178 = arith.constant 0 : index
    %184 = vector.load %arg5[%c160, %c0_178] : memref<288x64xf32, #tpu.memory_space<vmem>>, vector<32x64xf32>
    %cst_179 = arith.constant dense<0.000000e+00> : vector<32x64xf32>
    %185 = tpu.matmul %183, %184, %cst_179 {dimension_numbers = #tpu.dot_dimension_numbers<[1], [0], [0], [1], [0, 0, 1, 1], [], []>} : vector<32x32xf32>, vector<32x64xf32>, vector<32x64xf32> -> vector<32x64xf32>
    %186 = arith.addf %181, %185 : vector<32x64xf32>
    %c0_180 = arith.constant 0 : index
    %c2_181 = arith.constant 2 : index
    %c0_182 = arith.constant 0 : index
    %c0_183 = arith.constant 0 : index
    %187 = vector.load %arg14[%c0_180, %c2_181, %c0_182, %c0_183] : memref<2x6x6x32xf32, #tpu.memory_space<vmem>>, vector<2x4x4x32xf32>
    %188 = vector.shape_cast %187 : vector<2x4x4x32xf32> to vector<32x32xf32>
    %c192 = arith.constant 192 : index
    %c0_184 = arith.constant 0 : index
    %189 = vector.load %arg5[%c192, %c0_184] : memref<288x64xf32, #tpu.memory_space<vmem>>, vector<32x64xf32>
    %cst_185 = arith.constant dense<0.000000e+00> : vector<32x64xf32>
    %190 = tpu.matmul %188, %189, %cst_185 {dimension_numbers = #tpu.dot_dimension_numbers<[1], [0], [0], [1], [0, 0, 1, 1], [], []>} : vector<32x32xf32>, vector<32x64xf32>, vector<32x64xf32> -> vector<32x64xf32>
    %191 = arith.addf %186, %190 : vector<32x64xf32>
    %c0_186 = arith.constant 0 : index
    %c2_187 = arith.constant 2 : index
    %c1_188 = arith.constant 1 : index
    %c0_189 = arith.constant 0 : index
    %192 = vector.load %arg14[%c0_186, %c2_187, %c1_188, %c0_189] : memref<2x6x6x32xf32, #tpu.memory_space<vmem>>, vector<2x4x4x32xf32>
    %193 = vector.shape_cast %192 : vector<2x4x4x32xf32> to vector<32x32xf32>
    %c224 = arith.constant 224 : index
    %c0_190 = arith.constant 0 : index
    %194 = vector.load %arg5[%c224, %c0_190] : memref<288x64xf32, #tpu.memory_space<vmem>>, vector<32x64xf32>
    %cst_191 = arith.constant dense<0.000000e+00> : vector<32x64xf32>
    %195 = tpu.matmul %193, %194, %cst_191 {dimension_numbers = #tpu.dot_dimension_numbers<[1], [0], [0], [1], [0, 0, 1, 1], [], []>} : vector<32x32xf32>, vector<32x64xf32>, vector<32x64xf32> -> vector<32x64xf32>
    %196 = arith.addf %191, %195 : vector<32x64xf32>
    %c0_192 = arith.constant 0 : index
    %c2_193 = arith.constant 2 : index
    %c2_194 = arith.constant 2 : index
    %c0_195 = arith.constant 0 : index
    %197 = vector.load %arg14[%c0_192, %c2_193, %c2_194, %c0_195] : memref<2x6x6x32xf32, #tpu.memory_space<vmem>>, vector<2x4x4x32xf32>
    %198 = vector.shape_cast %197 : vector<2x4x4x32xf32> to vector<32x32xf32>
    %c256 = arith.constant 256 : index
    %c0_196 = arith.constant 0 : index
    %199 = vector.load %arg5[%c256, %c0_196] : memref<288x64xf32, #tpu.memory_space<vmem>>, vector<32x64xf32>
    %cst_197 = arith.constant dense<0.000000e+00> : vector<32x64xf32>
    %200 = tpu.matmul %198, %199, %cst_197 {dimension_numbers = #tpu.dot_dimension_numbers<[1], [0], [0], [1], [0, 0, 1, 1], [], []>} : vector<32x32xf32>, vector<32x64xf32>, vector<32x64xf32> -> vector<32x64xf32>
    %201 = arith.addf %196, %200 : vector<32x64xf32>
    %c0_198 = arith.constant 0 : index
    %c0_199 = arith.constant 0 : index
    %202 = vector.load %arg6[%c0_198, %c0_199] : memref<1x64xf32, #tpu.memory_space<vmem>>, vector<1x64xf32>
    %203 = vector.broadcast %202 : vector<1x64xf32> to vector<32x64xf32>
    %204 = arith.addf %201, %203 : vector<32x64xf32>
    %cst_200 = arith.constant 0.000000e+00 : f32
    %205 = vector.broadcast %cst_200 : f32 to vector<32x64xf32>
    %206 = arith.maximumf %204, %205 : vector<32x64xf32>
    %207 = vector.shape_cast %206 : vector<32x64xf32> to vector<16x2x64xf32>
    %208 = vector.extract_strided_slice %207 {offsets = [0, 0, 0], sizes = [16, 1, 64], strides = [1, 1, 1]} : vector<16x2x64xf32> to vector<16x1x64xf32>
    %209 = vector.shape_cast %208 : vector<16x1x64xf32> to vector<16x64xf32>
    %210 = vector.extract_strided_slice %207 {offsets = [0, 1, 0], sizes = [16, 1, 64], strides = [1, 1, 1]} : vector<16x2x64xf32> to vector<16x1x64xf32>
    %211 = vector.shape_cast %210 : vector<16x1x64xf32> to vector<16x64xf32>
    %212 = arith.maximumf %209, %211 : vector<16x64xf32>
    %213 = vector.shape_cast %212 : vector<16x64xf32> to vector<4x2x2x64xf32>
    %214 = vector.extract_strided_slice %213 {offsets = [0, 0, 0, 0], sizes = [4, 1, 2, 64], strides = [1, 1, 1, 1]} : vector<4x2x2x64xf32> to vector<4x1x2x64xf32>
    %215 = vector.shape_cast %214 : vector<4x1x2x64xf32> to vector<4x2x64xf32>
    %216 = vector.extract_strided_slice %213 {offsets = [0, 1, 0, 0], sizes = [4, 1, 2, 64], strides = [1, 1, 1, 1]} : vector<4x2x2x64xf32> to vector<4x1x2x64xf32>
    %217 = vector.shape_cast %216 : vector<4x1x2x64xf32> to vector<4x2x64xf32>
    %218 = arith.maximumf %215, %217 : vector<4x2x64xf32>
    %219 = vector.shape_cast %218 : vector<4x2x64xf32> to vector<2x2x2x64xf32>
    %220 = vector.extract_strided_slice %219 {offsets = [0, 0, 0, 0], sizes = [2, 1, 1, 64], strides = [1, 1, 1, 1]} : vector<2x2x2x64xf32> to vector<2x1x1x64xf32>
    %221 = vector.shape_cast %220 : vector<2x1x1x64xf32> to vector<2x64xf32>
    %c0_201 = arith.constant 0 : index
    %c0_202 = arith.constant 0 : index
    %222 = vector.load %arg15[%c0_201, %c0_202] : memref<2x256xf32, #tpu.memory_space<vmem>>, vector<2x64xf32>
    tpu.vector_store %arg15[%c0_201, %c0_202], %221 {strides = array<i32>} : memref<2x256xf32, #tpu.memory_space<vmem>>, vector<2x64xf32>,
    %223 = vector.extract_strided_slice %219 {offsets = [0, 0, 1, 0], sizes = [2, 1, 1, 64], strides = [1, 1, 1, 1]} : vector<2x2x2x64xf32> to vector<2x1x1x64xf32>
    %224 = vector.shape_cast %223 : vector<2x1x1x64xf32> to vector<2x64xf32>
    %c0_203 = arith.constant 0 : index
    %c64_204 = arith.constant 64 : index
    %225 = vector.load %arg15[%c0_203, %c64_204] : memref<2x256xf32, #tpu.memory_space<vmem>>, vector<2x64xf32>
    tpu.vector_store %arg15[%c0_203, %c64_204], %224 {strides = array<i32>} : memref<2x256xf32, #tpu.memory_space<vmem>>, vector<2x64xf32>,
    %226 = vector.extract_strided_slice %219 {offsets = [0, 1, 0, 0], sizes = [2, 1, 1, 64], strides = [1, 1, 1, 1]} : vector<2x2x2x64xf32> to vector<2x1x1x64xf32>
    %227 = vector.shape_cast %226 : vector<2x1x1x64xf32> to vector<2x64xf32>
    %c0_205 = arith.constant 0 : index
    %c128_206 = arith.constant 128 : index
    %228 = vector.load %arg15[%c0_205, %c128_206] : memref<2x256xf32, #tpu.memory_space<vmem>>, vector<2x64xf32>
    tpu.vector_store %arg15[%c0_205, %c128_206], %227 {strides = array<i32>} : memref<2x256xf32, #tpu.memory_space<vmem>>, vector<2x64xf32>,
    %229 = vector.extract_strided_slice %219 {offsets = [0, 1, 1, 0], sizes = [2, 1, 1, 64], strides = [1, 1, 1, 1]} : vector<2x2x2x64xf32> to vector<2x1x1x64xf32>
    %230 = vector.shape_cast %229 : vector<2x1x1x64xf32> to vector<2x64xf32>
    %c0_207 = arith.constant 0 : index
    %c192_208 = arith.constant 192 : index
    %231 = vector.load %arg15[%c0_207, %c192_208] : memref<2x256xf32, #tpu.memory_space<vmem>>, vector<2x64xf32>
    tpu.vector_store %arg15[%c0_207, %c192_208], %230 {strides = array<i32>} : memref<2x256xf32, #tpu.memory_space<vmem>>, vector<2x64xf32>,
    %c0_209 = arith.constant 0 : index
    %c0_210 = arith.constant 0 : index
    %232 = vector.load %arg15[%c0_209, %c0_210] : memref<2x256xf32, #tpu.memory_space<vmem>>, vector<2x256xf32>
    %c0_211 = arith.constant 0 : index
    %c0_212 = arith.constant 0 : index
    %233 = vector.load %arg7[%c0_211, %c0_212] : memref<256x128xf32, #tpu.memory_space<vmem>>, vector<256x128xf32>
    %cst_213 = arith.constant dense<0.000000e+00> : vector<2x128xf32>
    %234 = tpu.matmul %232, %233, %cst_213 {dimension_numbers = #tpu.dot_dimension_numbers<[1], [0], [0], [1], [0, 0, 1, 1], [], []>} : vector<2x256xf32>, vector<256x128xf32>, vector<2x128xf32> -> vector<2x128xf32>
    %c0_214 = arith.constant 0 : index
    %c0_215 = arith.constant 0 : index
    %235 = vector.load %arg8[%c0_214, %c0_215] : memref<1x128xf32, #tpu.memory_space<vmem>>, vector<1x128xf32>
    %236 = vector.broadcast %235 : vector<1x128xf32> to vector<2x128xf32>
    %237 = arith.addf %234, %236 : vector<2x128xf32>
    %cst_216 = arith.constant 0.000000e+00 : f32
    %238 = vector.broadcast %cst_216 : f32 to vector<2x128xf32>
    %239 = arith.maximumf %237, %238 : vector<2x128xf32>
    %c0_217 = arith.constant 0 : index
    %c0_218 = arith.constant 0 : index
    %240 = vector.load %arg9[%c0_217, %c0_218] : memref<128x3xf32, #tpu.memory_space<vmem>>, vector<128x3xf32>
    %cst_219 = arith.constant dense<0.000000e+00> : vector<2x3xf32>
    %241 = tpu.matmul %239, %240, %cst_219 {dimension_numbers = #tpu.dot_dimension_numbers<[1], [0], [0], [1], [0, 0, 1, 1], [], []>} : vector<2x128xf32>, vector<128x3xf32>, vector<2x3xf32> -> vector<2x3xf32>
    %c0_220 = arith.constant 0 : index
    %c0_221 = arith.constant 0 : index
    %242 = vector.load %arg10[%c0_220, %c0_221] : memref<1x3xf32, #tpu.memory_space<vmem>>, vector<1x3xf32>
    %243 = vector.broadcast %242 : vector<1x3xf32> to vector<2x3xf32>
    %244 = arith.addf %241, %243 : vector<2x3xf32>
    %c0_222 = arith.constant 0 : index
    %c0_223 = arith.constant 0 : index
    %245 = vector.load %arg11[%c0_222, %c0_223] : memref<2x3xf32, #tpu.memory_space<vmem>>, vector<2x3xf32>
    tpu.vector_store %arg11[%c0_222, %c0_223], %244 {strides = array<i32>} : memref<2x3xf32, #tpu.memory_space<vmem>>, vector<2x3xf32>,
    return
  }
}

</mosaic_0001>

<bundles_post_ra>
// kernel: audio_cnn_forward.1
= control target key start
LH: loop header
LB: loop body
LE: loop exit
PB: predicated region body
PF: predicated region fallthrough
CT: control target
= control target key end

     0   :  { %vm103_vm0 = vcmask 7168   ;;  %vm106_vm1 = vcmask 1024   ;;  %v14576_v2 = vmov 0   ;;  %v20379_v3 = vmov 0.0   ;;  %s20367_s0 = inlined_call_operand.vmem [shape: f32[2,16,16,1], index: 0, kind: input, shape index: {}]   ;;  %s20368_s1 = inlined_call_operand.vmem [shape: f32[9,16], index: 1, kind: input, shape index: {}]   ;;  %s20369_s2 = inlined_call_operand.vmem [shape: f32[1,16], index: 2, kind: input, shape index: {}]   ;;  %s20370_s3 = inlined_call_operand.vmem [shape: f32[144,32], index: 3, kind: input, shape index: {}]   ;;  %s20371_s4 = inlined_call_operand.vmem [shape: f32[1,32], index: 4, kind: input, shape index: {}]   ;;  %s20372_s5 = inlined_call_operand.vmem [shape: f32[288,64], index: 5, kind: input, shape index: {}]   ;;  %s20373_s6 = inlined_call_operand.vmem [shape: f32[1,64], index: 6, kind: input, shape index: {}]   ;;  %s20374_s7 = inlined_call_operand.vmem [shape: f32[256,128], index: 7, kind: input, shape index: {}]   ;;  %s20375_s8 = inlined_call_operand.vmem [shape: f32[1,128], index: 8, kind: input, shape index: {}]   ;;  %s20376_s9 = inlined_call_operand.vmem [shape: f32[128,3], index: 9, kind: input, shape index: {}]   ;;  %s20377_s10 = inlined_call_operand.vmem [shape: f32[1,3], index: 10, kind: input, shape index: {}]   ;;  %s20378_s11 = inlined_call_operand.hbm [shape: f32[2,3], index: 11, kind: output, shape index: {}]  }
   0x1   :  { %v14646_v0 = vld [vmem:[%s20367_s0] sm:$0xff]  ;;  %v14651_v1 = vld [vmem:[%s20367_s0 + $0x8] sm:$0xff]  ;;  %14469 = vset.pattern.permute.xlu0 %v14576_v2  ;;  %14470 = vset.pattern.permute.xlu1 %v14576_v2  ;;  %104 = vst.msk [vmem:[#allocation2] sm:$0xff] %vm103_vm0, %v20379_v3  ;;  %105 = vst.msk [vmem:[#allocation2 + $0x8] sm:$0xff] %vm103_vm0, %v20379_v3 }
   0x2   :  { %108 = vst.msk [vmem:[#allocation2 + $0x18] sm:$0xff] %vm103_vm0, %v20379_v3  ;;  %109 = vst.msk [vmem:[#allocation2 + $0x20] sm:$0xff] %vm103_vm0, %v20379_v3  ;;  %v41_v4 = vld [vmem:[%s20367_s0 + $0x10] sm:$0xff]  ;;  %v42_v5 = vld [vmem:[%s20367_s0 + $0x18] sm:$0xff] }
   0x3   :  { %111 = vst.msk [vmem:[#allocation2 + $0x30] sm:$0xff] %vm103_vm0, %v20379_v3  ;;  %112 = vst.msk [vmem:[#allocation2 + $0x38] sm:$0xff] %vm103_vm0, %v20379_v3  ;;  %v43_v6 = vld [vmem:[%s20367_s0 + $0x20] sm:$0xff]  ;;  %v44_v7 = vld [vmem:[%s20367_s0 + $0x28] sm:$0xff] }
   0x4   :  { %114 = vst.msk [vmem:[#allocation2 + $0x48] sm:$0xff] %vm103_vm0, %v20379_v3  ;;  %115 = vst.msk [vmem:[#allocation2 + $0x50] sm:$0xff] %vm103_vm0, %v20379_v3  ;;  %v45_v8 = vld [vmem:[%s20367_s0 + $0x30] sm:$0xff]  ;;  %v46_v9 = vld [vmem:[%s20367_s0 + $0x38] sm:$0xff] }
   0x5   :  { %117 = vst.msk [vmem:[#allocation2 + $0x60] sm:$0xff] %vm103_vm0, %v20379_v3  ;;  %118 = vst.msk [vmem:[#allocation2 + $0x68] sm:$0xff] %vm103_vm0, %v20379_v3  ;;  %v47_v10 = vld [vmem:[%s20367_s0 + $0x40] sm:$0xff]  ;;  %v48_v11 = vld [vmem:[%s20367_s0 + $0x48] sm:$0xff] }
   0x6   :  { %120 = vst.msk [vmem:[#allocation2 + $0x78] sm:$0xff] %vm103_vm0, %v20379_v3  ;;  %121 = vst.msk [vmem:[#allocation2 + $0x80] sm:$0xff] %vm103_vm0, %v20379_v3  ;;  %v49_v12 = vld [vmem:[%s20367_s0 + $0x50] sm:$0xff]  ;;  %v50_v13 = vld [vmem:[%s20367_s0 + $0x58] sm:$0xff] }
   0x7   :  { %123 = vst.msk [vmem:[#allocation2 + $0x90] sm:$0xff] %vm103_vm0, %v20379_v3  ;;  %124 = vst.msk [vmem:[#allocation2 + $0x98] sm:$0xff] %vm103_vm0, %v20379_v3  ;;  %v51_v14 = vld [vmem:[%s20367_s0 + $0x60] sm:$0xff]  ;;  %v52_v15 = vld [vmem:[%s20367_s0 + $0x68] sm:$0xff] }
   0x8   :  { %126 = vst.msk [vmem:[#allocation2 + $0xa8] sm:$0xff] %vm103_vm0, %v20379_v3  ;;  %127 = vst.msk [vmem:[#allocation2 + $0xb0] sm:$0xff] %vm103_vm0, %v20379_v3  ;;  %v53_v16 = vld [vmem:[%s20367_s0 + $0x70] sm:$0xff]  ;;  %v54_v17 = vld [vmem:[%s20367_s0 + $0x78] sm:$0xff] }
   0x9   :  { %129 = vst.msk [vmem:[#allocation2 + $0xc0] sm:$0xff] %vm103_vm0, %v20379_v3  ;;  %130 = vst.msk [vmem:[#allocation2 + $0xc8] sm:$0xff] %vm103_vm0, %v20379_v3  ;;  %v55_v18 = vld [vmem:[%s20367_s0 + $0x80] sm:$0xff]  ;;  %v56_v19 = vld [vmem:[%s20367_s0 + $0x88] sm:$0xff] }
   0xa   :  { %132 = vst.msk [vmem:[#allocation2 + $0xd8] sm:$0xff] %vm103_vm0, %v20379_v3  ;;  %133 = vst.msk [vmem:[#allocation2 + $0xe0] sm:$0xff] %vm103_vm0, %v20379_v3  ;;  %v57_v20 = vld [vmem:[%s20367_s0 + $0x90] sm:$0xff]  ;;  %v58_v21 = vld [vmem:[%s20367_s0 + $0x98] sm:$0xff] }
   0xb   :  { %135 = vst.msk [vmem:[#allocation2 + $0xf0] sm:$0xff] %vm103_vm0, %v20379_v3  ;;  %136 = vst.msk [vmem:[#allocation2 + $0xf8] sm:$0xff] %vm103_vm0, %v20379_v3  ;;  %v59_v22 = vld [vmem:[%s20367_s0 + $0xa0] sm:$0xff]  ;;  %v60_v23 = vld [vmem:[%s20367_s0 + $0xa8] sm:$0xff] }
   0xc   :  { %138 = vst.msk [vmem:[#allocation2 + $0x108] sm:$0xff] %vm103_vm0, %v20379_v3  ;;  %139 = vst.msk [vmem:[#allocation2 + $0x110] sm:$0xff] %vm103_vm0, %v20379_v3  ;;  %v61_v24 = vld [vmem:[%s20367_s0 + $0xb0] sm:$0xff]  ;;  %v278_v25 = vld [vmem:[#allocation2] sm:$0xff] }
   0xd   :  { %141 = vst.msk [vmem:[#allocation2 + $0x120] sm:$0xff] %vm103_vm0, %v20379_v3  ;;  %142 = vst.msk [vmem:[#allocation2 + $0x128] sm:$0xff] %vm103_vm0, %v20379_v3  ;;  %v62_v26 = vld [vmem:[%s20367_s0 + $0xb8] sm:$0xff]  ;;  %345 = vperm.xlu0 %14469, %v278_v25   ;;  %v279_v28 = vld [vmem:[#allocation2 + $0x8] sm:$0xff] }
   0xe   :  { %144 = vst.msk [vmem:[#allocation2 + $0x138] sm:$0xff] %vm103_vm0, %v20379_v3  ;;  %145 = vst.msk [vmem:[#allocation2 + $0x140] sm:$0xff] %vm103_vm0, %v20379_v3  ;;  %v63_v33 = vld [vmem:[%s20367_s0 + $0xc0] sm:$0xff]  ;;  %v64_v34 = vld [vmem:[%s20367_s0 + $0xc8] sm:$0xff] }
   0xf   :  { %147 = vst.msk [vmem:[#allocation2 + $0x150] sm:$0xff] %vm103_vm0, %v20379_v3  ;;  %148 = vst.msk [vmem:[#allocation2 + $0x158] sm:$0xff] %vm103_vm0, %v20379_v3  ;;  %v65_v35 = vld [vmem:[%s20367_s0 + $0xd0] sm:$0xff]  ;;  %v66_v36 = vld [vmem:[%s20367_s0 + $0xd8] sm:$0xff] }
  0x10   :  { %150 = vst.msk [vmem:[#allocation2 + $0x168] sm:$0xff] %vm103_vm0, %v20379_v3  ;;  %151 = vst.msk [vmem:[#allocation2 + $0x170] sm:$0xff] %vm103_vm0, %v20379_v3  ;;  %v67_v37 = vld [vmem:[%s20367_s0 + $0xe0] sm:$0xff]  ;;  %v68_v38 = vld [vmem:[%s20367_s0 + $0xe8] sm:$0xff] }
  0x11   :  { %153 = vst.msk [vmem:[#allocation2 + $0x180] sm:$0xff] %vm103_vm0, %v20379_v3  ;;  %154 = vst.msk [vmem:[#allocation2 + $0x188] sm:$0xff] %vm103_vm0, %v20379_v3  ;;  %350 = vperm.xlu0 %14469, %v279_v28   ;;  %v71_v40 = vld [vmem:[%s20367_s0 + $0x100] sm:$0xff]  ;;  %v72_v42 = vld [vmem:[%s20367_s0 + $0x108] sm:$0xff] }
  0x12   :  { %156 = vst.msk [vmem:[#allocation2 + $0x198] sm:$0xff] %vm103_vm0, %v20379_v3  ;;  %157 = vst.msk [vmem:[#allocation2 + $0x1a0] sm:$0xff] %vm103_vm0, %v20379_v3  ;;  %v73_v43 = vld [vmem:[%s20367_s0 + $0x110] sm:$0xff]  ;;  %v74_v44 = vld [vmem:[%s20367_s0 + $0x118] sm:$0xff] }
  0x13   :  { %159 = vst.msk [vmem:[#allocation2 + $0x1b0] sm:$0xff] %vm103_vm0, %v20379_v3  ;;  %160 = vst.msk [vmem:[#allocation2 + $0x1b8] sm:$0xff] %vm103_vm0, %v20379_v3  ;;  %v75_v46 = vld [vmem:[%s20367_s0 + $0x120] sm:$0xff]  ;;  %v76_v47 = vld [vmem:[%s20367_s0 + $0x128] sm:$0xff] }
  0x14   :  { %162 = vst.msk [vmem:[#allocation2 + $0x1c8] sm:$0xff] %vm103_vm0, %v20379_v3  ;;  %163 = vst.msk [vmem:[#allocation2 + $0x1d0] sm:$0xff] %vm103_vm0, %v20379_v3  ;;  %v77_v48 = vld [vmem:[%s20367_s0 + $0x130] sm:$0xff]  ;;  %v78_v49 = vld [vmem:[%s20367_s0 + $0x138] sm:$0xff] }
  0x15   :  { %165 = vst.msk [vmem:[#allocation2 + $0x1e0] sm:$0xff] %vm103_vm0, %v20379_v3  ;;  %166 = vst.msk [vmem:[#allocation2 + $0x1e8] sm:$0xff] %vm103_vm0, %v20379_v3  ;;  %v79_v50 = vld [vmem:[%s20367_s0 + $0x140] sm:$0xff]  ;;  %v80_v51 = vld [vmem:[%s20367_s0 + $0x148] sm:$0xff] }
  0x16   :  { %168 = vst.msk [vmem:[#allocation2 + $0x1f8] sm:$0xff] %vm103_vm0, %v20379_v3  ;;  %169 = vst.msk [vmem:[#allocation2 + $0x200] sm:$0xff] %vm103_vm0, %v20379_v3  ;;  %v81_v52 = vld [vmem:[%s20367_s0 + $0x150] sm:$0xff]  ;;  %v82_v53 = vld [vmem:[%s20367_s0 + $0x158] sm:$0xff] }
  0x17   :  { %171 = vst.msk [vmem:[#allocation2 + $0x210] sm:$0xff] %vm103_vm0, %v20379_v3  ;;  %172 = vst.msk [vmem:[#allocation2 + $0x218] sm:$0xff] %vm103_vm0, %v20379_v3  ;;  %v83_v54 = vld [vmem:[%s20367_s0 + $0x160] sm:$0xff]  ;;  %v84_v55 = vld [vmem:[%s20367_s0 + $0x168] sm:$0xff] }
  0x18   :  { %174 = vst.msk [vmem:[#allocation2 + $0x228] sm:$0xff] %vm103_vm0, %v20379_v3  ;;  %175 = vst.msk [vmem:[#allocation2 + $0x230] sm:$0xff] %vm103_vm0, %v20379_v3  ;;  %v85_v56 = vld [vmem:[%s20367_s0 + $0x170] sm:$0xff]  ;;  %v86_v57 = vld [vmem:[%s20367_s0 + $0x178] sm:$0xff] }
  0x19   :  { %177 = vst.msk [vmem:[#allocation2 + $0x240] sm:$0xff] %vm103_vm0, %v20379_v3  ;;  %178 = vst.msk [vmem:[#allocation2 + $0x248] sm:$0xff] %vm103_vm0, %v20379_v3  ;;  %v87_v60 = vld [vmem:[%s20367_s0 + $0x180] sm:$0xff]  ;;  %v88_v61 = vld [vmem:[%s20367_s0 + $0x188] sm:$0xff] }
  0x1a   :  { %180 = vst.msk [vmem:[#allocation2 + $0x258] sm:$0xff] %vm103_vm0, %v20379_v3  ;;  %181 = vst.msk [vmem:[#allocation2 + $0x260] sm:$0xff] %vm103_vm0, %v20379_v3  ;;  %v90_v2 = vld [vmem:[%s20367_s0 + $0x198] sm:$0xff] }
  0x1b   :  { %183 = vst.msk [vmem:[#allocation2 + $0x270] sm:$0xff] %vm103_vm0, %v20379_v3  ;;  %184 = vst.msk [vmem:[#allocation2 + $0x278] sm:$0xff] %vm103_vm0, %v20379_v3 }
  0x1c   :  { %186 = vst.msk [vmem:[#allocation2 + $0x288] sm:$0xff] %vm103_vm0, %v20379_v3  ;;  %187 = vst.msk [vmem:[#allocation2 + $0x290] sm:$0xff] %vm103_vm0, %v20379_v3 }
  0x1d   :  { %189 = vst.msk [vmem:[#allocation2 + $0x2a0] sm:$0xff] %vm103_vm0, %v20379_v3  ;;  %190 = vst.msk [vmem:[#allocation2 + $0x2a8] sm:$0xff] %vm103_vm0, %v20379_v3 }
  0x1e   :  { %192 = vst.msk [vmem:[#allocation2 + $0x2b8] sm:$0xff] %vm103_vm0, %v20379_v3  ;;  %193 = vst.msk [vmem:[#allocation2 + $0x2c0] sm:$0xff] %vm103_vm0, %v20379_v3 }
  0x1f   :  { %195 = vst.msk [vmem:[#allocation2 + $0x2d0] sm:$0xff] %vm103_vm0, %v20379_v3  ;;  %196 = vst.msk [vmem:[#allocation2 + $0x2d8] sm:$0xff] %vm103_vm0, %v20379_v3 }
  0x20   :  { %198 = vst.msk [vmem:[#allocation2 + $0x2e8] sm:$0xff] %vm103_vm0, %v20379_v3  ;;  %199 = vst.msk [vmem:[#allocation2 + $0x2f0] sm:$0xff] %vm103_vm0, %v20379_v3 }
  0x21   :  { %201 = vst.msk [vmem:[#allocation2 + $0x300] sm:$0xff] %vm103_vm0, %v20379_v3  ;;  %202 = vst.msk [vmem:[#allocation2 + $0x308] sm:$0xff] %vm103_vm0, %v20379_v3 }
  0x22   :  { %204 = vst.msk [vmem:[#allocation2 + $0x318] sm:$0xff] %vm103_vm0, %v20379_v3  ;;  %205 = vst.msk [vmem:[#allocation2 + $0x320] sm:$0xff] %vm103_vm0, %v20379_v3 }
  0x23   :  { %207 = vst.msk [vmem:[#allocation2 + $0x330] sm:$0xff] %vm103_vm0, %v20379_v3  ;;  %208 = vst.msk [vmem:[#allocation2 + $0x338] sm:$0xff] %vm103_vm0, %v20379_v3 }
  0x24   :  { %210 = vst.msk [vmem:[#allocation2 + $0x348] sm:$0xff] %vm103_vm0, %v20379_v3  ;;  %211 = vst.msk [vmem:[#allocation2 + $0x350] sm:$0xff] %vm103_vm0, %v20379_v3 }
  0x25   :  { %110 = vst.msk [vmem:[#allocation2 + $0x28] sm:$0x3] %vm106_vm1, %v20379_v3  ;;  %107 = vst.msk [vmem:[#allocation2 + $0x10] sm:$0x3] %vm106_vm1, %v20379_v3 }
  0x26   :  { %113 = vst.msk [vmem:[#allocation2 + $0x40] sm:$0x3] %vm106_vm1, %v20379_v3  ;;  %116 = vst.msk [vmem:[#allocation2 + $0x58] sm:$0x3] %vm106_vm1, %v20379_v3 }
  0x27   :  { %119 = vst.msk [vmem:[#allocation2 + $0x70] sm:$0x3] %vm106_vm1, %v20379_v3  ;;  %122 = vst.msk [vmem:[#allocation2 + $0x88] sm:$0x3] %vm106_vm1, %v20379_v3 }
  0x28   :  { %125 = vst.msk [vmem:[#allocation2 + $0xa0] sm:$0x3] %vm106_vm1, %v20379_v3  ;;  %128 = vst.msk [vmem:[#allocation2 + $0xb8] sm:$0x3] %vm106_vm1, %v20379_v3 }
  0x29   :  { %131 = vst.msk [vmem:[#allocation2 + $0xd0] sm:$0x3] %vm106_vm1, %v20379_v3  ;;  %134 = vst.msk [vmem:[#allocation2 + $0xe8] sm:$0x3] %vm106_vm1, %v20379_v3 }
  0x2a   :  { %137 = vst.msk [vmem:[#allocation2 + $0x100] sm:$0x3] %vm106_vm1, %v20379_v3  ;;  %140 = vst.msk [vmem:[#allocation2 + $0x118] sm:$0x3] %vm106_vm1, %v20379_v3 }
  0x2b   :  { %143 = vst.msk [vmem:[#allocation2 + $0x130] sm:$0x3] %vm106_vm1, %v20379_v3  ;;  %146 = vst.msk [vmem:[#allocation2 + $0x148] sm:$0x3] %vm106_vm1, %v20379_v3 }
  0x2c   :  { %149 = vst.msk [vmem:[#allocation2 + $0x160] sm:$0x3] %vm106_vm1, %v20379_v3  ;;  %152 = vst.msk [vmem:[#allocation2 + $0x178] sm:$0x3] %vm106_vm1, %v20379_v3 }
  0x2d   :  { %155 = vst.msk [vmem:[#allocation2 + $0x190] sm:$0x3] %vm106_vm1, %v20379_v3  ;;  %158 = vst.msk [vmem:[#allocation2 + $0x1a8] sm:$0x3] %vm106_vm1, %v20379_v3 }
  0x2e   :  { %161 = vst.msk [vmem:[#allocation2 + $0x1c0] sm:$0x3] %vm106_vm1, %v20379_v3  ;;  %164 = vst.msk [vmem:[#allocation2 + $0x1d8] sm:$0x3] %vm106_vm1, %v20379_v3 }
  0x2f   :  { %167 = vst.msk [vmem:[#allocation2 + $0x1f0] sm:$0x3] %vm106_vm1, %v20379_v3  ;;  %170 = vst.msk [vmem:[#allocation2 + $0x208] sm:$0x3] %vm106_vm1, %v20379_v3 }
  0x30   :  { %173 = vst.msk [vmem:[#allocation2 + $0x220] sm:$0x3] %vm106_vm1, %v20379_v3  ;;  %176 = vst.msk [vmem:[#allocation2 + $0x238] sm:$0x3] %vm106_vm1, %v20379_v3 }
  0x31   :  { %179 = vst.msk [vmem:[#allocation2 + $0x250] sm:$0x3] %vm106_vm1, %v20379_v3  ;;  %182 = vst.msk [vmem:[#allocation2 + $0x268] sm:$0x3] %vm106_vm1, %v20379_v3 }
  0x32   :  { %185 = vst.msk [vmem:[#allocation2 + $0x280] sm:$0x3] %vm106_vm1, %v20379_v3  ;;  %188 = vst.msk [vmem:[#allocation2 + $0x298] sm:$0x3] %vm106_vm1, %v20379_v3 }
  0x33   :  { %191 = vst.msk [vmem:[#allocation2 + $0x2b0] sm:$0x3] %vm106_vm1, %v20379_v3  ;;  %194 = vst.msk [vmem:[#allocation2 + $0x2c8] sm:$0x3] %vm106_vm1, %v20379_v3 }
  0x34   :  { %197 = vst.msk [vmem:[#allocation2 + $0x2e0] sm:$0x3] %vm106_vm1, %v20379_v3  ;;  %200 = vst.msk [vmem:[#allocation2 + $0x2f8] sm:$0x3] %vm106_vm1, %v20379_v3 }
  0x35   :  { %203 = vst.msk [vmem:[#allocation2 + $0x310] sm:$0x3] %vm106_vm1, %v20379_v3  ;;  %206 = vst.msk [vmem:[#allocation2 + $0x328] sm:$0x3] %vm106_vm1, %v20379_v3 }
  0x36   :  { %209 = vst.msk [vmem:[#allocation2 + $0x340] sm:$0x3] %vm106_vm1, %v20379_v3  ;;  %212 = vst.msk [vmem:[#allocation2 + $0x358] sm:$0x3] %vm106_vm1, %v20379_v3 }
  0x37   :  { %214 = vst.msk [vmem:[#allocation2 + $0x19] sm:$0xff] %vm103_vm0, %v14646_v0  ;;  %215 = vst.msk [vmem:[#allocation2 + $0x21] sm:$0xff] %vm103_vm0, %v14651_v1  ;;  %v89_v1 = vld [vmem:[%s20367_s0 + $0x190] sm:$0xff] }
  0x38   :  { %216 = vst.msk [vmem:[#allocation2 + $0x31] sm:$0xff] %vm103_vm0, %v41_v4  ;;  %217 = vst.msk [vmem:[#allocation2 + $0x39] sm:$0xff] %vm103_vm0, %v42_v5  ;;  %v91_v4 = vld [vmem:[%s20367_s0 + $0x1a0] sm:$0xff]  ;;  %v92_v5 = vld [vmem:[%s20367_s0 + $0x1a8] sm:$0xff] }
  0x39   :  { %218 = vst.msk [vmem:[#allocation2 + $0x49] sm:$0xff] %vm103_vm0, %v43_v6  ;;  %219 = vst.msk [vmem:[#allocation2 + $0x51] sm:$0xff] %vm103_vm0, %v44_v7  ;;  %v93_v6 = vld [vmem:[%s20367_s0 + $0x1b0] sm:$0xff]  ;;  %v94_v7 = vld [vmem:[%s20367_s0 + $0x1b8] sm:$0xff] }
  0x3a   :  { %220 = vst.msk [vmem:[#allocation2 + $0x61] sm:$0xff] %vm103_vm0, %v45_v8  ;;  %221 = vst.msk [vmem:[#allocation2 + $0x69] sm:$0xff] %vm103_vm0, %v46_v9  ;;  %v95_v9 = vld [vmem:[%s20367_s0 + $0x1c0] sm:$0xff] }
  0x3b   :  { %222 = vst.msk [vmem:[#allocation2 + $0x79] sm:$0xff] %vm103_vm0, %v47_v10  ;;  %223 = vst.msk [vmem:[#allocation2 + $0x81] sm:$0xff] %vm103_vm0, %v48_v11  ;;  %v96_v10 = vld [vmem:[%s20367_s0 + $0x1c8] sm:$0xff]  ;;  %v97_v11 = vld [vmem:[%s20367_s0 + $0x1d0] sm:$0xff] }
  0x3c   :  { %224 = vst.msk [vmem:[#allocation2 + $0x91] sm:$0xff] %vm103_vm0, %v49_v12  ;;  %225 = vst.msk [vmem:[#allocation2 + $0x99] sm:$0xff] %vm103_vm0, %v50_v13  ;;  %v98_v12 = vld [vmem:[%s20367_s0 + $0x1d8] sm:$0xff]  ;;  %v99_v13 = vld [vmem:[%s20367_s0 + $0x1e0] sm:$0xff] }
  0x3d   :  { %226 = vst.msk [vmem:[#allocation2 + $0xa9] sm:$0xff] %vm103_vm0, %v51_v14  ;;  %227 = vst.msk [vmem:[#allocation2 + $0xb1] sm:$0xff] %vm103_vm0, %v52_v15  ;;  %v100_v14 = vld [vmem:[%s20367_s0 + $0x1e8] sm:$0xff] }
  0x3e   :  { %228 = vst.msk [vmem:[#allocation2 + $0xc1] sm:$0xff] %vm103_vm0, %v53_v16  ;;  %229 = vst.msk [vmem:[#allocation2 + $0xc9] sm:$0xff] %vm103_vm0, %v54_v17  ;;  %v280_v27 = vld [vmem:[#allocation2 + $0x18] sm:$0xff]  ;;  %v281_v29 = vld [vmem:[#allocation2 + $0x20] sm:$0xff] }
  0x3f   :  { %230 = vst.msk [vmem:[#allocation2 + $0xd9] sm:$0xff] %vm103_vm0, %v55_v18  ;;  %231 = vst.msk [vmem:[#allocation2 + $0xe1] sm:$0xff] %vm103_vm0, %v56_v19  ;;  %355 = vperm.xlu1 %14470, %v280_v27   ;;  %v282_v30 = vld [vmem:[#allocation2 + $0x30] sm:$0xff]  ;;  %v283_v31 = vld [vmem:[#allocation2 + $0x38] sm:$0xff] }
  0x40   :  { %232 = vst.msk [vmem:[#allocation2 + $0xf1] sm:$0xff] %vm103_vm0, %v57_v20  ;;  %233 = vst.msk [vmem:[#allocation2 + $0xf9] sm:$0xff] %vm103_vm0, %v58_v21  ;;  %v284_v32 = vld [vmem:[#allocation2 + $0x48] sm:$0xff]  ;;  %365 = vperm.xlu0 %14469, %v282_v30   ;;  %v285_v39 = vld [vmem:[#allocation2 + $0x50] sm:$0xff] }
  0x41   :  { %234 = vst.msk [vmem:[#allocation2 + $0x109] sm:$0xff] %vm103_vm0, %v59_v22  ;;  %235 = vst.msk [vmem:[#allocation2 + $0x111] sm:$0xff] %vm103_vm0, %v60_v23  ;;  %v286_v41 = vld [vmem:[#allocation2 + $0x60] sm:$0xff]  ;;  %v287_v45 = vld [vmem:[#allocation2 + $0x68] sm:$0xff] }
  0x42   :  { %236 = vst.msk [vmem:[#allocation2 + $0x121] sm:$0xff] %vm103_vm0, %v61_v24  ;;  %237 = vst.msk [vmem:[#allocation2 + $0x129] sm:$0xff] %vm103_vm0, %v62_v26  ;;  %v288_v58 = vld [vmem:[#allocation2 + $0x78] sm:$0xff]  ;;  %v289_v59 = vld [vmem:[#allocation2 + $0x80] sm:$0xff] }
  0x43   :  { %360 = vperm.xlu1 %14470, %v281_v29   ;;  %238 = vst.msk [vmem:[#allocation2 + $0x139] sm:$0xff] %vm103_vm0, %v63_v33  ;;  %239 = vst.msk [vmem:[#allocation2 + $0x141] sm:$0xff] %vm103_vm0, %v64_v34  ;;  %v290_v62 = vld [vmem:[#allocation2 + $0x90] sm:$0xff]  ;;  %v291_v63 = vld [vmem:[#allocation2 + $0x98] sm:$0xff] }
  0x44   :  { %240 = vst.msk [vmem:[#allocation2 + $0x151] sm:$0xff] %vm103_vm0, %v65_v35  ;;  %241 = vst.msk [vmem:[#allocation2 + $0x159] sm:$0xff] %vm103_vm0, %v66_v36  ;;  %375 = vperm.xlu0 %14469, %v284_v32   ;;  %v292_v0 = vld [vmem:[#allocation2 + $0xa8] sm:$0xff]  ;;  %v293_v8 = vld [vmem:[#allocation2 + $0xb0] sm:$0xff] }
  0x45   :  { %242 = vst.msk [vmem:[#allocation2 + $0x169] sm:$0xff] %vm103_vm0, %v67_v37  ;;  %243 = vst.msk [vmem:[#allocation2 + $0x171] sm:$0xff] %vm103_vm0, %v68_v38  ;;  %v294_v15 = vld [vmem:[#allocation2 + $0xc0] sm:$0xff]  ;;  %v295_v16 = vld [vmem:[#allocation2 + $0xc8] sm:$0xff] }
  0x46   :  { %246 = vst.msk [vmem:[#allocation2 + $0x1c9] sm:$0xff] %vm103_vm0, %v71_v40  ;;  %247 = vst.msk [vmem:[#allocation2 + $0x1d1] sm:$0xff] %vm103_vm0, %v72_v42  ;;  %v296_v17 = vld [vmem:[#allocation2 + $0xd8] sm:$0xff]  ;;  %v297_v18 = vld [vmem:[#allocation2 + $0xe0] sm:$0xff] }
  0x47   :  { %370 = vperm.xlu1 %14470, %v283_v31   ;;  %248 = vst.msk [vmem:[#allocation2 + $0x1e1] sm:$0xff] %vm103_vm0, %v73_v43  ;;  %249 = vst.msk [vmem:[#allocation2 + $0x1e9] sm:$0xff] %vm103_vm0, %v74_v44  ;;  %v298_v19 = vld [vmem:[#allocation2 + $0xf0] sm:$0xff]  ;;  %v299_v20 = vld [vmem:[#allocation2 + $0xf8] sm:$0xff] }
  0x48   :  { %250 = vst.msk [vmem:[#allocation2 + $0x1f9] sm:$0xff] %vm103_vm0, %v75_v46  ;;  %251 = vst.msk [vmem:[#allocation2 + $0x201] sm:$0xff] %vm103_vm0, %v76_v47  ;;  %385 = vperm.xlu0 %14469, %v286_v41  }
  0x49   :  { %252 = vst.msk [vmem:[#allocation2 + $0x211] sm:$0xff] %vm103_vm0, %v77_v48  ;;  %253 = vst.msk [vmem:[#allocation2 + $0x219] sm:$0xff] %vm103_vm0, %v78_v49 }
  0x4a   :  { %254 = vst.msk [vmem:[#allocation2 + $0x229] sm:$0xff] %vm103_vm0, %v79_v50  ;;  %255 = vst.msk [vmem:[#allocation2 + $0x231] sm:$0xff] %vm103_vm0, %v80_v51 }
  0x4b   :  { %380 = vperm.xlu1 %14470, %v285_v39   ;;  %256 = vst.msk [vmem:[#allocation2 + $0x241] sm:$0xff] %vm103_vm0, %v81_v52  ;;  %257 = vst.msk [vmem:[#allocation2 + $0x249] sm:$0xff] %vm103_vm0, %v82_v53 }
  0x4c   :  { %258 = vst.msk [vmem:[#allocation2 + $0x259] sm:$0xff] %vm103_vm0, %v83_v54  ;;  %259 = vst.msk [vmem:[#allocation2 + $0x261] sm:$0xff] %vm103_vm0, %v84_v55  ;;  %395 = vperm.xlu0 %14469, %v288_v58  }
  0x4d   :  { %260 = vst.msk [vmem:[#allocation2 + $0x271] sm:$0xff] %vm103_vm0, %v85_v56  ;;  %261 = vst.msk [vmem:[#allocation2 + $0x279] sm:$0xff] %vm103_vm0, %v86_v57 }
  0x4e   :  { %262 = vst.msk [vmem:[#allocation2 + $0x289] sm:$0xff] %vm103_vm0, %v87_v60  ;;  %263 = vst.msk [vmem:[#allocation2 + $0x291] sm:$0xff] %vm103_vm0, %v88_v61 }
  0x4f   :  { %390 = vperm.xlu1 %14470, %v287_v45   ;;  %264 = vst.msk [vmem:[#allocation2 + $0x2a1] sm:$0xff] %vm103_vm0, %v89_v1  ;;  %265 = vst.msk [vmem:[#allocation2 + $0x2a9] sm:$0xff] %vm103_vm0, %v90_v2 }
  0x50   :  { %405 = vperm.xlu0 %14469, %v290_v62   ;;  %266 = vst.msk [vmem:[#allocation2 + $0x2b9] sm:$0xff] %vm103_vm0, %v91_v4  ;;  %267 = vst.msk [vmem:[#allocation2 + $0x2c1] sm:$0xff] %vm103_vm0, %v92_v5 }
  0x51   :  { %268 = vst.msk [vmem:[#allocation2 + $0x2d1] sm:$0xff] %vm103_vm0, %v93_v6  ;;  %269 = vst.msk [vmem:[#allocation2 + $0x2d9] sm:$0xff] %vm103_vm0, %v94_v7 }
  0x52   :  { %270 = vst.msk [vmem:[#allocation2 + $0x2e9] sm:$0xff] %vm103_vm0, %v95_v9  ;;  %271 = vst.msk [vmem:[#allocation2 + $0x2f1] sm:$0xff] %vm103_vm0, %v96_v10 }
  0x53   :  { %400 = vperm.xlu1 %14470, %v289_v59   ;;  %272 = vst.msk [vmem:[#allocation2 + $0x301] sm:$0xff] %vm103_vm0, %v97_v11  ;;  %273 = vst.msk [vmem:[#allocation2 + $0x309] sm:$0xff] %vm103_vm0, %v98_v12 }
  0x54   :  { %415 = vperm.xlu0 %14469, %v292_v0   ;;  %274 = vst.msk [vmem:[#allocation2 + $0x319] sm:$0xff] %vm103_vm0, %v99_v13  ;;  %275 = vst.msk [vmem:[#allocation2 + $0x321] sm:$0xff] %vm103_vm0, %v100_v14 }
  0x57   :  { %410 = vperm.xlu1 %14470, %v291_v63  }
  0x58   :  { %425 = vperm.xlu0 %14469, %v294_v15  }
  0x5b   :  { %420 = vperm.xlu1 %14470, %v293_v8  }
  0x5c   :  { %435 = vperm.xlu0 %14469, %v296_v17  }
  0x5f   :  { %430 = vperm.xlu1 %14470, %v295_v16  }
  0x60   :  { %445 = vperm.xlu0 %14469, %v298_v19  }
  0x63   :  { %440 = vperm.xlu1 %14470, %v297_v18  }
  0x64   :  { %16 = vsyncpa [#allocation7], 0  ;;  %v300_v21 = vld [vmem:[#allocation2 + $0x108] sm:$0xff]  ;;  %v301_v22 = vld [vmem:[#allocation2 + $0x110] sm:$0xff]  ;;  %vm7627_vm2 = vcmask 130048   ;;  %vm7629_vm3 = vcmask 123904  }
  0x65   :  { %455 = vperm.xlu0 %14469, %v300_v21   ;;  %v302_v23 = vld [vmem:[#allocation2 + $0x120] sm:$0xff]  ;;  %v303_v24 = vld [vmem:[#allocation2 + $0x128] sm:$0xff]  ;;  %v304_v25 = vld [vmem:[#allocation2 + $0x138] sm:$0xff]  ;;  %vm8309_vm4 = vcmask 1041409   ;;  %vm8311_vm5 = vcmask 1042434   ;;  %vm8313_vm6 = vcmask 1043459  }
  0x66   :  { %v305_v26 = vld [vmem:[#allocation2 + $0x140] sm:$0xff]  ;;  %v306_v27 = vld [vmem:[#allocation2 + $0x150] sm:$0xff]  ;;  %v307_v28 = vld [vmem:[#allocation2 + $0x158] sm:$0xff]  ;;  %vm8315_vm7 = vcmask 1044484   ;;  %vm8317_vm8 = vcmask 1045509   ;;  %vm8319_vm9 = vcmask 1046534  }
  0x67   :  { %450 = vperm.xlu1 %14470, %v299_v20   ;;  %v308_v29 = vld [vmem:[#allocation2 + $0x168] sm:$0xff]  ;;  %v309_v30 = vld [vmem:[#allocation2 + $0x170] sm:$0xff]  ;;  %v311_v32 = vld [vmem:[#allocation2 + $0x1b8] sm:$0xff]  ;;  %vm8321_vm10 = vcmask 1047559   ;;  %vm11152_vm11 = vcmask 259072   ;;  %vm11358_vm12 = vcmask 257024  }
  0x68   :  { %v310_v31 = vld [vmem:[#allocation2 + $0x1b0] sm:$0xff]  ;;  %v312_v33 = vld [vmem:[#allocation2 + $0x1c8] sm:$0xff]  ;;  %v314_v35 = vld [vmem:[#allocation2 + $0x1e0] sm:$0xff]  ;;  %vm11403_vm13 = vcmask 261120   ;;  %vm12635_vm14 = vcmask 517120   ;;  %vm12649_vm15 = vcmask 1041920  }
  0x69   :  { %465 = vperm.xlu0 %14469, %v302_v23   ;;  %v313_v34 = vld [vmem:[#allocation2 + $0x1d0] sm:$0xff]  ;;  %v315_v36 = vld [vmem:[#allocation2 + $0x1e8] sm:$0xff]  ;;  %v316_v37 = vld [vmem:[#allocation2 + $0x1f8] sm:$0xff]  ;;  %vm12890_vm1 = vcmask 17408  }
  0x6a   :  { %v317_v38 = vld [vmem:[#allocation2 + $0x200] sm:$0xff]  ;;  %v318_v39 = vld [vmem:[#allocation2 + $0x210] sm:$0xff]  ;;  %v319_v40 = vld [vmem:[#allocation2 + $0x218] sm:$0xff] }
  0x6b   :  { %460 = vperm.xlu1 %14470, %v301_v22   ;;  %v320_v41 = vld [vmem:[#allocation2 + $0x228] sm:$0xff]  ;;  %v321_v42 = vld [vmem:[#allocation2 + $0x230] sm:$0xff]  ;;  %v322_v43 = vld [vmem:[#allocation2 + $0x240] sm:$0xff] }
  0x6c   :  { %v323_v44 = vld [vmem:[#allocation2 + $0x248] sm:$0xff]  ;;  %v324_v45 = vld [vmem:[#allocation2 + $0x258] sm:$0xff]  ;;  %v325_v46 = vld [vmem:[#allocation2 + $0x260] sm:$0xff] }
  0x6d   :  { %475 = vperm.xlu0 %14469, %v304_v25   ;;  %v326_v47 = vld [vmem:[#allocation2 + $0x270] sm:$0xff]  ;;  %v327_v48 = vld [vmem:[#allocation2 + $0x278] sm:$0xff]  ;;  %v328_v49 = vld [vmem:[#allocation2 + $0x288] sm:$0xff] }
  0x6e   :  { %v329_v50 = vld [vmem:[#allocation2 + $0x290] sm:$0xff]  ;;  %v330_v51 = vld [vmem:[#allocation2 + $0x2a0] sm:$0xff]  ;;  %v331_v52 = vld [vmem:[#allocation2 + $0x2a8] sm:$0xff] }
  0x6f   :  { %470 = vperm.xlu1 %14470, %v303_v24   ;;  %v332_v53 = vld [vmem:[#allocation2 + $0x2b8] sm:$0xff]  ;;  %v333_v54 = vld [vmem:[#allocation2 + $0x2c0] sm:$0xff]  ;;  %v334_v55 = vld [vmem:[#allocation2 + $0x2d0] sm:$0xff] }
  0x70   :  { %v335_v56 = vld [vmem:[#allocation2 + $0x2d8] sm:$0xff]  ;;  %v336_v57 = vld [vmem:[#allocation2 + $0x2e8] sm:$0xff]  ;;  %v337_v58 = vld [vmem:[#allocation2 + $0x2f0] sm:$0xff] }
  0x71   :  { %485 = vperm.xlu0 %14469, %v306_v27   ;;  %v338_v59 = vld [vmem:[#allocation2 + $0x300] sm:$0xff]  ;;  %v339_v60 = vld [vmem:[#allocation2 + $0x308] sm:$0xff]  ;;  %v340_v61 = vld [vmem:[#allocation2 + $0x318] sm:$0xff] }
  0x72   :  { %v341_v62 = vld [vmem:[#allocation2 + $0x320] sm:$0xff]  ;;  %v796_v0 = vld [vmem:[#allocation2 + $0x9] sm:$0xff]  ;;  %v799_v8 = vld [vmem:[#allocation2 + $0x31] sm:$0xff] }
  0x73   :  { %480 = vperm.xlu1 %14470, %v305_v26   ;;  %v795_v63 = vld [vmem:[#allocation2 + $0x1] sm:$0xff]  ;;  %v797_v4 = vld [vmem:[#allocation2 + $0x19] sm:$0xff]  ;;  %v801_v12 = vld [vmem:[#allocation2 + $0x49] sm:$0xff] }
  0x74   :  { %v798_v5 = vld [vmem:[#allocation2 + $0x21] sm:$0xff]  ;;  %v800_v9 = vld [vmem:[#allocation2 + $0x39] sm:$0xff]  ;;  %v802_v13 = vld [vmem:[#allocation2 + $0x51] sm:$0xff] }
  0x75   :  { %495 = vperm.xlu0 %14469, %v308_v29   ;;  %v803_v16 = vld [vmem:[#allocation2 + $0x61] sm:$0xff]  ;;  %v804_v17 = vld [vmem:[#allocation2 + $0x69] sm:$0xff]  ;;  %v805_v20 = vld [vmem:[#allocation2 + $0x79] sm:$0xff] }
  0x76   :  { %v806_v21 = vld [vmem:[#allocation2 + $0x81] sm:$0xff]  ;;  %v807_v24 = vld [vmem:[#allocation2 + $0x91] sm:$0xff]  ;;  %v808_v25 = vld [vmem:[#allocation2 + $0x99] sm:$0xff] }
  0x77   :  { %490 = vperm.xlu1 %14470, %v307_v28   ;;  %v809_v28 = vld [vmem:[#allocation2 + $0xa9] sm:$0xff]  ;;  %v810_v29 = vld [vmem:[#allocation2 + $0xb1] sm:$0xff] }
  0x79   :  { %505 = vperm.xlu0 %14469, %v310_v31  }
  0x7b   :  { %500 = vperm.xlu1 %14470, %v309_v30  }
  0x7d   :  { %515 = vperm.xlu0 %14469, %v312_v33   ;;  %v812_v33 = vld [vmem:[#allocation2 + $0xc9] sm:$0xff] }
  0x7f   :  { %510 = vperm.xlu1 %14470, %v311_v32   ;;  %v811_v32 = vld [vmem:[#allocation2 + $0xc1] sm:$0xff] }
  0x81   :  { %525 = vperm.xlu0 %14469, %v314_v35  }
  0x83   :  { %520 = vperm.xlu1 %14470, %v313_v34  }
  0x85   :  { %535 = vperm.xlu0 %14469, %v316_v37   ;;  %v814_v37 = vld [vmem:[#allocation2 + $0xe1] sm:$0xff] }
  0x87   :  { %530 = vperm.xlu1 %14470, %v315_v36   ;;  %v813_v36 = vld [vmem:[#allocation2 + $0xd9] sm:$0xff] }
  0x89   :  { %545 = vperm.xlu0 %14469, %v318_v39  }
  0x8b   :  { %540 = vperm.xlu1 %14470, %v317_v38  }
  0x8c   :  { %v15105_v1 = vpop.permute.xlu0 %345 }
  0x8d   :  { %555 = vperm.xlu0 %14469, %v320_v41   ;;  %v816_v41 = vld [vmem:[#allocation2 + $0xf9] sm:$0xff] }
  0x8f   :  { %550 = vperm.xlu1 %14470, %v319_v40   ;;  %v815_v40 = vld [vmem:[#allocation2 + $0xf1] sm:$0xff] }
  0x90   :  { %v15109_v6 = vpop.permute.xlu0 %350 }
  0x91   :  { %565 = vperm.xlu0 %14469, %v322_v43  }
  0x93   :  { %560 = vperm.xlu1 %14470, %v321_v42  }
  0x95   :  { %575 = vperm.xlu0 %14469, %v324_v45   ;;  %v818_v45 = vld [vmem:[#allocation2 + $0x111] sm:$0xff] }
  0x97   :  { %570 = vperm.xlu1 %14470, %v323_v44   ;;  %v817_v44 = vld [vmem:[#allocation2 + $0x109] sm:$0xff] }
  0x99   :  { %585 = vperm.xlu0 %14469, %v326_v47  }
  0x9b   :  { %580 = vperm.xlu1 %14470, %v325_v46  }
  0x9d   :  { %595 = vperm.xlu0 %14469, %v328_v49   ;;  %v820_v49 = vld [vmem:[#allocation2 + $0x129] sm:$0xff] }
  0x9f   :  { %590 = vperm.xlu1 %14470, %v327_v48   ;;  %v819_v48 = vld [vmem:[#allocation2 + $0x121] sm:$0xff] }
  0xa1   :  { %605 = vperm.xlu0 %14469, %v330_v51  }
  0xa3   :  { %600 = vperm.xlu1 %14470, %v329_v50  }
  0xa5   :  { %615 = vperm.xlu0 %14469, %v332_v53   ;;  %v822_v53 = vld [vmem:[#allocation2 + $0x141] sm:$0xff] }
  0xa7   :  { %610 = vperm.xlu1 %14470, %v331_v52   ;;  %v821_v52 = vld [vmem:[#allocation2 + $0x139] sm:$0xff] }
  0xa9   :  { %625 = vperm.xlu0 %14469, %v334_v55  }
  0xab   :  { %620 = vperm.xlu1 %14470, %v333_v54  }
  0xad   :  { %635 = vperm.xlu0 %14469, %v336_v57   ;;  %v824_v57 = vld [vmem:[#allocation2 + $0x159] sm:$0xff] }
  0xaf   :  { %630 = vperm.xlu1 %14470, %v335_v56   ;;  %v823_v56 = vld [vmem:[#allocation2 + $0x151] sm:$0xff] }
  0xb1   :  { %645 = vperm.xlu0 %14469, %v338_v59  }
  0xb3   :  { %640 = vperm.xlu1 %14470, %v337_v58  }
  0xb5   :  { %655 = vperm.xlu0 %14469, %v340_v61   ;;  %v826_v61 = vld [vmem:[#allocation2 + $0x171] sm:$0xff] }
  0xb7   :  { %650 = vperm.xlu1 %14470, %v339_v60   ;;  %v825_v60 = vld [vmem:[#allocation2 + $0x169] sm:$0xff] }
  0xb9   :  { %862 = vperm.xlu0 %14469, %v795_v63  }
  0xbb   :  { %660 = vperm.xlu1 %14470, %v341_v62  }
  0xbd   :  { %872 = vperm.xlu0 %14469, %v797_v4   ;;  %v828_v4 = vld [vmem:[#allocation2 + $0x1b9] sm:$0xff] }
  0xbe   :  { %v15107_v2 = vpop.permute.xlu1 %355 }
  0xbf   :  { %867 = vperm.xlu1 %14470, %v796_v0   ;;  %v15113_v10 = vpop.permute.xlu0 %365  ;;  %v827_v0 = vld [vmem:[#allocation2 + $0x1b1] sm:$0xff] }
  0xc1   :  { %882 = vperm.xlu0 %14469, %v799_v8  }
  0xc2   :  { %v15111_v7 = vpop.permute.xlu1 %360 }
  0xc3   :  { %877 = vperm.xlu1 %14470, %v798_v5   ;;  %v15117_v14 = vpop.permute.xlu0 %375 }
  0xc5   :  { %892 = vperm.xlu0 %14469, %v801_v12   ;;  %v830_v12 = vld [vmem:[#allocation2 + $0x1d1] sm:$0xff] }
  0xc6   :  { %v15115_v11 = vpop.permute.xlu1 %370 }
  0xc7   :  { %887 = vperm.xlu1 %14470, %v800_v9   ;;  %v15121_v18 = vpop.permute.xlu0 %385  ;;  %v829_v9 = vld [vmem:[#allocation2 + $0x1c9] sm:$0xff] }
  0xc9   :  { %902 = vperm.xlu0 %14469, %v803_v16  }
  0xca   :  { %v15119_v15 = vpop.permute.xlu1 %380 }
  0xcb   :  { %897 = vperm.xlu1 %14470, %v802_v13   ;;  %v15125_v22 = vpop.permute.xlu0 %395 }
  0xcd   :  { %912 = vperm.xlu0 %14469, %v805_v20   ;;  %v832_v20 = vld [vmem:[#allocation2 + $0x1e9] sm:$0xff] }
  0xce   :  { %v15123_v19 = vpop.permute.xlu1 %390 }
  0xcf   :  { %907 = vperm.xlu1 %14470, %v804_v17   ;;  %v15129_v26 = vpop.permute.xlu0 %405  ;;  %v831_v17 = vld [vmem:[#allocation2 + $0x1e1] sm:$0xff] }
  0xd1   :  { %922 = vperm.xlu0 %14469, %v807_v24  }
  0xd2   :  { %v15127_v23 = vpop.permute.xlu1 %400 }
  0xd3   :  { %917 = vperm.xlu1 %14470, %v806_v21   ;;  %v15133_v30 = vpop.permute.xlu0 %415 }
  0xd5   :  { %932 = vperm.xlu0 %14469, %v809_v28   ;;  %v834_v28 = vld [vmem:[#allocation2 + $0x201] sm:$0xff] }
  0xd6   :  { %v15131_v27 = vpop.permute.xlu1 %410 }
  0xd7   :  { %927 = vperm.xlu1 %14470, %v808_v25   ;;  %v15137_v34 = vpop.permute.xlu0 %425  ;;  %v833_v25 = vld [vmem:[#allocation2 + $0x1f9] sm:$0xff] }
  0xd9   :  { %942 = vperm.xlu0 %14469, %v811_v32  }
  0xda   :  { %v15135_v31 = vpop.permute.xlu1 %420 }
  0xdb   :  { %937 = vperm.xlu1 %14470, %v810_v29   ;;  %v15141_v38 = vpop.permute.xlu0 %435 }
  0xdd   :  { %952 = vperm.xlu0 %14469, %v813_v36   ;;  %v836_v36 = vld [vmem:[#allocation2 + $0x219] sm:$0xff] }
  0xde   :  { %v15139_v35 = vpop.permute.xlu1 %430 }
  0xdf   :  { %947 = vperm.xlu1 %14470, %v812_v33   ;;  %v15145_v42 = vpop.permute.xlu0 %445  ;;  %v835_v33 = vld [vmem:[#allocation2 + $0x211] sm:$0xff] }
  0xe1   :  { %962 = vperm.xlu0 %14469, %v815_v40  }
  0xe2   :  { %v15143_v39 = vpop.permute.xlu1 %440 }
  0xe3   :  { %957 = vperm.xlu1 %14470, %v814_v37  }
  0xe4   :  { %v15149_v46 = vpop.permute.xlu0 %455 }
  0xe5   :  { %972 = vperm.xlu0 %14469, %v817_v44   ;;  %v838_v44 = vld [vmem:[#allocation2 + $0x231] sm:$0xff] }
  0xe6   :  { %v15147_v43 = vpop.permute.xlu1 %450 }
  0xe7   :  { %967 = vperm.xlu1 %14470, %v816_v41   ;;  %v837_v41 = vld [vmem:[#allocation2 + $0x229] sm:$0xff] }
  0xe8   :  { %v15153_v50 = vpop.permute.xlu0 %465 }
  0xe9   :  { %982 = vperm.xlu0 %14469, %v819_v48  }
  0xea   :  { %v15151_v47 = vpop.permute.xlu1 %460 }
  0xeb   :  { %977 = vperm.xlu1 %14470, %v818_v45  }
  0xec   :  { %v15157_v54 = vpop.permute.xlu0 %475 }
  0xed   :  { %992 = vperm.xlu0 %14469, %v821_v52   ;;  %v840_v52 = vld [vmem:[#allocation2 + $0x249] sm:$0xff] }
  0xee   :  { %v15155_v51 = vpop.permute.xlu1 %470 }
  0xef   :  { %987 = vperm.xlu1 %14470, %v820_v49   ;;  %v839_v49 = vld [vmem:[#allocation2 + $0x241] sm:$0xff] }
  0xf0   :  { %v15161_v58 = vpop.permute.xlu0 %485 }
  0xf1   :  { %20454 = vst [vmem:[#allocation10_spill] sm:$0xff] %v15161_v58  ;;  %1002 = vperm.xlu0 %14469, %v823_v56   ;;  %v1337_v58 = vld [vmem:[#allocation2 + $0x12a] sm:$0xff] }
  0xf2   :  { %v15159_v55 = vpop.permute.xlu1 %480 }
  0xf3   :  { %20453 = vst [vmem:[#allocation9_spill] sm:$0xff] %v15159_v55  ;;  %997 = vperm.xlu1 %14470, %v822_v53  }
  0xf4   :  { %v15165_v62 = vpop.permute.xlu0 %495 }
  0xf5   :  { %20456 = vst [vmem:[#allocation12_spill] sm:$0xff] %v15165_v62  ;;  %1012 = vperm.xlu0 %14469, %v825_v60   ;;  %v842_v60 = vld [vmem:[#allocation2 + $0x261] sm:$0xff] }
  0xf6   :  { %v15163_v59 = vpop.permute.xlu1 %490 }
  0xf7   :  { %20455 = vst [vmem:[#allocation11_spill] sm:$0xff] %v15163_v59  ;;  %1007 = vperm.xlu1 %14470, %v824_v57   ;;  %v841_v57 = vld [vmem:[#allocation2 + $0x259] sm:$0xff] }
  0xf8   :  { %v15169_v5 = vpop.permute.xlu0 %505 }
  0xf9   :  { %20458 = vst [vmem:[#allocation14_spill] sm:$0xff] %v15169_v5  ;;  %1022 = vperm.xlu0 %14469, %v827_v0   ;;  %v15557_v5 = vld [vmem:[#allocation2 + $0x3a] sm:$0xff] }
  0xfa   :  { %v15167_v63 = vpop.permute.xlu1 %500 }
  0xfb   :  { %20457 = vst [vmem:[#allocation13_spill] sm:$0xff] %v15167_v63  ;;  %1017 = vperm.xlu1 %14470, %v826_v61   ;;  %v1335_v63 = vld [vmem:[#allocation2 + $0x112] sm:$0xff] }
  0xfc   :  { %v15173_v13 = vpop.permute.xlu0 %515 }
  0xfd   :  { %20460 = vst [vmem:[#allocation16_spill] sm:$0xff] %v15173_v13  ;;  %1032 = vperm.xlu0 %14469, %v829_v9   ;;  %v844_v9 = vld [vmem:[#allocation2 + $0x279] sm:$0xff] }
  0xfe   :  { %v15171_v8 = vpop.permute.xlu1 %510 }
  0xff   :  { %20459 = vst [vmem:[#allocation15_spill] sm:$0xff] %v15171_v8  ;;  %1027 = vperm.xlu1 %14470, %v828_v4   ;;  %v843_v4 = vld [vmem:[#allocation2 + $0x271] sm:$0xff] }
 0x100   :  { %v15177_v21 = vpop.permute.xlu0 %525 }
 0x101   :  { %20462 = vst [vmem:[#allocation18_spill] sm:$0xff] %v15177_v21  ;;  %1042 = vperm.xlu0 %14469, %v831_v17  }
 0x102   :  { %v15175_v16 = vpop.permute.xlu1 %520 }
 0x103   :  { %20461 = vst [vmem:[#allocation17_spill] sm:$0xff] %v15175_v16  ;;  %1037 = vperm.xlu1 %14470, %v830_v12  }
 0x104   :  { %v15181_v29 = vpop.permute.xlu0 %535 }
 0x105   :  { %20464 = vst [vmem:[#allocation20_spill] sm:$0xff] %v15181_v29  ;;  %1052 = vperm.xlu0 %14469, %v833_v25   ;;  %v846_v25 = vld [vmem:[#allocation2 + $0x291] sm:$0xff] }
 0x106   :  { %v15179_v24 = vpop.permute.xlu1 %530 }
 0x107   :  { %20463 = vst [vmem:[#allocation19_spill] sm:$0xff] %v15179_v24  ;;  %1047 = vperm.xlu1 %14470, %v832_v20   ;;  %v845_v20 = vld [vmem:[#allocation2 + $0x289] sm:$0xff]  ;;  %v1333_v24 = vld [vmem:[#allocation2 + $0xfa] sm:$0xff] }
 0x108   :  { %v15185_v37 = vpop.permute.xlu0 %545 }
 0x109   :  { %20466 = vst [vmem:[#allocation22_spill] sm:$0xff] %v15185_v37  ;;  %1062 = vperm.xlu0 %14469, %v835_v33  }
 0x10a   :  { %v15183_v32 = vpop.permute.xlu1 %540 }
 0x10b   :  { %20465 = vst [vmem:[#allocation21_spill] sm:$0xff] %v15183_v32  ;;  %1057 = vperm.xlu1 %14470, %v834_v28   ;;  %v1331_v32 = vld [vmem:[#allocation2 + $0xe2] sm:$0xff] }
 0x10c   :  { %v15189_v45 = vpop.permute.xlu0 %555 }
 0x10d   :  { %20468 = vst [vmem:[#allocation24_spill] sm:$0xff] %v15189_v45  ;;  %1072 = vperm.xlu0 %14469, %v837_v41   ;;  %v848_v41 = vld [vmem:[#allocation2 + $0x2a9] sm:$0xff] }
 0x10e   :  { %v15187_v40 = vpop.permute.xlu1 %550 }
 0x10f   :  { %20467 = vst [vmem:[#allocation23_spill] sm:$0xff] %v15187_v40  ;;  %1067 = vperm.xlu1 %14470, %v836_v36   ;;  %v847_v36 = vld [vmem:[#allocation2 + $0x2a1] sm:$0xff]  ;;  %v1329_v40 = vld [vmem:[#allocation2 + $0xca] sm:$0xff] }
 0x110   :  { %v15193_v53 = vpop.permute.xlu0 %565 }
 0x111   :  { %20470 = vst [vmem:[#allocation26_spill] sm:$0xff] %v15193_v53  ;;  %1082 = vperm.xlu0 %14469, %v839_v49  }
 0x112   :  { %v15191_v48 = vpop.permute.xlu1 %560 }
 0x113   :  { %20469 = vst [vmem:[#allocation25_spill] sm:$0xff] %v15191_v48  ;;  %1077 = vperm.xlu1 %14470, %v838_v44   ;;  %v1327_v48 = vld [vmem:[#allocation2 + $0xb2] sm:$0xff] }
 0x114   :  { %v15197_v61 = vpop.permute.xlu0 %575 }
 0x115   :  { %20472 = vst [vmem:[#allocation28_spill] sm:$0xff] %v15197_v61  ;;  %1092 = vperm.xlu0 %14469, %v841_v57   ;;  %v850_v57 = vld [vmem:[#allocation2 + $0x2c1] sm:$0xff] }
 0x116   :  { %v15195_v56 = vpop.permute.xlu1 %570 }
 0x117   :  { %20471 = vst [vmem:[#allocation27_spill] sm:$0xff] %v15195_v56  ;;  %1087 = vperm.xlu1 %14470, %v840_v52   ;;  %v849_v52 = vld [vmem:[#allocation2 + $0x2b9] sm:$0xff] }
 0x118   :  { %v15201_v12 = vpop.permute.xlu0 %585  ;;  %v1325_v56 = vld [vmem:[#allocation2 + $0x9a] sm:$0xff] }
 0x119   :  { %20474 = vst [vmem:[#allocation30_spill] sm:$0xff] %v15201_v12  ;;  %1102 = vperm.xlu0 %14469, %v843_v4  }
 0x11a   :  { %v15199_v0 = vpop.permute.xlu1 %580 }
 0x11b   :  { %20473 = vst [vmem:[#allocation29_spill] sm:$0xff] %v15199_v0  ;;  %1097 = vperm.xlu1 %14470, %v842_v60   ;;  %v1323_v0 = vld [vmem:[#allocation2 + $0x82] sm:$0xff] }
 0x11c   :  { %v15205_v28 = vpop.permute.xlu0 %595 }
 0x11d   :  { %20476 = vst [vmem:[#allocation32_spill] sm:$0xff] %v15205_v28  ;;  %1112 = vperm.xlu0 %14469, %v845_v20   ;;  %v852_v20 = vld [vmem:[#allocation2 + $0x2d9] sm:$0xff] }
 0x11e   :  { %v15203_v17 = vpop.permute.xlu1 %590 }
 0x11f   :  { %20475 = vst [vmem:[#allocation31_spill] sm:$0xff] %v15203_v17  ;;  %1107 = vperm.xlu1 %14470, %v844_v9   ;;  %v851_v9 = vld [vmem:[#allocation2 + $0x2d1] sm:$0xff] }
 0x120   :  { %v15209_v44 = vpop.permute.xlu0 %605  ;;  %v1321_v17 = vld [vmem:[#allocation2 + $0x6a] sm:$0xff] }
 0x121   :  { %20478 = vst [vmem:[#allocation34_spill] sm:$0xff] %v15209_v44  ;;  %1122 = vperm.xlu0 %14469, %v847_v36   ;;  %v853_v36 = vld [vmem:[#allocation2 + $0x2e9] sm:$0xff]  ;;  %v854_v44 = vld [vmem:[#allocation2 + $0x2f1] sm:$0xff] }
 0x122   :  { %v15207_v33 = vpop.permute.xlu1 %600 }
 0x123   :  { %20477 = vst [vmem:[#allocation33_spill] sm:$0xff] %v15207_v33  ;;  %1117 = vperm.xlu1 %14470, %v846_v25   ;;  %v1319_v33 = vld [vmem:[#allocation2 + $0x52] sm:$0xff] }
 0x124   :  { %v15213_v60 = vpop.permute.xlu0 %615 }
 0x125   :  { %20480 = vst [vmem:[#allocation36_spill] sm:$0xff] %v15213_v60  ;;  %1132 = vperm.xlu0 %14469, %v849_v52   ;;  %v855_v52 = vld [vmem:[#allocation2 + $0x301] sm:$0xff]  ;;  %v856_v60 = vld [vmem:[#allocation2 + $0x309] sm:$0xff] }
 0x126   :  { %v15211_v49 = vpop.permute.xlu1 %610 }
 0x127   :  { %20479 = vst [vmem:[#allocation35_spill] sm:$0xff] %v15211_v49  ;;  %1127 = vperm.xlu1 %14470, %v848_v41  }
 0x128   :  { %v15217_v3 = vpop.permute.xlu0 %625 }
 0x129   :  { %20482 = vst [vmem:[#allocation38_spill] sm:$0xff] %v15217_v3  ;;  %1142 = vperm.xlu0 %14469, %v851_v9   ;;  %v857_v9 = vld [vmem:[#allocation2 + $0x319] sm:$0xff]  ;;  %v858_v3 = vld [vmem:[#allocation2 + $0x321] sm:$0xff] }
 0x12a   :  { %v15215_v4 = vpop.permute.xlu1 %620 }
 0x12b   :  { %20481 = vst [vmem:[#allocation37_spill] sm:$0xff] %v15215_v4  ;;  %1137 = vperm.xlu1 %14470, %v850_v57  }
 0x12c   :  { %v15221_v49 = vpop.permute.xlu0 %635 }
 0x12d   :  { %20484 = vst [vmem:[#allocation40_spill] sm:$0xff] %v15221_v49  ;;  %1152 = vperm.xlu0 %14469, %v853_v36   ;;  %v1312_v36 = vld [vmem:[#allocation2 + $0x2] sm:$0xff]  ;;  %v1313_v49 = vld [vmem:[#allocation2 + $0xa] sm:$0xff] }
 0x12e   :  { %v15219_v25 = vpop.permute.xlu1 %630 }
 0x12f   :  { %20483 = vst [vmem:[#allocation39_spill] sm:$0xff] %v15219_v25  ;;  %1147 = vperm.xlu1 %14470, %v852_v20  }
 0x130   :  { %v15225_v4 = vpop.permute.xlu0 %645 }
 0x131   :  { %20486 = vst [vmem:[#allocation42_spill] sm:$0xff] %v15225_v4  ;;  %1162 = vperm.xlu0 %14469, %v855_v52   ;;  %v1314_v52 = vld [vmem:[#allocation2 + $0x1a] sm:$0xff]  ;;  %v1315_v4 = vld [vmem:[#allocation2 + $0x22] sm:$0xff] }
 0x132   :  { %v15223_v41 = vpop.permute.xlu1 %640 }
 0x133   :  { %20485 = vst [vmem:[#allocation41_spill] sm:$0xff] %v15223_v41  ;;  %1157 = vperm.xlu1 %14470, %v854_v44  }
 0x134   :  { %v15229_v25 = vpop.permute.xlu0 %655 }
 0x135   :  { %20488 = vst [vmem:[#allocation44_spill] sm:$0xff] %v15229_v25  ;;  %1172 = vperm.xlu0 %14469, %v857_v9   ;;  %v1316_v9 = vld [vmem:[#allocation2 + $0x32] sm:$0xff]  ;;  %v1317_v25 = vld [vmem:[#allocation2 + $0x3a] sm:$0xff] }
 0x136   :  { %v15227_v57 = vpop.permute.xlu1 %650 }
 0x137   :  { %20487 = vst [vmem:[#allocation43_spill] sm:$0xff] %v15227_v57  ;;  %1167 = vperm.xlu1 %14470, %v856_v60  }
 0x138   :  { %v15233_v41 = vpop.permute.xlu0 %862 }
 0x139   :  { %1379 = vperm.xlu0 %14469, %v1312_v36   ;;  %v1318_v36 = vld [vmem:[#allocation2 + $0x4a] sm:$0xff] }
 0x13a   :  { %v15231_v20 = vpop.permute.xlu1 %660 }
 0x13b   :  { %20489 = vst [vmem:[#allocation45_spill] sm:$0xff] %v15231_v20  ;;  %1177 = vperm.xlu1 %14470, %v858_v3  }
 0x13c   :  { %v15237_v57 = vpop.permute.xlu0 %872 }
 0x13d   :  { %20491 = vst [vmem:[#allocation47_spill] sm:$0xff] %v15237_v57  ;;  %1389 = vperm.xlu0 %14469, %v1314_v52   ;;  %v1320_v52 = vld [vmem:[#allocation2 + $0x62] sm:$0xff] }
 0x13e   :  { %v15235_v44 = vpop.permute.xlu1 %867  ;;  %v15590_v57 = vld [vmem:[#allocation2 + $0xc1] sm:$0xff] }
 0x13f   :  { %20490 = vst [vmem:[#allocation46_spill] sm:$0xff] %v15235_v44  ;;  %1384 = vperm.xlu1 %14470, %v1313_v49  }
 0x140   :  { %v15241_v20 = vpop.permute.xlu0 %882 }
 0x141   :  { %20493 = vst [vmem:[#allocation49_spill] sm:$0xff] %v15241_v20  ;;  %1399 = vperm.xlu0 %14469, %v1316_v9   ;;  %v1322_v9 = vld [vmem:[#allocation2 + $0x7a] sm:$0xff] }
 0x142   :  { %v15239_v60 = vpop.permute.xlu1 %877 }
 0x143   :  { %20492 = vst [vmem:[#allocation48_spill] sm:$0xff] %v15239_v60  ;;  %1394 = vperm.xlu1 %14470, %v1315_v4  }
 0x144   :  { %v15245_v28 = vpop.permute.xlu0 %892 }
 0x145   :  { %20495 = vst [vmem:[#allocation51_spill] sm:$0xff] %v15245_v28  ;;  %1409 = vperm.xlu0 %14469, %v1318_v36   ;;  %v1324_v36 = vld [vmem:[#allocation2 + $0x92] sm:$0xff] }
 0x146   :  { %v15243_v3 = vpop.permute.xlu1 %887  ;;  %v1856_v28 = vld [vmem:[#allocation2 + $0x158] sm:$0xff] }
 0x147   :  { %20494 = vst [vmem:[#allocation50_spill] sm:$0xff] %v15243_v3  ;;  %1404 = vperm.xlu1 %14470, %v1317_v25  }
 0x148   :  { %v15249_v12 = vpop.permute.xlu0 %902 }
 0x149   :  { %20497 = vst [vmem:[#allocation53_spill] sm:$0xff] %v15249_v12  ;;  %1419 = vperm.xlu0 %14469, %v1320_v52   ;;  %v1326_v52 = vld [vmem:[#allocation2 + $0xaa] sm:$0xff] }
 0x14a   :  { %v15247_v49 = vpop.permute.xlu1 %897 }
 0x14b   :  { %20496 = vst [vmem:[#allocation52_spill] sm:$0xff] %v15247_v49  ;;  %1414 = vperm.xlu1 %14470, %v1319_v33  }
 0x14c   :  { %v15253_v61 = vpop.permute.xlu0 %912 }
 0x14d   :  { %20499 = vst [vmem:[#allocation55_spill] sm:$0xff] %v15253_v61  ;;  %1429 = vperm.xlu0 %14469, %v1322_v9   ;;  %v1328_v9 = vld [vmem:[#allocation2 + $0xc2] sm:$0xff]  ;;  %v1848_v61 = vld [vmem:[#allocation2 + $0xf8] sm:$0xff] }
 0x14e   :  { %v15251_v4 = vpop.permute.xlu1 %907 }
 0x14f   :  { %20498 = vst [vmem:[#allocation54_spill] sm:$0xff] %v15251_v4  ;;  %1424 = vperm.xlu1 %14470, %v1321_v17  }
 0x150   :  { %v15257_v53 = vpop.permute.xlu0 %922 }
 0x151   :  { %20501 = vst [vmem:[#allocation57_spill] sm:$0xff] %v15257_v53  ;;  %1439 = vperm.xlu0 %14469, %v1324_v36   ;;  %v1330_v36 = vld [vmem:[#allocation2 + $0xda] sm:$0xff] }
 0x152   :  { %v15255_v25 = vpop.permute.xlu1 %917  ;;  %v1846_v53 = vld [vmem:[#allocation2 + $0xe0] sm:$0xff] }
 0x153   :  { %20500 = vst [vmem:[#allocation56_spill] sm:$0xff] %v15255_v25  ;;  %1434 = vperm.xlu1 %14470, %v1323_v0   ;;  %v15447_v25 = vld [vmem:[#allocation2 + $0xf0] sm:$0xff] }
 0x154   :  { %v15261_v45 = vpop.permute.xlu0 %932 }
 0x155   :  { %20503 = vst [vmem:[#allocation59_spill] sm:$0xff] %v15261_v45  ;;  %1449 = vperm.xlu0 %14469, %v1326_v52   ;;  %v1332_v52 = vld [vmem:[#allocation2 + $0xf2] sm:$0xff] }
 0x156   :  { %v15259_v33 = vpop.permute.xlu1 %927 }
 0x157   :  { %20502 = vst [vmem:[#allocation58_spill] sm:$0xff] %v15259_v33  ;;  %1444 = vperm.xlu1 %14470, %v1325_v56   ;;  %v15440_v33 = vld [vmem:[#allocation2 + $0xd8] sm:$0xff] }
 0x158   :  { %v15265_v37 = vpop.permute.xlu0 %942 }
 0x159   :  { %20505 = vst [vmem:[#allocation61_spill] sm:$0xff] %v15265_v37  ;;  %1459 = vperm.xlu0 %14469, %v1328_v9   ;;  %v1334_v9 = vld [vmem:[#allocation2 + $0x10a] sm:$0xff] }
 0x15a   :  { %v15263_v17 = vpop.permute.xlu1 %937 }
 0x15b   :  { %20504 = vst [vmem:[#allocation60_spill] sm:$0xff] %v15263_v17  ;;  %1454 = vperm.xlu1 %14470, %v1327_v48   ;;  %v15433_v17 = vld [vmem:[#allocation2 + $0xc0] sm:$0xff] }
 0x15c   :  { %v15269_v29 = vpop.permute.xlu0 %952 }
 0x15d   :  { %20507 = vst [vmem:[#allocation63_spill] sm:$0xff] %v15269_v29  ;;  %1469 = vperm.xlu0 %14469, %v1330_v36   ;;  %v1336_v36 = vld [vmem:[#allocation2 + $0x122] sm:$0xff] }
 0x15e   :  { %v15267_v0 = vpop.permute.xlu1 %947 }
 0x15f   :  { %20506 = vst [vmem:[#allocation62_spill] sm:$0xff] %v15267_v0  ;;  %1464 = vperm.xlu1 %14470, %v1329_v40   ;;  %v15423_v0 = vld [vmem:[#allocation2 + $0xa8] sm:$0xff] }
 0x160   :  { %v15273_v21 = vpop.permute.xlu0 %962 }
 0x161   :  { %20509 = vst [vmem:[#allocation65_spill] sm:$0xff] %v15273_v21  ;;  %1479 = vperm.xlu0 %14469, %v1332_v52   ;;  %v1338_v52 = vld [vmem:[#allocation2 + $0x13a] sm:$0xff]  ;;  %v1339_v21 = vld [vmem:[#allocation2 + $0x142] sm:$0xff] }
 0x162   :  { %v15271_v56 = vpop.permute.xlu1 %957 }
 0x163   :  { %20508 = vst [vmem:[#allocation64_spill] sm:$0xff] %v15271_v56  ;;  %1474 = vperm.xlu1 %14470, %v1331_v32   ;;  %v15413_v56 = vld [vmem:[#allocation2 + $0x90] sm:$0xff] }
 0x164   :  { %v15277_v59 = vpop.permute.xlu0 %972 }
 0x165   :  { %20511 = vst [vmem:[#allocation67_spill] sm:$0xff] %v15277_v59  ;;  %1489 = vperm.xlu0 %14469, %v1334_v9  }
 0x166   :  { %v15275_v48 = vpop.permute.xlu1 %967 }
 0x167   :  { %20510 = vst [vmem:[#allocation66_spill] sm:$0xff] %v15275_v48  ;;  %1484 = vperm.xlu1 %14470, %v1333_v24   ;;  %v69_v24 = vld [vmem:[%s20367_s0 + $0xf0] sm:$0xff] }
 0x168   :  { %v15281_v62 = vpop.permute.xlu0 %982  ;;  %244 = vst.msk [vmem:[#allocation2 + $0x181] sm:$0xff] %vm103_vm0, %v69_v24 }
 0x169   :  { %20513 = vst [vmem:[#allocation69_spill] sm:$0xff] %v15281_v62  ;;  %1499 = vperm.xlu0 %14469, %v1336_v36   ;;  %v1340_v36 = vld [vmem:[#allocation2 + $0x152] sm:$0xff] }
 0x16a   :  { %v15279_v40 = vpop.permute.xlu1 %977  ;;  %v1343_v62 = vld [vmem:[#allocation2 + $0x172] sm:$0xff] }
 0x16b   :  { %20512 = vst [vmem:[#allocation68_spill] sm:$0xff] %v15279_v40  ;;  %1494 = vperm.xlu1 %14470, %v1335_v63   ;;  %v70_v63 = vld [vmem:[%s20367_s0 + $0xf8] sm:$0xff] }
 0x16c   :  { %v15285_v48 = vpop.permute.xlu0 %992  ;;  %245 = vst.msk [vmem:[#allocation2 + $0x189] sm:$0xff] %vm103_vm0, %v70_v63  ;;  %v1344_v40 = vld [vmem:[#allocation2 + $0x1b2] sm:$0xff] }
 0x16d   :  { %20515 = vst [vmem:[#allocation71_spill] sm:$0xff] %v15285_v48  ;;  %1509 = vperm.xlu0 %14469, %v1338_v52   ;;  %v1342_v52 = vld [vmem:[#allocation2 + $0x16a] sm:$0xff] }
 0x16e   :  { %v15283_v32 = vpop.permute.xlu1 %987 }
 0x16f   :  { %20514 = vst [vmem:[#allocation70_spill] sm:$0xff] %v15283_v32  ;;  %1504 = vperm.xlu1 %14470, %v1337_v58   ;;  %v1341_v58 = vld [vmem:[#allocation2 + $0x15a] sm:$0xff] }
 0x170   :  { %v15297_v32 = vpop.permute.xlu0 %1002 }
 0x171   :  { %20517 = vst [vmem:[#allocation73_spill] sm:$0xff] %v15297_v32  ;;  %1519 = vperm.xlu0 %14469, %v1340_v36   ;;  %v1346_v36 = vld [vmem:[#allocation2 + $0x1ca] sm:$0xff]  ;;  %v1347_v32 = vld [vmem:[#allocation2 + $0x1d2] sm:$0xff] }
 0x172   :  { %v15290_v9 = vpop.permute.xlu1 %997 }
 0x173   :  { %20516 = vst [vmem:[#allocation72_spill] sm:$0xff] %v15290_v9  ;;  %1514 = vperm.xlu1 %14470, %v1339_v21   ;;  %v1345_v21 = vld [vmem:[#allocation2 + $0x1ba] sm:$0xff] }
 0x174   :  { %v15301_v9 = vpop.permute.xlu0 %1012 }
 0x175   :  { %20519 = vst [vmem:[#allocation75_spill] sm:$0xff] %v15301_v9  ;;  %1529 = vperm.xlu0 %14469, %v1342_v52   ;;  %v1348_v52 = vld [vmem:[#allocation2 + $0x1e2] sm:$0xff]  ;;  %v1349_v9 = vld [vmem:[#allocation2 + $0x1ea] sm:$0xff] }
 0x176   :  { %v15299_v48 = vpop.permute.xlu1 %1007 }
 0x177   :  { %20518 = vst [vmem:[#allocation74_spill] sm:$0xff] %v15299_v48  ;;  %1524 = vperm.xlu1 %14470, %v1341_v58  }
 0x178   :  { %v15305_v59 = vpop.permute.xlu0 %1022 }
 0x179   :  { %20521 = vst [vmem:[#allocation77_spill] sm:$0xff] %v15305_v59  ;;  %1539 = vperm.xlu0 %14469, %v1344_v40   ;;  %v1350_v40 = vld [vmem:[#allocation2 + $0x1fa] sm:$0xff]  ;;  %v1351_v59 = vld [vmem:[#allocation2 + $0x202] sm:$0xff] }
 0x17a   :  { %v15303_v24 = vpop.permute.xlu1 %1017 }
 0x17b   :  { %20520 = vst [vmem:[#allocation76_spill] sm:$0xff] %v15303_v24  ;;  %1534 = vperm.xlu1 %14470, %v1343_v62  }
 0x17c   :  { %v15309_v48 = vpop.permute.xlu0 %1032 }
 0x17d   :  { %20523 = vst [vmem:[#allocation79_spill] sm:$0xff] %v15309_v48  ;;  %1549 = vperm.xlu0 %14469, %v1346_v36   ;;  %v1352_v36 = vld [vmem:[#allocation2 + $0x212] sm:$0xff]  ;;  %v1353_v48 = vld [vmem:[#allocation2 + $0x21a] sm:$0xff] }
 0x17e   :  { %v15307_v63 = vpop.permute.xlu1 %1027 }
 0x17f   :  { %20522 = vst [vmem:[#allocation78_spill] sm:$0xff] %v15307_v63  ;;  %1544 = vperm.xlu1 %14470, %v1345_v21  }
 0x180   :  { %v15313_v24 = vpop.permute.xlu0 %1042 }
 0x181   :  { %20525 = vst [vmem:[#allocation81_spill] sm:$0xff] %v15313_v24  ;;  %1559 = vperm.xlu0 %14469, %v1348_v52   ;;  %v1354_v52 = vld [vmem:[#allocation2 + $0x22a] sm:$0xff]  ;;  %v1355_v24 = vld [vmem:[#allocation2 + $0x232] sm:$0xff] }
 0x182   :  { %v15311_v58 = vpop.permute.xlu1 %1037 }
 0x183   :  { %20524 = vst [vmem:[#allocation80_spill] sm:$0xff] %v15311_v58  ;;  %1554 = vperm.xlu1 %14470, %v1347_v32  }
 0x184   :  { %v15317_v63 = vpop.permute.xlu0 %1052 }
 0x185   :  { %20527 = vst [vmem:[#allocation83_spill] sm:$0xff] %v15317_v63  ;;  %1569 = vperm.xlu0 %14469, %v1350_v40   ;;  %v1356_v40 = vld [vmem:[#allocation2 + $0x242] sm:$0xff]  ;;  %v1357_v63 = vld [vmem:[#allocation2 + $0x24a] sm:$0xff] }
 0x186   :  { %v15315_v62 = vpop.permute.xlu1 %1047 }
 0x187   :  { %20526 = vst [vmem:[#allocation82_spill] sm:$0xff] %v15315_v62  ;;  %1564 = vperm.xlu1 %14470, %v1349_v9  }
 0x188   :  { %v15321_v58 = vpop.permute.xlu0 %1062 }
 0x189   :  { %20529 = vst [vmem:[#allocation85_spill] sm:$0xff] %v15321_v58  ;;  %1579 = vperm.xlu0 %14469, %v1352_v36   ;;  %v1358_v36 = vld [vmem:[#allocation2 + $0x25a] sm:$0xff]  ;;  %v1359_v58 = vld [vmem:[#allocation2 + $0x262] sm:$0xff] }
 0x18a   :  { %v15319_v21 = vpop.permute.xlu1 %1057 }
 0x18b   :  { %20528 = vst [vmem:[#allocation84_spill] sm:$0xff] %v15319_v21  ;;  %1574 = vperm.xlu1 %14470, %v1351_v59  }
 0x18c   :  { %v15325_v62 = vpop.permute.xlu0 %1072 }
 0x18d   :  { %20531 = vst [vmem:[#allocation87_spill] sm:$0xff] %v15325_v62  ;;  %1589 = vperm.xlu0 %14469, %v1354_v52   ;;  %v1360_v52 = vld [vmem:[#allocation2 + $0x272] sm:$0xff]  ;;  %v1361_v62 = vld [vmem:[#allocation2 + $0x27a] sm:$0xff] }
 0x18e   :  { %v15323_v32 = vpop.permute.xlu1 %1067 }
 0x18f   :  { %20530 = vst [vmem:[#allocation86_spill] sm:$0xff] %v15323_v32  ;;  %1584 = vperm.xlu1 %14470, %v1353_v48  }
 0x190   :  { %v15329_v21 = vpop.permute.xlu0 %1082 }
 0x191   :  { %20533 = vst [vmem:[#allocation89_spill] sm:$0xff] %v15329_v21  ;;  %1599 = vperm.xlu0 %14469, %v1356_v40   ;;  %v1362_v40 = vld [vmem:[#allocation2 + $0x28a] sm:$0xff]  ;;  %v1363_v21 = vld [vmem:[#allocation2 + $0x292] sm:$0xff] }
 0x192   :  { %v15327_v9 = vpop.permute.xlu1 %1077 }
 0x193   :  { %20532 = vst [vmem:[#allocation88_spill] sm:$0xff] %v15327_v9  ;;  %1594 = vperm.xlu1 %14470, %v1355_v24  }
 0x194   :  { %v15333_v32 = vpop.permute.xlu0 %1092 }
 0x195   :  { %20535 = vst [vmem:[#allocation91_spill] sm:$0xff] %v15333_v32  ;;  %1609 = vperm.xlu0 %14469, %v1358_v36   ;;  %v1364_v36 = vld [vmem:[#allocation2 + $0x2a2] sm:$0xff]  ;;  %v1365_v32 = vld [vmem:[#allocation2 + $0x2aa] sm:$0xff] }
 0x196   :  { %v15331_v59 = vpop.permute.xlu1 %1087 }
 0x197   :  { %20534 = vst [vmem:[#allocation90_spill] sm:$0xff] %v15331_v59  ;;  %1604 = vperm.xlu1 %14470, %v1357_v63  }
 0x198   :  { %v15337_v9 = vpop.permute.xlu0 %1102 }
 0x199   :  { %20537 = vst [vmem:[#allocation93_spill] sm:$0xff] %v15337_v9  ;;  %1619 = vperm.xlu0 %14469, %v1360_v52   ;;  %v1366_v52 = vld [vmem:[#allocation2 + $0x2ba] sm:$0xff]  ;;  %v1367_v9 = vld [vmem:[#allocation2 + $0x2c2] sm:$0xff] }
 0x19a   :  { %v15335_v48 = vpop.permute.xlu1 %1097 }
 0x19b   :  { %20536 = vst [vmem:[#allocation92_spill] sm:$0xff] %v15335_v48  ;;  %1614 = vperm.xlu1 %14470, %v1359_v58  }
 0x19c   :  { %v15341_v59 = vpop.permute.xlu0 %1112 }
 0x19d   :  { %20539 = vst [vmem:[#allocation95_spill] sm:$0xff] %v15341_v59  ;;  %1629 = vperm.xlu0 %14469, %v1362_v40   ;;  %v1368_v40 = vld [vmem:[#allocation2 + $0x2d2] sm:$0xff]  ;;  %v1369_v59 = vld [vmem:[#allocation2 + $0x2da] sm:$0xff] }
 0x19e   :  { %v15339_v24 = vpop.permute.xlu1 %1107 }
 0x19f   :  { %20538 = vst [vmem:[#allocation94_spill] sm:$0xff] %v15339_v24  ;;  %1624 = vperm.xlu1 %14470, %v1361_v62  }
 0x1a0   :  { %v15345_v48 = vpop.permute.xlu0 %1122 }
 0x1a1   :  { %20541 = vst [vmem:[#allocation97_spill] sm:$0xff] %v15345_v48  ;;  %1639 = vperm.xlu0 %14469, %v1364_v36   ;;  %v1370_v36 = vld [vmem:[#allocation2 + $0x2ea] sm:$0xff]  ;;  %v1371_v48 = vld [vmem:[#allocation2 + $0x2f2] sm:$0xff] }
 0x1a2   :  { %v15343_v63 = vpop.permute.xlu1 %1117 }
 0x1a3   :  { %20540 = vst [vmem:[#allocation96_spill] sm:$0xff] %v15343_v63  ;;  %1634 = vperm.xlu1 %14470, %v1363_v21  }
 0x1a4   :  { %v15349_v24 = vpop.permute.xlu0 %1132 }
 0x1a5   :  { %20543 = vst [vmem:[#allocation99_spill] sm:$0xff] %v15349_v24  ;;  %1649 = vperm.xlu0 %14469, %v1366_v52   ;;  %v1372_v52 = vld [vmem:[#allocation2 + $0x302] sm:$0xff]  ;;  %v1373_v24 = vld [vmem:[#allocation2 + $0x30a] sm:$0xff] }
 0x1a6   :  { %v15347_v58 = vpop.permute.xlu1 %1127 }
 0x1a7   :  { %20542 = vst [vmem:[#allocation98_spill] sm:$0xff] %v15347_v58  ;;  %1644 = vperm.xlu1 %14470, %v1365_v32  }
 0x1a8   :  { %v15353_v63 = vpop.permute.xlu0 %1142 }
 0x1a9   :  { %20545 = vst [vmem:[#allocation101_spill] sm:$0xff] %v15353_v63  ;;  %1659 = vperm.xlu0 %14469, %v1368_v40   ;;  %v1374_v40 = vld [vmem:[#allocation2 + $0x31a] sm:$0xff]  ;;  %v1375_v63 = vld [vmem:[#allocation2 + $0x322] sm:$0xff] }
 0x1aa   :  { %v15351_v62 = vpop.permute.xlu1 %1137 }
 0x1ab   :  { %20544 = vst [vmem:[#allocation100_spill] sm:$0xff] %v15351_v62  ;;  %1654 = vperm.xlu1 %14470, %v1367_v9  }
 0x1ac   :  { %v15357_v58 = vpop.permute.xlu0 %1152 }
 0x1ad   :  { %20547 = vst [vmem:[#allocation103_spill] sm:$0xff] %v15357_v58  ;;  %1669 = vperm.xlu0 %14469, %v1370_v36   ;;  %v1829_v36 = vld [vmem:[#allocation2 + $0x18] sm:$0xff]  ;;  %v1830_v58 = vld [vmem:[#allocation2 + $0x20] sm:$0xff] }
 0x1ae   :  { %v15355_v21 = vpop.permute.xlu1 %1147 }
 0x1af   :  { %20546 = vst [vmem:[#allocation102_spill] sm:$0xff] %v15355_v21  ;;  %1664 = vperm.xlu1 %14470, %v1369_v59  }
 0x1b0   :  { %v15361_v62 = vpop.permute.xlu0 %1162 }
 0x1b1   :  { %20549 = vst [vmem:[#allocation105_spill] sm:$0xff] %v15361_v62  ;;  %1679 = vperm.xlu0 %14469, %v1372_v52   ;;  %v15373_v52 = vld [vmem:[#allocation2 + $0x30] sm:$0xff]  ;;  %v15395_v62 = vld [vmem:[#allocation2 + $0x68] sm:$0xff] }
 0x1b2   :  { %v15359_v32 = vpop.permute.xlu1 %1157 }
 0x1b3   :  { %20548 = vst [vmem:[#allocation104_spill] sm:$0xff] %v15359_v32  ;;  %1674 = vperm.xlu1 %14470, %v1371_v48  }
 0x1b4   :  { %v15365_v21 = vpop.permute.xlu0 %1172 }
 0x1b5   :  { %20551 = vst [vmem:[#allocation107_spill] sm:$0xff] %v15365_v21  ;;  %1689 = vperm.xlu0 %14469, %v1374_v40   ;;  %v15393_v21 = vld [vmem:[#allocation2 + $0x60] sm:$0xff] }
 0x1b6   :  { %v15363_v9 = vpop.permute.xlu1 %1167 }
 0x1b7   :  { %20550 = vst [vmem:[#allocation106_spill] sm:$0xff] %v15363_v9  ;;  %1684 = vperm.xlu1 %14470, %v1373_v24   ;;  %v15375_v9 = vld [vmem:[#allocation2 + $0x38] sm:$0xff] }
 0x1b8   :  { %v15369_v32 = vpop.permute.xlu0 %1379 }
 0x1b9   :  { %20553 = vst [vmem:[#allocation109_spill] sm:$0xff] %v15369_v32  ;;  %1896 = vperm.xlu0 %14469, %v1829_v36  }
 0x1ba   :  { %v15367_v59 = vpop.permute.xlu1 %1177 }
 0x1bb   :  { %20552 = vst [vmem:[#allocation108_spill] sm:$0xff] %v15367_v59  ;;  %1694 = vperm.xlu1 %14470, %v1375_v63   ;;  %v15383_v63 = vld [vmem:[#allocation2 + $0x48] sm:$0xff]  ;;  %v15385_v59 = vld [vmem:[#allocation2 + $0x50] sm:$0xff] }
 0x1bc   :  { %v15377_v24 = vpop.permute.xlu0 %1389 }
 0x1bd   :  { %20555 = vst [vmem:[#allocation111_spill] sm:$0xff] %v15377_v24  ;;  %1906 = vperm.xlu0 %14469, %v15373_v52  }
 0x1be   :  { %v15371_v48 = vpop.permute.xlu1 %1384 }
 0x1bf   :  { %20554 = vst [vmem:[#allocation110_spill] sm:$0xff] %v15371_v48  ;;  %1901 = vperm.xlu1 %14470, %v1830_v58   ;;  %v15403_v48 = vld [vmem:[#allocation2 + $0x78] sm:$0xff] }
 0x1c0   :  { %v15387_v36 = vpop.permute.xlu0 %1399 }
 0x1c1   :  { %20557 = vst [vmem:[#allocation113_spill] sm:$0xff] %v15387_v36  ;;  %1916 = vperm.xlu0 %14469, %v15383_v63   ;;  %v15405_v36 = vld [vmem:[#allocation2 + $0x80] sm:$0xff] }
 0x1c2   :  { %v15380_v40 = vpop.permute.xlu1 %1394 }
 0x1c3   :  { %20556 = vst [vmem:[#allocation112_spill] sm:$0xff] %v15380_v40  ;;  %1911 = vperm.xlu1 %14470, %v15375_v9  }
 0x1c4   :  { %v15397_v24 = vpop.permute.xlu0 %1409 }
 0x1c5   :  { %20559 = vst [vmem:[#allocation115_spill] sm:$0xff] %v15397_v24  ;;  %1926 = vperm.xlu0 %14469, %v15393_v21   ;;  %v15415_v24 = vld [vmem:[#allocation2 + $0x98] sm:$0xff] }
 0x1c6   :  { %v15390_v58 = vpop.permute.xlu1 %1404 }
 0x1c7   :  { %20558 = vst [vmem:[#allocation114_spill] sm:$0xff] %v15390_v58  ;;  %1921 = vperm.xlu1 %14470, %v15385_v59  }
 0x1c8   :  { %v15407_v32 = vpop.permute.xlu0 %1419 }
 0x1c9   :  { %20561 = vst [vmem:[#allocation117_spill] sm:$0xff] %v15407_v32  ;;  %1936 = vperm.xlu0 %14469, %v15403_v48   ;;  %v15425_v32 = vld [vmem:[#allocation2 + $0xb0] sm:$0xff] }
 0x1ca   :  { %v15400_v40 = vpop.permute.xlu1 %1414 }
 0x1cb   :  { %20560 = vst [vmem:[#allocation116_spill] sm:$0xff] %v15400_v40  ;;  %1931 = vperm.xlu1 %14470, %v15395_v62  }
 0x1cc   :  { %v15417_v29 = vpop.permute.xlu0 %1429 }
 0x1cd   :  { %20563 = vst [vmem:[#allocation119_spill] sm:$0xff] %v15417_v29  ;;  %1946 = vperm.xlu0 %14469, %v15413_v56   ;;  %v1844_v29 = vld [vmem:[#allocation2 + $0xc8] sm:$0xff] }
 0x1ce   :  { %v15410_v58 = vpop.permute.xlu1 %1424 }
 0x1cf   :  { %20562 = vst [vmem:[#allocation118_spill] sm:$0xff] %v15410_v58  ;;  %1941 = vperm.xlu1 %14470, %v15405_v36  }
 0x1d0   :  { %v15427_v37 = vpop.permute.xlu0 %1439 }
 0x1d1   :  { %20565 = vst [vmem:[#allocation121_spill] sm:$0xff] %v15427_v37  ;;  %1956 = vperm.xlu0 %14469, %v15423_v0  }
 0x1d2   :  { %v15420_v40 = vpop.permute.xlu1 %1434 }
 0x1d3   :  { %20564 = vst [vmem:[#allocation120_spill] sm:$0xff] %v15420_v40  ;;  %1951 = vperm.xlu1 %14470, %v15415_v24  }
 0x1d4   :  { %v15435_v45 = vpop.permute.xlu0 %1449 }
 0x1d5   :  { %20567 = vst [vmem:[#allocation123_spill] sm:$0xff] %v15435_v45  ;;  %1966 = vperm.xlu0 %14469, %v15433_v17  }
 0x1d6   :  { %v15430_v58 = vpop.permute.xlu1 %1444 }
 0x1d7   :  { %20566 = vst [vmem:[#allocation122_spill] sm:$0xff] %v15430_v58  ;;  %1961 = vperm.xlu1 %14470, %v15425_v32  }
 0x1d8   :  { %v15442_v37 = vpop.permute.xlu0 %1459 }
 0x1d9   :  { %20569 = vst [vmem:[#allocation125_spill] sm:$0xff] %v15442_v37  ;;  %1976 = vperm.xlu0 %14469, %v15440_v33  }
 0x1da   :  { %v15438_v40 = vpop.permute.xlu1 %1454 }
 0x1db   :  { %20568 = vst [vmem:[#allocation124_spill] sm:$0xff] %v15438_v40  ;;  %1971 = vperm.xlu1 %14470, %v1844_v29   ;;  %v15454_v29 = vld [vmem:[#allocation2 + $0x108] sm:$0xff]  ;;  %v1850_v40 = vld [vmem:[#allocation2 + $0x110] sm:$0xff] }
 0x1dc   :  { %v15449_v4 = vpop.permute.xlu0 %1469 }
 0x1dd   :  { %20571 = vst [vmem:[#allocation127_spill] sm:$0xff] %v15449_v4  ;;  %1986 = vperm.xlu0 %14469, %v15447_v25  }
 0x1de   :  { %v15445_v58 = vpop.permute.xlu1 %1464 }
 0x1df   :  { %20570 = vst [vmem:[#allocation126_spill] sm:$0xff] %v15445_v58  ;;  %1981 = vperm.xlu1 %14470, %v1846_v53   ;;  %v1851_v53 = vld [vmem:[#allocation2 + $0x120] sm:$0xff]  ;;  %v1852_v58 = vld [vmem:[#allocation2 + $0x128] sm:$0xff] }
 0x1e0   :  { %v15456_v12 = vpop.permute.xlu0 %1479 }
 0x1e1   :  { %20573 = vst [vmem:[#allocation129_spill] sm:$0xff] %v15456_v12  ;;  %1996 = vperm.xlu0 %14469, %v15454_v29   ;;  %v1855_v12 = vld [vmem:[#allocation2 + $0x150] sm:$0xff] }
 0x1e2   :  { %v15452_v45 = vpop.permute.xlu1 %1474 }
 0x1e3   :  { %20572 = vst [vmem:[#allocation128_spill] sm:$0xff] %v15452_v45  ;;  %1991 = vperm.xlu1 %14470, %v1848_v61   ;;  %v1853_v45 = vld [vmem:[#allocation2 + $0x138] sm:$0xff]  ;;  %v1854_v61 = vld [vmem:[#allocation2 + $0x140] sm:$0xff] }
 0x1e4   :  { %v15461_v49 = vpop.permute.xlu0 %1489 }
 0x1e5   :  { %20575 = vst [vmem:[#allocation131_spill] sm:$0xff] %v15461_v49  ;;  %2006 = vperm.xlu0 %14469, %v1851_v53   ;;  %v1857_v53 = vld [vmem:[#allocation2 + $0x168] sm:$0xff]  ;;  %v1858_v49 = vld [vmem:[#allocation2 + $0x170] sm:$0xff] }
 0x1e6   :  { %v15459_v37 = vpop.permute.xlu1 %1484 }
 0x1e7   :  { %20574 = vst [vmem:[#allocation130_spill] sm:$0xff] %v15459_v37  ;;  %2001 = vperm.xlu1 %14470, %v1850_v40  }
 0x1e8   :  { %v15465_v16 = vpop.permute.xlu0 %1499 }
 0x1e9   :  { %20577 = vst [vmem:[#allocation133_spill] sm:$0xff] %v15465_v16  ;;  %2016 = vperm.xlu0 %14469, %v1853_v45   ;;  %v1859_v45 = vld [vmem:[#allocation2 + $0x180] sm:$0xff]  ;;  %v1860_v16 = vld [vmem:[#allocation2 + $0x188] sm:$0xff] }
 0x1ea   :  { %v15463_v4 = vpop.permute.xlu1 %1494 }
 0x1eb   :  { %20576 = vst [vmem:[#allocation132_spill] sm:$0xff] %v15463_v4  ;;  %2011 = vperm.xlu1 %14470, %v1852_v58  }
 0x1ec   :  { %v15469_v37 = vpop.permute.xlu0 %1509 }
 0x1ed   :  { %20579 = vst [vmem:[#allocation135_spill] sm:$0xff] %v15469_v37  ;;  %2026 = vperm.xlu0 %14469, %v1855_v12   ;;  %v1861_v12 = vld [vmem:[#allocation2 + $0x1c8] sm:$0xff]  ;;  %v1862_v37 = vld [vmem:[#allocation2 + $0x1d0] sm:$0xff] }
 0x1ee   :  { %v15467_v13 = vpop.permute.xlu1 %1504 }
 0x1ef   :  { %20578 = vst [vmem:[#allocation134_spill] sm:$0xff] %v15467_v13  ;;  %2021 = vperm.xlu1 %14470, %v1854_v61  }
 0x1f0   :  { %v15473_v4 = vpop.permute.xlu0 %1519 }
 0x1f1   :  { %20581 = vst [vmem:[#allocation137_spill] sm:$0xff] %v15473_v4  ;;  %2036 = vperm.xlu0 %14469, %v1857_v53   ;;  %v1863_v53 = vld [vmem:[#allocation2 + $0x1e0] sm:$0xff]  ;;  %v1864_v4 = vld [vmem:[#allocation2 + $0x1e8] sm:$0xff] }
 0x1f2   :  { %v15471_v40 = vpop.permute.xlu1 %1514 }
 0x1f3   :  { %20580 = vst [vmem:[#allocation136_spill] sm:$0xff] %v15471_v40  ;;  %2031 = vperm.xlu1 %14470, %v1856_v28  }
 0x1f4   :  { %v15477_v13 = vpop.permute.xlu0 %1529 }
 0x1f5   :  { %20583 = vst [vmem:[#allocation139_spill] sm:$0xff] %v15477_v13  ;;  %2046 = vperm.xlu0 %14469, %v1859_v45   ;;  %v1865_v45 = vld [vmem:[#allocation2 + $0x1f8] sm:$0xff]  ;;  %v1866_v13 = vld [vmem:[#allocation2 + $0x200] sm:$0xff] }
 0x1f6   :  { %v15475_v58 = vpop.permute.xlu1 %1524 }
 0x1f7   :  { %20582 = vst [vmem:[#allocation138_spill] sm:$0xff] %v15475_v58  ;;  %2041 = vperm.xlu1 %14470, %v1858_v49  }
 0x1f8   :  { %v15481_v40 = vpop.permute.xlu0 %1539 }
 0x1f9   :  { %20585 = vst [vmem:[#allocation141_spill] sm:$0xff] %v15481_v40  ;;  %2056 = vperm.xlu0 %14469, %v1861_v12   ;;  %v1867_v12 = vld [vmem:[#allocation2 + $0x210] sm:$0xff]  ;;  %v1868_v40 = vld [vmem:[#allocation2 + $0x218] sm:$0xff] }
 0x1fa   :  { %v15479_v61 = vpop.permute.xlu1 %1534 }
 0x1fb   :  { %20584 = vst [vmem:[#allocation140_spill] sm:$0xff] %v15479_v61  ;;  %2051 = vperm.xlu1 %14470, %v1860_v16  }
 0x1fc   :  { %v15485_v58 = vpop.permute.xlu0 %1549 }
 0x1fd   :  { %20587 = vst [vmem:[#allocation143_spill] sm:$0xff] %v15485_v58  ;;  %2066 = vperm.xlu0 %14469, %v1863_v53   ;;  %v1869_v53 = vld [vmem:[#allocation2 + $0x228] sm:$0xff]  ;;  %v1870_v58 = vld [vmem:[#allocation2 + $0x230] sm:$0xff] }
 0x1fe   :  { %v15483_v28 = vpop.permute.xlu1 %1544 }
 0x1ff   :  { %20586 = vst [vmem:[#allocation142_spill] sm:$0xff] %v15483_v28  ;;  %2061 = vperm.xlu1 %14470, %v1862_v37  }
 0x200   :  { %v15489_v61 = vpop.permute.xlu0 %1559 }
 0x201   :  { %20589 = vst [vmem:[#allocation145_spill] sm:$0xff] %v15489_v61  ;;  %2076 = vperm.xlu0 %14469, %v1865_v45   ;;  %v1871_v45 = vld [vmem:[#allocation2 + $0x240] sm:$0xff]  ;;  %v1872_v61 = vld [vmem:[#allocation2 + $0x248] sm:$0xff] }
 0x202   :  { %v15487_v49 = vpop.permute.xlu1 %1554 }
 0x203   :  { %20588 = vst [vmem:[#allocation144_spill] sm:$0xff] %v15487_v49  ;;  %2071 = vperm.xlu1 %14470, %v1864_v4  }
 0x204   :  { %v15493_v28 = vpop.permute.xlu0 %1569 }
 0x205   :  { %20591 = vst [vmem:[#allocation147_spill] sm:$0xff] %v15493_v28  ;;  %2086 = vperm.xlu0 %14469, %v1867_v12   ;;  %v1873_v12 = vld [vmem:[#allocation2 + $0x258] sm:$0xff]  ;;  %v1874_v28 = vld [vmem:[#allocation2 + $0x260] sm:$0xff] }
 0x206   :  { %v15491_v16 = vpop.permute.xlu1 %1564 }
 0x207   :  { %20590 = vst [vmem:[#allocation146_spill] sm:$0xff] %v15491_v16  ;;  %2081 = vperm.xlu1 %14470, %v1866_v13  }
 0x208   :  { %v15497_v49 = vpop.permute.xlu0 %1579 }
 0x209   :  { %20593 = vst [vmem:[#allocation149_spill] sm:$0xff] %v15497_v49  ;;  %2096 = vperm.xlu0 %14469, %v1869_v53   ;;  %v2346_v53 = vld [vmem:[#allocation2 + $0x19] sm:$0xff]  ;;  %v2348_v49 = vld [vmem:[#allocation2 + $0x31] sm:$0xff] }
 0x20a   :  { %v15495_v37 = vpop.permute.xlu1 %1574 }
 0x20b   :  { %20592 = vst [vmem:[#allocation148_spill] sm:$0xff] %v15495_v37  ;;  %2091 = vperm.xlu1 %14470, %v1868_v40  }
 0x20c   :  { %v15501_v16 = vpop.permute.xlu0 %1589 }
 0x20d   :  { %20595 = vst [vmem:[#allocation151_spill] sm:$0xff] %v15501_v16  ;;  %2106 = vperm.xlu0 %14469, %v1871_v45   ;;  %v2863_v45 = vld [vmem:[#allocation2 + $0x1a] sm:$0xff]  ;;  %v15513_v16 = vld [vmem:[#allocation2 + $0x32] sm:$0xff] }
 0x20e   :  { %v15499_v4 = vpop.permute.xlu1 %1584 }
 0x20f   :  { %20594 = vst [vmem:[#allocation150_spill] sm:$0xff] %v15499_v4  ;;  %2101 = vperm.xlu1 %14470, %v1870_v58  }
 0x210   :  { %v15505_v37 = vpop.permute.xlu0 %1599 }
 0x211   :  { %20597 = vst [vmem:[#allocation153_spill] sm:$0xff] %v15505_v37  ;;  %2116 = vperm.xlu0 %14469, %v1873_v12   ;;  %v2350_v12 = vld [vmem:[#allocation2 + $0x49] sm:$0xff] }
 0x212   :  { %v15503_v13 = vpop.permute.xlu1 %1594 }
 0x213   :  { %20596 = vst [vmem:[#allocation152_spill] sm:$0xff] %v15503_v13  ;;  %2111 = vperm.xlu1 %14470, %v1872_v61  }
 0x214   :  { %v15509_v4 = vpop.permute.xlu0 %1609 }
 0x215   :  { %20599 = vst [vmem:[#allocation155_spill] sm:$0xff] %v15509_v4  ;;  %2413 = vperm.xlu0 %14469, %v2346_v53   ;;  %v15527_v4 = vld [vmem:[#allocation2 + $0x39] sm:$0xff] }
 0x216   :  { %v15507_v40 = vpop.permute.xlu1 %1604 }
 0x217   :  { %20598 = vst [vmem:[#allocation154_spill] sm:$0xff] %v15507_v40  ;;  %2121 = vperm.xlu1 %14470, %v1874_v28   ;;  %v15520_v28 = vld [vmem:[#allocation2 + $0x61] sm:$0xff] }
 0x218   :  { %v15515_v61 = vpop.permute.xlu0 %1619 }
 0x219   :  { %20601 = vst [vmem:[#allocation157_spill] sm:$0xff] %v15515_v61  ;;  %2930 = vperm.xlu0 %14469, %v2863_v45   ;;  %v15536_v61 = vld [vmem:[#allocation2 + $0x91] sm:$0xff] }
 0x21a   :  { %v15511_v58 = vpop.permute.xlu1 %1614 }
 0x21b   :  { %20600 = vst [vmem:[#allocation156_spill] sm:$0xff] %v15511_v58  ;;  %2423 = vperm.xlu1 %14470, %v2348_v49   ;;  %v2347_v58 = vld [vmem:[#allocation2 + $0x21] sm:$0xff] }
 0x21c   :  { %v15522_v40 = vpop.permute.xlu0 %1629 }
 0x21d   :  { %20603 = vst [vmem:[#allocation159_spill] sm:$0xff] %v15522_v40  ;;  %2433 = vperm.xlu0 %14469, %v2350_v12  }
 0x21e   :  { %v15517_v13 = vpop.permute.xlu1 %1624 }
 0x21f   :  { %20602 = vst [vmem:[#allocation158_spill] sm:$0xff] %v15517_v13  ;;  %2940 = vperm.xlu1 %14470, %v15513_v16   ;;  %v15534_v13 = vld [vmem:[#allocation2 + $0x79] sm:$0xff] }
 0x220   :  { %v15529_v37 = vpop.permute.xlu0 %1639 }
 0x221   :  { %20605 = vst [vmem:[#allocation161_spill] sm:$0xff] %v15529_v37  ;;  %2418 = vperm.xlu0 %14469, %v2347_v58   ;;  %v2867_v37 = vld [vmem:[#allocation2 + $0x4a] sm:$0xff] }
 0x222   :  { %v15524_v53 = vpop.permute.xlu1 %1634 }
 0x223   :  { %20604 = vst [vmem:[#allocation160_spill] sm:$0xff] %v15524_v53  ;;  %2443 = vperm.xlu1 %14470, %v15520_v28  }
 0x224   :  { %v15538_v40 = vpop.permute.xlu0 %1649 }
 0x225   :  { %20607 = vst [vmem:[#allocation163_spill] sm:$0xff] %v15538_v40  ;;  %2453 = vperm.xlu0 %14469, %v15534_v13  }
 0x226   :  { %v15531_v45 = vpop.permute.xlu1 %1644 }
 0x227   :  { %20606 = vst [vmem:[#allocation162_spill] sm:$0xff] %v15531_v45  ;;  %2428 = vperm.xlu1 %14470, %v15527_v4   ;;  %v15550_v45 = vld [vmem:[#allocation2 + $0x62] sm:$0xff] }
 0x228   :  { %v15544_v3 = vpop.permute.xlu0 %1659 }
 0x229   :  { %20609 = vst [vmem:[#allocation165_spill] sm:$0xff] %v15544_v3  ;;  %3448 = vperm.xlu0 %14469, %v15373_v52  }
 0x22a   :  { %v15541_v53 = vpop.permute.xlu1 %1654 }
 0x22b   :  { %20608 = vst [vmem:[#allocation164_spill] sm:$0xff] %v15541_v53  ;;  %2463 = vperm.xlu1 %14470, %v15536_v61   ;;  %v2864_v53 = vld [vmem:[#allocation2 + $0x22] sm:$0xff] }
 0x22c   :  { %v15552_v8 = vpop.permute.xlu0 %1669 }
 0x22d   :  { %20611 = vst [vmem:[#allocation167_spill] sm:$0xff] %v15552_v8  ;;  %2950 = vperm.xlu0 %14469, %v2867_v37  }
 0x22e   :  { %v15547_v58 = vpop.permute.xlu1 %1664 }
 0x22f   :  { %20610 = vst [vmem:[#allocation166_spill] sm:$0xff] %v15547_v58  ;;  %3458 = vperm.xlu1 %14470, %v15383_v63   ;;  %v15564_v63 = vld [vmem:[#allocation2 + $0x7a] sm:$0xff]  ;;  %v15566_v58 = vld [vmem:[#allocation2 + $0x92] sm:$0xff] }
 0x230   :  { %v15559_v3 = vpop.permute.xlu0 %1679 }
 0x231   :  { %20613 = vst [vmem:[#allocation169_spill] sm:$0xff] %v15559_v3  ;;  %2935 = vperm.xlu0 %14469, %v2864_v53   ;;  %v15580_v3 = vld [vmem:[#allocation2 + $0x69] sm:$0xff] }
 0x232   :  { %v15554_v40 = vpop.permute.xlu1 %1674 }
 0x233   :  { %20612 = vst [vmem:[#allocation168_spill] sm:$0xff] %v15554_v40  ;;  %2960 = vperm.xlu1 %14470, %v15550_v45  }
 0x234   :  { %v15568_v8 = vpop.permute.xlu0 %1689 }
 0x235   :  { %20615 = vst [vmem:[#allocation171_spill] sm:$0xff] %v15568_v8  ;;  %2970 = vperm.xlu0 %14469, %v15564_v63  }
 0x236   :  { %v15561_v52 = vpop.permute.xlu1 %1684 }
 0x237   :  { %20614 = vst [vmem:[#allocation170_spill] sm:$0xff] %v15561_v52  ;;  %2945 = vperm.xlu1 %14470, %v15557_v5   ;;  %v15578_v52 = vld [vmem:[#allocation2 + $0x51] sm:$0xff] }
 0x238   :  { %v15574_v20 = vpop.permute.xlu0 %1896 }
 0x239   :  { %20617 = vst [vmem:[#allocation173_spill] sm:$0xff] %v15574_v20  ;;  %3965 = vperm.xlu0 %14469, %v2348_v49   ;;  %v15606_v20 = vld [vmem:[#allocation2 + $0x99] sm:$0xff] }
 0x23a   :  { %v15571_v40 = vpop.permute.xlu1 %1694 }
 0x23b   :  { %20616 = vst [vmem:[#allocation172_spill] sm:$0xff] %v15571_v40  ;;  %2980 = vperm.xlu1 %14470, %v15566_v58   ;;  %v15588_v40 = vld [vmem:[#allocation2 + $0xa9] sm:$0xff] }
 0x23c   :  { %v15582_v60 = vpop.permute.xlu0 %1906 }
 0x23d   :  { %20619 = vst [vmem:[#allocation175_spill] sm:$0xff] %v15582_v60  ;;  %2438 = vperm.xlu0 %14469, %v15578_v52  }
 0x23e   :  { %v15576_v53 = vpop.permute.xlu1 %1901 }
 0x23f   :  { %20618 = vst [vmem:[#allocation174_spill] sm:$0xff] %v15576_v53  ;;  %3975 = vperm.xlu1 %14470, %v2350_v12  }
 0x240   :  { %v15592_v49 = vpop.permute.xlu0 %1916 }
 0x241   :  { %20621 = vst [vmem:[#allocation177_spill] sm:$0xff] %v15592_v49  ;;  %2473 = vperm.xlu0 %14469, %v15588_v40  }
 0x242   :  { %v15585_v8 = vpop.permute.xlu1 %1911 }
 0x243   :  { %20620 = vst [vmem:[#allocation176_spill] sm:$0xff] %v15585_v8  ;;  %2448 = vperm.xlu1 %14470, %v15580_v3   ;;  %v15604_v8 = vld [vmem:[#allocation2 + $0x81] sm:$0xff] }
 0x244   :  { %v15598_v53 = vpop.permute.xlu0 %1926 }
 0x245   :  { %20623 = vst [vmem:[#allocation179_spill] sm:$0xff] %v15598_v53  ;;  %3468 = vperm.xlu0 %14469, %v15393_v21   ;;  %v15616_v53 = vld [vmem:[#allocation2 + $0xf1] sm:$0xff] }
 0x246   :  { %v15595_v12 = vpop.permute.xlu1 %1921 }
 0x247   :  { %20622 = vst [vmem:[#allocation178_spill] sm:$0xff] %v15595_v12  ;;  %2483 = vperm.xlu1 %14470, %v15590_v57   ;;  %v15614_v12 = vld [vmem:[#allocation2 + $0xd9] sm:$0xff] }
 0x248   :  { %v15608_v55 = vpop.permute.xlu0 %1936 }
 0x249   :  { %20625 = vst [vmem:[#allocation181_spill] sm:$0xff] %v15608_v55  ;;  %2458 = vperm.xlu0 %14469, %v15604_v8  }
 0x24a   :  { %v15601_v60 = vpop.permute.xlu1 %1931 }
 0x24b   :  { %20624 = vst [vmem:[#allocation180_spill] sm:$0xff] %v15601_v60  ;;  %3478 = vperm.xlu1 %14470, %v15403_v48  }
 0x24c   :  { %v15618_v21 = vpop.permute.xlu0 %1946 }
 0x24d   :  { %20627 = vst [vmem:[#allocation183_spill] sm:$0xff] %v15618_v21  ;;  %2493 = vperm.xlu0 %14469, %v15614_v12  }
 0x24e   :  { %v15611_v49 = vpop.permute.xlu1 %1941 }
 0x24f   :  { %20626 = vst [vmem:[#allocation182_spill] sm:$0xff] %v15611_v49  ;;  %2468 = vperm.xlu1 %14470, %v15606_v20  }
 0x250   :  { %v15624_v60 = vpop.permute.xlu0 %1956 }
 0x251   :  { %20629 = vst [vmem:[#allocation185_spill] sm:$0xff] %v15624_v60  ;;  %3453 = vperm.xlu0 %14469, %v15375_v9   ;;  %v15641_v9 = vld [vmem:[#allocation2 + $0x52] sm:$0xff] }
 0x252   :  { %v15621_v48 = vpop.permute.xlu1 %1951 }
 0x253   :  { %20628 = vst [vmem:[#allocation184_spill] sm:$0xff] %v15621_v48  ;;  %2503 = vperm.xlu1 %14470, %v15616_v53  }
 0x254   :  { %v15630_v49 = vpop.permute.xlu0 %1966 }
 0x255   :  { %20631 = vst [vmem:[#allocation187_spill] sm:$0xff] %v15630_v49  ;;  %3488 = vperm.xlu0 %14469, %v15413_v56  }
 0x256   :  { %v15627_v55 = vpop.permute.xlu1 %1961 }
 0x257   :  { %20630 = vst [vmem:[#allocation186_spill] sm:$0xff] %v15627_v55  ;;  %3463 = vperm.xlu1 %14470, %v15385_v59   ;;  %v15643_v55 = vld [vmem:[#allocation2 + $0x6a] sm:$0xff] }
 0x258   :  { %v15636_v21 = vpop.permute.xlu0 %1976 }
 0x259   :  { %20633 = vst [vmem:[#allocation189_spill] sm:$0xff] %v15636_v21  ;;  %4482 = vperm.xlu0 %14469, %v15513_v16   ;;  %v15653_v21 = vld [vmem:[#allocation2 + $0xc2] sm:$0xff] }
 0x25a   :  { %v15633_v44 = vpop.permute.xlu1 %1971 }
 0x25b   :  { %20632 = vst [vmem:[#allocation188_spill] sm:$0xff] %v15633_v44  ;;  %3498 = vperm.xlu1 %14470, %v15423_v0   ;;  %v15651_v0 = vld [vmem:[#allocation2 + $0xaa] sm:$0xff]  ;;  %v15669_v44 = vld [vmem:[#allocation2 + $0x9a] sm:$0xff] }
 0x25c   :  { %v15645_v59 = vpop.permute.xlu0 %1986 }
 0x25d   :  { %20635 = vst [vmem:[#allocation191_spill] sm:$0xff] %v15645_v59  ;;  %2955 = vperm.xlu0 %14469, %v15641_v9  }
 0x25e   :  { %v15639_v48 = vpop.permute.xlu1 %1981 }
 0x25f   :  { %20634 = vst [vmem:[#allocation190_spill] sm:$0xff] %v15639_v48  ;;  %4492 = vperm.xlu1 %14470, %v2867_v37  }
 0x260   :  { %v15655_v16 = vpop.permute.xlu0 %1996 }
 0x261   :  { %20637 = vst [vmem:[#allocation193_spill] sm:$0xff] %v15655_v16  ;;  %2990 = vperm.xlu0 %14469, %v15651_v0  }
 0x262   :  { %v15648_v56 = vpop.permute.xlu1 %1991 }
 0x263   :  { %20636 = vst [vmem:[#allocation192_spill] sm:$0xff] %v15648_v56  ;;  %2965 = vperm.xlu1 %14470, %v15643_v55   ;;  %v15667_v56 = vld [vmem:[#allocation2 + $0x82] sm:$0xff] }
 0x264   :  { %v15661_v48 = vpop.permute.xlu0 %2006 }
 0x265   :  { %20639 = vst [vmem:[#allocation195_spill] sm:$0xff] %v15661_v48  ;;  %3985 = vperm.xlu0 %14469, %v15520_v28   ;;  %v15679_v48 = vld [vmem:[#allocation2 + $0xf2] sm:$0xff] }
 0x266   :  { %v15658_v37 = vpop.permute.xlu1 %2001  ;;  %20643 = vst [vmem:[#allocation199_spill] sm:$0xff] %v15679_v48 }
 0x267   :  { %20638 = vst [vmem:[#allocation194_spill] sm:$0xff] %v15658_v37  ;;  %3000 = vperm.xlu1 %14470, %v15653_v21   ;;  %v15677_v37 = vld [vmem:[#allocation2 + $0xda] sm:$0xff] }
 0x268   :  { %v15671_v49 = vpop.permute.xlu0 %2016 }
 0x269   :  { %20641 = vst [vmem:[#allocation197_spill] sm:$0xff] %v15671_v49  ;;  %2975 = vperm.xlu0 %14469, %v15667_v56  }
 0x26a   :  { %v15664_v59 = vpop.permute.xlu1 %2011 }
 0x26b   :  { %20640 = vst [vmem:[#allocation196_spill] sm:$0xff] %v15664_v59  ;;  %3995 = vperm.xlu1 %14470, %v15534_v13  }
 0x26c   :  { %v15681_v28 = vpop.permute.xlu0 %2026 }
 0x26d   :  { %20644 = vst [vmem:[#allocation200_spill] sm:$0xff] %v15681_v28  ;;  %3010 = vperm.xlu0 %14469, %v15677_v37   ;;  %v15699_v28 = vld [vmem:[#allocation2 + $0xb1] sm:$0xff] }
 0x26e   :  { %v15674_v16 = vpop.permute.xlu1 %2021 }
 0x26f   :  { %20642 = vst [vmem:[#allocation198_spill] sm:$0xff] %v15674_v16  ;;  %2985 = vperm.xlu1 %14470, %v15669_v44  }
 0x270   :  { %v15687_v59 = vpop.permute.xlu0 %2036 }
 0x271   :  { %20646 = vst [vmem:[#allocation202_spill] sm:$0xff] %v15687_v59  ;;  %3970 = vperm.xlu0 %14469, %v15527_v4  }
 0x272   :  { %v15684_v13 = vpop.permute.xlu1 %2031 }
 0x273   :  { %20645 = vst [vmem:[#allocation201_spill] sm:$0xff] %v15684_v13  ;;  %3020 = vperm.xlu1 %14470, %v15679_v48   ;;  %v15701_v13 = vld [vmem:[#allocation2 + $0xc9] sm:$0xff] }
 0x274   :  { %v15693_v16 = vpop.permute.xlu0 %2046 }
 0x275   :  { %20648 = vst [vmem:[#allocation204_spill] sm:$0xff] %v15693_v16  ;;  %4005 = vperm.xlu0 %14469, %v15536_v61  }
 0x276   :  { %v15690_v49 = vpop.permute.xlu1 %2041 }
 0x277   :  { %20647 = vst [vmem:[#allocation203_spill] sm:$0xff] %v15690_v49  ;;  %3980 = vperm.xlu1 %14470, %v15578_v52   ;;  %v15709_v52 = vld [vmem:[#allocation2 + $0x109] sm:$0xff]  ;;  %v15711_v49 = vld [vmem:[#allocation2 + $0x121] sm:$0xff] }
 0x278   :  { %v15703_v48 = vpop.permute.xlu0 %2056  ;;  %20652 = vst [vmem:[#allocation208_spill] sm:$0xff] %v15711_v49 }
 0x279   :  { %20650 = vst [vmem:[#allocation206_spill] sm:$0xff] %v15703_v48  ;;  %2478 = vperm.xlu0 %14469, %v15699_v28  }
 0x27a   :  { %v15696_v60 = vpop.permute.xlu1 %2051 }
 0x27b   :  { %20649 = vst [vmem:[#allocation205_spill] sm:$0xff] %v15696_v60  ;;  %4015 = vperm.xlu1 %14470, %v15588_v40  }
 0x27c   :  { %v15713_v61 = vpop.permute.xlu0 %2066 }
 0x27d   :  { %20653 = vst [vmem:[#allocation209_spill] sm:$0xff] %v15713_v61  ;;  %2513 = vperm.xlu0 %14469, %v15709_v52  }
 0x27e   :  { %v15706_v4 = vpop.permute.xlu1 %2061 }
 0x27f   :  { %20651 = vst [vmem:[#allocation207_spill] sm:$0xff] %v15706_v4  ;;  %2488 = vperm.xlu1 %14470, %v15701_v13  }
 0x280   :  { %v15719_v60 = vpop.permute.xlu0 %2076 }
 0x281   :  { %20655 = vst [vmem:[#allocation211_spill] sm:$0xff] %v15719_v60  ;;  %3473 = vperm.xlu0 %14469, %v15395_v62   ;;  %v15737_v62 = vld [vmem:[#allocation2 + $0xe1] sm:$0xff] }
 0x282   :  { %v15716_v40 = vpop.permute.xlu1 %2071  ;;  %20661 = vst [vmem:[#allocation217_spill] sm:$0xff] %v15737_v62  ;;  %v15793_v60 = vld [vmem:[#allocation2 + $0x122] sm:$0xff] }
 0x283   :  { %20654 = vst [vmem:[#allocation210_spill] sm:$0xff] %v15716_v40  ;;  %2523 = vperm.xlu1 %14470, %v15711_v49   ;;  %20676 = vst [vmem:[#allocation232_spill] sm:$0xff] %v15793_v60 }
 0x284   :  { %v15725_v16 = vpop.permute.xlu0 %2086 }
 0x285   :  { %20657 = vst [vmem:[#allocation213_spill] sm:$0xff] %v15725_v16  ;;  %3508 = vperm.xlu0 %14469, %v15433_v17   ;;  %v15783_v16 = vld [vmem:[#allocation2 + $0xca] sm:$0xff] }
 0x286   :  { %v15722_v59 = vpop.permute.xlu1 %2081  ;;  %20673 = vst [vmem:[#allocation229_spill] sm:$0xff] %v15783_v16 }
 0x287   :  { %20656 = vst [vmem:[#allocation212_spill] sm:$0xff] %v15722_v59  ;;  %3483 = vperm.xlu1 %14470, %v15405_v36   ;;  %v15739_v59 = vld [vmem:[#allocation2 + $0xf9] sm:$0xff] }
 0x288   :  { %v15731_v61 = vpop.permute.xlu0 %2096  ;;  %20662 = vst [vmem:[#allocation218_spill] sm:$0xff] %v15739_v59 }
 0x289   :  { %20659 = vst [vmem:[#allocation215_spill] sm:$0xff] %v15731_v61  ;;  %4502 = vperm.xlu0 %14469, %v15550_v45   ;;  %v15749_v61 = vld [vmem:[#allocation2 + $0x151] sm:$0xff] }
 0x28a   :  { %v15728_v4 = vpop.permute.xlu1 %2091  ;;  %20666 = vst [vmem:[#allocation222_spill] sm:$0xff] %v15749_v61 }
 0x28b   :  { %20658 = vst [vmem:[#allocation214_spill] sm:$0xff] %v15728_v4  ;;  %3518 = vperm.xlu1 %14470, %v15440_v33   ;;  %v15747_v33 = vld [vmem:[#allocation2 + $0x139] sm:$0xff] }
 0x28c   :  { %v15741_v36 = vpop.permute.xlu0 %2106  ;;  %20665 = vst [vmem:[#allocation221_spill] sm:$0xff] %v15747_v33 }
 0x28d   :  { %20663 = vst [vmem:[#allocation219_spill] sm:$0xff] %v15741_v36  ;;  %2498 = vperm.xlu0 %14469, %v15737_v62   ;;  %v20717_v62 = vld [vmem:[#allocation54_spill] sm:$0xff] }
 0x28e   :  { %v15734_v40 = vpop.permute.xlu1 %2101 }
 0x28f   :  { %20660 = vst [vmem:[#allocation216_spill] sm:$0xff] %v15734_v40  ;;  %4512 = vperm.xlu1 %14470, %v15564_v63  }
 0x290   :  { %v15751_v45 = vpop.permute.xlu0 %2116 }
 0x291   :  { %20667 = vst [vmem:[#allocation223_spill] sm:$0xff] %v15751_v45  ;;  %2533 = vperm.xlu0 %14469, %v15747_v33  }
 0x292   :  { %v15744_v17 = vpop.permute.xlu1 %2111 }
 0x293   :  { %20664 = vst [vmem:[#allocation220_spill] sm:$0xff] %v15744_v17  ;;  %2508 = vperm.xlu1 %14470, %v15739_v59  }
 0x294   :  { %v15757_v40 = vpop.permute.xlu0 %2413 }
 0x295   :  { %3493 = vperm.xlu0 %14469, %v15415_v24  }
 0x296   :  { %v15754_v63 = vpop.permute.xlu1 %2121 }
 0x297   :  { %20668 = vst [vmem:[#allocation224_spill] sm:$0xff] %v15754_v63  ;;  %2543 = vperm.xlu1 %14470, %v15749_v61   ;;  %v15900_v61 = vld [vmem:[#allocation2 + $0x13a] sm:$0xff] }
 0x298   :  { %v15763_v17 = vpop.permute.xlu0 %2930  ;;  %20687 = vst [vmem:[#allocation242_spill] sm:$0xff] %v15900_v61 }
 0x299   :  { %3528 = vperm.xlu0 %14469, %v15447_v25   ;;  %v15781_v25 = vld [vmem:[#allocation2 + $0xb2] sm:$0xff] }
 0x29a   :  { %v15760_v36 = vpop.permute.xlu1 %2423 }
 0x29b   :  { %3503 = vperm.xlu1 %14470, %v15425_v32  }
 0x29c   :  { %v15769_v45 = vpop.permute.xlu0 %2433 }
 0x29d   :  { %20669 = vst [vmem:[#allocation225_spill] sm:$0xff] %v15769_v45  ;;  %4487 = vperm.xlu0 %14469, %v15557_v5   ;;  %v20707_v45 = vld [vmem:[#allocation49_spill] sm:$0xff] }
 0x29e   :  { %v15766_v4 = vpop.permute.xlu1 %2940 }
 0x29f   :  { %3538 = vperm.xlu1 %14470, %v15454_v29  }
 0x2a0   :  { %v15775_v24 = vpop.permute.xlu0 %2418 }
 0x2a1   :  { %20671 = vst [vmem:[#allocation227_spill] sm:$0xff] %v15775_v24  ;;  %4522 = vperm.xlu0 %14469, %v15566_v58   ;;  %v3401_v24 = vld [vmem:[#allocation2 + $0x120] sm:$0xff] }
 0x2a2   :  { %v15772_v63 = vpop.permute.xlu1 %2443 }
 0x2a3   :  { %20670 = vst [vmem:[#allocation226_spill] sm:$0xff] %v15772_v63  ;;  %4497 = vperm.xlu1 %14470, %v15641_v9   ;;  %v15791_v9 = vld [vmem:[#allocation2 + $0x10a] sm:$0xff] }
 0x2a4   :  { %v15785_v29 = vpop.permute.xlu0 %2453 }
 0x2a5   :  { %20674 = vst [vmem:[#allocation230_spill] sm:$0xff] %v15785_v29  ;;  %2995 = vperm.xlu0 %14469, %v15781_v25  }
 0x2a6   :  { %v15778_v32 = vpop.permute.xlu1 %2428 }
 0x2a7   :  { %20672 = vst [vmem:[#allocation228_spill] sm:$0xff] %v15778_v32  ;;  %4532 = vperm.xlu1 %14470, %v15651_v0  }
 0x2a8   :  { %v15795_v58 = vpop.permute.xlu0 %3448 }
 0x2a9   :  { %20677 = vst [vmem:[#allocation233_spill] sm:$0xff] %v15795_v58  ;;  %3030 = vperm.xlu0 %14469, %v15791_v9   ;;  %v20720_v58 = vld [vmem:[#allocation56_spill] sm:$0xff] }
 0x2aa   :  { %v15788_v5 = vpop.permute.xlu1 %2463 }
 0x2ab   :  { %20675 = vst [vmem:[#allocation231_spill] sm:$0xff] %v15788_v5  ;;  %3005 = vperm.xlu1 %14470, %v15783_v16   ;;  %v20681_v16 = vmov 0.0  }
 0x2ac   :  { %v15801_v32 = vpop.permute.xlu0 %2950  ;;  %7631 = vst.msk [vmem:[#allocation3 + $0x10] sm:$0xff] %vm7627_vm2, %v20681_v16  ;;  %7628 = vst.msk [vmem:[#allocation3] sm:$0xff] %vm7627_vm2, %v20681_v16 }
 0x2ad   :  { %20679 = vst [vmem:[#allocation235_spill] sm:$0xff] %v15801_v32  ;;  %3990 = vperm.xlu0 %14469, %v15580_v3   ;;  %7632 = vst.msk [vmem:[#allocation3 + $0x18] sm:$0x3] %vm7629_vm3, %v20681_v16 }
 0x2ae   :  { %v15798_v0 = vpop.permute.xlu1 %3458  ;;  %7630 = vst.msk [vmem:[#allocation3 + $0x8] sm:$0x3] %vm7629_vm3, %v20681_v16  ;;  %7634 = vst.msk [vmem:[#allocation3 + $0x28] sm:$0x3] %vm7629_vm3, %v20681_v16 }
 0x2af   :  { %20678 = vst [vmem:[#allocation234_spill] sm:$0xff] %v15798_v0  ;;  %3040 = vperm.xlu1 %14470, %v15793_v60   ;;  %7633 = vst.msk [vmem:[#allocation3 + $0x20] sm:$0xff] %vm7627_vm2, %v20681_v16  ;;  %v15893_v60 = vld [vmem:[#allocation2 + $0xe2] sm:$0xff] }
 0x2b0   :  { %7635 = vst.msk [vmem:[#allocation3 + $0x30] sm:$0xff] %vm7627_vm2, %v20681_v16  ;;  %7637 = vst.msk [vmem:[#allocation3 + $0x40] sm:$0xff] %vm7627_vm2, %v20681_v16 }
 0x2b1   :  { %7636 = vst.msk [vmem:[#allocation3 + $0x38] sm:$0x3] %vm7629_vm3, %v20681_v16  ;;  %7638 = vst.msk [vmem:[#allocation3 + $0x48] sm:$0x3] %vm7629_vm3, %v20681_v16  ;;  %4025 = vperm.xlu0 %14469, %v15590_v57  }
 0x2b2   :  { %v15804_v29 = vpop.permute.xlu1 %2960  ;;  %7639 = vst.msk [vmem:[#allocation3 + $0x50] sm:$0xff] %vm7627_vm2, %v20681_v16  ;;  %7641 = vst.msk [vmem:[#allocation3 + $0x60] sm:$0xff] %vm7627_vm2, %v20681_v16 }
 0x2b3   :  { %20680 = vst [vmem:[#allocation236_spill] sm:$0xff] %v15804_v29  ;;  %4000 = vperm.xlu1 %14470, %v15604_v8   ;;  %7640 = vst.msk [vmem:[#allocation3 + $0x58] sm:$0x3] %vm7629_vm3, %v20681_v16  ;;  %v15887_v8 = vpop.permute.xlu0 %2935  ;;  %v2882_v29 = vld [vmem:[#allocation2 + $0xfa] sm:$0xff] }
 0x2b4   :  { %7642 = vst.msk [vmem:[#allocation3 + $0x68] sm:$0x3] %vm7629_vm3, %v20681_v16  ;;  %7644 = vst.msk [vmem:[#allocation3 + $0x78] sm:$0x3] %vm7629_vm3, %v20681_v16 }
 0x2b5   :  { %7643 = vst.msk [vmem:[#allocation3 + $0x70] sm:$0xff] %vm7627_vm2, %v20681_v16  ;;  %7645 = vst.msk [vmem:[#allocation3 + $0x80] sm:$0xff] %vm7627_vm2, %v20681_v16  ;;  %3015 = vperm.xlu0 %14469, %v15893_v60  }
 0x2b6   :  { %7646 = vst.msk [vmem:[#allocation3 + $0x88] sm:$0x3] %vm7629_vm3, %v20681_v16  ;;  %7648 = vst.msk [vmem:[#allocation3 + $0x98] sm:$0x3] %vm7629_vm3, %v20681_v16  ;;  %v15890_v3 = vpop.permute.xlu1 %2945 }
 0x2b7   :  { %7647 = vst.msk [vmem:[#allocation3 + $0x90] sm:$0xff] %vm7627_vm2, %v20681_v16  ;;  %7649 = vst.msk [vmem:[#allocation3 + $0xa0] sm:$0xff] %vm7627_vm2, %v20681_v16  ;;  %4035 = vperm.xlu1 %14470, %v15614_v12   ;;  %v15895_v32 = vpop.permute.xlu0 %2970 }
 0x2b8   :  { %7650 = vst.msk [vmem:[#allocation3 + $0xa8] sm:$0x3] %vm7629_vm3, %v20681_v16  ;;  %7652 = vst.msk [vmem:[#allocation3 + $0xb8] sm:$0x3] %vm7629_vm3, %v20681_v16 }
 0x2b9   :  { %7651 = vst.msk [vmem:[#allocation3 + $0xb0] sm:$0xff] %vm7627_vm2, %v20681_v16  ;;  %7653 = vst.msk [vmem:[#allocation3 + $0xc0] sm:$0xff] %vm7627_vm2, %v20681_v16  ;;  %3050 = vperm.xlu0 %14469, %v15900_v61  }
 0x2ba   :  { %7654 = vst.msk [vmem:[#allocation3 + $0xc8] sm:$0x3] %vm7629_vm3, %v20681_v16  ;;  %7656 = vst.msk [vmem:[#allocation3 + $0xd8] sm:$0x3] %vm7629_vm3, %v20681_v16  ;;  %v15898_v5 = vpop.permute.xlu1 %2980 }
 0x2bb   :  { %7655 = vst.msk [vmem:[#allocation3 + $0xd0] sm:$0xff] %vm7627_vm2, %v20681_v16  ;;  %7657 = vst.msk [vmem:[#allocation3 + $0xe0] sm:$0xff] %vm7627_vm2, %v20681_v16  ;;  %3025 = vperm.xlu1 %14470, %v2882_v29   ;;  %v8495_v29 = vld [vmem:[%s20370_s3 + $0x10] sm:$0xff] }
 0x2bc   :  { %7658 = vst.msk [vmem:[#allocation3 + $0xe8] sm:$0x3] %vm7629_vm3, %v20681_v16  ;;  %7660 = vst.msk [vmem:[#allocation3 + $0xf8] sm:$0x3] %vm7629_vm3, %v20681_v16 }
 0x2bd   :  { %7659 = vst.msk [vmem:[#allocation3 + $0xf0] sm:$0xff] %vm7627_vm2, %v20681_v16  ;;  %7661 = vst.msk [vmem:[#allocation3 + $0x100] sm:$0xff] %vm7627_vm2, %v20681_v16  ;;  %4010 = vperm.xlu0 %14469, %v15606_v20   ;;  %v8900_v20 = vld [vmem:[%s20370_s3 + $0x28] sm:$0xff] }
 0x2be   :  { %7662 = vst.msk [vmem:[#allocation3 + $0x108] sm:$0x3] %vm7629_vm3, %v20681_v16  ;;  %7664 = vst.msk [vmem:[#allocation3 + $0x118] sm:$0x3] %vm7629_vm3, %v20681_v16  ;;  %v15905_v57 = vpop.permute.xlu1 %3975 }
 0x2bf   :  { %7663 = vst.msk [vmem:[#allocation3 + $0x110] sm:$0xff] %vm7627_vm2, %v20681_v16  ;;  %7665 = vst.msk [vmem:[#allocation3 + $0x120] sm:$0xff] %vm7627_vm2, %v20681_v16 }
 0x2c0   :  { %7666 = vst.msk [vmem:[#allocation3 + $0x128] sm:$0x3] %vm7629_vm3, %v20681_v16  ;;  %7668 = vst.msk [vmem:[#allocation3 + $0x138] sm:$0x3] %vm7629_vm3, %v20681_v16 }
 0x2c1   :  { %7667 = vst.msk [vmem:[#allocation3 + $0x130] sm:$0xff] %vm7627_vm2, %v20681_v16  ;;  %20682 = vst [vmem:[#allocation237_spill] sm:$0xff] %v15887_v8  ;;  %v2889_v16 = vld [vmem:[#allocation2 + $0x152] sm:$0xff]  ;;  %v15902_v8 = vpop.permute.xlu0 %3965  ;;  %4045 = vperm.xlu0 %14469, %v15616_v53  }
 0x2c2   :  { %20683 = vst [vmem:[#allocation238_spill] sm:$0xff] %v15890_v3  ;;  %20684 = vst [vmem:[#allocation239_spill] sm:$0xff] %v15893_v60  ;;  %3060 = vperm.xlu1 %14470, %v2889_v16   ;;  %v8496_v60 = vld [vmem:[%s20370_s3 + $0x18] sm:$0xff]  ;;  %v8899_v16 = vld [vmem:[%s20370_s3 + $0x20] sm:$0xff] }
 0x2c3   :  { %20685 = vst [vmem:[#allocation240_spill] sm:$0xff] %v15895_v32  ;;  %20686 = vst [vmem:[#allocation241_spill] sm:$0xff] %v15898_v5  ;;  %v15910_v32 = vpop.permute.xlu1 %2448  ;;  %v14136_v5 = vpack.c.bf16 %v8496_v60, %v8495_v29  ;;  %v15933_v3 = vld [vmem:[#allocation2 + $0x111] sm:$0xff]  ;;  %v8883_v60 = vld [vmem:[#allocation3 + $0x2] sm:$0xff] }
 0x2c4   :  { %20688 = vst [vmem:[#allocation243_spill] sm:$0xff] %v15902_v8  ;;  %20689 = vst [vmem:[#allocation244_spill] sm:$0xff] %v15905_v57  ;;  %v2369_v29 = vld [vmem:[#allocation2 + $0x129] sm:$0xff]  ;;  %13783 = vmatprep.mubr.msk.f32.mxu0 %vm7627_vm2, %v8883_v60 }
 0x2c5   :  { %v15907_v12 = vpop.permute.xlu0 %2438  ;;  %20691 = vst [vmem:[#allocation246_spill] sm:$0xff] %v15910_v32  ;;  %v15930_v32 = vpack.c.bf16 %v8900_v20, %v8899_v16  ;;  %20695 = vst [vmem:[#allocation250_spill] sm:$0xff] %v15933_v3  ;;  %14137 = vmatprep.subr.bf16.mxu1 %v14136_v5  ;;  %2518 = vperm.xlu0 %14469, %v15933_v3   ;;  %v3394_v16 = vld [vmem:[#allocation2 + $0xc8] sm:$0xff]  ;;  %v3396_v20 = vld [vmem:[#allocation2 + $0xe0] sm:$0xff] }
 0x2c6   :  { %20690 = vst [vmem:[#allocation245_spill] sm:$0xff] %v15907_v12  ;;  %4020 = vperm.xlu1 %14470, %v15699_v28   ;;  %v8479_v12 = vld [vmem:[#allocation3 + $0x1] sm:$0xff]  ;;  %14139 = vmatpush3.bf16.msra.mxu1 %v14136_v5  ;;  %v20709_v3 = vld [vmem:[#allocation14_spill] sm:$0xff] }
 0x2c7   :  { %v15928_v28 = vpop.permute.xlu1 %2483  ;;  %20694 = vst [vmem:[#allocation249_spill] sm:$0xff] %v15930_v32  ;;  %14145 = vmatprep.subr.bf16.mxu0 %v15930_v32  ;;  %13727 = vmatprep.mubr.msk.f32.mxu1 %vm7627_vm2, %v8479_v12  ;;  %v20716_v57 = vld [vmem:[#allocation53_spill] sm:$0xff] }
 0x2c8   :  { %20693 = vst [vmem:[#allocation248_spill] sm:$0xff] %v15928_v28  ;;  %14147 = vmatpush3.bf16.msra.mxu0 %v15930_v32 }
 0x2c9   :  { %v15919_v61 = vpop.permute.xlu0 %2473  ;;  %3513 = vperm.xlu0 %14469, %v3394_v16   ;;  %v3403_v16 = vld [vmem:[#allocation2 + $0x138] sm:$0xff] }
 0x2ca   :  { %20692 = vst [vmem:[#allocation247_spill] sm:$0xff] %v15919_v61  ;;  %4055 = vperm.xlu1 %14470, %v15709_v52   ;;  %v12906_v52 = vld [vmem:[%s20368_s1] ss:$0 sm:$0xff] }
 0x2cb   :  { %v15941_v53 = vpop.permute.xlu1 %3478  ;;  %v669_v12 = vmul.f32 %v12906_v52, %v15107_v2  ;;  %v670_v60 = vmul.f32 %v12906_v52, %v15111_v7  ;;  %v671_v28 = vmul.f32 %v12906_v52, %v15113_v10  ;;  %v673_v63 = vmul.f32 %v12906_v52, %v15117_v14 }
 0x2cc   :  { %20697 = vst [vmem:[#allocation252_spill] sm:$0xff] %v15941_v53  ;;  %v668_v53 = vmul.f32 %v12906_v52, %v15109_v6  ;;  %v15964_v2 = vmul.f32 %v12906_v52, %v15125_v22  ;;  %v15967_v6 = vmul.f32 %v12906_v52, %v15127_v23  ;;  %v15970_v7 = vmul.f32 %v12906_v52, %v15129_v26 }
 0x2cd   :  { %v15936_v61 = vpop.permute.xlu0 %3468  ;;  %v15978_v14 = vmul.f32 %v12906_v52, %v15133_v30  ;;  %3548 = vperm.xlu0 %14469, %v3401_v24   ;;  %v15994_v23 = vmul.f32 %v12906_v52, %v15139_v35  ;;  %v15997_v26 = vmul.f32 %v12906_v52, %v15141_v38  ;;  %v16003_v30 = vmul.f32 %v12906_v52, %v15145_v42 }
 0x2ce   :  { %20696 = vst [vmem:[#allocation251_spill] sm:$0xff] %v15936_v61  ;;  %2528 = vperm.xlu1 %14470, %v2369_v29   ;;  %v667_v61 = vmul.f32 %v12906_v52, %v15105_v1  ;;  %v672_v29 = vmul.f32 %v12906_v52, %v15115_v11  ;;  %v675_v1 = vmul.f32 %v12906_v52, %v15121_v18 }
 0x2cf   :  { %v15950_v32 = vpop.permute.xlu1 %2468  ;;  %v15975_v11 = vmul.f32 %v12906_v52, %v15131_v27  ;;  %v15984_v18 = vmul.f32 %v12906_v52, %v15137_v34  ;;  %v16000_v27 = vmul.f32 %v12906_v52, %v15143_v39  ;;  %v16009_v34 = vmul.f32 %v12906_v52, %v15149_v46 }
 0x2d0   :  { %20699 = vst [vmem:[#allocation254_spill] sm:$0xff] %v15950_v32  ;;  %v15961_v32 = vmul.f32 %v12906_v52, %v15123_v19  ;;  %v15989_v19 = vld [vmem:[%s20368_s1 + $0x1] ss:$0 sm:$0xff]  ;;  %v16012_v24 = vmul.f32 %v12906_v52, %v15151_v47  ;;  %v16015_v35 = vmul.f32 %v12906_v52, %v15153_v50  ;;  %v16018_v38 = vmul.f32 %v12906_v52, %v15155_v51 }
 0x2d1   :  { %v15947_v5 = vpop.permute.xlu0 %2458  ;;  %v16021_v39 = vmul.f32 %v12906_v52, %v15157_v54  ;;  %v1184_v42 = vmul.f32 %v15989_v19, %v15233_v41  ;;  %v1188_v54 = vmul.f32 %v15989_v19, %v20707_v45  ;;  %4507 = vperm.xlu0 %14469, %v15643_v55   ;;  %v20714_v55 = vld [vmem:[#allocation17_spill] sm:$0xff] }
 0x2d2   :  { %20698 = vst [vmem:[#allocation253_spill] sm:$0xff] %v15947_v5  ;;  %3523 = vperm.xlu1 %14470, %v3396_v20   ;;  %v674_v5 = vmul.f32 %v12906_v52, %v15119_v15  ;;  %v15981_v15 = vmul.f32 %v12906_v52, %v15135_v31  ;;  %v16006_v31 = vmul.f32 %v12906_v52, %v15147_v43  ;;  %v20702_v43 = vld [vmem:[#allocation46_spill] sm:$0xff] }
 0x2d3   :  { %v15991_v22 = vpop.permute.xlu1 %2503  ;;  %v1185_v20 = vmul.f32 %v15989_v19, %v20702_v43  ;;  %v16042_v43 = vmul.f32 %v12906_v52, %v20709_v3  ;;  %v16056_v49 = vmul.f32 %v12906_v52, %v20714_v55  ;;  %v16062_v8 = vadd.f32 %v1184_v42, %v667_v61  ;;  %v20722_v42 = vld [vmem:[#allocation57_spill] sm:$0xff] }
 0x2d4   :  { %20701 = vst [vmem:[#allocation256_spill] sm:$0xff] %v15991_v22  ;;  %v20705_v22 = vld [vmem:[#allocation47_spill] sm:$0xff]  ;;  %v1195_v61 = vmul.f32 %v15989_v19, %v20720_v58 }
 0x2d5   :  { %v15972_v10 = vpop.permute.xlu0 %2493  ;;  %v1186_v50 = vmul.f32 %v15989_v19, %v20705_v22  ;;  %v20712_v22 = vld [vmem:[#allocation51_spill] sm:$0xff]  ;;  %4542 = vperm.xlu0 %14469, %v15653_v21  }
 0x2d6   :  { %20700 = vst [vmem:[#allocation255_spill] sm:$0xff] %v15972_v10  ;;  %3558 = vperm.xlu1 %14470, %v3403_v16   ;;  %v20704_v16 = vld [vmem:[#allocation9_spill] sm:$0xff]  ;;  %v20706_v10 = vld [vmem:[#allocation48_spill] sm:$0xff]  ;;  %v1190_v33 = vmul.f32 %v15989_v19, %v20712_v22  ;;  %v1193_v22 = vmul.f32 %v15989_v19, %v20717_v62  ;;  %v20725_v21 = vld [vmem:[#allocation59_spill] sm:$0xff] }
 0x2d7   :  { %v16030_v47 = vmul.f32 %v12906_v52, %v20704_v16  ;;  %v1187_v51 = vmul.f32 %v15989_v19, %v20706_v10  ;;  %v16039_v41 = vpop.permute.xlu1 %3463  ;;  %v20711_v16 = vld [vmem:[#allocation50_spill] sm:$0xff]  ;;  %v20713_v10 = vld [vmem:[#allocation16_spill] sm:$0xff] }
 0x2d8   :  { %20708 = vst [vmem:[#allocation9_spill] sm:$0xff] %v16039_v41  ;;  %v1189_v48 = vmul.f32 %v15989_v19, %v20711_v16  ;;  %v16053_v45 = vmul.f32 %v12906_v52, %v20713_v10  ;;  %v20715_v41 = vld [vmem:[#allocation52_spill] sm:$0xff]  ;;  %v16064_v16 = vadd.f32 %v1185_v20, %v668_v53  ;;  %v16085_v62 = vadd.f32 %v1190_v33, %v673_v63 }
 0x2d9   :  { %v16027_v46 = vpop.permute.xlu0 %3453  ;;  %v1191_v3 = vmul.f32 %v15989_v19, %v20715_v41  ;;  %v16074_v55 = vadd.f32 %v1187_v51, %v670_v60  ;;  %v16076_v41 = vadd.f32 %v1188_v54, %v671_v28  ;;  %v1196_v20 = vmul.f32 %v15989_v19, %v20722_v42  ;;  %v16092_v28 = vld [vmem:[#allocation2 + $0x141] sm:$0xff]  ;;  %v16102_v63 = vld [vmem:[#allocation2 + $0x159] sm:$0xff] }
 0x2da   :  { %20703 = vst [vmem:[#allocation46_spill] sm:$0xff] %v16027_v46  ;;  %v20710_v46 = vld [vmem:[#allocation15_spill] sm:$0xff]  ;;  %4517 = vperm.xlu1 %14470, %v15667_v56   ;;  %v16083_v53 = vadd.f32 %v1189_v48, %v672_v29  ;;  %20724 = vst [vmem:[#allocation49_spill] sm:$0xff] %v16092_v28  ;;  %v1198_v48 = vmul.f32 %v15989_v19, %v20725_v21  ;;  %v20726_v29 = vld [vmem:[#allocation60_spill] sm:$0xff]  ;;  %v16105_v51 = vadd.f32 %v1193_v22, %v15961_v32 }
 0x2db   :  { %v16045_v59 = vmul.f32 %v12906_v52, %v20710_v46  ;;  %v1192_v46 = vmul.f32 %v15989_v19, %v20716_v57  ;;  %v20718_v56 = vld [vmem:[#allocation55_spill] sm:$0xff]  ;;  %v16072_v52 = vadd.f32 %v1186_v50, %v669_v12  ;;  %v16081_v57 = vpop.permute.xlu1 %3498  ;;  %v20723_v12 = vld [vmem:[#allocation58_spill] sm:$0xff]  ;;  %v16094_v50 = vadd.f32 %v1191_v3, %v674_v5  ;;  %20727 = vst [vmem:[#allocation14_spill] sm:$0xff] %v16102_v63  ;;  %v20731_v21 = vld [vmem:[#allocation64_spill] sm:$0xff] }
 0x2dc   :  { %v1194_v10 = vmul.f32 %v15989_v19, %v20718_v56  ;;  %20721 = vst [vmem:[#allocation48_spill] sm:$0xff] %v16081_v57  ;;  %v1197_v60 = vmul.f32 %v15989_v19, %v20723_v12  ;;  %v1199_v33 = vmul.f32 %v15989_v19, %v20726_v29  ;;  %v20729_v3 = vld [vmem:[#allocation62_spill] sm:$0xff]  ;;  %v16117_v56 = vadd.f32 %v1195_v61, %v15967_v6  ;;  %v20730_v42 = vld [vmem:[#allocation63_spill] sm:$0xff]  ;;  %v20732_v22 = vld [vmem:[#allocation65_spill] sm:$0xff] }
 0x2dd   :  { %v16070_v0 = vpop.permute.xlu0 %3488  ;;  %v16096_v58 = vadd.f32 %v1192_v46, %v675_v1  ;;  %v1201_v1 = vmul.f32 %v15989_v19, %v20729_v3  ;;  %v1202_v12 = vmul.f32 %v15989_v19, %v20730_v42  ;;  %v1203_v32 = vmul.f32 %v15989_v19, %v20731_v21  ;;  %2538 = vperm.xlu0 %14469, %v16092_v28   ;;  %v20733_v6 = vld [vmem:[#allocation66_spill] sm:$0xff]  ;;  %v20734_v3 = vld [vmem:[#allocation67_spill] sm:$0xff]  ;;  %v16149_v57 = vld [vmem:[#allocation2 + $0x1e1] sm:$0xff] }
 0x2de   :  { %20719 = vst [vmem:[#allocation47_spill] sm:$0xff] %v16070_v0  ;;  %4552 = vperm.xlu1 %14470, %v15677_v37   ;;  %v16108_v54 = vadd.f32 %v1194_v10, %v15964_v2  ;;  %v20728_v37 = vld [vmem:[#allocation61_spill] sm:$0xff]  ;;  %v1204_v2 = vmul.f32 %v15989_v19, %v20732_v22  ;;  %v16129_v29 = vadd.f32 %v1196_v20, %v15970_v7  ;;  %v20735_v7 = vld [vmem:[#allocation68_spill] sm:$0xff]  ;;  %20737 = vst [vmem:[#allocation15_spill] sm:$0xff] %v16149_v57 }
 0x2df   :  { %v1200_v5 = vmul.f32 %v15989_v19, %v20728_v37  ;;  %v16126_v10 = vpop.permute.xlu1 %4492  ;;  %v16132_v37 = vadd.f32 %v1197_v60, %v15975_v11  ;;  %v1205_v61 = vmul.f32 %v15989_v19, %v20733_v6  ;;  %v1206_v42 = vmul.f32 %v15989_v19, %v20734_v3  ;;  %v2378_v21 = vld [vmem:[#allocation2 + $0x1c9] sm:$0xff] }
 0x2e0   :  { %v16140_v22 = vadd.f32 %v1198_v48, %v15978_v14  ;;  %v16143_v28 = vadd.f32 %v1199_v33, %v15981_v15  ;;  %v1207_v20 = vmul.f32 %v15989_v19, %v20735_v7  ;;  %v20736_v11 = vld [vmem:[#allocation69_spill] sm:$0xff]  ;;  %v16155_v3 = vadd.f32 %v1201_v1, %v15994_v23  ;;  %v20739_v48 = vld [vmem:[#allocation71_spill] sm:$0xff] }
 0x2e1   :  { %v16114_v46 = vpop.permute.xlu0 %4482  ;;  %v1208_v60 = vmul.f32 %v15989_v19, %v20736_v11  ;;  %v16152_v6 = vadd.f32 %v1200_v5, %v15984_v18  ;;  %v1210_v15 = vmul.f32 %v15989_v19, %v20739_v48  ;;  %v16164_v7 = vadd.f32 %v1202_v12, %v15997_v26  ;;  %v20741_v5 = vld [vmem:[#allocation72_spill] sm:$0xff]  ;;  %2573 = vperm.xlu0 %14469, %v2378_v21   ;;  %v20743_v12 = vld [vmem:[#allocation77_spill] sm:$0xff] }
 0x2e2   :  { %2548 = vperm.xlu1 %14470, %v16102_v63   ;;  %v20738_v63 = vld [vmem:[#allocation70_spill] sm:$0xff]  ;;  %v16167_v11 = vadd.f32 %v1203_v32, %v16000_v27  ;;  %v16170_v18 = vadd.f32 %v1204_v2, %v16003_v30  ;;  %v1211_v23 = vmul.f32 %v15989_v19, %v20741_v5  ;;  %v16182_v26 = vadd.f32 %v1205_v61, %v16006_v31  ;;  %v3398_v48 = vld [vmem:[#allocation2 + $0xf8] sm:$0xff] }
 0x2e3   :  { %v1209_v14 = vmul.f32 %v15989_v19, %v20738_v63  ;;  %v16177_v63 = vld [vmem:[%s20368_s1 + $0x2] ss:$0 sm:$0xff]  ;;  %v16179_v1 = vpop.permute.xlu1 %2965  ;;  %v16185_v27 = vadd.f32 %v1206_v42, %v16009_v34  ;;  %v1216_v30 = vmul.f32 %v15989_v19, %v20743_v12  ;;  %v20744_v32 = vld [vmem:[#allocation78_spill] sm:$0xff]  ;;  %v16193_v5 = vadd.f32 %v1207_v20, %v16012_v24  ;;  %v20745_v31 = vld [vmem:[#allocation79_spill] sm:$0xff] }
 0x2e4   :  { %20742 = vst [vmem:[#allocation51_spill] sm:$0xff] %v16179_v1  ;;  %v1217_v2 = vmul.f32 %v15989_v19, %v20744_v32  ;;  %v16196_v21 = vadd.f32 %v1208_v60, %v16015_v35  ;;  %v1218_v61 = vmul.f32 %v15989_v19, %v20745_v31  ;;  %v20746_v34 = vld [vmem:[#allocation80_spill] sm:$0xff]  ;;  %v3400_v1 = vld [vmem:[#allocation2 + $0x110] sm:$0xff]  ;;  %v16206_v32 = vadd.f32 %v1210_v15, %v16021_v39 }
 0x2e5   :  { %v16161_v33 = vpop.permute.xlu0 %2955  ;;  %v1219_v42 = vmul.f32 %v15989_v19, %v20746_v34  ;;  %v16203_v12 = vadd.f32 %v1209_v14, %v16018_v38  ;;  %v20748_v20 = vld [vmem:[#allocation110_spill] sm:$0xff]  ;;  %v16215_v31 = vadd.f32 %v1211_v23, %v16030_v47  ;;  %v20751_v34 = vld [vmem:[#allocation112_spill] sm:$0xff]  ;;  %v20752_v14 = vld [vmem:[#allocation113_spill] sm:$0xff]  ;;  %3533 = vperm.xlu0 %14469, %v3398_v48  }
 0x2e6   :  { %20740 = vst [vmem:[#allocation50_spill] sm:$0xff] %v16161_v33  ;;  %2583 = vperm.xlu1 %14470, %v16149_v57   ;;  %v20747_v57 = vld [vmem:[#allocation109_spill] sm:$0xff]  ;;  %v1702_v35 = vmul.f32 %v16177_v63, %v20748_v20  ;;  %v20750_v33 = vld [vmem:[#allocation111_spill] sm:$0xff]  ;;  %v1704_v38 = vmul.f32 %v16177_v63, %v20751_v34  ;;  %v1705_v39 = vmul.f32 %v16177_v63, %v20752_v14  ;;  %v20754_v47 = vld [vmem:[#allocation114_spill] sm:$0xff] }
 0x2e7   :  { %v1701_v24 = vmul.f32 %v16177_v63, %v20747_v57  ;;  %v1703_v19 = vmul.f32 %v16177_v63, %v20750_v33  ;;  %v16223_v15 = vpop.permute.xlu1 %3000  ;;  %v16226_v57 = vadd.f32 %v1216_v30, %v16042_v43  ;;  %v16229_v20 = vadd.f32 %v1217_v2, %v16045_v59  ;;  %v3405_v34 = vld [vmem:[#allocation2 + $0x150] sm:$0xff]  ;;  %v20756_v14 = vld [vmem:[#allocation116_spill] sm:$0xff]  ;;  %v20757_v30 = vld [vmem:[#allocation117_spill] sm:$0xff] }
 0x2e8   :  { %20753 = vst [vmem:[#allocation17_spill] sm:$0xff] %v16223_v15  ;;  %v1706_v23 = vmul.f32 %v16177_v63, %v20754_v47  ;;  %v16236_v0 = vadd.f32 %v1218_v61, %v16053_v45  ;;  %v16239_v48 = vadd.f32 %v1219_v42, %v16056_v49  ;;  %v1708_v43 = vmul.f32 %v16177_v63, %v20756_v14  ;;  %v3407_v2 = vld [vmem:[#allocation2 + $0x168] sm:$0xff]  ;;  %v20759_v61 = vld [vmem:[#allocation119_spill] sm:$0xff] }
 0x2e9   :  { %v16212_v60 = vpop.permute.xlu0 %2990  ;;  %v1709_v59 = vmul.f32 %v16177_v63, %v20757_v30  ;;  %v16246_v47 = vadd.f32 %v1701_v24, %v16062_v8  ;;  %v1711_v49 = vmul.f32 %v16177_v63, %v20759_v61  ;;  %v16258_v14 = vadd.f32 %v1703_v19, %v16072_v52  ;;  %v20761_v24 = vld [vmem:[#allocation120_spill] sm:$0xff]  ;;  %3568 = vperm.xlu0 %14469, %v3405_v34   ;;  %v20763_v52 = vld [vmem:[#allocation121_spill] sm:$0xff]  ;;  %v20765_v34 = vld [vmem:[#allocation123_spill] sm:$0xff] }
 0x2ea   :  { %20749 = vst [vmem:[#allocation16_spill] sm:$0xff] %v16212_v60  ;;  %v20755_v60 = vld [vmem:[#allocation115_spill] sm:$0xff]  ;;  %3543 = vperm.xlu1 %14470, %v3400_v1   ;;  %v20758_v1 = vld [vmem:[#allocation118_spill] sm:$0xff]  ;;  %v16261_v30 = vadd.f32 %v1704_v38, %v16074_v55  ;;  %v16264_v8 = vadd.f32 %v1705_v39, %v16076_v41  ;;  %v1713_v19 = vmul.f32 %v16177_v63, %v20763_v52  ;;  %v20767_v52 = vld [vmem:[#allocation125_spill] sm:$0xff] }
 0x2eb   :  { %v1707_v33 = vmul.f32 %v16177_v63, %v20755_v60  ;;  %v16249_v60 = vadd.f32 %v1702_v35, %v16064_v16  ;;  %v1710_v45 = vmul.f32 %v16177_v63, %v20758_v1  ;;  %v1712_v16 = vmul.f32 %v16177_v63, %v20761_v24  ;;  %v16268_v35 = vpop.permute.xlu1 %3995  ;;  %v20764_v55 = vld [vmem:[#allocation122_spill] sm:$0xff] }
 0x2ec   :  { %20762 = vst [vmem:[#allocation53_spill] sm:$0xff] %v16268_v35  ;;  %v16271_v1 = vadd.f32 %v1706_v23, %v16083_v53  ;;  %v1714_v38 = vmul.f32 %v16177_v63, %v20764_v55  ;;  %v16281_v41 = vadd.f32 %v1708_v43, %v16094_v50  ;;  %v16284_v39 = vadd.f32 %v1709_v59, %v16096_v58  ;;  %v20766_v23 = vld [vmem:[#allocation124_spill] sm:$0xff]  ;;  %v20768_v50 = vld [vmem:[#allocation126_spill] sm:$0xff]  ;;  %v20770_v55 = vld [vmem:[#allocation127_spill] sm:$0xff] }
 0x2ed   :  { %v16255_v42 = vpop.permute.xlu0 %3985  ;;  %v16274_v61 = vadd.f32 %v1707_v33, %v16085_v62  ;;  %v1715_v53 = vmul.f32 %v16177_v63, %v20765_v34  ;;  %v1716_v62 = vmul.f32 %v16177_v63, %v20766_v23  ;;  %v16291_v33 = vadd.f32 %v1710_v45, %v16105_v51  ;;  %v20771_v23 = vld [vmem:[#allocation128_spill] sm:$0xff]  ;;  %v20772_v45 = vld [vmem:[#allocation129_spill] sm:$0xff]  ;;  %4527 = vperm.xlu0 %14469, %v15669_v44  }
 0x2ee   :  { %20760 = vst [vmem:[#allocation52_spill] sm:$0xff] %v16255_v42  ;;  %3578 = vperm.xlu1 %14470, %v3407_v2   ;;  %v16294_v24 = vadd.f32 %v1711_v49, %v16108_v54  ;;  %v1717_v2 = vmul.f32 %v16177_v63, %v20767_v52  ;;  %v1718_v43 = vmul.f32 %v16177_v63, %v20768_v50  ;;  %v20822_v35 = vld [vmem:[#allocation189_spill] sm:$0xff] }
 0x2ef   :  { %v16303_v59 = vadd.f32 %v1712_v16, %v16117_v56  ;;  %v1719_v34 = vmul.f32 %v16177_v63, %v20770_v55  ;;  %v1720_v51 = vmul.f32 %v16177_v63, %v20771_v23  ;;  %v1721_v54 = vmul.f32 %v16177_v63, %v20772_v45  ;;  %v16312_v49 = vpop.permute.xlu1 %2985  ;;  %v20774_v56 = vld [vmem:[#allocation130_spill] sm:$0xff]  ;;  %v20775_v55 = vld [vmem:[#allocation131_spill] sm:$0xff]  ;;  %v20776_v45 = vld [vmem:[#allocation132_spill] sm:$0xff] }
 0x2f0   :  { %20773 = vst [vmem:[#allocation55_spill] sm:$0xff] %v16312_v49  ;;  %v16315_v52 = vadd.f32 %v1713_v19, %v16129_v29  ;;  %v16318_v50 = vadd.f32 %v1714_v38, %v16132_v37  ;;  %v1722_v16 = vmul.f32 %v16177_v63, %v20774_v56  ;;  %v16326_v23 = vadd.f32 %v1715_v53, %v16140_v22  ;;  %v20777_v19 = vld [vmem:[#allocation133_spill] sm:$0xff]  ;;  %v20779_v22 = vld [vmem:[#allocation135_spill] sm:$0xff]  ;;  %v20793_v49 = vld [vmem:[#allocation176_spill] sm:$0xff] }
 0x2f1   :  { %v16300_v58 = vpop.permute.xlu0 %2975  ;;  %v16329_v44 = vadd.f32 %v1716_v62, %v16143_v28  ;;  %v1724_v29 = vmul.f32 %v16177_v63, %v20776_v45  ;;  %v1725_v37 = vmul.f32 %v16177_v63, %v20777_v19  ;;  %v16336_v38 = vadd.f32 %v1717_v2, %v16152_v6  ;;  %v20781_v2 = vld [vmem:[#allocation136_spill] sm:$0xff]  ;;  %v20782_v19 = vld [vmem:[#allocation199_spill] sm:$0xff] }
 0x2f2   :  { %20769 = vst [vmem:[#allocation54_spill] sm:$0xff] %v16300_v58  ;;  %v1723_v58 = vmul.f32 %v16177_v63, %v20775_v55  ;;  %4537 = vperm.xlu1 %14470, %v15781_v25   ;;  %v16339_v56 = vadd.f32 %v1718_v43, %v16155_v3  ;;  %v20778_v55 = vld [vmem:[#allocation134_spill] sm:$0xff]  ;;  %v1727_v53 = vmul.f32 %v16177_v63, %v20779_v22  ;;  %v16361_v43 = vld [vmem:[%s20368_s1 + $0x3] ss:$0 sm:$0xff] }
 0x2f3   :  { %v1726_v25 = vmul.f32 %v16177_v63, %v20778_v55  ;;  %v16348_v62 = vadd.f32 %v1719_v34, %v16164_v7  ;;  %v16351_v45 = vadd.f32 %v1720_v51, %v16167_v11  ;;  %v16354_v6 = vadd.f32 %v1721_v54, %v16170_v18  ;;  %4562 = vperm.xlu0 %14469, %v20782_v19   ;;  %v16364_v55 = vpop.permute.xlu1 %3020  ;;  %v20784_v18 = vld [vmem:[#allocation141_spill] sm:$0xff]  ;;  %v20785_v51 = vld [vmem:[#allocation142_spill] sm:$0xff] }
 0x2f4   :  { %v1728_v3 = vmul.f32 %v16177_v63, %v20781_v2  ;;  %20783 = vst [vmem:[#allocation57_spill] sm:$0xff] %v16364_v55  ;;  %v16367_v7 = vadd.f32 %v1722_v16, %v16182_v26  ;;  %v16370_v11 = vadd.f32 %v1723_v58, %v16185_v27  ;;  %v1733_v34 = vmul.f32 %v16177_v63, %v20784_v18  ;;  %v16377_v22 = vld [vmem:[#allocation2 + $0x112] sm:$0xff]  ;;  %v20788_v58 = vld [vmem:[#allocation144_spill] sm:$0xff] }
 0x2f5   :  { %v16345_v28 = vpop.permute.xlu0 %3010  ;;  %v1734_v54 = vmul.f32 %v16177_v63, %v20785_v51  ;;  %20786 = vst [vmem:[#allocation58_spill] sm:$0xff] %v16377_v22  ;;  %v16380_v2 = vadd.f32 %v1724_v29, %v16193_v5  ;;  %v16383_v19 = vadd.f32 %v1725_v37, %v16196_v21  ;;  %v20787_v26 = vld [vmem:[#allocation143_spill] sm:$0xff]  ;;  %v1736_v16 = vmul.f32 %v16177_v63, %v20788_v58  ;;  %v16392_v18 = vld [vmem:[%s20368_s1 + $0x4] ss:$0 sm:$0xff]  ;;  %v20790_v21 = vld [vmem:[#allocation173_spill] sm:$0xff] }
 0x2f6   :  { %20780 = vst [vmem:[#allocation56_spill] sm:$0xff] %v16345_v28  ;;  %4572 = vperm.xlu1 %14470, %v15791_v9   ;;  %v1735_v27 = vmul.f32 %v16177_v63, %v20787_v26  ;;  %v16394_v9 = vld [vmem:[#allocation2 + $0x12a] sm:$0xff]  ;;  %v16397_v51 = vadd.f32 %v1726_v25, %v16203_v12  ;;  %v16400_v5 = vadd.f32 %v1727_v53, %v16206_v32  ;;  %v20791_v37 = vld [vmem:[#allocation175_spill] sm:$0xff]  ;;  %v16420_v53 = vld [vmem:[%s20368_s1 + $0x5] ss:$0 sm:$0xff] }
 0x2f7   :  { %20789 = vst [vmem:[#allocation59_spill] sm:$0xff] %v16394_v9  ;;  %v2218_v29 = vmul.f32 %v16361_v43, %v20790_v21  ;;  %v2220_v26 = vmul.f32 %v16361_v43, %v20791_v37  ;;  %v16409_v58 = vadd.f32 %v1728_v3, %v16215_v31  ;;  %v20792_v55 = vld [vmem:[#allocation174_spill] sm:$0xff]  ;;  %v2221_v12 = vmul.f32 %v16361_v43, %v20793_v49  ;;  %v20794_v25 = vld [vmem:[#allocation177_spill] sm:$0xff]  ;;  %v16423_v21 = vpop.permute.xlu1 %3980 }
 0x2f8   :  { %v2219_v28 = vmul.f32 %v16361_v43, %v20792_v55  ;;  %v2222_v32 = vmul.f32 %v16361_v43, %v20794_v25  ;;  %3035 = vperm.xlu0 %14469, %v16377_v22   ;;  %20795 = vst [vmem:[#allocation60_spill] sm:$0xff] %v16423_v21  ;;  %v16426_v31 = vadd.f32 %v1733_v34, %v16226_v57  ;;  %v20796_v22 = vld [vmem:[#allocation178_spill] sm:$0xff]  ;;  %v20797_v34 = vld [vmem:[#allocation179_spill] sm:$0xff] }
 0x2f9   :  { %v16406_v63 = vpop.permute.xlu0 %3970  ;;  %v16429_v3 = vadd.f32 %v1734_v54, %v16229_v20  ;;  %v2735_v49 = vmul.f32 %v16392_v18, %v15757_v40  ;;  %v2737_v55 = vmul.f32 %v16392_v18, %v15760_v36  ;;  %v16437_v37 = vadd.f32 %v1735_v27, %v16236_v0  ;;  %v16449_v40 = vld [vmem:[%s20368_s1 + $0x6] ss:$0 sm:$0xff]  ;;  %v20823_v21 = vld [vmem:[#allocation190_spill] sm:$0xff] }
 0x2fa   :  { %3045 = vperm.xlu1 %14470, %v16394_v9   ;;  %v16440_v25 = vadd.f32 %v1736_v16, %v16239_v48  ;;  %v2223_v57 = vmul.f32 %v16361_v43, %v20796_v22  ;;  %v2224_v20 = vmul.f32 %v16361_v43, %v20797_v34  ;;  %v2282_v36 = vadd.f32 %v2218_v29, %v16246_v47  ;;  %v20799_v47 = vld [vmem:[#allocation180_spill] sm:$0xff]  ;;  %v20802_v29 = vld [vmem:[#allocation233_spill] sm:$0xff] }
 0x2fb   :  { %v2284_v54 = vadd.f32 %v2220_v26, %v16258_v14  ;;  %v3252_v0 = vmul.f32 %v16420_v53, %v15763_v17  ;;  %v3254_v48 = vmul.f32 %v16420_v53, %v15766_v4  ;;  %v16460_v22 = vadd.f32 %v2219_v28, %v16249_v60  ;;  %v16473_v17 = vld [vmem:[%s20368_s1 + $0x7] ss:$0 sm:$0xff]  ;;  %v16476_v4 = vpop.permute.xlu1 %4015  ;;  %v20803_v26 = vld [vmem:[#allocation234_spill] sm:$0xff] }
 0x2fc   :  { %v16463_v16 = vadd.f32 %v2221_v12, %v16261_v30  ;;  %v16466_v34 = vadd.f32 %v2222_v32, %v16264_v8  ;;  %v2225_v14 = vmul.f32 %v16361_v43, %v20799_v47  ;;  %20800 = vst [vmem:[#allocation62_spill] sm:$0xff] %v16473_v17  ;;  %4030 = vperm.xlu0 %14469, %v15701_v13   ;;  %20801 = vst [vmem:[#allocation63_spill] sm:$0xff] %v16476_v4  ;;  %v20804_v12 = vld [vmem:[#allocation217_spill] sm:$0xff] }
 0x2fd   :  { %v16457_v27 = vpop.permute.xlu0 %4005  ;;  %v2799_v60 = vadd.f32 %v2735_v49, %v2282_v36  ;;  %v2801_v28 = vadd.f32 %v2737_v55, %v2284_v54  ;;  %v3770_v30 = vmul.f32 %v16449_v40, %v20802_v29  ;;  %v3772_v8 = vmul.f32 %v16449_v40, %v20803_v26  ;;  %v20805_v9 = vld [vmem:[#allocation181_spill] sm:$0xff]  ;;  %v20807_v54 = vld [vmem:[#allocation243_spill] sm:$0xff]  ;;  %v20808_v26 = vld [vmem:[#allocation244_spill] sm:$0xff] }
 0x2fe   :  { %20798 = vst [vmem:[#allocation61_spill] sm:$0xff] %v16457_v27  ;;  %4040 = vperm.xlu1 %14470, %v20804_v12   ;;  %v16484_v32 = vadd.f32 %v2223_v57, %v16271_v1  ;;  %v16487_v47 = vadd.f32 %v2224_v20, %v16274_v61  ;;  %v2226_v13 = vmul.f32 %v16361_v43, %v20805_v9  ;;  %v16494_v49 = vld [vmem:[%s20368_s1 + $0x8] ss:$0 sm:$0xff]  ;;  %v20810_v20 = vld [vmem:[#allocation182_spill] sm:$0xff]  ;;  %v20811_v12 = vld [vmem:[#allocation183_spill] sm:$0xff]  ;;  %v5135_v27 = vlaneseq }
 0x2ff   :  { %20806 = vst [vmem:[#allocation64_spill] sm:$0xff] %v16494_v49  ;;  %v3316_v55 = vadd.f32 %v3252_v0, %v2799_v60  ;;  %v3318_v36 = vadd.f32 %v3254_v48, %v2801_v28  ;;  %v4287_v29 = vmul.f32 %v16473_v17, %v20807_v54  ;;  %v4289_v1 = vmul.f32 %v16473_v17, %v20808_v26  ;;  %v20812_v0 = vld [vmem:[#allocation208_spill] sm:$0xff]  ;;  %v16510_v48 = vpop.permute.xlu1 %2488 }
 0x300   :  { %v16503_v61 = vadd.f32 %v2225_v14, %v16281_v41  ;;  %v2227_v9 = vmul.f32 %v16361_v43, %v20810_v20  ;;  %v2228_v4 = vmul.f32 %v16361_v43, %v20811_v12  ;;  %4065 = vperm.xlu0 %14469, %v20812_v0   ;;  %20813 = vst [vmem:[#allocation66_spill] sm:$0xff] %v16510_v48  ;;  %v20814_v14 = vld [vmem:[#allocation221_spill] sm:$0xff]  ;;  %v20816_v12 = vld [vmem:[#allocation184_spill] sm:$0xff]  ;;  %v20820_v48 = vld [vmem:[#allocation187_spill] sm:$0xff] }
 0x301   :  { %v16500_v57 = vpop.permute.xlu0 %2478  ;;  %v3834_v60 = vadd.f32 %v3770_v30, %v3316_v55  ;;  %v3836_v28 = vadd.f32 %v3772_v8, %v3318_v36  ;;  %v4804_v54 = vmul.f32 %v16494_v49, %v16114_v46  ;;  %v4806_v41 = vmul.f32 %v16494_v49, %v16126_v10  ;;  %v16517_v26 = vld [vmem:[#allocation2 + $0x142] sm:$0xff]  ;;  %v16526_v36 = vld [vmem:[#allocation2 + $0x15a] sm:$0xff]  ;;  %v20819_v46 = vld [vmem:[#allocation186_spill] sm:$0xff] }
 0x302   :  { %20809 = vst [vmem:[#allocation65_spill] sm:$0xff] %v16500_v57  ;;  %4075 = vperm.xlu1 %14470, %v20814_v14   ;;  %20815 = vst [vmem:[#allocation67_spill] sm:$0xff] %v16517_v26  ;;  %v16520_v20 = vadd.f32 %v2226_v13, %v16284_v39  ;;  %v2229_v0 = vmul.f32 %v16361_v43, %v20816_v12  ;;  %v20817_v57 = vld [vmem:[#allocation185_spill] sm:$0xff]  ;;  %v14578_v8 = vmov 1983009808   ;;  %v2231_v10 = vmul.f32 %v16361_v43, %v20819_v46  ;;  %v20821_v12 = vld [vmem:[#allocation188_spill] sm:$0xff] }
 0x303   :  { %v2230_v30 = vmul.f32 %v16361_v43, %v20817_v57  ;;  %v5133_v55 = vunpack.c.l.s4 %v14578_v8  ;;  %20818 = vst [vmem:[#allocation68_spill] sm:$0xff] %v16526_v36  ;;  %v2232_v14 = vmul.f32 %v16361_v43, %v20820_v48  ;;  %v4351_v15 = vadd.f32 %v4287_v29, %v3834_v60  ;;  %v16544_v46 = vpop.permute.xlu1 %2523  ;;  %v20824_v60 = vld [vmem:[#allocation191_spill] sm:$0xff] }
 0x304   :  { %v4353_v49 = vadd.f32 %v4289_v1, %v3836_v28  ;;  %v16535_v13 = vadd.f32 %v2227_v9, %v16291_v33  ;;  %v2233_v57 = vmul.f32 %v16361_v43, %v20821_v12  ;;  %v2234_v8 = vmul.f32 %v16361_v43, %v20822_v35  ;;  %3055 = vperm.xlu0 %14469, %v16517_v26   ;;  %v2895_v9 = vld [vmem:[#allocation2 + $0x1ca] sm:$0xff]  ;;  %v20825_v35 = vld [vmem:[#allocation192_spill] sm:$0xff] }
 0x305   :  { %v16532_v39 = vpop.permute.xlu0 %2513  ;;  %v2235_v42 = vmul.f32 %v16361_v43, %v20823_v21  ;;  %v16547_v29 = vadd.f32 %v2228_v4, %v16294_v24  ;;  %v5136_v1 = vshrl.u32 %v5135_v27, 7  ;;  %v4868_v48 = vadd.f32 %v4804_v54, %v4351_v15  ;;  %v20826_v21 = vld [vmem:[#allocation193_spill] sm:$0xff]  ;;  %v16559_v24 = vld [vmem:[%s20369_s2] ss:$0 sm:$0xff] }
 0x306   :  { %v4870_v33 = vadd.f32 %v4806_v41, %v4353_v49  ;;  %3065 = vperm.xlu1 %14470, %v16526_v36   ;;  %v2236_v28 = vmul.f32 %v16361_v43, %v20824_v60  ;;  %v2237_v12 = vmul.f32 %v16361_v43, %v20825_v35  ;;  %v2238_v26 = vmul.f32 %v16361_v43, %v20826_v21  ;;  %v16561_v15 = vld [vmem:[#allocation2 + $0x1e2] sm:$0xff] }
 0x307   :  { %v5134_v27 = vunpack.c.0.s8 %v5133_v55  ;;  %20827 = vst [vmem:[#allocation69_spill] sm:$0xff] %v16561_v15  ;;  %v16564_v4 = vadd.f32 %v2229_v0, %v16303_v59  ;;  %v16567_v49 = vadd.f32 %v2230_v30, %v16315_v52  ;;  %v16570_v54 = vadd.f32 %v2231_v10, %v16318_v50  ;;  %v20829_v0 = vld [vmem:[#allocation194_spill] sm:$0xff]  ;;  %v16588_v50 = vpop.permute.xlu1 %3483  ;;  %v20831_v30 = vld [vmem:[#allocation195_spill] sm:$0xff]  ;;  %v20832_v10 = vld [vmem:[#allocation196_spill] sm:$0xff] }
 0x308   :  { %v16573_v41 = vadd.f32 %v2232_v14, %v16326_v23  ;;  %v16578_v35 = vadd.f32 %v2233_v57, %v16329_v44  ;;  %v16581_v55 = vadd.f32 %v2234_v8, %v16336_v38  ;;  %v16584_v59 = vadd.f32 %v2235_v42, %v16339_v56  ;;  %3090 = vperm.xlu0 %14469, %v2895_v9   ;;  %v20835_v9 = vld [vmem:[#allocation197_spill] sm:$0xff] }
 0x309   :  { %v16575_v60 = vpop.permute.xlu0 %3473  ;;  %v2239_v52 = vmul.f32 %v16361_v43, %v20829_v0  ;;  %20830 = vst [vmem:[#allocation71_spill] sm:$0xff] %v16588_v50  ;;  %v2240_v23 = vmul.f32 %v16361_v43, %v20831_v30  ;;  %v2241_v14 = vmul.f32 %v16361_v43, %v20832_v10  ;;  %v4939_v44 = vadd.f32 %v16559_v24, %v4868_v48  ;;  %v20836_v0 = vld [vmem:[#allocation198_spill] sm:$0xff]  ;;  %v20838_v10 = vld [vmem:[#allocation201_spill] sm:$0xff] }
 0x30a   :  { %20828 = vst [vmem:[#allocation70_spill] sm:$0xff] %v16584_v59  ;;  %v4941_v38 = vadd.f32 %v16559_v24, %v4870_v33  ;;  %3100 = vperm.xlu1 %14470, %v16561_v15   ;;  %v16598_v42 = vadd.f32 %v2236_v28, %v16348_v62  ;;  %v16601_v56 = vadd.f32 %v2237_v12, %v16351_v45  ;;  %v20837_v33 = vld [vmem:[#allocation200_spill] sm:$0xff]  ;;  %v20842_v12 = vld [vmem:[#allocation207_spill] sm:$0xff]  ;;  %v20844_v15 = vld [vmem:[#allocation218_spill] sm:$0xff] }
 0x30b   :  { %v16604_v57 = vadd.f32 %v2238_v26, %v16354_v6  ;;  %v16606_v8 = vsub.s32 %v5134_v27, %v5136_v1  ;;  %v2242_v21 = vmul.f32 %v16361_v43, %v20835_v9  ;;  %v2243_v48 = vmul.f32 %v16361_v43, %v20836_v0  ;;  %v20841_v6 = vld [vmem:[#allocation206_spill] sm:$0xff]  ;;  %v20843_v9 = vld [vmem:[#allocation209_spill] sm:$0xff] }
 0x30c   :  { %20833 = vst [vmem:[#allocation72_spill] sm:$0xff] %v16601_v56  ;;  %v2244_v30 = vmul.f32 %v16361_v43, %v20837_v33  ;;  %v2245_v62 = vmul.f32 %v16361_v43, %v20838_v10  ;;  %v16619_v45 = vadd.f32 %v2239_v52, %v16367_v7  ;;  %v2250_v26 = vmul.f32 %v16361_v43, %v20841_v6  ;;  %v16628_v33 = vpop.permute.xlu1 %3518  ;;  %v20848_v6 = vld [vmem:[#allocation210_spill] sm:$0xff]  ;;  %v20849_v56 = vld [vmem:[#allocation225_spill] sm:$0xff] }
 0x30d   :  { %20834 = vst [vmem:[#allocation77_spill] sm:$0xff] %v16606_v8  ;;  %v16616_v28 = vpop.permute.xlu0 %3508  ;;  %v2251_v27 = vmul.f32 %v16361_v43, %v20842_v12  ;;  %v2252_v0 = vmul.f32 %v16361_v43, %v20843_v9  ;;  %4050 = vperm.xlu0 %14469, %v20844_v15   ;;  %20845 = vst [vmem:[#allocation80_spill] sm:$0xff] %v16628_v33  ;;  %v16631_v10 = vadd.f32 %v2240_v23, %v16370_v11  ;;  %v20850_v59 = vld [vmem:[#allocation226_spill] sm:$0xff] }
 0x30e   :  { %20839 = vst [vmem:[#allocation78_spill] sm:$0xff] %v16616_v28  ;;  %20840 = vst [vmem:[#allocation79_spill] sm:$0xff] %v16619_v45  ;;  %v16634_v36 = vadd.f32 %v2241_v14, %v16380_v2  ;;  %v5003_v7 = vmax.f32 %v4939_v44, 0.0  ;;  %v5005_v52 = vmax.f32 %v4941_v38, 0.0  ;;  %v20847_v45 = vld [vmem:[#allocation250_spill] sm:$0xff]  ;;  %v2253_v12 = vmul.f32 %v16361_v43, %v20848_v6  ;;  %v20860_v38 = vld [vmem:[#allocation227_spill] sm:$0xff] }
 0x30f   :  { %4060 = vperm.xlu1 %14470, %v20847_v45   ;;  %v2739_v9 = vmul.f32 %v16392_v18, %v20849_v56  ;;  %v2741_v15 = vmul.f32 %v16392_v18, %v20850_v59  ;;  %v16643_v33 = vsub.s32 0, %v5136_v1  ;;  %v16645_v11 = vld [vmem:[#allocation2 + $0x169] sm:$0xff]  ;;  %v16648_v2 = vadd.f32 %v2242_v21, %v16383_v19  ;;  %v3404_v6 = vld [vmem:[#allocation2 + $0x140] sm:$0xff] }
 0x310   :  { %20846 = vst [vmem:[#allocation109_spill] sm:$0xff] %v16634_v36  ;;  %20852 = vst [vmem:[#allocation111_spill] sm:$0xff] %v16645_v11  ;;  %v16651_v23 = vadd.f32 %v2243_v48, %v16397_v51  ;;  %v16654_v14 = vadd.f32 %v2244_v30, %v16400_v5  ;;  %v16657_v43 = vadd.f32 %v2245_v62, %v16409_v58  ;;  %v20861_v56 = vld [vmem:[#allocation222_spill] sm:$0xff]  ;;  %v16673_v5 = vpop.permute.xlu1 %4512  ;;  %v20862_v58 = vld [vmem:[#allocation228_spill] sm:$0xff] }
 0x311   :  { %20851 = vst [vmem:[#allocation110_spill] sm:$0xff] %v16643_v33  ;;  %20853 = vst [vmem:[#allocation112_spill] sm:$0xff] %v16648_v2  ;;  %v16659_v44 = vpop.permute.xlu0 %4502  ;;  %v16662_v59 = vadd.f32 %v2250_v26, %v16426_v31  ;;  %v16665_v1 = vadd.f32 %v2251_v27, %v16429_v3  ;;  %v16668_v19 = vadd.f32 %v2252_v0, %v16437_v37  ;;  %4085 = vperm.xlu0 %14469, %v20861_v56   ;;  %v20863_v48 = vld [vmem:[#allocation230_spill] sm:$0xff]  ;;  %v20865_v27 = vld [vmem:[#allocation231_spill] sm:$0xff] }
 0x312   :  { %20854 = vst [vmem:[#allocation113_spill] sm:$0xff] %v16651_v23  ;;  %20855 = vst [vmem:[#allocation114_spill] sm:$0xff] %v16654_v14  ;;  %v2736_v51 = vmul.f32 %v16392_v18, %v20860_v38  ;;  %v2738_v21 = vmul.f32 %v16392_v18, %v20862_v58  ;;  %v2743_v31 = vmul.f32 %v16392_v18, %v20863_v48  ;;  %v3402_v37 = vld [vmem:[#allocation2 + $0x128] sm:$0xff]  ;;  %v20866_v38 = vld [vmem:[#allocation235_spill] sm:$0xff] }
 0x313   :  { %20856 = vst [vmem:[#allocation115_spill] sm:$0xff] %v16657_v43  ;;  %20857 = vst [vmem:[#allocation116_spill] sm:$0xff] %v16662_v59  ;;  %v16680_v30 = vrot.slane %v5003_v7, %v16606_v8  ;;  %v16683_v3 = vrot.slane %v5005_v52, %v16606_v8  ;;  %4095 = vperm.xlu1 %14470, %v16645_v11   ;;  %v16687_v62 = vadd.f32 %v2253_v12, %v16440_v25  ;;  %v20867_v58 = vld [vmem:[#allocation236_spill] sm:$0xff]  ;;  %v20870_v12 = vld [vmem:[#allocation238_spill] sm:$0xff] }
 0x314   :  { %20858 = vst [vmem:[#allocation117_spill] sm:$0xff] %v16665_v1  ;;  %20859 = vst [vmem:[#allocation118_spill] sm:$0xff] %v16668_v19  ;;  %v2803_v45 = vadd.f32 %v2739_v9, %v16466_v34  ;;  %v2805_v26 = vadd.f32 %v2741_v15, %v16487_v47  ;;  %v2745_v0 = vmul.f32 %v16392_v18, %v20865_v27  ;;  %v20868_v1 = vld [vmem:[#allocation237_spill] sm:$0xff]  ;;  %v20871_v9 = vld [vmem:[#allocation240_spill] sm:$0xff] }
 0x315   :  { %20864 = vst [vmem:[#allocation119_spill] sm:$0xff] %v16687_v62  ;;  %v3256_v56 = vmul.f32 %v16420_v53, %v20866_v38  ;;  %v3258_v48 = vmul.f32 %v16420_v53, %v20867_v58  ;;  %v3253_v19 = vmul.f32 %v16420_v53, %v20868_v1  ;;  %v5131_v59 = vcombine.high %v5003_v7, %v5003_v7  ;;  %v16699_v25 = vpop.permute.xlu0 %2498  ;;  %v16706_v38 = vpop.permute.xlu1 %2508  ;;  %v20878_v11 = vld [vmem:[#allocation229_spill] sm:$0xff] }
 0x316   :  { %20869 = vst [vmem:[#allocation120_spill] sm:$0xff] %v16699_v25  ;;  %v2800_v34 = vadd.f32 %v2736_v51, %v16460_v22  ;;  %v3255_v47 = vmul.f32 %v16420_v53, %v20870_v12  ;;  %v3260_v15 = vmul.f32 %v16420_v53, %v20871_v9  ;;  %v5165_v27 = vcombine.high %v5005_v52, %v5005_v52  ;;  %v20873_v51 = vld [vmem:[#allocation241_spill] sm:$0xff]  ;;  %v20875_v9 = vld [vmem:[#allocation246_spill] sm:$0xff] }
 0x317   :  { %3553 = vperm.xlu0 %14469, %v3402_v37   ;;  %20872 = vst [vmem:[#allocation121_spill] sm:$0xff] %v16706_v38  ;;  %v2802_v58 = vadd.f32 %v2738_v21, %v16463_v16  ;;  %v2807_v62 = vadd.f32 %v2743_v31, %v16520_v20  ;;  %v5146_v7 = vcombine.high %v16680_v30, %v16680_v30  ;;  %v20874_v52 = vld [vmem:[#allocation245_spill] sm:$0xff]  ;;  %v20889_v38 = vld [vmem:[#allocation254_spill] sm:$0xff] }
 0x318   :  { %v5180_v22 = vcombine.high %v16683_v3, %v16683_v3  ;;  %3563 = vperm.xlu1 %14470, %v3404_v6   ;;  %v2809_v1 = vadd.f32 %v2745_v0, %v16547_v29  ;;  %v3262_v12 = vmul.f32 %v16420_v53, %v20873_v51  ;;  %v2740_v37 = vmul.f32 %v16392_v18, %v20874_v52  ;;  %v20877_v29 = vld [vmem:[#allocation247_spill] sm:$0xff]  ;;  %v20891_v28 = vld [vmem:[#allocation9_spill] sm:$0xff] }
 0x319   :  { %v2742_v16 = vmul.f32 %v16392_v18, %v20875_v9  ;;  %v3320_v21 = vadd.f32 %v3256_v56, %v2803_v45  ;;  %v3322_v20 = vadd.f32 %v3258_v48, %v2805_v26  ;;  %v3317_v31 = vadd.f32 %v3253_v19, %v2800_v34  ;;  %v16722_v23 = vpop.permute.xlu0 %2533  ;;  %v16730_v52 = vpop.permute.xlu1 %2543  ;;  %v20880_v9 = vld [vmem:[#allocation248_spill] sm:$0xff]  ;;  %v20881_v19 = vld [vmem:[#allocation251_spill] sm:$0xff] }
 0x31a   :  { %v5145_v43 = vrot.slane %v5131_v59, %v16606_v8  ;;  %20876 = vst [vmem:[#allocation122_spill] sm:$0xff] %v16722_v23  ;;  %v3319_v36 = vadd.f32 %v3255_v47, %v2802_v58  ;;  %v16724_v6 = vadd.f32 %v3260_v15, %v2807_v62  ;;  %v2747_v0 = vmul.f32 %v16392_v18, %v20877_v29  ;;  %v20882_v48 = vld [vmem:[#allocation239_spill] sm:$0xff] }
 0x31b   :  { %v5179_v51 = vrot.slane %v5165_v27, %v16606_v8  ;;  %4547 = vperm.xlu0 %14469, %v20878_v11   ;;  %20879 = vst [vmem:[#allocation123_spill] sm:$0xff] %v16730_v52  ;;  %v2749_v45 = vmul.f32 %v16392_v18, %v20880_v9  ;;  %v3774_v59 = vmul.f32 %v16449_v40, %v20881_v19  ;;  %v12917_v26 = vrot.slane %v5146_v7, 9  ;;  %v20883_v11 = vld [vmem:[#allocation252_spill] sm:$0xff]  ;;  %v20884_v27 = vld [vmem:[#allocation253_spill] sm:$0xff]  ;;  %v20888_v52 = vld [vmem:[#allocation242_spill] sm:$0xff] }
 0x31c   :  { %v12925_v56 = vrot.slane %v5180_v22, 9  ;;  %4557 = vperm.xlu1 %14470, %v20882_v48   ;;  %v16737_v62 = vadd.f32 %v3262_v12, %v2809_v1  ;;  %v16740_v34 = vadd.f32 %v2740_v37, %v16484_v32  ;;  %v16743_v47 = vadd.f32 %v2742_v16, %v16503_v61  ;;  %v20886_v37 = vld [vmem:[#allocation232_spill] sm:$0xff]  ;;  %v2379_v23 = vld [vmem:[#allocation2 + $0x1d1] sm:$0xff] }
 0x31d   :  { %v3776_v15 = vmul.f32 %v16449_v40, %v20883_v11  ;;  %v2744_v58 = vmul.f32 %v16392_v18, %v20884_v27  ;;  %v5147_v29 = vcombine.high %v5145_v43, %v5145_v43  ;;  %v12916_v9 = vrot.slane %v16680_v30, 9  ;;  %v16751_v48 = vpop.permute.xlu0 %3493  ;;  %v16757_v16 = vpop.permute.xlu1 %3503 }
 0x31e   :  { %v12924_v19 = vrot.slane %v16683_v3, 9  ;;  %20885 = vst [vmem:[#allocation124_spill] sm:$0xff] %v16751_v48  ;;  %v16754_v1 = vadd.f32 %v2747_v0, %v16567_v49  ;;  %v12918_v32 = vrot.slane %v5145_v43, 9  ;;  %v5181_v12 = vcombine.high %v5179_v51, %v5179_v51  ;;  %20887 = vst [vmem:[#allocation125_spill] sm:$0xff] %v16757_v16  ;;  %v20890_v0 = vld [vmem:[#allocation46_spill] sm:$0xff] }
 0x31f   :  { %v12926_v61 = vrot.slane %v5179_v51, 9  ;;  %4582 = vperm.xlu0 %14469, %v20886_v37   ;;  %v16760_v11 = vadd.f32 %v2749_v45, %v16573_v41  ;;  %v3838_v27 = vadd.f32 %v3774_v59, %v3320_v21  ;;  %v7244_v14 = vmax.f32 %v5146_v7, %v12917_v26  ;;  %v16769_v16 = vld [vmem:[#allocation2 + $0x1e9] sm:$0xff]  ;;  %v20895_v26 = vld [vmem:[#allocation255_spill] sm:$0xff] }
 0x320   :  { %v7252_v2 = vmax.f32 %v5180_v22, %v12925_v56  ;;  %4592 = vperm.xlu1 %14470, %v20888_v52   ;;  %v3840_v48 = vadd.f32 %v3776_v15, %v3322_v20  ;;  %v2746_v49 = vmul.f32 %v16392_v18, %v20889_v38  ;;  %v3771_v25 = vmul.f32 %v16449_v40, %v20890_v0  ;;  %v20896_v15 = vld [vmem:[#allocation52_spill] sm:$0xff] }
 0x321   :  { %v3773_v37 = vmul.f32 %v16449_v40, %v20891_v28  ;;  %20892 = vst [vmem:[#allocation126_spill] sm:$0xff] %v16769_v16  ;;  %v16772_v41 = vadd.f32 %v2744_v58, %v16535_v13  ;;  %v12919_v7 = vrot.slane %v5147_v29, 9  ;;  %v7243_v22 = vmax.f32 %v16680_v30, %v12916_v9  ;;  %v16776_v20 = vpop.permute.xlu0 %3528  ;;  %v16780_v28 = vpop.permute.xlu1 %3538 }
 0x322   :  { %v7251_v21 = vmax.f32 %v16683_v3, %v12924_v19  ;;  %20893 = vst [vmem:[#allocation127_spill] sm:$0xff] %v16776_v20  ;;  %v7245_v38 = vmax.f32 %v5145_v43, %v12918_v32  ;;  %v12927_v52 = vrot.slane %v5181_v12, 9  ;;  %v7253_v45 = vmax.f32 %v5179_v51, %v12926_v61  ;;  %20894 = vst [vmem:[#allocation128_spill] sm:$0xff] %v16780_v28  ;;  %v20897_v3 = vld [vmem:[#allocation60_spill] sm:$0xff]  ;;  %v3408_v61 = vld [vmem:[#allocation2 + $0x170] sm:$0xff] }
 0x323   :  { %v4288_v59 = vmul.f32 %v16473_v17, %v16406_v63  ;;  %2578 = vperm.xlu0 %14469, %v2379_v23   ;;  %v2751_v13 = vmul.f32 %v16392_v18, %v20895_v26  ;;  %v7500_v56 = vmax.f32 %v7244_v14, %v7252_v2  ;;  %v4291_v30 = vmul.f32 %v16473_v17, %v20896_v15  ;;  %v3406_v43 = vld [vmem:[#allocation2 + $0x158] sm:$0xff]  ;;  %v20900_v14 = vld [vmem:[#allocation53_spill] sm:$0xff] }
 0x324   :  { %v4290_v58 = vmul.f32 %v16473_v17, %v20897_v3  ;;  %2588 = vperm.xlu1 %14470, %v16769_v16   ;;  %v3835_v51 = vadd.f32 %v3771_v25, %v3317_v31  ;;  %v3837_v9 = vadd.f32 %v3773_v37, %v3319_v36  ;;  %v20898_v63 = vld [vmem:[#allocation47_spill] sm:$0xff]  ;;  %v20899_v19 = vld [vmem:[#allocation48_spill] sm:$0xff]  ;;  %v7246_v0 = vmax.f32 %v5147_v29, %v12919_v7 }
 0x325   :  { %v3778_v23 = vmul.f32 %v16449_v40, %v20898_v63  ;;  %v3780_v32 = vmul.f32 %v16449_v40, %v20899_v19  ;;  %v7499_v2 = vmax.f32 %v7243_v22, %v7251_v21  ;;  %v4293_v26 = vmul.f32 %v16473_v17, %v20900_v14  ;;  %v20901_v15 = vld [vmem:[#allocation64_spill] sm:$0xff]  ;;  %v4488_v28 = vpop.permute.xlu0 %4487  ;;  %v4498_v31 = vpop.permute.xlu1 %4497 }
 0x326   :  { %v4808_v3 = vmul.f32 %v20901_v15, %v16659_v44  ;;  %v7254_v16 = vmax.f32 %v5181_v12, %v12927_v52  ;;  %v7501_v20 = vmax.f32 %v7245_v38, %v7253_v45  ;;  %v4352_v25 = vadd.f32 %v4288_v59, %v3835_v51  ;;  %v3413_v7 = vld [vmem:[#allocation2 + $0x1e0] sm:$0xff]  ;;  %v3415_v52 = vld [vmem:[#allocation2 + $0x1f8] sm:$0xff] }
 0x327   :  { %v4805_v36 = vmul.f32 %v20901_v15, %v4488_v28  ;;  %3573 = vperm.xlu0 %14469, %v3406_v43   ;;  %v7804_v37 = vrot.slane %v7500_v56, %v16643_v33  ;;  %v4355_v63 = vadd.f32 %v4291_v30, %v3838_v27  ;;  %v4354_v19 = vadd.f32 %v4290_v58, %v3837_v9  ;;  %v20902_v44 = vld [vmem:[#allocation256_spill] sm:$0xff] }
 0x328   :  { %v4807_v29 = vmul.f32 %v20901_v15, %v4498_v31  ;;  %3583 = vperm.xlu1 %14470, %v3408_v61   ;;  %v16801_v22 = vadd.f32 %v2746_v49, %v16564_v4  ;;  %v16805_v12 = vmul.f32 %v16392_v18, %v20902_v44  ;;  %v4810_v21 = vmul.f32 %v20901_v15, %v16673_v5 }
 0x329   :  { %v4869_v38 = vadd.f32 %v4805_v36, %v4352_v25  ;;  %v16810_v45 = vadd.f32 %v2751_v13, %v16581_v55  ;;  %v7800_v27 = vrot.slane %v7499_v2, %v16643_v33  ;;  %v4872_v59 = vadd.f32 %v4808_v3, %v4355_v63  ;;  %v16813_v56 = vpop.permute.xlu0 %4522  ;;  %v16817_v43 = vpop.permute.xlu1 %4532 }
 0x32a   :  { %v4871_v28 = vadd.f32 %v4807_v29, %v4354_v19  ;;  %v7502_v4 = vmax.f32 %v7246_v0, %v7254_v16  ;;  %v7808_v49 = vrot.slane %v7501_v20, %v16643_v33  ;;  %v4357_v30 = vadd.f32 %v4293_v26, %v3840_v48  ;;  %v20903_v16 = vld [vmem:[#allocation50_spill] sm:$0xff]  ;;  %v20904_v20 = vld [vmem:[#allocation51_spill] sm:$0xff]  ;;  %v20909_v19 = vld [vmem:[#allocation61_spill] sm:$0xff] }
 0x32b   :  { %v4940_v58 = vadd.f32 %v16559_v24, %v4869_v38  ;;  %3608 = vperm.xlu0 %14469, %v3413_v7   ;;  %v16820_v5 = vadd.f32 %v3778_v23, %v16724_v6  ;;  %v16823_v55 = vadd.f32 %v3780_v32, %v16737_v62  ;;  %v8310_v13 = vsel %vm8309_vm4, %v7804_v37, %v7800_v27  ;;  %v20905_v23 = vld [vmem:[#allocation16_spill] sm:$0xff]  ;;  %v20906_v32 = vld [vmem:[#allocation17_spill] sm:$0xff]  ;;  %v20910_v7 = vld [vmem:[#allocation63_spill] sm:$0xff] }
 0x32c   :  { %v4942_v51 = vadd.f32 %v16559_v24, %v4871_v28  ;;  %3618 = vperm.xlu1 %14470, %v3415_v52   ;;  %v16829_v48 = vmul.f32 %v16420_v53, %v20903_v16  ;;  %v16833_v9 = vmul.f32 %v16420_v53, %v20904_v20  ;;  %v4874_v61 = vadd.f32 %v4810_v21, %v4357_v30  ;;  %v14507_v37 = vld [vmem:[#allocation2 + $0xfa] sm:$0xff]  ;;  %v20911_v52 = vld [vmem:[#allocation58_spill] sm:$0xff] }
 0x32d   :  { %v5004_v6 = vmax.f32 %v4940_v58, 0.0  ;;  %v16837_v62 = vmul.f32 %v16420_v53, %v20905_v23  ;;  %v16841_v0 = vmul.f32 %v16420_v53, %v20906_v32  ;;  %v4943_v2 = vadd.f32 %v16559_v24, %v4872_v59  ;;  %v16844_v26 = vpop.permute.xlu0 %2995  ;;  %v16849_v63 = vpop.permute.xlu1 %3005  ;;  %v14508_v32 = vld [vmem:[#allocation2 + $0x152] sm:$0xff] }
 0x32e   :  { %v5006_v14 = vmax.f32 %v4942_v51, 0.0  ;;  %20907 = vst [vmem:[#allocation129_spill] sm:$0xff] %v16844_v26  ;;  %v7812_v3 = vrot.slane %v7502_v4, %v16643_v33  ;;  %v8312_v25 = vsel %vm8311_vm5, %v7808_v49, %v8310_v13  ;;  %20908 = vst [vmem:[#allocation130_spill] sm:$0xff] %v16849_v63  ;;  %v4295_v29 = vmul.f32 %v16473_v17, %v20909_v19  ;;  %v16859_v49 = vld [vmem:[#allocation2 + $0x16a] sm:$0xff] }
 0x32f   :  { %v5148_v36 = vcombine.high %v5004_v6, %v5004_v6  ;;  %v5155_v31 = vrot.slane %v5004_v6, %v16606_v8  ;;  %4567 = vperm.xlu0 %14469, %v14507_v37   ;;  %v4297_v44 = vmul.f32 %v16473_v17, %v20910_v7  ;;  %v4945_v27 = vadd.f32 %v16559_v24, %v4874_v61 }
 0x330   :  { %v5182_v21 = vcombine.high %v5006_v14, %v5006_v14  ;;  %v5189_v38 = vrot.slane %v5006_v14, %v16606_v8  ;;  %4577 = vperm.xlu1 %14470, %v20911_v52   ;;  %20912 = vst [vmem:[#allocation131_spill] sm:$0xff] %v16859_v49  ;;  %v16861_v30 = vmax.f32 %v4943_v2, 0.0  ;;  %v4812_v50 = vmul.f32 %v20901_v15, %v16813_v56 }
 0x331   :  { %v5162_v59 = vrot.slane %v5148_v36, %v16606_v8  ;;  %v5163_v28 = vcombine.high %v5155_v31, %v5155_v31  ;;  %v12920_v4 = vrot.slane %v5155_v31, 9  ;;  %v16864_v16 = vpop.permute.xlu0 %3030  ;;  %v16866_v14 = vpop.permute.xlu1 %3040  ;;  %v16869_v7 = vmax.f32 %v4945_v27, 0.0  ;;  %v14509_v27 = vld [vmem:[#allocation2 + $0x129] sm:$0xff] }
 0x332   :  { %v5196_v58 = vrot.slane %v5182_v21, %v16606_v8  ;;  %v5197_v13 = vcombine.high %v5189_v38, %v5189_v38  ;;  %v12928_v51 = vrot.slane %v5189_v38, 9  ;;  %20913 = vst [vmem:[#allocation132_spill] sm:$0xff] %v16864_v16  ;;  %20914 = vst [vmem:[#allocation133_spill] sm:$0xff] %v16866_v14  ;;  %v8314_v14 = vsel %vm8313_vm6, %v7812_v3, %v8312_v25 }
 0x333   :  { %v5164_v20 = vcombine.high %v5162_v59, %v5162_v59  ;;  %v12921_v6 = vrot.slane %v5163_v28, 9  ;;  %v12922_v23 = vrot.slane %v5162_v59, 9  ;;  %v7247_v61 = vmax.f32 %v5155_v31, %v12920_v4  ;;  %4602 = vperm.xlu0 %14469, %v14508_v32  }
 0x334   :  { %v5198_v36 = vcombine.high %v5196_v58, %v5196_v58  ;;  %v12929_v37 = vrot.slane %v5197_v13, 9  ;;  %v12930_v2 = vrot.slane %v5196_v58, 9  ;;  %v7255_v19 = vmax.f32 %v5189_v38, %v12928_v51  ;;  %4612 = vperm.xlu1 %14470, %v16859_v49  }
 0x335   :  { %v12923_v21 = vrot.slane %v5164_v20, 9  ;;  %v7248_v52 = vmax.f32 %v5163_v28, %v12921_v6  ;;  %v7249_v16 = vmax.f32 %v5162_v59, %v12922_v23  ;;  %v16871_v4 = vpop.permute.xlu0 %3990  ;;  %v4814_v38 = vmul.f32 %v20901_v15, %v16817_v43  ;;  %v16878_v51 = vpop.permute.xlu1 %4000  ;;  %v20915_v6 = vld [vmem:[#allocation49_spill] sm:$0xff] }
 0x336   :  { %v12931_v17 = vrot.slane %v5198_v36, 9  ;;  %v7256_v63 = vmax.f32 %v5197_v13, %v12929_v37  ;;  %v7257_v26 = vmax.f32 %v5196_v58, %v12930_v2  ;;  %v7503_v31 = vmax.f32 %v7247_v61, %v7255_v19 }
 0x337   :  { %v7250_v32 = vmax.f32 %v5164_v20, %v12923_v21  ;;  %4070 = vperm.xlu0 %14469, %v14509_v27   ;;  %v2896_v20 = vld [vmem:[#allocation2 + $0x1d2] sm:$0xff]  ;;  %v4359_v3 = vadd.f32 %v4295_v29, %v16820_v5  ;;  %v4361_v25 = vadd.f32 %v4297_v44, %v16823_v55  ;;  %v16886_v56 = vrot.slane %v16861_v30, %v16606_v8 }
 0x338   :  { %v7258_v59 = vmax.f32 %v5198_v36, %v12931_v17  ;;  %v7504_v28 = vmax.f32 %v7248_v52, %v7256_v63  ;;  %v7505_v13 = vmax.f32 %v7249_v16, %v7257_v26  ;;  %v7816_v58 = vrot.slane %v7503_v31, %v16643_v33  ;;  %4080 = vperm.xlu1 %14470, %v20915_v6   ;;  %v16892_v17 = vld [vmem:[#allocation2 + $0x1ea] sm:$0xff]  ;;  %v20917_v44 = vld [vmem:[#allocation55_spill] sm:$0xff]  ;;  %v20918_v36 = vld [vmem:[#allocation56_spill] sm:$0xff] }
 0x339   :  { %v16890_v43 = vrot.slane %v16869_v7, %v16606_v8  ;;  %v16897_v5 = vpop.permute.xlu0 %4025  ;;  %v20916_v55 = vld [vmem:[#allocation54_spill] sm:$0xff]  ;;  %v3263_v61 = vmul.f32 %v16420_v53, %v20917_v44  ;;  %v3268_v37 = vmul.f32 %v16420_v53, %v20918_v36  ;;  %v5199_v2 = vcombine.high %v16861_v30, %v16861_v30  ;;  %v16907_v19 = vpop.permute.xlu1 %4035 }
 0x33a   :  { %v7506_v26 = vmax.f32 %v7250_v32, %v7258_v59  ;;  %v7820_v63 = vrot.slane %v7504_v28, %v16643_v33  ;;  %v7824_v16 = vrot.slane %v7505_v13, %v16643_v33  ;;  %v8316_v23 = vsel %vm8315_vm7, %v7816_v58, %v8314_v14  ;;  %v16919_v28 = vld [vmem:[#allocation2 + $0x171] sm:$0xff] }
 0x33b   :  { %v3261_v29 = vmul.f32 %v16420_v53, %v20916_v55  ;;  %3095 = vperm.xlu0 %14469, %v2896_v20   ;;  %v4876_v52 = vadd.f32 %v4812_v50, %v4359_v3  ;;  %v4878_v31 = vadd.f32 %v4814_v38, %v4361_v25  ;;  %v5214_v32 = vcombine.high %v16886_v56, %v16886_v56 }
 0x33c   :  { %v7828_v21 = vrot.slane %v7506_v26, %v16643_v33  ;;  %v8318_v14 = vsel %vm8317_vm8, %v7820_v63, %v8316_v23  ;;  %3105 = vperm.xlu1 %14470, %v16892_v17   ;;  %v5233_v27 = vcombine.high %v16869_v7, %v16869_v7  ;;  %v5248_v30 = vcombine.high %v16890_v43, %v16890_v43  ;;  %v16960_v26 = vld [vmem:[#allocation2 + $0x1f9] sm:$0xff]  ;;  %v20923_v63 = vld [vmem:[#allocation65_spill] sm:$0xff] }
 0x33d   :  { %v8320_v59 = vsel %vm8319_vm9, %v7824_v16, %v8318_v14  ;;  %20919 = vst [vmem:[#allocation134_spill] sm:$0xff] %v16919_v28  ;;  %v2817_v13 = vadd.f32 %v16805_v12, %v16598_v42  ;;  %v3321_v50 = vadd.f32 %v16829_v48, %v16740_v34  ;;  %v16927_v38 = vadd.f32 %v16833_v9, %v16743_v47  ;;  %v16930_v7 = vpop.permute.xlu0 %3015  ;;  %v20920_v34 = vld [vmem:[#allocation57_spill] sm:$0xff]  ;;  %v20921_v47 = vld [vmem:[#allocation14_spill] sm:$0xff]  ;;  %v16947_v48 = vpop.permute.xlu1 %3025 }
 0x33e   :  { %v8322_v58 = vsel %vm8321_vm10, %v7828_v21, %v8320_v59  ;;  %v16934_v6 = vadd.f32 %v16837_v62, %v16754_v1  ;;  %v16938_v20 = vadd.f32 %v16841_v0, %v16760_v11  ;;  %v16941_v42 = vadd.f32 %v3261_v29, %v16772_v41  ;;  %20922 = vst [vmem:[#allocation135_spill] sm:$0xff] %v16960_v26  ;;  %v20924_v16 = vld [vmem:[#allocation66_spill] sm:$0xff] }
 0x33f   :  { %v3270_v12 = vmul.f32 %v16420_v53, %v20920_v34  ;;  %8445 = vst.msk [vmem:[#allocation3 + $0x11] sm:$0xff] %vm7627_vm2, %v8322_v58  ;;  %4090 = vperm.xlu0 %14469, %v20921_v47   ;;  %v16950_v9 = vadd.f32 %v3263_v61, %v16801_v22  ;;  %v5213_v1 = vrot.slane %v5199_v2, %v16606_v8  ;;  %v12933_v0 = vrot.slane %v5214_v32, 9  ;;  %v20925_v2 = vld [vmem:[#allocation15_spill] sm:$0xff] }
 0x340   :  { %v4947_v11 = vadd.f32 %v16559_v24, %v4876_v52  ;;  %v4949_v62 = vadd.f32 %v16559_v24, %v4878_v31  ;;  %4100 = vperm.xlu1 %14470, %v16919_v28   ;;  %v16957_v41 = vadd.f32 %v3268_v37, %v16810_v45  ;;  %v5247_v3 = vrot.slane %v5233_v27, %v16606_v8  ;;  %v17089_v28 = vld [vmem:[#allocation2 + $0x201] sm:$0xff] }
 0x341   :  { %v12941_v25 = vrot.slane %v5248_v30, 9  ;;  %v2748_v22 = vmul.f32 %v16392_v18, %v20923_v63  ;;  %v2750_v23 = vmul.f32 %v16392_v18, %v20924_v16  ;;  %v2755_v55 = vmul.f32 %v16392_v18, %v16532_v39  ;;  %v16970_v45 = vpop.permute.xlu0 %3050  ;;  %v16979_v21 = vpop.permute.xlu1 %3060  ;;  %v20929_v16 = vld [vmem:[#allocation67_spill] sm:$0xff] }
 0x342   :  { %v2757_v29 = vmul.f32 %v16392_v18, %v16544_v46  ;;  %v16972_v44 = vadd.f32 %v3270_v12, %v2817_v13  ;;  %v3775_v61 = vmul.f32 %v16449_v40, %v16575_v60  ;;  %v12932_v36 = vrot.slane %v16886_v56, 9 }
 0x343   :  { %v12940_v37 = vrot.slane %v16890_v43, 9  ;;  %4125 = vperm.xlu0 %14469, %v20925_v2   ;;  %v5215_v14 = vcombine.high %v5213_v1, %v5213_v1  ;;  %v12934_v39 = vrot.slane %v5213_v1, 9  ;;  %v5011_v52 = vmax.f32 %v4947_v11, 0.0 }
 0x344   :  { %v5013_v31 = vmax.f32 %v4949_v62, 0.0  ;;  %4135 = vperm.xlu1 %14470, %v16960_v26   ;;  %v7260_v46 = vmax.f32 %v5214_v32, %v12933_v0  ;;  %v5249_v27 = vcombine.high %v5247_v3, %v5247_v3  ;;  %v12942_v59 = vrot.slane %v5247_v3, 9  ;;  %v20926_v32 = vld [vmem:[#allocation71_spill] sm:$0xff] }
 0x345   :  { %v7268_v13 = vmax.f32 %v5248_v30, %v12941_v25  ;;  %v16983_v60 = vadd.f32 %v2748_v22, %v16570_v54  ;;  %v16986_v58 = vadd.f32 %v2750_v23, %v16578_v35  ;;  %v16989_v34 = vadd.f32 %v2755_v55, %v16604_v57  ;;  %v16994_v47 = vpop.permute.xlu0 %4010  ;;  %v20927_v25 = vld [vmem:[#allocation59_spill] sm:$0xff]  ;;  %v17002_v35 = vpop.permute.xlu1 %4020  ;;  %v3414_v23 = vld [vmem:[#allocation2 + $0x1e8] sm:$0xff] }
 0x346   :  { %v16992_v12 = vadd.f32 %v2757_v29, %v16631_v10  ;;  %v8480_v11 = vld [vmem:[#allocation3 + $0x11] sm:$0xff]  ;;  %v3777_v0 = vmul.f32 %v16449_v40, %v20926_v32  ;;  %v7259_v30 = vmax.f32 %v16886_v56, %v12932_v36  ;;  %v7267_v54 = vmax.f32 %v16890_v43, %v12940_v37  ;;  %20928 = vst [vmem:[#allocation136_spill] sm:$0xff] %v17002_v35  ;;  %v3416_v36 = vld [vmem:[#allocation2 + $0x200] sm:$0xff] }
 0x347   :  { %v8884_v62 = vld [vmem:[#allocation3 + $0x12] sm:$0xff]  ;;  %4587 = vperm.xlu0 %14469, %v20927_v25   ;;  %13728 = vmatmul.mubr.msk.f32.vlgmr.msra.gmra.mrb[0].mxu1 %vm7627_vm2, %v8480_v11  ;;  %v17004_v57 = vadd.f32 %v3775_v61, %v3321_v50  ;;  %v12935_v10 = vrot.slane %v5215_v14, 9  ;;  %v5267_v63 = vcombine.high %v5011_v52, %v5011_v52  ;;  %v5301_v22 = vcombine.high %v5013_v31, %v5013_v31  ;;  %v20931_v11 = vld [vmem:[#allocation80_spill] sm:$0xff]  ;;  %v20933_v25 = vld [vmem:[#allocation121_spill] sm:$0xff] }
 0x348   :  { %13784 = vmatmul.mubr.msk.f32.vlgmr.msra.gmra.mrb[0].mxu0 %vm7627_vm2, %v8884_v62  ;;  %4597 = vperm.xlu1 %14470, %v20929_v16   ;;  %v7261_v55 = vmax.f32 %v5213_v1, %v12934_v39  ;;  %v12943_v56 = vrot.slane %v5249_v27, 9  ;;  %v7269_v29 = vmax.f32 %v5247_v3, %v12942_v59  ;;  %v7508_v43 = vmax.f32 %v7260_v46, %v7268_v13  ;;  %v20930_v37 = vld [vmem:[#allocation78_spill] sm:$0xff]  ;;  %v20932_v61 = vld [vmem:[#allocation120_spill] sm:$0xff] }
 0x349   :  { %v3782_v2 = vmul.f32 %v16449_v40, %v20930_v37  ;;  %v3784_v50 = vmul.f32 %v16449_v40, %v20931_v11  ;;  %v2752_v32 = vmul.f32 %v16392_v18, %v20932_v61  ;;  %v2754_v62 = vmul.f32 %v16392_v18, %v20933_v25  ;;  %v17016_v26 = vpop.permute.xlu0 %4045  ;;  %v17023_v59 = vpop.permute.xlu1 %4055  ;;  %v20936_v13 = vld [vmem:[#allocation122_spill] sm:$0xff]  ;;  %v20937_v37 = vld [vmem:[#allocation123_spill] sm:$0xff] }
 0x34a   :  { %20934 = vst [vmem:[#allocation199_spill] sm:$0xff] %v17016_v26  ;;  %v17019_v1 = vadd.f32 %v3777_v0, %v16927_v38  ;;  %v7507_v3 = vmax.f32 %v7259_v30, %v7267_v54  ;;  %v5274_v39 = vrot.slane %v5011_v52, %v16606_v8  ;;  %v5308_v46 = vrot.slane %v5013_v31, %v16606_v8  ;;  %v17032_v31 = vld [vmem:[#allocation2 + $0x172] sm:$0xff] }
 0x34b   :  { %3613 = vperm.xlu0 %14469, %v3414_v23   ;;  %20935 = vst [vmem:[#allocation141_spill] sm:$0xff] %v17023_v59  ;;  %v2759_v16 = vmul.f32 %v16392_v18, %v20936_v13  ;;  %v2761_v11 = vmul.f32 %v16392_v18, %v20937_v37  ;;  %v5281_v61 = vrot.slane %v5267_v63, %v16606_v8  ;;  %20938 = vst [vmem:[#allocation142_spill] sm:$0xff] %v17032_v31  ;;  %v20939_v13 = vld [vmem:[#allocation70_spill] sm:$0xff]  ;;  %v20940_v63 = vld [vmem:[#allocation72_spill] sm:$0xff] }
 0x34c   :  { %v5315_v25 = vrot.slane %v5301_v22, %v16606_v8  ;;  %3623 = vperm.xlu1 %14470, %v3416_v36   ;;  %v7262_v38 = vmax.f32 %v5215_v14, %v12935_v10  ;;  %v7270_v0 = vmax.f32 %v5249_v27, %v12943_v56  ;;  %v7509_v30 = vmax.f32 %v7261_v55, %v7269_v29  ;;  %v20942_v27 = vld [vmem:[#allocation124_spill] sm:$0xff]  ;;  %v20947_v36 = vld [vmem:[#allocation125_spill] sm:$0xff] }
 0x34d   :  { %v7836_v52 = vrot.slane %v7508_v43, %v16643_v33  ;;  %v17035_v54 = vadd.f32 %v3782_v2, %v16934_v6  ;;  %v17038_v23 = vadd.f32 %v3784_v50, %v16938_v20  ;;  %v17041_v18 = vadd.f32 %v2752_v32, %v20939_v13  ;;  %v17046_v22 = vpop.permute.xlu0 %2518  ;;  %v20943_v6 = vld [vmem:[#allocation68_spill] sm:$0xff]  ;;  %v17052_v29 = vpop.permute.xlu1 %2528 }
 0x34e   :  { %v17044_v37 = vadd.f32 %v2754_v62, %v20940_v63  ;;  %20941 = vst [vmem:[#allocation143_spill] sm:$0xff] %v17046_v22  ;;  %v7832_v14 = vrot.slane %v7507_v3, %v16643_v33  ;;  %v3779_v10 = vmul.f32 %v16449_v40, %v20942_v27  ;;  %v5282_v55 = vcombine.high %v5274_v39, %v5274_v39  ;;  %v20945_v20 = vld [vmem:[#allocation112_spill] sm:$0xff]  ;;  %v20948_v63 = vld [vmem:[#allocation114_spill] sm:$0xff] }
 0x34f   :  { %v5316_v56 = vcombine.high %v5308_v46, %v5308_v46  ;;  %4607 = vperm.xlu0 %14469, %v20943_v6   ;;  %20944 = vst [vmem:[#allocation144_spill] sm:$0xff] %v17052_v29  ;;  %v17055_v43 = vadd.f32 %v2759_v16, %v20945_v20  ;;  %v3781_v2 = vmul.f32 %v16449_v40, %v20947_v36  ;;  %v17065_v6 = vld [vmem:[#allocation2 + $0x1fa] sm:$0xff]  ;;  %v12948_v29 = vrot.slane %v5274_v39, 9 }
 0x350   :  { %v5283_v50 = vcombine.high %v5281_v61, %v5281_v61  ;;  %v5317_v32 = vcombine.high %v5315_v25, %v5315_v25  ;;  %4617 = vperm.xlu1 %14470, %v17032_v31   ;;  %v7510_v62 = vmax.f32 %v7262_v38, %v7270_v0  ;;  %v7840_v3 = vrot.slane %v7509_v30, %v16643_v33  ;;  %v20953_v31 = vld [vmem:[#allocation127_spill] sm:$0xff] }
 0x351   :  { %20946 = vst [vmem:[#allocation173_spill] sm:$0xff] %v17055_v43  ;;  %v8323_v13 = vsel %vm8309_vm4, %v7836_v52, %v7832_v14  ;;  %v17063_v27 = vadd.f32 %v2761_v11, %v20948_v63  ;;  %20950 = vst [vmem:[#allocation174_spill] sm:$0xff] %v17065_v6  ;;  %v12950_v16 = vrot.slane %v5281_v61, 9  ;;  %v12956_v20 = vrot.slane %v5308_v46, 9  ;;  %v17067_v59 = vpop.permute.xlu0 %3513  ;;  %v20954_v52 = vld [vmem:[#allocation69_spill] sm:$0xff]  ;;  %v17075_v11 = vpop.permute.xlu1 %3523  ;;  %v20957_v63 = vld [vmem:[#allocation128_spill] sm:$0xff] }
 0x352   :  { %v12958_v22 = vrot.slane %v5315_v25, 9  ;;  %20951 = vst [vmem:[#allocation176_spill] sm:$0xff] %v17067_v59  ;;  %v17070_v36 = vadd.f32 %v3779_v10, %v16941_v42  ;;  %v3786_v38 = vmul.f32 %v16449_v40, %v20953_v31  ;;  %v12949_v0 = vrot.slane %v5282_v55, 9  ;;  %20955 = vst [vmem:[#allocation178_spill] sm:$0xff] %v17075_v11  ;;  %v20958_v10 = vld [vmem:[#allocation129_spill] sm:$0xff] }
 0x353   :  { %20949 = vst [vmem:[#allocation175_spill] sm:$0xff] %v17063_v27  ;;  %v12957_v30 = vrot.slane %v5316_v56, 9  ;;  %4642 = vperm.xlu0 %14469, %v20954_v52   ;;  %v17078_v14 = vadd.f32 %v3781_v2, %v16950_v9  ;;  %v3788_v26 = vmul.f32 %v16449_v40, %v20957_v63  ;;  %v12951_v27 = vrot.slane %v5283_v50, 9  ;;  %v20959_v52 = vld [vmem:[#allocation130_spill] sm:$0xff] }
 0x354   :  { %20952 = vst [vmem:[#allocation177_spill] sm:$0xff] %v17070_v36  ;;  %v12959_v59 = vrot.slane %v5317_v32, 9  ;;  %4652 = vperm.xlu1 %14470, %v17065_v6   ;;  %v7844_v42 = vrot.slane %v7510_v62, %v16643_v33  ;;  %v8324_v31 = vsel %vm8311_vm5, %v7840_v3, %v8323_v13  ;;  %v3265_v36 = vmul.f32 %v16420_v53, %v20958_v10  ;;  %v20960_v3 = vld [vmem:[#allocation62_spill] sm:$0xff] }
 0x355   :  { %20956 = vst [vmem:[#allocation179_spill] sm:$0xff] %v17078_v14  ;;  %v3267_v11 = vmul.f32 %v16420_v53, %v20959_v52  ;;  %v7275_v9 = vmax.f32 %v5274_v39, %v12948_v29  ;;  %v7277_v2 = vmax.f32 %v5281_v61, %v12950_v16  ;;  %v7283_v14 = vmax.f32 %v5308_v46, %v12956_v20  ;;  %v17091_v63 = vpop.permute.xlu0 %3548  ;;  %v20961_v10 = vld [vmem:[#allocation126_spill] sm:$0xff]  ;;  %v17099_v43 = vpop.permute.xlu1 %3558  ;;  %v20962_v39 = vld [vmem:[#allocation132_spill] sm:$0xff] }
 0x356   :  { %v7285_v40 = vmax.f32 %v5315_v25, %v12958_v22  ;;  %v17094_v6 = vadd.f32 %v3786_v38, %v16957_v41  ;;  %v7276_v62 = vmax.f32 %v5282_v55, %v12949_v0  ;;  %v7284_v35 = vmax.f32 %v5316_v56, %v12957_v30 }
 0x357   :  { %v4292_v13 = vmul.f32 %v20960_v3, %v16871_v4  ;;  %4130 = vperm.xlu0 %14469, %v20961_v10   ;;  %v7278_v52 = vmax.f32 %v5283_v50, %v12951_v27  ;;  %v7286_v49 = vmax.f32 %v5317_v32, %v12959_v59  ;;  %v3272_v46 = vmul.f32 %v16420_v53, %v20962_v39  ;;  %v20963_v4 = vld [vmem:[#allocation133_spill] sm:$0xff] }
 0x358   :  { %v4294_v61 = vmul.f32 %v20960_v3, %v16878_v51  ;;  %4140 = vperm.xlu1 %14470, %v17089_v28   ;;  %v17107_v41 = vadd.f32 %v3788_v26, %v16972_v44  ;;  %v17110_v25 = vadd.f32 %v3265_v36, %v16983_v60  ;;  %v3274_v22 = vmul.f32 %v16420_v53, %v20963_v4  ;;  %v17117_v59 = vld [vmem:[#allocation2 + $0x202] sm:$0xff] }
 0x359   :  { %v17115_v55 = vsel %vm8313_vm6, %v7844_v42, %v8324_v31  ;;  %20964 = vst [vmem:[#allocation180_spill] sm:$0xff] %v17117_v59  ;;  %v7515_v56 = vmax.f32 %v7275_v9, %v7283_v14  ;;  %v7517_v29 = vmax.f32 %v7277_v2, %v7285_v40  ;;  %v17120_v51 = vadd.f32 %v3267_v11, %v16986_v58  ;;  %v4508_v44 = vpop.permute.xlu0 %4507  ;;  %v4518_v27 = vpop.permute.xlu1 %4517  ;;  %v20965_v14 = vld [vmem:[#allocation111_spill] sm:$0xff]  ;;  %v17168_v2 = vld [vmem:[%s20368_s1 + $0x8] ss:$0 sm:$0xff]  ;;  %v17185_v10 = vld [vmem:[%s20368_s1 + $0x7] ss:$0 sm:$0xff] }
 0x35a   :  { %v4299_v26 = vmul.f32 %v20960_v3, %v16897_v5  ;;  %v7516_v50 = vmax.f32 %v7276_v62, %v7284_v35  ;;  %v4356_v60 = vadd.f32 %v4292_v13, %v17004_v57  ;;  %v4301_v53 = vmul.f32 %v20960_v3, %v16907_v19  ;;  %v17141_v19 = vld [vmem:[%s20368_s1 + $0x5] ss:$0 sm:$0xff]  ;;  %20966 = vst [vmem:[#allocation233_spill] sm:$0xff] %v17168_v2 }
 0x35b   :  { %v4809_v32 = vmul.f32 %v20901_v15, %v4508_v44  ;;  %4647 = vperm.xlu0 %14469, %v16892_v17   ;;  %v7518_v16 = vmax.f32 %v7278_v52, %v7286_v49  ;;  %v17130_v20 = vadd.f32 %v3272_v46, %v16989_v34  ;;  %v4358_v58 = vadd.f32 %v4294_v61, %v17019_v1  ;;  %v17147_v57 = vld [vmem:[#allocation2 + $0x181] sm:$0xff] }
 0x35c   :  { %v4811_v5 = vmul.f32 %v20901_v15, %v4518_v27  ;;  %4657 = vperm.xlu1 %14470, %v17117_v59   ;;  %v17136_v35 = vadd.f32 %v3274_v22, %v16992_v12  ;;  %v3269_v49 = vmul.f32 %v17141_v19, %v16930_v7  ;;  %v3271_v17 = vmul.f32 %v17141_v19, %v16947_v48  ;;  %v20969_v44 = vld [vmem:[#allocation136_spill] sm:$0xff] }
 0x35d   :  { %v4873_v34 = vadd.f32 %v4809_v32, %v4356_v60  ;;  %v7864_v1 = vrot.slane %v7515_v56, %v16643_v33  ;;  %v17151_v36 = vrot.slane %v7517_v29, %v16643_v33  ;;  %v4363_v12 = vadd.f32 %v4299_v26, %v17035_v54  ;;  %v4543_v0 = vpop.permute.xlu0 %4542  ;;  %v4553_v42 = vpop.permute.xlu1 %4552  ;;  %v20968_v29 = vld [vmem:[#allocation173_spill] sm:$0xff] }
 0x35e   :  { %v4875_v38 = vadd.f32 %v4811_v5, %v4358_v58  ;;  %v7868_v30 = vrot.slane %v7516_v50, %v16643_v33  ;;  %v4365_v11 = vadd.f32 %v4301_v53, %v17038_v23  ;;  %v4816_v48 = vmul.f32 %v20901_v15, %v4543_v0  ;;  %v17205_v58 = vld [vmem:[#allocation2 + $0x189] sm:$0xff] }
 0x35f   :  { %v4944_v7 = vadd.f32 %v16559_v24, %v4873_v34  ;;  %2553 = vperm.xlu0 %14469, %v20965_v14   ;;  %v17160_v31 = vrot.slane %v7518_v16, %v16643_v33  ;;  %v3276_v9 = vmul.f32 %v17141_v19, %v16970_v45  ;;  %v4818_v23 = vmul.f32 %v17168_v2, %v4553_v42  ;;  %v17178_v45 = vld [vmem:[#allocation2 + $0x182] sm:$0xff] }
 0x360   :  { %v4946_v54 = vadd.f32 %v16559_v24, %v4875_v38  ;;  %2563 = vperm.xlu1 %14470, %v17147_v57   ;;  %v17173_v15 = vadd.f32 %v3269_v49, %v17041_v18  ;;  %v17176_v40 = vadd.f32 %v3271_v17, %v17044_v37  ;;  %v4880_v3 = vadd.f32 %v4816_v48, %v4363_v12 }
 0x361   :  { %v5008_v62 = vmax.f32 %v4944_v7, 0.0  ;;  %v3278_v13 = vmul.f32 %v17141_v19, %v16979_v21  ;;  %v4296_v52 = vmul.f32 %v17185_v10, %v16994_v47  ;;  %v4882_v39 = vadd.f32 %v4818_v23, %v4365_v11  ;;  %v17189_v46 = vpop.permute.xlu0 %2538  ;;  %v20967_v21 = vld [vmem:[#allocation131_spill] sm:$0xff]  ;;  %v17195_v56 = vpop.permute.xlu1 %2548  ;;  %20970 = vst [vmem:[#allocation234_spill] sm:$0xff] %v17205_v58  ;;  %v20971_v11 = vld [vmem:[#allocation134_spill] sm:$0xff] }
 0x362   :  { %v5010_v18 = vmax.f32 %v4946_v54, 0.0  ;;  %v8330_v37 = vsel %vm8309_vm4, %v7868_v30, %v7864_v1  ;;  %v4951_v22 = vadd.f32 %v16559_v24, %v4880_v3  ;;  %v17198_v26 = vadd.f32 %v3276_v9, %v20968_v29  ;;  %v17215_v3 = vld [vmem:[#allocation2 + $0x211] sm:$0xff] }
 0x363   :  { %v5216_v61 = vcombine.high %v5008_v62, %v5008_v62  ;;  %v5223_v4 = vrot.slane %v5008_v62, %v16606_v8  ;;  %3070 = vperm.xlu0 %14469, %v20967_v21   ;;  %v4298_v47 = vmul.f32 %v17185_v10, %v20969_v44  ;;  %v4953_v34 = vadd.f32 %v16559_v24, %v4882_v39 }
 0x364   :  { %v5250_v50 = vcombine.high %v5010_v18, %v5010_v18  ;;  %v5257_v60 = vrot.slane %v5010_v18, %v16606_v8  ;;  %3080 = vperm.xlu1 %14470, %v17178_v45   ;;  %v5015_v16 = vmax.f32 %v4951_v22, 0.0  ;;  %20972 = vst [vmem:[#allocation217_spill] sm:$0xff] %v17215_v3 }
 0x365   :  { %v5230_v53 = vrot.slane %v5216_v61, %v16606_v8  ;;  %v5231_v32 = vcombine.high %v5223_v4, %v5223_v4  ;;  %v12936_v27 = vrot.slane %v5223_v4, 9  ;;  %v17209_v1 = vpop.permute.xlu0 %2573  ;;  %v17212_v7 = vpop.permute.xlu1 %2583 }
 0x366   :  { %v5264_v5 = vrot.slane %v5250_v50, %v16606_v8  ;;  %v5265_v49 = vcombine.high %v5257_v60, %v5257_v60  ;;  %v12944_v17 = vrot.slane %v5257_v60, 9  ;;  %v5335_v24 = vcombine.high %v5015_v16, %v5015_v16 }
 0x367   :  { %v5232_v12 = vcombine.high %v5230_v53, %v5230_v53  ;;  %v12937_v38 = vrot.slane %v5231_v32, 9  ;;  %v12938_v0 = vrot.slane %v5230_v53, 9  ;;  %v7263_v30 = vmax.f32 %v5223_v4, %v12936_v27  ;;  %2558 = vperm.xlu0 %14469, %v20971_v11  }
 0x368   :  { %v5266_v48 = vcombine.high %v5264_v5, %v5264_v5  ;;  %v12945_v14 = vrot.slane %v5265_v49, 9  ;;  %v12946_v42 = vrot.slane %v5264_v5, 9  ;;  %v7271_v9 = vmax.f32 %v5257_v60, %v12944_v17  ;;  %2568 = vperm.xlu1 %14470, %v17205_v58   ;;  %v20973_v60 = vld [vmem:[#allocation135_spill] sm:$0xff] }
 0x369   :  { %v12939_v54 = vrot.slane %v5232_v12, 9  ;;  %v7264_v23 = vmax.f32 %v5231_v32, %v12937_v38  ;;  %v7265_v62 = vmax.f32 %v5230_v53, %v12938_v0  ;;  %v17217_v22 = vpop.permute.xlu0 %3533  ;;  %v17220_v29 = vrot.slane %v5015_v16, %v16606_v8  ;;  %v17226_v53 = vpop.permute.xlu1 %3543  ;;  %v20975_v0 = vld [vmem:[#allocation177_spill] sm:$0xff] }
 0x36a   :  { %v12947_v18 = vrot.slane %v5266_v48, 9  ;;  %v7272_v39 = vmax.f32 %v5265_v49, %v12945_v14  ;;  %v7273_v61 = vmax.f32 %v5264_v5, %v12946_v42  ;;  %v7511_v4 = vmax.f32 %v7263_v30, %v7271_v9  ;;  %v3409_v49 = vld [vmem:[#allocation2 + $0x180] sm:$0xff]  ;;  %v20976_v30 = vld [vmem:[#allocation179_spill] sm:$0xff] }
 0x36b   :  { %v7266_v21 = vmax.f32 %v5232_v12, %v12939_v54  ;;  %v17223_v44 = vrot.slane %v5335_v24, %v16606_v8  ;;  %v5017_v50 = vmax.f32 %v4953_v34, 0.0  ;;  %2593 = vperm.xlu0 %14469, %v20973_v60   ;;  %v8331_v16 = vsel %vm8311_vm5, %v17151_v36, %v8330_v37  ;;  %v20974_v12 = vld [vmem:[#allocation175_spill] sm:$0xff]  ;;  %v20978_v37 = vld [vmem:[#allocation141_spill] sm:$0xff] }
 0x36c   :  { %v7274_v32 = vmax.f32 %v5266_v48, %v12947_v18  ;;  %v7512_v27 = vmax.f32 %v7264_v23, %v7272_v39  ;;  %v7513_v17 = vmax.f32 %v7265_v62, %v7273_v61  ;;  %v7848_v5 = vrot.slane %v7511_v4, %v16643_v33  ;;  %2603 = vperm.xlu1 %14470, %v17215_v3   ;;  %v3411_v48 = vld [vmem:[#allocation2 + $0x198] sm:$0xff]  ;;  %v1875_v60 = vld [vmem:[#allocation2 + $0x270] sm:$0xff] }
 0x36d   :  { %v17233_v38 = vadd.f32 %v3278_v13, %v20974_v12  ;;  %v17236_v34 = vadd.f32 %v4296_v52, %v20975_v0  ;;  %v17239_v11 = vadd.f32 %v4298_v47, %v20976_v30  ;;  %v17245_v23 = vpop.permute.xlu0 %3568  ;;  %v20977_v36 = vld [vmem:[#allocation199_spill] sm:$0xff]  ;;  %v4305_v52 = vmul.f32 %v17185_v10, %v20978_v37  ;;  %v17254_v47 = vld [vmem:[%s20368_s1 + $0x4] ss:$0 sm:$0xff]  ;;  %v17258_v39 = vpop.permute.xlu1 %3578  ;;  %v20983_v30 = vld [vmem:[#allocation178_spill] sm:$0xff] }
 0x36e   :  { %v7514_v14 = vmax.f32 %v7266_v21, %v7274_v32  ;;  %v7852_v42 = vrot.slane %v7512_v27, %v16643_v33  ;;  %v7856_v9 = vrot.slane %v7513_v17, %v16643_v33  ;;  %v8326_v54 = vsel %vm8315_vm7, %v7848_v5, %v17115_v55  ;;  %20979 = vst [vmem:[#allocation181_spill] sm:$0xff] %v17254_v47  ;;  %v20980_v62 = vld [vmem:[#allocation143_spill] sm:$0xff]  ;;  %v20981_v32 = vld [vmem:[#allocation144_spill] sm:$0xff]  ;;  %v17271_v17 = vld [vmem:[%s20368_s1 + $0x6] ss:$0 sm:$0xff] }
 0x36f   :  { %v4303_v13 = vmul.f32 %v17185_v10, %v20977_v36  ;;  %v2756_v24 = vmul.f32 %v17254_v47, %v20980_v62  ;;  %v5369_v18 = vcombine.high %v5017_v50, %v5017_v50  ;;  %3588 = vperm.xlu0 %14469, %v3409_v49   ;;  %v5350_v4 = vcombine.high %v17220_v29, %v17220_v29  ;;  %v20982_v5 = vld [vmem:[#allocation176_spill] sm:$0xff] }
 0x370   :  { %v7860_v55 = vrot.slane %v7514_v14, %v16643_v33  ;;  %v8327_v61 = vsel %vm8317_vm8, %v7852_v42, %v8326_v54  ;;  %v5351_v21 = vcombine.high %v17223_v44, %v17223_v44  ;;  %3598 = vperm.xlu1 %14470, %v3411_v48   ;;  %v2758_v27 = vmul.f32 %v17254_v47, %v20981_v32 }
 0x371   :  { %v3783_v49 = vmul.f32 %v17271_v17, %v20982_v5  ;;  %v8328_v12 = vsel %vm8319_vm9, %v7856_v9, %v8327_v61  ;;  %v5376_v0 = vrot.slane %v5017_v50, %v16606_v8  ;;  %v3785_v14 = vmul.f32 %v17271_v17, %v20983_v30  ;;  %v4528_v36 = vpop.permute.xlu0 %4527  ;;  %v20984_v5 = vld [vmem:[#allocation142_spill] sm:$0xff]  ;;  %v20986_v30 = vld [vmem:[#allocation109_spill] sm:$0xff] }
 0x372   :  { %v3790_v48 = vmul.f32 %v17271_v17, %v17091_v63  ;;  %v3792_v42 = vmul.f32 %v17271_v17, %v17099_v43  ;;  %v8329_v54 = vsel %vm8321_vm10, %v7860_v55, %v8328_v12  ;;  %v4367_v37 = vadd.f32 %v4303_v13, %v17094_v6  ;;  %v4538_v63 = vpop.permute.xlu1 %4537  ;;  %v2894_v6 = vld [vmem:[#allocation2 + $0x18a] sm:$0xff]  ;;  %v20985_v13 = vld [vmem:[#allocation79_spill] sm:$0xff] }
 0x373   :  { %8446 = vst.msk [vmem:[#allocation3 + $0x21] sm:$0xff] %vm7627_vm2, %v8329_v54  ;;  %v12964_v9 = vrot.slane %v17220_v29, 9  ;;  %v5383_v50 = vrot.slane %v5369_v18, %v16606_v8  ;;  %2126 = vperm.xlu0 %14469, %v1875_v60   ;;  %v17290_v62 = vsel %vm8313_vm6, %v17160_v31, %v8331_v16  ;;  %v4369_v61 = vadd.f32 %v4305_v52, %v17107_v41 }
 0x374   :  { %v12965_v43 = vrot.slane %v5350_v4, 9  ;;  %v12966_v55 = vrot.slane %v17223_v44, 9  ;;  %v12967_v32 = vrot.slane %v5351_v21, 9  ;;  %3075 = vperm.xlu1 %14470, %v20984_v5   ;;  %v17296_v12 = vadd.f32 %v2756_v24, %v20985_v13 }
 0x375   :  { %v17299_v18 = vadd.f32 %v2758_v27, %v20986_v30  ;;  %v17302_v60 = vadd.f32 %v3783_v49, %v17110_v25  ;;  %v5384_v31 = vcombine.high %v5376_v0, %v5376_v0  ;;  %v17305_v16 = vadd.f32 %v3785_v14, %v17120_v51  ;;  %v4563_v54 = vpop.permute.xlu0 %4562 }
 0x376   :  { %v17308_v41 = vadd.f32 %v3790_v48, %v17130_v20  ;;  %v17311_v52 = vadd.f32 %v3792_v42, %v17136_v35  ;;  %v2760_v24 = vmul.f32 %v17254_v47, %v17189_v46  ;;  %v17316_v27 = vmax.f32 %v17220_v29, %v12964_v9  ;;  %v4573_v51 = vpop.permute.xlu1 %4572  ;;  %v20987_v48 = vld [vmem:[#allocation174_spill] sm:$0xff] }
 0x377   :  { %v5385_v5 = vcombine.high %v5383_v50, %v5383_v50  ;;  %v12972_v25 = vrot.slane %v5376_v0, 9  ;;  %v2762_v49 = vmul.f32 %v17254_v47, %v17195_v56  ;;  %3085 = vperm.xlu0 %14469, %v2894_v6   ;;  %v17320_v14 = vmax.f32 %v5350_v4, %v12965_v43  ;;  %v2901_v29 = vld [vmem:[#allocation2 + $0x212] sm:$0xff]  ;;  %v20988_v6 = vld [vmem:[#allocation113_spill] sm:$0xff] }
 0x378   :  { %v17323_v20 = vmax.f32 %v17223_v44, %v12966_v55  ;;  %v17325_v35 = vmax.f32 %v5351_v21, %v12967_v32  ;;  %v4813_v46 = vmul.f32 %v17168_v2, %v4528_v36  ;;  %3110 = vperm.xlu1 %14470, %v20987_v48   ;;  %v12973_v42 = vrot.slane %v5384_v31, 9 }
 0x379   :  { %v12974_v9 = vrot.slane %v5383_v50, 9  ;;  %v2767_v13 = vmul.f32 %v17254_v47, %v17209_v1  ;;  %v4815_v56 = vmul.f32 %v17168_v2, %v4538_v63  ;;  %v17333_v4 = vadd.f32 %v2760_v24, %v20988_v6  ;;  %v17339_v43 = vpop.permute.xlu0 %3035  ;;  %v20993_v6 = vld [vmem:[#allocation118_spill] sm:$0xff] }
 0x37a   :  { %v2769_v44 = vmul.f32 %v17254_v47, %v17212_v7  ;;  %v4877_v21 = vadd.f32 %v4813_v46, %v17236_v34  ;;  %v4820_v36 = vmul.f32 %v17168_v2, %v4563_v54  ;;  %v8481_v55 = vld [vmem:[#allocation3 + $0x21] sm:$0xff]  ;;  %v12975_v30 = vrot.slane %v5385_v5, 9  ;;  %v17346_v24 = vpop.permute.xlu1 %3045  ;;  %v20989_v7 = vld [vmem:[#allocation115_spill] sm:$0xff] }
 0x37b   :  { %v8885_v32 = vld [vmem:[#allocation3 + $0x22] sm:$0xff]  ;;  %v17341_v48 = vmax.f32 %v5376_v0, %v12972_v25  ;;  %v4879_v1 = vadd.f32 %v4815_v56, %v17239_v11  ;;  %v4822_v63 = vmul.f32 %v17168_v2, %v4573_v51  ;;  %3120 = vperm.xlu0 %14469, %v2901_v29   ;;  %13730 = vmatprep.mubr.msk.f32.mxu1 %vm7627_vm2, %v8481_v55  ;;  %v17356_v0 = vld [vmem:[%s20369_s2] ss:$0 sm:$0xff] }
 0x37c   :  { %v17349_v34 = vadd.f32 %v2762_v49, %v20989_v7  ;;  %v3787_v54 = vmul.f32 %v17271_v17, %v17217_v22  ;;  %20990 = vst [vmem:[#allocation243_spill] sm:$0xff] %v17356_v0  ;;  %v4948_v11 = vadd.f32 %v17356_v0, %v4877_v21  ;;  %v4884_v25 = vadd.f32 %v4820_v36, %v4367_v37  ;;  %v3928_v51 = vld [vmem:[#allocation2 + $0x199] sm:$0xff] }
 0x37d   :  { %13786 = vmatprep.mubr.msk.f32.mxu0 %vm7627_vm2, %v8885_v32  ;;  %v17360_v46 = vmax.f32 %v5384_v31, %v12973_v42  ;;  %v17362_v29 = vmax.f32 %v5383_v50, %v12974_v9  ;;  %v20991_v49 = vld [vmem:[#allocation116_spill] sm:$0xff]  ;;  %v4950_v22 = vadd.f32 %v17356_v0, %v4879_v1  ;;  %4105 = vperm.xlu1 %14470, %v17147_v57   ;;  %v17373_v36 = vpop.permute.xlu0 %4030  ;;  %v17375_v31 = vld [vmem:[#allocation2 + $0x229] sm:$0xff] }
 0x37e   :  { %v17365_v56 = vadd.f32 %v2767_v13, %v20991_v49  ;;  %v17370_v55 = vadd.f32 %v2769_v44, %v20993_v6  ;;  %v5012_v7 = vmax.f32 %v4948_v11, 0.0  ;;  %v4955_v37 = vadd.f32 %v17356_v0, %v4884_v25  ;;  %20995 = vst [vmem:[#allocation183_spill] sm:$0xff] %v17375_v31  ;;  %v17383_v13 = vpop.permute.xlu1 %4040 }
 0x37f   :  { %v4886_v21 = vadd.f32 %v4822_v63, %v4369_v61  ;;  %v17377_v50 = vmax.f32 %v5385_v5, %v12975_v30  ;;  %v3789_v9 = vmul.f32 %v17271_v17, %v17226_v53  ;;  %v5014_v57 = vmax.f32 %v4950_v22, 0.0  ;;  %4115 = vperm.xlu0 %14469, %v3928_v51   ;;  %v2388_v63 = vld [vmem:[#allocation2 + $0x241] sm:$0xff] }
 0x380   :  { %20992 = vst [vmem:[#allocation244_spill] sm:$0xff] %v17365_v56  ;;  %20994 = vst [vmem:[#allocation182_spill] sm:$0xff] %v17370_v55  ;;  %v17386_v44 = vadd.f32 %v3787_v54, %v17173_v15  ;;  %v5284_v61 = vcombine.high %v5012_v7, %v5012_v7  ;;  %v5291_v32 = vrot.slane %v5012_v7, %v16606_v8  ;;  %v5019_v1 = vmax.f32 %v4955_v37, 0.0 }
 0x381   :  { %v7524_v5 = vmax.f32 %v17320_v14, %v17360_v46  ;;  %v7525_v30 = vmax.f32 %v17323_v20, %v17362_v29  ;;  %v5318_v11 = vcombine.high %v5014_v57, %v5014_v57  ;;  %v5325_v53 = vrot.slane %v5014_v57, %v16606_v8  ;;  %2613 = vperm.xlu1 %14470, %v17375_v31   ;;  %v17397_v49 = vpop.permute.xlu0 %4065 }
 0x382   :  { %20996 = vst [vmem:[#allocation208_spill] sm:$0xff] %v17386_v44  ;;  %v5298_v25 = vrot.slane %v5284_v61, %v16606_v8  ;;  %v5299_v15 = vcombine.high %v5291_v32, %v5291_v32  ;;  %v12952_v54 = vrot.slane %v5291_v32, 9  ;;  %v4957_v51 = vadd.f32 %v17356_v0, %v4886_v21  ;;  %v17403_v20 = vpop.permute.xlu1 %4075  ;;  %v2385_v61 = vld [vmem:[#allocation2 + $0x219] sm:$0xff] }
 0x383   :  { %v5332_v22 = vrot.slane %v5318_v11, %v16606_v8  ;;  %v5333_v6 = vcombine.high %v5325_v53, %v5325_v53  ;;  %v12960_v14 = vrot.slane %v5325_v53, 9  ;;  %v17401_v46 = vrot.slane %v5019_v1, %v16606_v8  ;;  %2623 = vperm.xlu0 %14469, %v2388_v63   ;;  %v2390_v63 = vld [vmem:[#allocation2 + $0x259] sm:$0xff] }
 0x384   :  { %v5300_v29 = vcombine.high %v5298_v25, %v5298_v25  ;;  %v12953_v7 = vrot.slane %v5299_v15, 9  ;;  %v12954_v37 = vrot.slane %v5298_v25, 9  ;;  %v7279_v57 = vmax.f32 %v5291_v32, %v12952_v54 }
 0x385   :  { %v5334_v42 = vcombine.high %v5332_v22, %v5332_v22  ;;  %v12961_v31 = vrot.slane %v5333_v6, 9  ;;  %v12962_v21 = vrot.slane %v5332_v22, 9  ;;  %v7287_v3 = vmax.f32 %v5325_v53, %v12960_v14  ;;  %2598 = vperm.xlu1 %14470, %v17089_v28   ;;  %v17406_v0 = vpop.permute.xlu0 %3055 }
 0x386   :  { %v12955_v11 = vrot.slane %v5300_v29, 9  ;;  %v7280_v58 = vmax.f32 %v5299_v15, %v12953_v7  ;;  %v7281_v59 = vmax.f32 %v5298_v25, %v12954_v37  ;;  %v5403_v47 = vcombine.high %v5019_v1, %v5019_v1  ;;  %v17408_v32 = vpop.permute.xlu1 %3065  ;;  %v2392_v25 = vld [vmem:[#allocation2 + $0x271] sm:$0xff] }
 0x387   :  { %v12963_v44 = vrot.slane %v5334_v42, 9  ;;  %v7288_v55 = vmax.f32 %v5333_v6, %v12961_v31  ;;  %v7289_v56 = vmax.f32 %v5332_v22, %v12962_v21  ;;  %v7519_v2 = vmax.f32 %v7279_v57, %v7287_v3  ;;  %2608 = vperm.xlu0 %14469, %v2385_v61   ;;  %v3417_v21 = vld [vmem:[#allocation2 + $0x210] sm:$0xff] }
 0x388   :  { %v17411_v54 = vadd.f32 %v3789_v9, %v17176_v40  ;;  %v7282_v53 = vmax.f32 %v5300_v29, %v12955_v11  ;;  %v5418_v28 = vcombine.high %v17401_v46, %v17401_v46  ;;  %v5021_v15 = vmax.f32 %v4957_v51, 0.0  ;;  %v3410_v51 = vld [vmem:[#allocation2 + $0x188] sm:$0xff] }
 0x389   :  { %v7290_v1 = vmax.f32 %v5334_v42, %v12963_v44  ;;  %v7520_v14 = vmax.f32 %v7280_v58, %v7288_v55  ;;  %v7521_v7 = vmax.f32 %v7281_v59, %v7289_v56  ;;  %v7880_v37 = vrot.slane %v7519_v2, %v16643_v33  ;;  %2633 = vperm.xlu1 %14470, %v2390_v63   ;;  %v17422_v22 = vpop.permute.xlu0 %3090 }
 0x38a   :  { %v7900_v3 = vrot.slane %v7524_v5, %v16643_v33  ;;  %v3794_v31 = vmul.f32 %v17271_v17, %v17245_v23  ;;  %v3796_v40 = vmul.f32 %v17271_v17, %v17258_v39  ;;  %v5417_v9 = vrot.slane %v5403_v47, %v16606_v8  ;;  %v17428_v56 = vpop.permute.xlu1 %3100  ;;  %v101_v23 = vld [vmem:[%s20367_s0 + $0x1f0] sm:$0xff]  ;;  %v3412_v5 = vld [vmem:[#allocation2 + $0x1a0] sm:$0xff] }
 0x38b   :  { %v7522_v6 = vmax.f32 %v7282_v53, %v7290_v1  ;;  %v7884_v58 = vrot.slane %v7520_v14, %v16643_v33  ;;  %v7888_v59 = vrot.slane %v7521_v7, %v16643_v33  ;;  %v8333_v2 = vsel %vm8315_vm7, %v7880_v37, %v17290_v62  ;;  %2643 = vperm.xlu0 %14469, %v2392_v25  }
 0x38c   :  { %v7526_v47 = vmax.f32 %v17325_v35, %v17377_v50  ;;  %v20997_v39 = vmax.f32 %v17316_v27, %v17341_v48  ;;  %v7904_v42 = vrot.slane %v7525_v30, %v16643_v33  ;;  %v5437_v44 = vcombine.high %v5021_v15, %v5021_v15  ;;  %276 = vst.msk [vmem:[#allocation2 + $0x331] sm:$0xff] %vm103_vm0, %v101_v23 }
 0x38d   :  { %v7892_v62 = vrot.slane %v7522_v6, %v16643_v33  ;;  %v8334_v29 = vsel %vm8317_vm8, %v7884_v58, %v8333_v2  ;;  %v12981_v57 = vrot.slane %v5418_v28, 9  ;;  %v5444_v61 = vrot.slane %v5021_v15, %v16606_v8  ;;  %3593 = vperm.xlu1 %14470, %v3410_v51   ;;  %v17447_v30 = vpop.permute.xlu0 %4050 }
 0x38e   :  { %v7896_v55 = vrot.slane %v20997_v39, %v16643_v33  ;;  %v8335_v50 = vsel %vm8319_vm9, %v7888_v59, %v8334_v29  ;;  %v5419_v27 = vcombine.high %v5417_v9, %v5417_v9  ;;  %v5451_v48 = vrot.slane %v5437_v44, %v16606_v8  ;;  %v17451_v1 = vpop.permute.xlu1 %4060 }
 0x38f   :  { %v8336_v11 = vsel %vm8321_vm10, %v7892_v62, %v8335_v50  ;;  %v12980_v63 = vrot.slane %v17401_v46, 9  ;;  %v5452_v53 = vcombine.high %v5444_v61, %v5444_v61  ;;  %v12988_v25 = vrot.slane %v5444_v61, 9  ;;  %3603 = vperm.xlu0 %14469, %v3412_v5  }
 0x390   :  { %v8337_v35 = vsel %vm8309_vm4, %v7900_v3, %v7896_v55  ;;  %8447 = vst.msk [vmem:[#allocation3 + $0x31] sm:$0xff] %vm7627_vm2, %v8336_v11  ;;  %v12982_v15 = vrot.slane %v5417_v9, 9  ;;  %v5453_v14 = vcombine.high %v5451_v48, %v5451_v48  ;;  %v12990_v7 = vrot.slane %v5451_v48, 9  ;;  %v3419_v3 = vld [vmem:[#allocation2 + $0x228] sm:$0xff] }
 0x391   :  { %v3273_v37 = vmul.f32 %v17141_v19, %v17339_v43  ;;  %v17457_v51 = vadd.f32 %v3794_v31, %v17198_v26  ;;  %v7308_v6 = vmax.f32 %v5418_v28, %v12981_v57  ;;  %v12989_v58 = vrot.slane %v5452_v53, 9  ;;  %3628 = vperm.xlu1 %14470, %v3417_v21   ;;  %v17466_v44 = vpop.permute.xlu0 %4085 }
 0x392   :  { %v3275_v59 = vmul.f32 %v17141_v19, %v17346_v24  ;;  %v7908_v2 = vrot.slane %v7526_v47, %v16643_v33  ;;  %v8338_v23 = vsel %vm8311_vm5, %v7904_v42, %v8337_v35  ;;  %v17464_v39 = vadd.f32 %v3796_v40, %v17233_v38  ;;  %v4096_v5 = vpop.permute.xlu1 %4095  ;;  %v4445_v38 = vld [vmem:[#allocation2 + $0x19a] sm:$0xff]  ;;  %v9126_v40 = vld [vmem:[%s20370_s3 + $0x30] sm:$0xff] }
 0x393   :  { %v12983_v55 = vrot.slane %v5419_v27, 9  ;;  %v7307_v43 = vmax.f32 %v17401_v46, %v12980_v63  ;;  %v12991_v26 = vrot.slane %v5453_v14, 9  ;;  %v7315_v31 = vmax.f32 %v5444_v61, %v12988_v25  ;;  %3638 = vperm.xlu0 %14469, %v3419_v3   ;;  %v9127_v46 = vld [vmem:[%s20370_s3 + $0x38] sm:$0xff]  ;;  %v1879_v25 = vld [vmem:[#allocation2 + $0x2a0] sm:$0xff] }
 0x394   :  { %v7316_v28 = vmax.f32 %v5452_v53, %v12989_v58  ;;  %v7309_v62 = vmax.f32 %v5417_v9, %v12982_v15  ;;  %v7317_v24 = vmax.f32 %v5451_v48, %v12990_v7  ;;  %v17470_v29 = vadd.f32 %v3273_v37, %v17296_v12 }
 0x395   :  { %v4300_v47 = vmul.f32 %v17185_v10, %v17373_v36  ;;  %v17481_v57 = vadd.f32 %v3275_v59, %v17299_v18  ;;  %v4302_v12 = vmul.f32 %v17185_v10, %v17383_v13  ;;  %v4307_v9 = vmul.f32 %v17185_v10, %v17397_v49  ;;  %4622 = vperm.xlu1 %14470, %v17178_v45   ;;  %v17494_v18 = vld [vmem:[#allocation2 + $0x288] sm:$0xff] }
 0x396   :  { %v7532_v42 = vmax.f32 %v7308_v6, %v7316_v28  ;;  %v4309_v36 = vmul.f32 %v17185_v10, %v17403_v20  ;;  %v3277_v61 = vmul.f32 %v17141_v19, %v17406_v0  ;;  %v3279_v35 = vmul.f32 %v17141_v19, %v17408_v32  ;;  %v3554_v50 = vpop.permute.xlu0 %3553  ;;  %v17517_v6 = vld [vmem:[#allocation2 + $0x22a] sm:$0xff] }
 0x397   :  { %v17497_v48 = vsel %vm8313_vm6, %v7908_v2, %v8338_v23  ;;  %v7310_v13 = vmax.f32 %v5419_v27, %v12983_v55  ;;  %v7318_v21 = vmax.f32 %v5453_v14, %v12991_v26  ;;  %v7531_v49 = vmax.f32 %v7307_v43, %v7315_v31  ;;  %v8482_v11 = vld [vmem:[#allocation3 + $0x31] sm:$0xff]  ;;  %4632 = vperm.xlu0 %14469, %v4445_v38   ;;  %v3564_v63 = vpop.permute.xlu1 %3563  ;;  %v20999_v2 = vld [vmem:[#allocation244_spill] sm:$0xff] }
 0x398   :  { %v8886_v45 = vld [vmem:[#allocation3 + $0x32] sm:$0xff]  ;;  %v14148_v20 = vpack.c.bf16 %v9127_v46, %v9126_v40  ;;  %v7533_v53 = vmax.f32 %v7309_v62, %v7317_v24  ;;  %v4364_v0 = vadd.f32 %v4300_v47, %v17302_v60  ;;  %v3284_v32 = vmul.f32 %v17141_v19, %v17422_v22  ;;  %13731 = vmatmul.mubr.msk.f32.gmra.mrb[2].mxu1 %vm7627_vm2, %v8482_v11  ;;  %v2905_v55 = vld [vmem:[#allocation2 + $0x242] sm:$0xff] }
 0x399   :  { %13787 = vmatmul.mubr.msk.f32.gmra.mrb[2].mxu0 %vm7627_vm2, %v8886_v45  ;;  %v7932_v27 = vrot.slane %v7532_v42, %v16643_v33  ;;  %v4366_v15 = vadd.f32 %v4302_v12, %v17305_v16  ;;  %v4371_v14 = vadd.f32 %v4307_v9, %v17308_v41  ;;  %2136 = vperm.xlu1 %14470, %v17494_v18   ;;  %v21000_v28 = vld [vmem:[#allocation182_spill] sm:$0xff]  ;;  %v1876_v40 = vld [vmem:[#allocation2 + $0x278] sm:$0xff] }
 0x39a   :  { %14149 = vmatprep.subr.bf16.mxu0 %v14148_v20  ;;  %v4373_v7 = vadd.f32 %v4309_v36, %v17311_v52  ;;  %v17510_v60 = vadd.f32 %v3277_v61, %v17333_v4  ;;  %v17513_v22 = vadd.f32 %v3279_v35, %v17349_v34  ;;  %v3286_v37 = vmul.f32 %v17141_v19, %v17428_v56  ;;  %v4548_v3 = vpop.permute.xlu0 %4547  ;;  %v20998_v52 = vld [vmem:[#allocation233_spill] sm:$0xff]  ;;  %v21001_v42 = vld [vmem:[#allocation208_spill] sm:$0xff] }
 0x39b   :  { %14151 = vmatpush3.bf16.msra.mxu0 %v14148_v20  ;;  %v7534_v16 = vmax.f32 %v7310_v13, %v7318_v21  ;;  %v7928_v41 = vrot.slane %v7531_v49, %v16643_v33  ;;  %v4304_v58 = vmul.f32 %v17185_v10, %v17447_v30  ;;  %v4817_v59 = vmul.f32 %v20998_v52, %v4548_v3  ;;  %v4558_v4 = vpop.permute.xlu1 %4557  ;;  %v1881_v21 = vld [vmem:[#allocation2 + $0x2b8] sm:$0xff]  ;;  %v21003_v3 = vld [vmem:[#allocation181_spill] sm:$0xff] }
 0x39c   :  { %2146 = vperm.xlu0 %14469, %v1879_v25   ;;  %v7936_v34 = vrot.slane %v7533_v53, %v16643_v33  ;;  %v17525_v23 = vadd.f32 %v3284_v32, %v20999_v2  ;;  %v4306_v19 = vmul.f32 %v17185_v10, %v17451_v1  ;;  %v4819_v56 = vmul.f32 %v20998_v52, %v4558_v4  ;;  %v1883_v25 = vld [vmem:[#allocation2 + $0x2d0] sm:$0xff] }
 0x39d   :  { %v8344_v43 = vsel %vm8309_vm4, %v7932_v27, %v7928_v41  ;;  %v4311_v30 = vmul.f32 %v17185_v10, %v17466_v44  ;;  %v4313_v26 = vmul.f32 %v17185_v10, %v4096_v5  ;;  %v4881_v31 = vadd.f32 %v4817_v59, %v4364_v0  ;;  %3130 = vperm.xlu1 %14470, %v17517_v6   ;;  %v21002_v44 = vld [vmem:[#allocation243_spill] sm:$0xff] }
 0x39e   :  { %v17536_v62 = vadd.f32 %v3286_v37, %v21000_v28  ;;  %v3791_v24 = vmul.f32 %v17271_v17, %v3554_v50  ;;  %v3793_v1 = vmul.f32 %v17271_v17, %v3564_v63  ;;  %v4883_v47 = vadd.f32 %v4819_v56, %v4366_v15  ;;  %v4583_v38 = vpop.permute.xlu0 %4582  ;;  %v21004_v28 = vld [vmem:[#allocation180_spill] sm:$0xff] }
 0x39f   :  { %v7940_v46 = vrot.slane %v7534_v16, %v16643_v33  ;;  %v17542_v12 = vadd.f32 %v4304_v58, %v21001_v42  ;;  %v4952_v5 = vadd.f32 %v21002_v44, %v4881_v31  ;;  %v4824_v9 = vmul.f32 %v20998_v52, %v4583_v38  ;;  %v4593_v36 = vpop.permute.xlu1 %4592 }
 0x3a0   :  { %3140 = vperm.xlu0 %14469, %v2905_v55   ;;  %v8345_v61 = vsel %vm8311_vm5, %v7936_v34, %v8344_v43  ;;  %v17548_v35 = vadd.f32 %v4306_v19, %v17411_v54  ;;  %v4954_v50 = vadd.f32 %v21002_v44, %v4883_v47  ;;  %v4826_v13 = vmul.f32 %v20998_v52, %v4593_v36  ;;  %v2902_v55 = vld [vmem:[#allocation2 + $0x21a] sm:$0xff] }
 0x3a1   :  { %v17553_v49 = vadd.f32 %v4311_v30, %v17457_v51  ;;  %v17556_v11 = vadd.f32 %v4313_v26, %v17464_v39  ;;  %v5016_v45 = vmax.f32 %v4952_v5, 0.0  ;;  %v4888_v63 = vadd.f32 %v4824_v9, %v4371_v14  ;;  %2131 = vperm.xlu1 %14470, %v1876_v40  }
 0x3a2   :  { %v17559_v20 = vadd.f32 %v3791_v24, %v17470_v29  ;;  %v17562_v54 = vadd.f32 %v3793_v1, %v17481_v57  ;;  %v5018_v53 = vmax.f32 %v4954_v50, 0.0  ;;  %v4890_v0 = vadd.f32 %v4826_v13, %v4373_v7  ;;  %v2579_v32 = vpop.permute.xlu0 %2578 }
 0x3a3   :  { %v5352_v27 = vcombine.high %v5016_v45, %v5016_v45  ;;  %v5359_v51 = vrot.slane %v5016_v45, %v16606_v8  ;;  %v4959_v15 = vadd.f32 %v21002_v44, %v4888_v63  ;;  %v17566_v39 = vpop.permute.xlu1 %2588  ;;  %v17569_v14 = vsel %vm8313_vm6, %v7940_v46, %v8345_v61  ;;  %v2907_v46 = vld [vmem:[#allocation2 + $0x25a] sm:$0xff]  ;;  %v2909_v63 = vld [vmem:[#allocation2 + $0x272] sm:$0xff] }
 0x3a4   :  { %2156 = vperm.xlu0 %14469, %v1881_v21   ;;  %v5386_v29 = vcombine.high %v5018_v53, %v5018_v53  ;;  %v5393_v37 = vrot.slane %v5018_v53, %v16606_v8  ;;  %v4961_v57 = vadd.f32 %v21002_v44, %v4890_v0  ;;  %v17574_v7 = vmul.f32 %v21003_v3, %v2579_v32 }
 0x3a5   :  { %v5366_v16 = vrot.slane %v5352_v27, %v16606_v8  ;;  %v5367_v41 = vcombine.high %v5359_v51, %v5359_v51  ;;  %v12968_v58 = vrot.slane %v5359_v51, 9  ;;  %v5023_v59 = vmax.f32 %v4959_v15, 0.0  ;;  %2166 = vperm.xlu1 %14470, %v1883_v25  }
 0x3a6   :  { %v5400_v4 = vrot.slane %v5386_v29, %v16606_v8  ;;  %v5401_v34 = vcombine.high %v5393_v37, %v5393_v37  ;;  %v12976_v2 = vrot.slane %v5393_v37, 9  ;;  %v5025_v19 = vmax.f32 %v4961_v57, 0.0  ;;  %v17578_v56 = vpop.permute.xlu0 %3573 }
 0x3a7   :  { %v5368_v43 = vcombine.high %v5366_v16, %v5366_v16  ;;  %v12969_v30 = vrot.slane %v5367_v41, 9  ;;  %v12970_v26 = vrot.slane %v5366_v16, 9  ;;  %v7295_v31 = vmax.f32 %v5359_v51, %v12968_v58  ;;  %v3584_v24 = vpop.permute.xlu1 %3583 }
 0x3a8   :  { %3115 = vperm.xlu0 %14469, %v21004_v28   ;;  %v5402_v1 = vcombine.high %v5400_v4, %v5400_v4  ;;  %v12977_v47 = vrot.slane %v5401_v34, 9  ;;  %v12978_v38 = vrot.slane %v5400_v4, 9  ;;  %v7303_v40 = vmax.f32 %v5393_v37, %v12976_v2 }
 0x3a9   :  { %v12971_v42 = vrot.slane %v5368_v43, 9  ;;  %v7296_v5 = vmax.f32 %v5367_v41, %v12969_v30  ;;  %v7297_v9 = vmax.f32 %v5366_v16, %v12970_v26  ;;  %v5471_v36 = vcombine.high %v5023_v59, %v5023_v59  ;;  %3125 = vperm.xlu1 %14470, %v2902_v55  }
 0x3aa   :  { %v12979_v61 = vrot.slane %v5402_v1, 9  ;;  %v7304_v50 = vmax.f32 %v5401_v34, %v12977_v47  ;;  %v7305_v13 = vmax.f32 %v5400_v4, %v12978_v38  ;;  %v7527_v21 = vmax.f32 %v7295_v31, %v7303_v40  ;;  %v3609_v45 = vpop.permute.xlu0 %3608 }
 0x3ab   :  { %v7298_v53 = vmax.f32 %v5368_v43, %v12971_v42  ;;  %v5478_v0 = vrot.slane %v5023_v59, %v16606_v8  ;;  %v5485_v32 = vrot.slane %v5471_v36, %v16606_v8  ;;  %v5505_v25 = vcombine.high %v5025_v19, %v5025_v19  ;;  %v3619_v27 = vpop.permute.xlu1 %3618  ;;  %v3929_v43 = vld [vmem:[#allocation2 + $0x1a1] sm:$0xff] }
 0x3ac   :  { %3150 = vperm.xlu0 %14469, %v2907_v46   ;;  %v7306_v51 = vmax.f32 %v5402_v1, %v12979_v61  ;;  %v7528_v15 = vmax.f32 %v7296_v5, %v7304_v50  ;;  %v7529_v29 = vmax.f32 %v7297_v9, %v7305_v13  ;;  %v7912_v37 = vrot.slane %v7527_v21, %v16643_v33  ;;  %v21005_v1 = vld [vmem:[#allocation234_spill] sm:$0xff] }
 0x3ad   :  { %v5486_v57 = vcombine.high %v5478_v0, %v5478_v0  ;;  %v5487_v16 = vcombine.high %v5485_v32, %v5485_v32  ;;  %v12996_v41 = vrot.slane %v5478_v0, 9  ;;  %v12998_v58 = vrot.slane %v5485_v32, 9  ;;  %3160 = vperm.xlu1 %14470, %v2909_v63   ;;  %v21006_v63 = vld [vmem:[#allocation117_spill] sm:$0xff] }
 0x3ae   :  { %v7530_v4 = vmax.f32 %v7298_v53, %v7306_v51  ;;  %v7916_v34 = vrot.slane %v7528_v15, %v16643_v33  ;;  %v7920_v59 = vrot.slane %v7529_v29, %v16643_v33  ;;  %v8340_v2 = vsel %vm8315_vm7, %v7912_v37, %v17497_v48  ;;  %v4568_v55 = vpop.permute.xlu0 %4567 }
 0x3af   :  { %v12997_v30 = vrot.slane %v5486_v57, 9  ;;  %v12999_v26 = vrot.slane %v5487_v16, 9  ;;  %v7323_v31 = vmax.f32 %v5478_v0, %v12996_v41  ;;  %v2770_v28 = vmul.f32 %v21003_v3, %v17566_v39  ;;  %v4578_v47 = vpop.permute.xlu1 %4577  ;;  %v21008_v41 = vld [vmem:[#allocation119_spill] sm:$0xff] }
 0x3b0   :  { %4110 = vperm.xlu0 %14469, %v21005_v1   ;;  %v7924_v38 = vrot.slane %v7530_v4, %v16643_v33  ;;  %v8341_v40 = vsel %vm8317_vm8, %v7916_v34, %v8340_v2  ;;  %v5512_v46 = vrot.slane %v5025_v19, %v16606_v8  ;;  %v5519_v42 = vrot.slane %v5505_v25, %v16606_v8 }
 0x3b1   :  { %v8342_v48 = vsel %vm8319_vm9, %v7920_v59, %v8341_v40  ;;  %v7324_v5 = vmax.f32 %v5486_v57, %v12997_v30  ;;  %v7325_v9 = vmax.f32 %v5485_v32, %v12998_v58  ;;  %v7326_v36 = vmax.f32 %v5487_v16, %v12999_v26  ;;  %4120 = vperm.xlu1 %14470, %v3929_v43   ;;  %v21007_v32 = vld [vmem:[#allocation217_spill] sm:$0xff]  ;;  %v17607_v57 = vld [vmem:[#allocation2 + $0x231] sm:$0xff] }
 0x3b2   :  { %v8343_v61 = vsel %vm8321_vm10, %v7924_v38, %v8342_v48  ;;  %v5520_v39 = vcombine.high %v5512_v46, %v5512_v46  ;;  %v5521_v3 = vcombine.high %v5519_v42, %v5519_v42  ;;  %v13004_v50 = vrot.slane %v5512_v46, 9  ;;  %v4603_v13 = vpop.permute.xlu0 %4602  ;;  %v2389_v43 = vld [vmem:[#allocation2 + $0x249] sm:$0xff] }
 0x3b3   :  { %8448 = vst.msk [vmem:[#allocation3 + $0x41] sm:$0xff] %vm7627_vm2, %v8343_v61  ;;  %v13006_v21 = vrot.slane %v5519_v42, 9  ;;  %v17600_v19 = vadd.f32 %v17574_v7, %v21006_v63  ;;  %v3795_v53 = vmul.f32 %v17271_v17, %v17578_v56  ;;  %v3797_v0 = vmul.f32 %v17271_v17, %v3584_v24  ;;  %v4613_v25 = vpop.permute.xlu1 %4612  ;;  %v21009_v24 = vld [vmem:[#allocation183_spill] sm:$0xff]  ;;  %v17630_v38 = vld [vmem:[#allocation2 + $0x289] sm:$0xff]  ;;  %v2396_v61 = vld [vmem:[#allocation2 + $0x2a1] sm:$0xff] }
 0x3b4   :  { %4145 = vperm.xlu0 %14469, %v21007_v32   ;;  %v13005_v51 = vrot.slane %v5520_v39, 9  ;;  %v13007_v15 = vrot.slane %v5521_v3, 9  ;;  %v7331_v29 = vmax.f32 %v5512_v46, %v13004_v50  ;;  %v3802_v37 = vmul.f32 %v17271_v17, %v3609_v45 }
 0x3b5   :  { %v7333_v16 = vmax.f32 %v5519_v42, %v13006_v21  ;;  %v17610_v58 = vadd.f32 %v2770_v28, %v21008_v41  ;;  %v17613_v7 = vadd.f32 %v3795_v53, %v17510_v60  ;;  %v3804_v56 = vmul.f32 %v17271_v17, %v3619_v27  ;;  %4155 = vperm.xlu1 %14470, %v21009_v24   ;;  %v17653_v21 = vld [vmem:[%s20368_s1 + $0x5] ss:$0 sm:$0xff] }
 0x3b6   :  { %v7332_v4 = vmax.f32 %v5520_v39, %v13005_v51  ;;  %v7334_v34 = vmax.f32 %v5521_v3, %v13007_v15  ;;  %v7539_v59 = vmax.f32 %v7323_v31, %v7331_v29  ;;  %v17618_v2 = vadd.f32 %v3797_v0, %v17513_v22  ;;  %v4071_v45 = vpop.permute.xlu0 %4070 }
 0x3b7   :  { %v7541_v30 = vmax.f32 %v7325_v9, %v7333_v16  ;;  %v17621_v26 = vadd.f32 %v3802_v37, %v17525_v23  ;;  %v4821_v28 = vmul.f32 %v20998_v52, %v4568_v55  ;;  %v4823_v60 = vmul.f32 %v20998_v52, %v4578_v47  ;;  %v4081_v17 = vpop.permute.xlu1 %4080  ;;  %v3423_v16 = vld [vmem:[#allocation2 + $0x258] sm:$0xff] }
 0x3b8   :  { %2618 = vperm.xlu0 %14469, %v17607_v57   ;;  %v7540_v27 = vmax.f32 %v7324_v5, %v7332_v4  ;;  %v7542_v1 = vmax.f32 %v7326_v36, %v7334_v34  ;;  %v17627_v31 = vadd.f32 %v3804_v56, %v17536_v62  ;;  %v4828_v22 = vmul.f32 %v20998_v52, %v4603_v13 }
 0x3b9   :  { %v7960_v40 = vrot.slane %v7539_v59, %v16643_v33  ;;  %v4885_v23 = vadd.f32 %v4821_v28, %v17542_v12  ;;  %v4887_v55 = vadd.f32 %v4823_v60, %v17548_v35  ;;  %v4830_v47 = vmul.f32 %v20998_v52, %v4613_v25  ;;  %2628 = vperm.xlu1 %14470, %v2389_v43  }
 0x3ba   :  { %v7964_v46 = vrot.slane %v7540_v27, %v16643_v33  ;;  %v7968_v42 = vrot.slane %v7541_v30, %v16643_v33  ;;  %v4892_v62 = vadd.f32 %v4828_v22, %v17553_v49  ;;  %v4308_v48 = vmul.f32 %v17185_v10, %v4071_v45  ;;  %v3096_v5 = vpop.permute.xlu0 %3095  ;;  %v8483_v9 = vld [vmem:[#allocation3 + $0x41] sm:$0xff] }
 0x3bb   :  { %v8887_v36 = vld [vmem:[#allocation3 + $0x42] sm:$0xff]  ;;  %v4956_v39 = vadd.f32 %v21002_v44, %v4885_v23  ;;  %v4958_v12 = vadd.f32 %v21002_v44, %v4887_v55  ;;  %v4894_v35 = vadd.f32 %v4830_v47, %v17556_v11  ;;  %v4310_v52 = vmul.f32 %v17185_v10, %v4081_v17  ;;  %v3106_v3 = vpop.permute.xlu1 %3105  ;;  %13733 = vmatprep.mubr.msk.f32.mxu1 %vm7627_vm2, %v8483_v9  ;;  %v2393_v23 = vld [vmem:[#allocation2 + $0x279] sm:$0xff] }
 0x3bc   :  { %2653 = vperm.xlu0 %14469, %v17630_v38   ;;  %v17646_v50 = vrot.slane %v7542_v1, %v16643_v33  ;;  %v8351_v49 = vsel %vm8309_vm4, %v7964_v46, %v7960_v40  ;;  %v4963_v13 = vadd.f32 %v21002_v44, %v4892_v62  ;;  %v3285_v63 = vmul.f32 %v17653_v21, %v3096_v5  ;;  %v3421_v10 = vld [vmem:[#allocation2 + $0x240] sm:$0xff] }
 0x3bd   :  { %v5020_v11 = vmax.f32 %v4956_v39, 0.0  ;;  %v5022_v53 = vmax.f32 %v4958_v12, 0.0  ;;  %v4965_v0 = vadd.f32 %v21002_v44, %v4894_v35  ;;  %v17659_v32 = vadd.f32 %v4308_v48, %v17559_v20  ;;  %13789 = vmatprep.mubr.msk.f32.mxu0 %vm7627_vm2, %v8887_v36  ;;  %2663 = vperm.xlu1 %14470, %v2396_v61   ;;  %v2391_v45 = vld [vmem:[#allocation2 + $0x261] sm:$0xff]  ;;  %v2398_v61 = vld [vmem:[#allocation2 + $0x2b9] sm:$0xff] }
 0x3be   :  { %v17663_v25 = vsel %vm8311_vm5, %v7968_v42, %v8351_v49  ;;  %v5027_v51 = vmax.f32 %v4963_v13, 0.0  ;;  %v17666_v15 = vadd.f32 %v4310_v52, %v17562_v54  ;;  %v17669_v29 = vadd.f32 %v3285_v63, %v17600_v19  ;;  %v17671_v37 = vpop.permute.xlu0 %4090 }
 0x3bf   :  { %v5420_v41 = vcombine.high %v5020_v11, %v5020_v11  ;;  %v5427_v20 = vrot.slane %v5020_v11, %v16606_v8  ;;  %v5454_v56 = vcombine.high %v5022_v53, %v5022_v53  ;;  %v5461_v24 = vrot.slane %v5022_v53, %v16606_v8  ;;  %v17675_v4 = vpop.permute.xlu1 %4100  ;;  %v2400_v11 = vld [vmem:[#allocation2 + $0x2d1] sm:$0xff] }
 0x3c0   :  { %3648 = vperm.xlu0 %14469, %v3421_v10   ;;  %v5539_v34 = vcombine.high %v5027_v51, %v5027_v51  ;;  %v5546_v59 = vrot.slane %v5027_v51, %v16606_v8  ;;  %v17678_v54 = vmax.f32 %v4965_v0, 0.0  ;;  %v3287_v19 = vmul.f32 %v17653_v21, %v3106_v3 }
 0x3c1   :  { %v5434_v43 = vrot.slane %v5420_v41, %v16606_v8  ;;  %v5435_v30 = vcombine.high %v5427_v20, %v5427_v20  ;;  %v12984_v28 = vrot.slane %v5427_v20, 9  ;;  %v5468_v60 = vrot.slane %v5454_v56, %v16606_v8  ;;  %3658 = vperm.xlu1 %14470, %v3423_v16  }
 0x3c2   :  { %v5469_v17 = vcombine.high %v5461_v24, %v5461_v24  ;;  %v12992_v27 = vrot.slane %v5461_v24, 9  ;;  %v5553_v1 = vrot.slane %v5539_v34, %v16606_v8  ;;  %v5554_v22 = vcombine.high %v5546_v59, %v5546_v59  ;;  %v4126_v40 = vpop.permute.xlu0 %4125 }
 0x3c3   :  { %v5436_v55 = vcombine.high %v5434_v43, %v5434_v43  ;;  %v12985_v47 = vrot.slane %v5435_v30, 9  ;;  %v12986_v46 = vrot.slane %v5434_v43, 9  ;;  %v7311_v42 = vmax.f32 %v5427_v20, %v12984_v28  ;;  %v17684_v62 = vpop.permute.xlu1 %4135 }
 0x3c4   :  { %2638 = vperm.xlu0 %14469, %v2391_v45   ;;  %v5470_v48 = vcombine.high %v5468_v60, %v5468_v60  ;;  %v12993_v5 = vrot.slane %v5469_v17, 9  ;;  %v12994_v9 = vrot.slane %v5468_v60, 9  ;;  %v7319_v36 = vmax.f32 %v5461_v24, %v12992_v27  ;;  %v3418_v45 = vld [vmem:[#allocation2 + $0x218] sm:$0xff] }
 0x3c5   :  { %v12987_v39 = vrot.slane %v5436_v55, 9  ;;  %v7312_v12 = vmax.f32 %v5435_v30, %v12985_v47  ;;  %v7313_v35 = vmax.f32 %v5434_v43, %v12986_v46  ;;  %v5555_v52 = vcombine.high %v5553_v1, %v5553_v1  ;;  %2648 = vperm.xlu1 %14470, %v2393_v23   ;;  %v3420_v46 = vld [vmem:[#allocation2 + $0x230] sm:$0xff] }
 0x3c6   :  { %v12995_v3 = vrot.slane %v5470_v48, 9  ;;  %v7320_v49 = vmax.f32 %v5469_v17, %v12993_v5  ;;  %v7321_v13 = vmax.f32 %v5468_v60, %v12994_v9  ;;  %v7535_v63 = vmax.f32 %v7311_v42, %v7319_v36  ;;  %v4588_v10 = vpop.permute.xlu0 %4587  ;;  %v3425_v36 = vld [vmem:[#allocation2 + $0x270] sm:$0xff] }
 0x3c7   :  { %v7314_v53 = vmax.f32 %v5436_v55, %v12987_v39  ;;  %v13012_v0 = vrot.slane %v5546_v59, 9  ;;  %v13013_v51 = vrot.slane %v5554_v22, 9  ;;  %v13014_v16 = vrot.slane %v5553_v1, 9  ;;  %v4598_v41 = vpop.permute.xlu1 %4597 }
 0x3c8   :  { %2673 = vperm.xlu0 %14469, %v2398_v61   ;;  %v7322_v20 = vmax.f32 %v5470_v48, %v12995_v3  ;;  %v7536_v56 = vmax.f32 %v7312_v12, %v7320_v49  ;;  %v7537_v24 = vmax.f32 %v7313_v35, %v7321_v13  ;;  %v7944_v34 = vrot.slane %v7535_v63, %v16643_v33 }
 0x3c9   :  { %v13015_v43 = vrot.slane %v5555_v52, 9  ;;  %v17687_v30 = vmax.f32 %v5546_v59, %v13012_v0  ;;  %v17689_v28 = vmax.f32 %v5554_v22, %v13013_v51  ;;  %v17692_v60 = vadd.f32 %v3287_v19, %v17610_v58  ;;  %2683 = vperm.xlu1 %14470, %v2400_v11   ;;  %v17705_v58 = vld [vmem:[%s20368_s1 + $0x7] ss:$0 sm:$0xff] }
 0x3ca   :  { %v7538_v17 = vmax.f32 %v7314_v53, %v7322_v20  ;;  %v7948_v27 = vrot.slane %v7536_v56, %v16643_v33  ;;  %v7952_v23 = vrot.slane %v7537_v24, %v16643_v33  ;;  %v8347_v55 = vsel %vm8315_vm7, %v7944_v34, %v17569_v14  ;;  %v3614_v47 = vpop.permute.xlu0 %3613  ;;  %v102_v14 = vld [vmem:[%s20367_s0 + $0x1f8] sm:$0xff]  ;;  %v4444_v20 = vld [vmem:[#allocation2 + $0x18a] sm:$0xff] }
 0x3cb   :  { %v7341_v42 = vmax.f32 %v5553_v1, %v13014_v16  ;;  %v5573_v59 = vcombine.high %v17678_v54, %v17678_v54  ;;  %v5580_v22 = vrot.slane %v17678_v54, %v16606_v8  ;;  %v4312_v19 = vmul.f32 %v17705_v58, %v17671_v37  ;;  %v3624_v48 = vpop.permute.xlu1 %3623  ;;  %277 = vst.msk [vmem:[#allocation2 + $0x339] sm:$0xff] %vm103_vm0, %v102_v14 }
 0x3cc   :  { %3633 = vperm.xlu0 %14469, %v3418_v45   ;;  %v7956_v1 = vrot.slane %v7538_v17, %v16643_v33  ;;  %v8348_v5 = vsel %vm8317_vm8, %v7948_v27, %v8347_v55  ;;  %v4314_v54 = vmul.f32 %v17705_v58, %v17675_v4  ;;  %v4319_v9 = vmul.f32 %v17705_v58, %v4126_v40 }
 0x3cd   :  { %v8349_v37 = vsel %vm8319_vm9, %v7952_v23, %v8348_v5  ;;  %v5587_v61 = vrot.slane %v5573_v59, %v16606_v8  ;;  %v5588_v39 = vcombine.high %v5580_v22, %v5580_v22  ;;  %v13020_v12 = vrot.slane %v5580_v22, 9  ;;  %3643 = vperm.xlu1 %14470, %v3420_v46  }
 0x3ce   :  { %v8350_v35 = vsel %vm8321_vm10, %v7956_v1, %v8349_v37  ;;  %v7342_v3 = vmax.f32 %v5555_v52, %v13015_v43  ;;  %v4376_v49 = vadd.f32 %v4312_v19, %v17613_v7  ;;  %v17723_v13 = vadd.f32 %v4314_v54, %v17618_v2  ;;  %v4608_v4 = vpop.permute.xlu0 %4607  ;;  %v17734_v7 = vld [vmem:[%s20368_s1 + $0x8] ss:$0 sm:$0xff] }
 0x3cf   :  { %8449 = vst.msk [vmem:[#allocation3 + $0x51] sm:$0xff] %vm7627_vm2, %v8350_v35  ;;  %v5589_v40 = vcombine.high %v5587_v61, %v5587_v61  ;;  %v13021_v63 = vrot.slane %v5588_v39, 9  ;;  %v13022_v11 = vrot.slane %v5587_v61, 9  ;;  %v7347_v53 = vmax.f32 %v5580_v22, %v13020_v12  ;;  %v4618_v0 = vpop.permute.xlu1 %4617 }
 0x3d0   :  { %3668 = vperm.xlu0 %14469, %v3425_v36   ;;  %v17727_v51 = vadd.f32 %v4319_v9, %v17621_v26  ;;  %v4321_v52 = vmul.f32 %v17705_v58, %v17684_v62  ;;  %v4825_v2 = vmul.f32 %v17734_v7, %v4588_v10  ;;  %v4827_v16 = vmul.f32 %v17734_v7, %v4598_v41  ;;  %v17750_v10 = vld [vmem:[%s20368_s1 + $0x6] ss:$0 sm:$0xff] }
 0x3d1   :  { %v13023_v56 = vrot.slane %v5589_v40, 9  ;;  %v7348_v24 = vmax.f32 %v5588_v39, %v13021_v63  ;;  %v7349_v34 = vmax.f32 %v5587_v61, %v13022_v11  ;;  %v7547_v45 = vmax.f32 %v17687_v30, %v7347_v53  ;;  %3678 = vperm.xlu1 %14470, %v17494_v18   ;;  %v4446_v30 = vld [vmem:[#allocation2 + $0x1a2] sm:$0xff] }
 0x3d2   :  { %v4889_v26 = vadd.f32 %v4825_v2, %v17659_v32  ;;  %v17744_v62 = vsel %vm8313_vm6, %v17646_v50, %v17663_v25  ;;  %v4891_v43 = vadd.f32 %v4827_v16, %v17666_v15  ;;  %v3803_v41 = vmul.f32 %v17750_v10, %v3614_v47  ;;  %v17753_v17 = vpop.permute.xlu0 %4642  ;;  %v1880_v2 = vld [vmem:[#allocation2 + $0x2a8] sm:$0xff] }
 0x3d3   :  { %v7350_v18 = vmax.f32 %v5589_v40, %v13023_v56  ;;  %v7548_v32 = vmax.f32 %v17689_v28, %v7348_v24  ;;  %v7549_v27 = vmax.f32 %v7341_v42, %v7349_v34  ;;  %v17757_v23 = vadd.f32 %v4321_v52, %v17627_v31  ;;  %v17759_v50 = vpop.permute.xlu1 %4652  ;;  %v4451_v31 = vld [vmem:[#allocation2 + $0x212] sm:$0xff] }
 0x3d4   :  { %4627 = vperm.xlu0 %14469, %v4444_v20   ;;  %v7992_v25 = vrot.slane %v7547_v45, %v16643_v33  ;;  %v4960_v15 = vadd.f32 %v21002_v44, %v4889_v26  ;;  %v4962_v55 = vadd.f32 %v21002_v44, %v4891_v43  ;;  %v3805_v47 = vmul.f32 %v17750_v10, %v3624_v48  ;;  %v17798_v40 = vld [vmem:[#allocation2 + $0x290] sm:$0xff] }
 0x3d5   :  { %v7550_v46 = vmax.f32 %v7342_v3, %v7350_v18  ;;  %v7996_v59 = vrot.slane %v7548_v32, %v16643_v33  ;;  %v8000_v28 = vrot.slane %v7549_v27, %v16643_v33  ;;  %v4829_v42 = vmul.f32 %v17734_v7, %v4608_v4  ;;  %4637 = vperm.xlu1 %14470, %v4446_v30   ;;  %v17793_v3 = vld [vmem:[%s20369_s2] ss:$0 sm:$0xff]  ;;  %v17808_v32 = vld [vmem:[#allocation2 + $0x2e8] sm:$0xff] }
 0x3d6   :  { %v5024_v22 = vmax.f32 %v4960_v15, 0.0  ;;  %v5026_v19 = vmax.f32 %v4962_v55, 0.0  ;;  %v17769_v14 = vadd.f32 %v3803_v41, %v17669_v29  ;;  %v8484_v1 = vld [vmem:[#allocation3 + $0x51] sm:$0xff]  ;;  %v4831_v44 = vmul.f32 %v17734_v7, %v4618_v0  ;;  %v17772_v54 = vpop.permute.xlu0 %4130 }
 0x3d7   :  { %v8888_v5 = vld [vmem:[#allocation3 + $0x52] sm:$0xff]  ;;  %v8358_v48 = vsel %vm8309_vm4, %v7996_v59, %v7992_v25  ;;  %v17776_v9 = vadd.f32 %v3805_v47, %v17692_v60  ;;  %v4893_v36 = vadd.f32 %v4829_v42, %v4376_v49  ;;  %13734 = vmatmul.mubr.msk.f32.gmra.mrb[4].mxu1 %vm7627_vm2, %v8484_v1  ;;  %v17780_v37 = vpop.permute.xlu1 %4140  ;;  %v17783_v29 = vrot.slane %v7550_v46, %v16643_v33  ;;  %v1887_v46 = vld [vmem:[#allocation2 + $0x300] sm:$0xff] }
 0x3d8   :  { %13790 = vmatmul.mubr.msk.f32.gmra.mrb[4].mxu0 %vm7627_vm2, %v8888_v5  ;;  %v5488_v61 = vcombine.high %v5024_v22, %v5024_v22  ;;  %v5495_v39 = vrot.slane %v5024_v22, %v16606_v8  ;;  %v5522_v12 = vcombine.high %v5026_v19, %v5026_v19  ;;  %4662 = vperm.xlu0 %14469, %v4451_v31   ;;  %vm14581_vm0 = vmmov 0  }
 0x3d9   :  { %v17787_v35 = vsel %vm8311_vm5, %v8000_v28, %v8358_v48  ;;  %v5529_v60 = vrot.slane %v5026_v19, %v16606_v8  ;;  %v4964_v49 = vadd.f32 %v17793_v3, %v4893_v36  ;;  %v4895_v4 = vadd.f32 %v4831_v44, %v17723_v13  ;;  %4672 = vperm.xlu1 %14470, %v17517_v6  }
 0x3da   :  { %v5502_v63 = vrot.slane %v5488_v61, %v16606_v8  ;;  %v5503_v11 = vcombine.high %v5495_v39, %v5495_v39  ;;  %v13000_v53 = vrot.slane %v5495_v39, 9  ;;  %v5536_v0 = vrot.slane %v5522_v12, %v16606_v8  ;;  %v17802_v52 = vpop.permute.xlu0 %4647  ;;  %v17818_v12 = vld [vmem:[#allocation2 + $0x232] sm:$0xff] }
 0x3db   :  { %v5537_v16 = vcombine.high %v5529_v60, %v5529_v60  ;;  %v13008_v20 = vrot.slane %v5529_v60, 9  ;;  %v5028_v56 = vmax.f32 %v4964_v49, 0.0  ;;  %v4966_v24 = vadd.f32 %v17793_v3, %v4895_v4  ;;  %v17805_v34 = vpop.permute.xlu1 %4657 }
 0x3dc   :  { %v5504_v13 = vcombine.high %v5502_v63, %v5502_v63  ;;  %v13001_v6 = vrot.slane %v5503_v11, 9  ;;  %v13002_v45 = vrot.slane %v5502_v63, 9  ;;  %v7327_v26 = vmax.f32 %v5495_v39, %v13000_v53  ;;  %2141 = vperm.xlu0 %14469, %v17798_v40   ;;  %v2906_v53 = vld [vmem:[#allocation2 + $0x24a] sm:$0xff] }
 0x3dd   :  { %v5538_v43 = vcombine.high %v5536_v0, %v5536_v0  ;;  %v13009_v41 = vrot.slane %v5537_v16, 9  ;;  %v13010_v30 = vrot.slane %v5536_v0, 9  ;;  %v7335_v18 = vmax.f32 %v5529_v60, %v13008_v20  ;;  %2151 = vperm.xlu1 %14470, %v1880_v2  }
 0x3de   :  { %v13003_v27 = vrot.slane %v5504_v13, 9  ;;  %v7328_v25 = vmax.f32 %v5503_v11, %v13001_v6  ;;  %v7329_v15 = vmax.f32 %v5502_v63, %v13002_v45  ;;  %v5556_v55 = vcombine.high %v5028_v56, %v5028_v56  ;;  %v17810_v47 = vpop.permute.xlu0 %2553 }
 0x3df   :  { %v13011_v59 = vrot.slane %v5538_v43, 9  ;;  %v7336_v28 = vmax.f32 %v5537_v16, %v13009_v41  ;;  %v7337_v42 = vmax.f32 %v5536_v0, %v13010_v30  ;;  %v7543_v31 = vmax.f32 %v7327_v26, %v7335_v18  ;;  %v17812_v22 = vpop.permute.xlu1 %2563 }
 0x3e0   :  { %v7330_v19 = vmax.f32 %v5504_v13, %v13003_v27  ;;  %v5563_v1 = vrot.slane %v5028_v56, %v16606_v8  ;;  %v5570_v5 = vrot.slane %v5556_v55, %v16606_v8  ;;  %v5030_v44 = vmax.f32 %v4966_v24, 0.0  ;;  %2176 = vperm.xlu0 %14469, %v17808_v32  }
 0x3e1   :  { %v7338_v48 = vmax.f32 %v5538_v43, %v13011_v59  ;;  %v7544_v36 = vmax.f32 %v7328_v25, %v7336_v28  ;;  %v7545_v61 = vmax.f32 %v7329_v15, %v7337_v42  ;;  %v7976_v39 = vrot.slane %v7543_v31, %v16643_v33  ;;  %2186 = vperm.xlu1 %14470, %v1887_v46  }
 0x3e2   :  { %v5571_v60 = vcombine.high %v5563_v1, %v5563_v1  ;;  %v5572_v49 = vcombine.high %v5570_v5, %v5570_v5  ;;  %v13016_v4 = vrot.slane %v5563_v1, 9  ;;  %v13018_v63 = vrot.slane %v5570_v5, 9  ;;  %v17820_v11 = vpop.permute.xlu0 %3070 }
 0x3e3   :  { %v7546_v0 = vmax.f32 %v7330_v19, %v7338_v48  ;;  %v7980_v2 = vrot.slane %v7544_v36, %v16643_v33  ;;  %v7984_v16 = vrot.slane %v7545_v61, %v16643_v33  ;;  %v8354_v20 = vsel %vm8315_vm7, %v7976_v39, %v17744_v62  ;;  %v17826_v56 = vpop.permute.xlu1 %3080  ;;  %v17835_v62 = vld [vmem:[#allocation2 + $0x28a] sm:$0xff]  ;;  %v3938_v61 = vld [vmem:[#allocation2 + $0x241] sm:$0xff] }
 0x3e4   :  { %v13017_v24 = vrot.slane %v5571_v60, 9  ;;  %v13019_v13 = vrot.slane %v5572_v49, 9  ;;  %v7343_v6 = vmax.f32 %v5563_v1, %v13016_v4  ;;  %v8360_v45 = vsel %vm8313_vm6, %v17783_v29, %v17787_v35  ;;  %3135 = vperm.xlu0 %14469, %v17818_v12   ;;  %v2913_v35 = vld [vmem:[#allocation2 + $0x2a2] sm:$0xff] }
 0x3e5   :  { %v7988_v26 = vrot.slane %v7546_v0, %v16643_v33  ;;  %v8355_v43 = vsel %vm8317_vm8, %v7980_v2, %v8354_v20  ;;  %v5590_v41 = vcombine.high %v5030_v44, %v5030_v44  ;;  %v5597_v30 = vrot.slane %v5030_v44, %v16606_v8  ;;  %3145 = vperm.xlu1 %14470, %v2906_v53  }
 0x3e6   :  { %v8356_v18 = vsel %vm8319_vm9, %v7984_v16, %v8355_v43  ;;  %v7344_v27 = vmax.f32 %v5571_v60, %v13017_v24  ;;  %v7345_v25 = vmax.f32 %v5570_v5, %v13018_v63  ;;  %v4836_v15 = vmul.f32 %v17734_v7, %v17753_v17  ;;  %v17840_v29 = vpop.permute.xlu0 %2558 }
 0x3e7   :  { %v8357_v55 = vsel %vm8321_vm10, %v7988_v26, %v8356_v18  ;;  %v5604_v46 = vrot.slane %v5590_v41, %v16606_v8  ;;  %v5605_v59 = vcombine.high %v5597_v30, %v5597_v30  ;;  %v13024_v28 = vrot.slane %v5597_v30, 9  ;;  %v17844_v42 = vpop.permute.xlu1 %2568 }
 0x3e8   :  { %8450 = vst.msk [vmem:[#allocation3 + $0x61] sm:$0xff] %vm7627_vm2, %v8357_v55  ;;  %v7346_v31 = vmax.f32 %v5572_v49, %v13019_v13  ;;  %v4900_v19 = vadd.f32 %v4836_v15, %v17727_v51  ;;  %v4838_v1 = vmul.f32 %v17734_v7, %v17759_v50  ;;  %v4320_v17 = vmul.f32 %v17705_v58, %v17772_v54  ;;  %v3940_v54 = vld [vmem:[#allocation2 + $0x259] sm:$0xff] }
 0x3e9   :  { %3170 = vperm.xlu0 %14469, %v17835_v62   ;;  %v5606_v5 = vcombine.high %v5604_v46, %v5604_v46  ;;  %v13025_v44 = vrot.slane %v5605_v59, 9  ;;  %v13026_v48 = vrot.slane %v5604_v46, 9  ;;  %v7351_v36 = vmax.f32 %v5597_v30, %v13024_v28  ;;  %3180 = vperm.xlu1 %14470, %v2913_v35   ;;  %v17871_v15 = vld [vmem:[#allocation2 + $0x2c0] sm:$0xff] }
 0x3ea   :  { %v4971_v39 = vadd.f32 %v17793_v3, %v4900_v19  ;;  %v4902_v60 = vadd.f32 %v4838_v1, %v17757_v23  ;;  %v4384_v51 = vadd.f32 %v4320_v17, %v17769_v14  ;;  %v4322_v50 = vmul.f32 %v17705_v58, %v17780_v37  ;;  %v17858_v49 = vpop.permute.xlu0 %2593 }
 0x3eb   :  { %v13027_v4 = vrot.slane %v5606_v5, 9  ;;  %v7352_v63 = vmax.f32 %v5605_v59, %v13025_v44  ;;  %v7353_v53 = vmax.f32 %v5604_v46, %v13026_v48  ;;  %v7551_v0 = vmax.f32 %v7343_v6, %v7351_v36  ;;  %v17860_v2 = vpop.permute.xlu1 %2603  ;;  %v1884_v59 = vld [vmem:[#allocation2 + $0x2d8] sm:$0xff] }
 0x3ec   :  { %v5035_v16 = vmax.f32 %v4971_v39, 0.0  ;;  %v4973_v20 = vadd.f32 %v17793_v3, %v4902_v60  ;;  %v4837_v23 = vmul.f32 %v17734_v7, %v17802_v52  ;;  %v4839_v14 = vmul.f32 %v17734_v7, %v17805_v34 }
 0x3ed   :  { %4165 = vperm.xlu0 %14469, %v3938_v61   ;;  %v7354_v37 = vmax.f32 %v5606_v5, %v13027_v4  ;;  %v7552_v24 = vmax.f32 %v7344_v27, %v7352_v63  ;;  %v7553_v13 = vmax.f32 %v7345_v25, %v7353_v53  ;;  %v8008_v26 = vrot.slane %v7551_v0, %v16643_v33  ;;  %v1891_v0 = vld [vmem:[#allocation2 + $0x330] sm:$0xff] }
 0x3ee   :  { %4175 = vperm.xlu1 %14470, %v3940_v54   ;;  %v5675_v43 = vcombine.high %v5035_v16, %v5035_v16  ;;  %v5682_v6 = vrot.slane %v5035_v16, %v16606_v8  ;;  %v5037_v41 = vmax.f32 %v4973_v20, 0.0  ;;  %v4901_v30 = vadd.f32 %v4837_v23, %v4384_v51  ;;  %v17869_v18 = vpop.permute.xlu0 %3588  ;;  %v17889_v51 = vld [vmem:[#allocation2 + $0x318] sm:$0xff] }
 0x3ef   :  { %v7554_v52 = vmax.f32 %v7346_v31, %v7354_v37  ;;  %v8012_v35 = vrot.slane %v7552_v24, %v16643_v33  ;;  %v8016_v34 = vrot.slane %v7553_v13, %v16643_v33  ;;  %v8361_v27 = vsel %vm8315_vm7, %v8008_v26, %v8360_v45  ;;  %v8485_v25 = vld [vmem:[#allocation3 + $0x61] sm:$0xff]  ;;  %v17876_v46 = vpop.permute.xlu1 %3598 }
 0x3f0   :  { %v8889_v55 = vld [vmem:[#allocation3 + $0x62] sm:$0xff]  ;;  %v5689_v28 = vrot.slane %v5675_v43, %v16606_v8  ;;  %v5690_v19 = vcombine.high %v5682_v6, %v5682_v6  ;;  %v13044_v1 = vrot.slane %v5682_v6, 9  ;;  %v5709_v17 = vcombine.high %v5037_v41, %v5037_v41  ;;  %13736 = vmatprep.mubr.msk.f32.mxu1 %vm7627_vm2, %v8485_v25 }
 0x3f1   :  { %13792 = vmatprep.mubr.msk.f32.mxu0 %vm7627_vm2, %v8889_v55  ;;  %v8020_v31 = vrot.slane %v7554_v52, %v16643_v33  ;;  %v8362_v5 = vsel %vm8317_vm8, %v8012_v35, %v8361_v27  ;;  %v5716_v45 = vrot.slane %v5037_v41, %v16606_v8  ;;  %v4972_v44 = vadd.f32 %v17793_v3, %v4901_v30  ;;  %v17900_v27 = vld [vmem:[#allocation2 + $0x262] sm:$0xff] }
 0x3f2   :  { %2161 = vperm.xlu0 %14469, %v17871_v15   ;;  %v8363_v48 = vsel %vm8319_vm9, %v8016_v34, %v8362_v5  ;;  %v5691_v36 = vcombine.high %v5689_v28, %v5689_v28  ;;  %v13045_v61 = vrot.slane %v5690_v19, 9  ;;  %v13046_v39 = vrot.slane %v5689_v28, 9  ;;  %2171 = vperm.xlu1 %14470, %v1884_v59   ;;  %v17887_v60 = vpop.permute.xlu0 %2126 }
 0x3f3   :  { %21010 = vst [vmem:[#allocation221_spill] sm:$0xff] %v17887_v60  ;;  %v8364_v54 = vsel %vm8321_vm10, %v8020_v31, %v8363_v48  ;;  %v5723_v4 = vrot.slane %v5709_v17, %v16606_v8  ;;  %v5724_v63 = vcombine.high %v5716_v45, %v5716_v45  ;;  %v17893_v53 = vpop.permute.xlu1 %3075  ;;  %v13052_v23 = vrot.slane %v5716_v45, 9 }
 0x3f4   :  { %8451 = vst.msk [vmem:[#allocation3 + $0x71] sm:$0xff] %vm7627_vm2, %v8364_v54  ;;  %v13047_v16 = vrot.slane %v5691_v36, 9  ;;  %v7372_v20 = vmax.f32 %v5690_v19, %v13045_v61  ;;  %v4386_v37 = vadd.f32 %v4322_v50, %v17776_v9  ;;  %v5036_v43 = vmax.f32 %v4972_v44, 0.0  ;;  %v17904_v50 = vld [vmem:[#allocation2 + $0x27a] sm:$0xff] }
 0x3f5   :  { %v5725_v24 = vcombine.high %v5723_v4, %v5723_v4  ;;  %v13053_v13 = vrot.slane %v5724_v63, 9  ;;  %v13054_v26 = vrot.slane %v5723_v4, 9  ;;  %v7371_v41 = vmax.f32 %v5682_v6, %v13044_v1  ;;  %21011 = vst [vmem:[#allocation184_spill] sm:$0xff] %v17904_v50  ;;  %v8487_v61 = vld [vmem:[#allocation3 + $0xa1] sm:$0xff] }
 0x3f6   :  { %2196 = vperm.xlu0 %14469, %v17889_v51   ;;  %v7373_v30 = vmax.f32 %v5689_v28, %v13046_v39  ;;  %v7379_v52 = vmax.f32 %v5716_v45, %v13052_v23  ;;  %v4903_v35 = vadd.f32 %v4839_v14, %v4386_v37  ;;  %2206 = vperm.xlu1 %14470, %v1891_v0   ;;  %v17898_v34 = vpop.permute.xlu0 %3085  ;;  %v8891_v39 = vld [vmem:[#allocation3 + $0xa2] sm:$0xff] }
 0x3f7   :  { %v13055_v25 = vrot.slane %v5725_v24, 9  ;;  %v7380_v55 = vmax.f32 %v5724_v63, %v13053_v13  ;;  %v7381_v59 = vmax.f32 %v5723_v4, %v13054_v26  ;;  %v5692_v19 = vcombine.high %v5036_v43, %v5036_v43  ;;  %v17902_v9 = vpop.permute.xlu1 %3110  ;;  %v17920_v13 = vld [vmem:[#allocation2 + $0x2d2] sm:$0xff] }
 0x3f8   :  { %v5699_v17 = vrot.slane %v5036_v43, %v16606_v8  ;;  %v4974_v6 = vadd.f32 %v17793_v3, %v4903_v35  ;;  %v7374_v28 = vmax.f32 %v5691_v36, %v13047_v16  ;;  %v7563_v5 = vmax.f32 %v7371_v41, %v7379_v52  ;;  %v17913_v16 = vld [vmem:[#allocation2 + $0x2ba] sm:$0xff]  ;;  %21012 = vst [vmem:[#allocation185_spill] sm:$0xff] %v17920_v13 }
 0x3f9   :  { %v7564_v1 = vmax.f32 %v7372_v20, %v7380_v55  ;;  %v5706_v14 = vrot.slane %v5692_v19, %v16606_v8  ;;  %v7382_v31 = vmax.f32 %v5725_v24, %v13055_v25  ;;  %v7565_v54 = vmax.f32 %v7373_v30, %v7381_v59 }
 0x3fa   :  { %3155 = vperm.xlu0 %14469, %v17900_v27   ;;  %v5707_v45 = vcombine.high %v5699_v17, %v5699_v17  ;;  %v5038_v44 = vmax.f32 %v4974_v6, 0.0  ;;  %3165 = vperm.xlu1 %14470, %v17904_v50   ;;  %v17911_v48 = vpop.permute.xlu0 %3120  ;;  %v13048_v63 = vrot.slane %v5699_v17, 9  ;;  %v8056_v30 = vrot.slane %v7563_v5, %v16643_v33 }
 0x3fb   :  { %v5708_v4 = vcombine.high %v5706_v14, %v5706_v14  ;;  %v8486_v0 = vld [vmem:[#allocation3 + $0x71] sm:$0xff]  ;;  %v8060_v20 = vrot.slane %v7564_v1, %v16643_v33  ;;  %v13050_v23 = vrot.slane %v5706_v14, 9  ;;  %v7566_v41 = vmax.f32 %v7374_v28, %v7382_v31  ;;  %v3935_v1 = vld [vmem:[#allocation2 + $0x219] sm:$0xff] }
 0x3fc   :  { %v8890_v36 = vld [vmem:[#allocation3 + $0x72] sm:$0xff]  ;;  %v5726_v37 = vcombine.high %v5038_v44, %v5038_v44  ;;  %13737 = vmatmul.mubr.msk.f32.gmra.mrb[6].mxu1 %vm7627_vm2, %v8486_v0  ;;  %v17918_v24 = vpop.permute.xlu1 %4105  ;;  %v13049_v26 = vrot.slane %v5707_v45, 9  ;;  %v5733_v43 = vrot.slane %v5038_v44, %v16606_v8  ;;  %v8064_v55 = vrot.slane %v7565_v54, %v16643_v33 }
 0x3fd   :  { %13793 = vmatmul.mubr.msk.f32.gmra.mrb[6].mxu0 %vm7627_vm2, %v8890_v36  ;;  %13739 = vmatprep.mubr.msk.f32.mxu1 %vm7627_vm2, %v8487_v61  ;;  %v13051_v52 = vrot.slane %v5708_v4, 9  ;;  %v7375_v59 = vmax.f32 %v5699_v17, %v13048_v63  ;;  %v8372_v44 = vsel %vm8309_vm4, %v8060_v20, %v8056_v30  ;;  %v7377_v28 = vmax.f32 %v5706_v14, %v13050_v23  ;;  %v3942_v14 = vld [vmem:[#allocation2 + $0x271] sm:$0xff] }
 0x3fe   :  { %13795 = vmatprep.mubr.msk.f32.mxu0 %vm7627_vm2, %v8891_v39  ;;  %v5740_v35 = vrot.slane %v5726_v37, %v16606_v8  ;;  %3190 = vperm.xlu0 %14469, %v17913_v16   ;;  %v17928_v25 = vpop.permute.xlu0 %4115  ;;  %v5741_v19 = vcombine.high %v5733_v43, %v5733_v43  ;;  %v13056_v6 = vrot.slane %v5733_v43, 9  ;;  %v7376_v39 = vmax.f32 %v5707_v45, %v13049_v26 }
 0x3ff   :  { %3200 = vperm.xlu1 %14470, %v17920_v13   ;;  %v8068_v37 = vrot.slane %v7566_v41, %v16643_v33  ;;  %v7378_v60 = vmax.f32 %v5708_v4, %v13051_v52  ;;  %v8373_v13 = vsel %vm8311_vm5, %v8064_v55, %v8372_v44 }
 0x400   :  { %v5742_v31 = vcombine.high %v5740_v35, %v5740_v35  ;;  %v13058_v5 = vrot.slane %v5740_v35, 9  ;;  %v17933_v61 = vpop.permute.xlu1 %2613  ;;  %v13057_v0 = vrot.slane %v5741_v19, 9  ;;  %v7383_v36 = vmax.f32 %v5733_v43, %v13056_v6  ;;  %v17955_v6 = vld [vmem:[#allocation2 + $0x2a9] sm:$0xff] }
 0x401   :  { %v8374_v4 = vsel %vm8313_vm6, %v8068_v37, %v8373_v13  ;;  %21016 = vst [vmem:[#allocation189_spill] sm:$0xff] %v17955_v6 }
 0x402   :  { %v13059_v54 = vrot.slane %v5742_v31, 9  ;;  %v7385_v17 = vmax.f32 %v5740_v35, %v13058_v5  ;;  %4150 = vperm.xlu0 %14469, %v3935_v1   ;;  %v17936_v63 = vpop.permute.xlu0 %2623  ;;  %v7384_v50 = vmax.f32 %v5741_v19, %v13057_v0  ;;  %v7567_v20 = vmax.f32 %v7375_v59, %v7383_v36  ;;  %v17950_v59 = vld [vmem:[#allocation2 + $0x291] sm:$0xff]  ;;  %v3424_v36 = vld [vmem:[#allocation2 + $0x260] sm:$0xff] }
 0x403   :  { %4160 = vperm.xlu1 %14470, %v17607_v57  }
 0x404   :  { %v7386_v23 = vmax.f32 %v5742_v31, %v13059_v54  ;;  %v7569_v30 = vmax.f32 %v7377_v28, %v7385_v17  ;;  %v17940_v45 = vpop.permute.xlu1 %2598  ;;  %v7568_v26 = vmax.f32 %v7376_v39, %v7384_v50  ;;  %v8072_v43 = vrot.slane %v7567_v20, %v16643_v33  ;;  %v17969_v31 = vld [vmem:[#allocation2 + $0x301] sm:$0xff] }
 0x405   :  { %21013 = vst [vmem:[#allocation186_spill] sm:$0xff] %v17940_v45  ;;  %21018 = vst [vmem:[#allocation191_spill] sm:$0xff] %v17969_v31  ;;  %v3422_v39 = vld [vmem:[#allocation2 + $0x248] sm:$0xff]  ;;  %v3429_v20 = vld [vmem:[#allocation2 + $0x2a0] sm:$0xff] }
 0x406   :  { %v7570_v41 = vmax.f32 %v7378_v60, %v7386_v23  ;;  %v8080_v52 = vrot.slane %v7569_v30, %v16643_v33  ;;  %4185 = vperm.xlu0 %14469, %v3942_v14   ;;  %v17945_v35 = vpop.permute.xlu0 %2608  ;;  %v8076_v55 = vrot.slane %v7568_v26, %v16643_v33  ;;  %v8375_v57 = vsel %vm8315_vm7, %v8072_v43, %v8374_v4  ;;  %v9110_v14 = vld [vmem:[#allocation3 + $0x10] sm:$0xff]  ;;  %v3431_v30 = vld [vmem:[#allocation2 + $0x2b8] sm:$0xff]  ;;  %v9111_v43 = vld [vmem:[#allocation3 + $0x20] sm:$0xff] }
 0x407   :  { %21014 = vst [vmem:[#allocation187_spill] sm:$0xff] %v17945_v35  ;;  %4195 = vperm.xlu1 %14470, %v17630_v38   ;;  %v17964_v38 = vld [vmem:[#allocation2 + $0x2e9] sm:$0xff]  ;;  %v21127_v45 = vld [vmem:[#allocation96_spill] sm:$0xff] }
 0x408   :  { %v8084_v50 = vrot.slane %v7570_v41, %v16643_v33  ;;  %v17953_v19 = vpop.permute.xlu1 %2633  ;;  %v8376_v60 = vsel %vm8317_vm8, %v8076_v55, %v8375_v57  ;;  %v4455_v4 = vld [vmem:[#allocation2 + $0x242] sm:$0xff]  ;;  %v9112_v41 = vld [vmem:[#allocation3 + $0x30] sm:$0xff]  ;;  %v4457_v55 = vld [vmem:[#allocation2 + $0x25a] sm:$0xff] }
 0x409   :  { %21015 = vst [vmem:[#allocation188_spill] sm:$0xff] %v17953_v19  ;;  %v8377_v13 = vsel %vm8319_vm9, %v8080_v52, %v8376_v60  ;;  %v17992_v60 = vld [vmem:[#allocation2 + $0x2c1] sm:$0xff]  ;;  %v3950_v19 = vld [vmem:[#allocation2 + $0x2d1] sm:$0xff] }
 0x40a   :  { %2658 = vperm.xlu0 %14469, %v17950_v59   ;;  %v17960_v1 = vpop.permute.xlu0 %2643  ;;  %v8378_v44 = vsel %vm8321_vm10, %v8084_v50, %v8377_v13  ;;  %v9113_v50 = vld [vmem:[#allocation3 + $0x40] sm:$0xff]  ;;  %21021 = vst [vmem:[#allocation194_spill] sm:$0xff] %v17992_v60  ;;  %v9114_v13 = vld [vmem:[#allocation3 + $0x50] sm:$0xff]  ;;  %v14529_v35 = vld [vmem:[#allocation2 + $0x2a8] sm:$0xff] }
 0x40b   :  { %21017 = vst [vmem:[#allocation190_spill] sm:$0xff] %v17960_v1  ;;  %2668 = vperm.xlu1 %14470, %v17955_v6   ;;  %8453 = vst.msk [vmem:[#allocation3 + $0xb1] sm:$0xff] %vm7627_vm2, %v8378_v44 }
 0x40c   :  { %v17967_v28 = vpop.permute.xlu1 %3593 }
 0x40e   :  { %2693 = vperm.xlu0 %14469, %v17964_v38   ;;  %v17972_v5 = vpop.permute.xlu0 %3603 }
 0x40f   :  { %2703 = vperm.xlu1 %14470, %v17969_v31   ;;  %v4452_v31 = vld [vmem:[#allocation2 + $0x21a] sm:$0xff] }
 0x410   :  { %v17975_v0 = vpop.permute.xlu1 %3628 }
 0x412   :  { %3653 = vperm.xlu0 %14469, %v3422_v39   ;;  %v17977_v37 = vpop.permute.xlu0 %3638  ;;  %v8488_v54 = vld [vmem:[#allocation3 + $0xb1] sm:$0xff]  ;;  %v17997_v39 = vld [vmem:[#allocation2 + $0x2d9] sm:$0xff] }
 0x413   :  { %v8892_v17 = vld [vmem:[#allocation3 + $0xb2] sm:$0xff]  ;;  %3663 = vperm.xlu1 %14470, %v3424_v36   ;;  %13740 = vmatmul.mubr.msk.f32.gmra.mrb[8].mxu1 %vm7627_vm2, %v8488_v54  ;;  %21023 = vst [vmem:[#allocation196_spill] sm:$0xff] %v17997_v39  ;;  %v9115_v54 = vld [vmem:[#allocation3 + $0x60] sm:$0xff] }
 0x414   :  { %13796 = vmatmul.mubr.msk.f32.gmra.mrb[8].mxu0 %vm7627_vm2, %v8892_v17  ;;  %v17981_v23 = vpop.permute.xlu1 %4622  ;;  %v18004_v17 = vld [vmem:[#allocation2 + $0x319] sm:$0xff] }
 0x415   :  { %13811 = vmatprep.mubr.msk.f32.mxu0 %vm7627_vm2, %v9110_v14  ;;  %21025 = vst [vmem:[#allocation198_spill] sm:$0xff] %v18004_v17 }
 0x416   :  { %3688 = vperm.xlu0 %14469, %v3429_v20   ;;  %v17984_v26 = vpop.permute.xlu0 %4632  ;;  %v9116_v20 = vld [vmem:[#allocation3 + $0x70] sm:$0xff] }
 0x417   :  { %3698 = vperm.xlu1 %14470, %v3431_v30   ;;  %v2408_v30 = vld [vmem:[#allocation2 + $0x331] sm:$0xff] }
 0x418   :  { %13812 = vmatmul.mubr.msk.f32.vlgmr.msra.gmra.mrb[0].mxu0 %vm7627_vm2, %v9111_v43  ;;  %v17987_v52 = vpop.permute.xlu1 %2136 }
 0x419   :  { %21019 = vst [vmem:[#allocation192_spill] sm:$0xff] %v17987_v52  ;;  %13814 = vmatprep.mubr.msk.f32.mxu0 %vm7627_vm2, %v9112_v41  ;;  %v21040_v52 = vld [vmem:[#allocation202_spill] sm:$0xff] }
 0x41a   :  { %4682 = vperm.xlu0 %14469, %v4455_v4   ;;  %v3426_v4 = vld [vmem:[#allocation2 + $0x278] sm:$0xff] }
 0x41b   :  { %v17990_v57 = vpop.permute.xlu0 %2146  ;;  %4692 = vperm.xlu1 %14470, %v4457_v55  }
 0x41c   :  { %21020 = vst [vmem:[#allocation193_spill] sm:$0xff] %v17990_v57  ;;  %13815 = vmatmul.mubr.msk.f32.gmra.mrb[2].mxu0 %vm7627_vm2, %v9113_v50  ;;  %v17995_v44 = vpop.permute.xlu1 %3130  ;;  %v3433_v50 = vld [vmem:[#allocation2 + $0x2d0] sm:$0xff]  ;;  %v21039_v57 = vld [vmem:[#allocation204_spill] sm:$0xff] }
 0x41d   :  { %21022 = vst [vmem:[#allocation195_spill] sm:$0xff] %v17995_v44  ;;  %13817 = vmatprep.mubr.msk.f32.mxu0 %vm7627_vm2, %v9114_v13  ;;  %v18055_v44 = vld [vmem:[%s20368_s1 + $0x3] ss:$0 sm:$0xff] }
 0x41e   :  { %2678 = vperm.xlu0 %14469, %v17992_v60  }
 0x41f   :  { %v18001_v36 = vpop.permute.xlu0 %3140  ;;  %2688 = vperm.xlu1 %14470, %v17997_v39  }
 0x420   :  { %21024 = vst [vmem:[#allocation197_spill] sm:$0xff] %v18001_v36  ;;  %13818 = vmatmul.mubr.msk.f32.gmra.mrb[4].mxu0 %vm7627_vm2, %v9115_v54  ;;  %v18007_v14 = vpop.permute.xlu1 %2131  ;;  %v18023_v54 = vld [vmem:[%s20368_s1 + $0x1] ss:$0 sm:$0xff]  ;;  %v21038_v36 = vld [vmem:[#allocation137_spill] sm:$0xff] }
 0x421   :  { %21026 = vst [vmem:[#allocation200_spill] sm:$0xff] %v18007_v14  ;;  %13820 = vmatprep.mubr.msk.f32.mxu0 %vm7627_vm2, %v9116_v20  ;;  %v21031_v20 = vld [vmem:[#allocation75_spill] sm:$0xff] }
 0x422   :  { %2713 = vperm.xlu0 %14469, %v18004_v17   ;;  %v1214_v14 = vmul.f32 %v18023_v54, %v21031_v20  ;;  %v18041_v17 = vld [vmem:[%s20368_s1 + $0x2] ss:$0 sm:$0xff]  ;;  %v21035_v20 = vld [vmem:[#allocation139_spill] sm:$0xff] }
 0x423   :  { %v18011_v43 = vpop.permute.xlu0 %2156  ;;  %2723 = vperm.xlu1 %14470, %v2408_v30  }
 0x424   :  { %21027 = vst [vmem:[#allocation201_spill] sm:$0xff] %v18011_v43  ;;  %v18013_v41 = vpop.permute.xlu1 %2166  ;;  %v21034_v43 = vld [vmem:[#allocation73_spill] sm:$0xff] }
 0x425   :  { %21028 = vst [vmem:[#allocation206_spill] sm:$0xff] %v18013_v41  ;;  %v1212_v39 = vmul.f32 %v18023_v54, %v21034_v43  ;;  %v1729_v43 = vmul.f32 %v18041_v17, %v21038_v36  ;;  %v18066_v36 = vld [vmem:[%s20368_s1 + $0x4] ss:$0 sm:$0xff] }
 0x426   :  { %3673 = vperm.xlu0 %14469, %v3426_v4   ;;  %v18032_v4 = vld [vmem:[%s20368_s1] ss:$0 sm:$0xff] }
 0x427   :  { %v18015_v55 = vpop.permute.xlu0 %3115  ;;  %3683 = vperm.xlu1 %14470, %v17798_v40   ;;  %v21033_v40 = vld [vmem:[#allocation12_spill] sm:$0xff] }
 0x428   :  { %21029 = vst [vmem:[#allocation207_spill] sm:$0xff] %v18015_v55  ;;  %v18018_v13 = vpop.permute.xlu1 %3125  ;;  %v697_v41 = vmul.f32 %v18032_v4, %v21033_v40 }
 0x429   :  { %21030 = vst [vmem:[#allocation209_spill] sm:$0xff] %v18018_v13  ;;  %v21037_v13 = vld [vmem:[#allocation10_spill] sm:$0xff] }
 0x42a   :  { %3708 = vperm.xlu0 %14469, %v3433_v50   ;;  %v1731_v50 = vmul.f32 %v18041_v17, %v21035_v20  ;;  %v695_v55 = vmul.f32 %v18032_v4, %v21037_v13  ;;  %v1278_v40 = vadd.f32 %v1214_v14, %v697_v41  ;;  %v2248_v20 = vmul.f32 %v18055_v44, %v21039_v57  ;;  %v4459_v41 = vld [vmem:[#allocation2 + $0x272] sm:$0xff] }
 0x42b   :  { %v18027_v30 = vpop.permute.xlu0 %3150  ;;  %3718 = vperm.xlu1 %14470, %v17808_v32   ;;  %v2246_v13 = vmul.f32 %v18055_v44, %v21040_v52  ;;  %v2765_v14 = vmul.f32 %v18066_v36, %v17812_v22  ;;  %v3282_v52 = vmul.f32 %v17653_v21, %v17826_v56  ;;  %v18082_v22 = vld [vmem:[%s20368_s1 + $0x5] ss:$0 sm:$0xff]  ;;  %v18093_v56 = vld [vmem:[#allocation2 + $0x308] sm:$0xff] }
 0x42c   :  { %21032 = vst [vmem:[#allocation218_spill] sm:$0xff] %v18027_v30  ;;  %v18046_v30 = vpop.permute.xlu1 %3160  ;;  %v1276_v60 = vadd.f32 %v1212_v39, %v695_v55  ;;  %v2763_v39 = vmul.f32 %v18066_v36, %v17810_v47  ;;  %v18089_v47 = vld [vmem:[#allocation2 + $0x2f0] sm:$0xff]  ;;  %21041 = vst [vmem:[#allocation210_spill] sm:$0xff] %v18093_v56 }
 0x42d   :  { %21036 = vst [vmem:[#allocation250_spill] sm:$0xff] %v18046_v30  ;;  %v1795_v30 = vadd.f32 %v1731_v50, %v1278_v40 }
 0x42e   :  { %4667 = vperm.xlu0 %14469, %v4452_v31   ;;  %v1793_v31 = vadd.f32 %v1729_v43, %v1276_v60  ;;  %v3800_v60 = vmul.f32 %v17750_v10, %v17876_v46  ;;  %v3798_v43 = vmul.f32 %v17750_v10, %v17869_v18 }
 0x42f   :  { %v18059_v32 = vpop.permute.xlu0 %4110  ;;  %4677 = vperm.xlu1 %14470, %v17818_v12   ;;  %v2312_v1 = vadd.f32 %v2248_v20, %v1795_v30  ;;  %v3280_v12 = vmul.f32 %v18082_v22, %v17820_v11  ;;  %v4317_v20 = vmul.f32 %v17705_v58, %v17928_v25 }
 0x430   :  { %v18071_v57 = vpop.permute.xlu1 %4120  ;;  %v2310_v50 = vadd.f32 %v2246_v13, %v1793_v31  ;;  %v4315_v13 = vmul.f32 %v17705_v58, %v17918_v24  ;;  %v18111_v31 = vld [vmem:[#allocation2 + $0x2aa] sm:$0xff] }
 0x431   :  { %v2829_v40 = vadd.f32 %v2765_v14, %v2312_v1  ;;  %v4834_v14 = vmul.f32 %v17734_v7, %v17984_v26  ;;  %21044 = vst [vmem:[#allocation227_spill] sm:$0xff] %v18111_v31  ;;  %v18119_v26 = vld [vmem:[#allocation2 + $0x2ea] sm:$0xff] }
 0x432   :  { %4702 = vperm.xlu0 %14469, %v4459_v41   ;;  %v2827_v1 = vadd.f32 %v2763_v39, %v2310_v50  ;;  %v18107_v41 = vld [vmem:[#allocation2 + $0x292] sm:$0xff] }
 0x433   :  { %v18077_v55 = vpop.permute.xlu0 %4145  ;;  %4712 = vperm.xlu1 %14470, %v17835_v62   ;;  %v3346_v30 = vadd.f32 %v3282_v52, %v2829_v40  ;;  %v4832_v52 = vmul.f32 %v17734_v7, %v17981_v23  ;;  %v3939_v23 = vld [vmem:[#allocation2 + $0x249] sm:$0xff] }
 0x434   :  { %v18091_v21 = vpop.permute.xlu1 %4155  ;;  %v3344_v46 = vadd.f32 %v3280_v12, %v2827_v1  ;;  %v18123_v12 = vld [vmem:[#allocation2 + $0x302] sm:$0xff] }
 0x435   :  { %v3864_v62 = vadd.f32 %v3800_v60, %v3346_v30  ;;  %21047 = vst [vmem:[#allocation230_spill] sm:$0xff] %v18123_v12 }
 0x436   :  { %2181 = vperm.xlu0 %14469, %v18089_v47   ;;  %v3862_v25 = vadd.f32 %v3798_v43, %v3344_v46  ;;  %v3941_v43 = vld [vmem:[#allocation2 + $0x261] sm:$0xff] }
 0x437   :  { %v18100_v11 = vpop.permute.xlu0 %2618  ;;  %2191 = vperm.xlu1 %14470, %v18093_v56   ;;  %v4381_v39 = vadd.f32 %v4317_v20, %v3864_v62  ;;  %v21051_v62 = vld [vmem:[#allocation74_spill] sm:$0xff]  ;;  %v21059_v56 = vld [vmem:[#allocation203_spill] sm:$0xff] }
 0x438   :  { %21042 = vst [vmem:[#allocation225_spill] sm:$0xff] %v18100_v11  ;;  %v18109_v18 = vpop.permute.xlu1 %2628  ;;  %v4379_v58 = vadd.f32 %v4315_v13, %v3862_v25  ;;  %v1213_v13 = vmul.f32 %v18023_v54, %v21051_v62  ;;  %v3946_v25 = vld [vmem:[#allocation2 + $0x2a1] sm:$0xff] }
 0x439   :  { %21043 = vst [vmem:[#allocation226_spill] sm:$0xff] %v18109_v18  ;;  %v4898_v24 = vadd.f32 %v4834_v14, %v4381_v39  ;;  %v21052_v39 = vld [vmem:[#allocation76_spill] sm:$0xff]  ;;  %v21054_v18 = vld [vmem:[#allocation11_spill] sm:$0xff] }
 0x43a   :  { %3175 = vperm.xlu0 %14469, %v18107_v41   ;;  %v4896_v60 = vadd.f32 %v4832_v52, %v4379_v58  ;;  %v1215_v52 = vmul.f32 %v18023_v54, %v21052_v39  ;;  %v696_v11 = vmul.f32 %v18032_v4, %v21054_v18  ;;  %v21057_v62 = vld [vmem:[#allocation140_spill] sm:$0xff] }
 0x43b   :  { %v18116_v50 = vpop.permute.xlu0 %2653  ;;  %3185 = vperm.xlu1 %14470, %v18111_v31   ;;  %v4969_v7 = vadd.f32 %v17793_v3, %v4898_v24  ;;  %v3948_v24 = vld [vmem:[#allocation2 + $0x2b9] sm:$0xff] }
 0x43c   :  { %21045 = vst [vmem:[#allocation222_spill] sm:$0xff] %v18116_v50  ;;  %v18121_v40 = vpop.permute.xlu1 %2663  ;;  %v4967_v20 = vadd.f32 %v17793_v3, %v4896_v60  ;;  %v1277_v39 = vadd.f32 %v1213_v13, %v696_v11  ;;  %v18154_v18 = vld [vmem:[#allocation2 + $0x320] sm:$0xff]  ;;  %v2764_v11 = vmul.f32 %v18066_v36, %v17840_v29 }
 0x43d   :  { %21046 = vst [vmem:[#allocation228_spill] sm:$0xff] %v18121_v40  ;;  %v5033_v14 = vmax.f32 %v4969_v7, 0.0  ;;  %v1732_v7 = vmul.f32 %v18041_v17, %v21057_v62  ;;  %21060 = vst [vmem:[#allocation240_spill] sm:$0xff] %v18154_v18  ;;  %v18160_v40 = vld [vmem:[#allocation2 + $0x338] sm:$0xff] }
 0x43e   :  { %3210 = vperm.xlu0 %14469, %v18119_v26   ;;  %21063 = vst [vmem:[#allocation245_spill] sm:$0xff] %v18160_v40 }
 0x43f   :  { %v18126_v1 = vpop.permute.xlu0 %3648  ;;  %3220 = vperm.xlu1 %14470, %v18123_v12   ;;  %v21055_v12 = vld [vmem:[#allocation138_spill] sm:$0xff]  ;;  %v5641_v62 = vcombine.high %v5033_v14, %v5033_v14 }
 0x440   :  { %21048 = vst [vmem:[#allocation231_spill] sm:$0xff] %v18126_v1  ;;  %v18130_v30 = vpop.permute.xlu1 %3658  ;;  %v1730_v60 = vmul.f32 %v18041_v17, %v21055_v12 }
 0x441   :  { %21049 = vst [vmem:[#allocation235_spill] sm:$0xff] %v18130_v30  ;;  %v5648_v30 = vrot.slane %v5033_v14, %v16606_v8  ;;  %v3283_v14 = vmul.f32 %v18082_v22, %v17898_v34  ;;  %v18192_v34 = vld [vmem:[%s20368_s1 + $0x7] ss:$0 sm:$0xff] }
 0x442   :  { %4170 = vperm.xlu0 %14469, %v3939_v23   ;;  %v5031_v23 = vmax.f32 %v4967_v20, 0.0  ;;  %v21061_v20 = vld [vmem:[#allocation205_spill] sm:$0xff] }
 0x443   :  { %v18133_v46 = vpop.permute.xlu0 %2638  ;;  %4180 = vperm.xlu1 %14470, %v3941_v43   ;;  %v2249_v1 = vmul.f32 %v18055_v44, %v21061_v20  ;;  %v3281_v20 = vmul.f32 %v18082_v22, %v17893_v53 }
 0x444   :  { %21050 = vst [vmem:[#allocation236_spill] sm:$0xff] %v18133_v46  ;;  %v18139_v58 = vpop.permute.xlu1 %2648  ;;  %v21056_v46 = vld [vmem:[#allocation13_spill] sm:$0xff]  ;;  %v5614_v13 = vrot.slane %v5031_v23, %v16606_v8 }
 0x445   :  { %21053 = vst [vmem:[#allocation237_spill] sm:$0xff] %v18139_v58  ;;  %v698_v31 = vmul.f32 %v18032_v4, %v21056_v46  ;;  %v2247_v58 = vmul.f32 %v18055_v44, %v21059_v56 }
 0x446   :  { %4205 = vperm.xlu0 %14469, %v3946_v25   ;;  %v1794_v25 = vadd.f32 %v1730_v60, %v1277_v39  ;;  %v18173_v60 = vld [vmem:[#allocation2 + $0x2c2] sm:$0xff]  ;;  %v5607_v39 = vcombine.high %v5031_v23, %v5031_v23  ;;  %v3801_v23 = vmul.f32 %v17750_v10, %v17972_v5 }
 0x447   :  { %v18149_v43 = vpop.permute.xlu0 %2673  ;;  %4215 = vperm.xlu1 %14470, %v3948_v24   ;;  %v1279_v12 = vadd.f32 %v1215_v52, %v698_v31  ;;  %v2766_v24 = vmul.f32 %v18066_v36, %v17844_v42  ;;  %21065 = vst [vmem:[#allocation247_spill] sm:$0xff] %v18173_v60 }
 0x448   :  { %21058 = vst [vmem:[#allocation238_spill] sm:$0xff] %v18149_v43  ;;  %v18158_v46 = vpop.permute.xlu1 %2683  ;;  %v2311_v52 = vadd.f32 %v2247_v58, %v1794_v25  ;;  %v3799_v58 = vmul.f32 %v17750_v10, %v17967_v28  ;;  %v5622_v25 = vcombine.high %v5614_v13, %v5614_v13  ;;  %v5655_v43 = vrot.slane %v5641_v62, %v16606_v8 }
 0x449   :  { %21062 = vst [vmem:[#allocation241_spill] sm:$0xff] %v18158_v46  ;;  %v1796_v56 = vadd.f32 %v1732_v7, %v1279_v12  ;;  %v5656_v46 = vcombine.high %v5648_v30, %v5648_v30  ;;  %v18177_v12 = vld [vmem:[#allocation2 + $0x2da] sm:$0xff]  ;;  %v4316_v28 = vmul.f32 %v18192_v34, %v18059_v32  ;;  %v13036_v62 = vrot.slane %v5648_v30, 9 }
 0x44a   :  { %2201 = vperm.xlu0 %14469, %v18154_v18   ;;  %21067 = vst [vmem:[#allocation248_spill] sm:$0xff] %v18177_v12  ;;  %v2828_v42 = vadd.f32 %v2764_v11, %v2311_v52  ;;  %v18197_v11 = vld [vmem:[#allocation2 + $0x31a] sm:$0xff]  ;;  %v5657_v18 = vcombine.high %v5655_v43, %v5655_v43  ;;  %v13038_v32 = vrot.slane %v5655_v43, 9 }
 0x44b   :  { %v18168_v31 = vpop.permute.xlu0 %3633  ;;  %2211 = vperm.xlu1 %14470, %v18160_v40   ;;  %v2313_v29 = vadd.f32 %v2249_v1, %v1796_v56  ;;  %v13037_v56 = vrot.slane %v5656_v46, 9  ;;  %21069 = vst [vmem:[#allocation239_spill] sm:$0xff] %v18197_v11 }
 0x44c   :  { %21064 = vst [vmem:[#allocation246_spill] sm:$0xff] %v18168_v31  ;;  %v18175_v7 = vpop.permute.xlu1 %3643  ;;  %v3345_v1 = vadd.f32 %v3281_v20, %v2828_v42  ;;  %v18202_v20 = vld [vmem:[#allocation2 + $0x332] sm:$0xff]  ;;  %v4318_v42 = vmul.f32 %v18192_v34, %v18071_v57 }
 0x44d   :  { %21066 = vst [vmem:[#allocation229_spill] sm:$0xff] %v18175_v7  ;;  %v2830_v53 = vadd.f32 %v2766_v24, %v2313_v29  ;;  %v5621_v24 = vrot.slane %v5607_v39, %v16606_v8  ;;  %21071 = vst [vmem:[#allocation253_spill] sm:$0xff] %v18202_v20  ;;  %v13029_v29 = vrot.slane %v5622_v25, 9  ;;  %v7364_v7 = vmax.f32 %v5656_v46, %v13037_v56 }
 0x44e   :  { %3195 = vperm.xlu0 %14469, %v18173_v60   ;;  %v3863_v5 = vadd.f32 %v3799_v58, %v3345_v1  ;;  %v13028_v60 = vrot.slane %v5614_v13, 9  ;;  %v13039_v56 = vrot.slane %v5657_v18, 9 }
 0x44f   :  { %v18185_v40 = vpop.permute.xlu0 %3668  ;;  %3205 = vperm.xlu1 %14470, %v18177_v12   ;;  %v3347_v10 = vadd.f32 %v3283_v14, %v2830_v53  ;;  %v18211_v14 = vld [vmem:[%s20368_s1 + $0x8] ss:$0 sm:$0xff]  ;;  %v3943_v53 = vld [vmem:[#allocation2 + $0x279] sm:$0xff]  ;;  %v5623_v57 = vcombine.high %v5621_v24, %v5621_v24  ;;  %v13030_v1 = vrot.slane %v5621_v24, 9  ;;  %v7356_v50 = vmax.f32 %v5622_v25, %v13029_v29  ;;  %v21072_v29 = vld [vmem:[#allocation18_spill] sm:$0xff] }
 0x450   :  { %21068 = vst [vmem:[#allocation251_spill] sm:$0xff] %v18185_v40  ;;  %v18200_v52 = vpop.permute.xlu1 %3678  ;;  %v4380_v39 = vadd.f32 %v4316_v28, %v3863_v5  ;;  %v7365_v28 = vmax.f32 %v5655_v43, %v13038_v32  ;;  %v21073_v43 = vld [vmem:[#allocation19_spill] sm:$0xff] }
 0x451   :  { %21070 = vst [vmem:[#allocation252_spill] sm:$0xff] %v18200_v52  ;;  %v3865_v40 = vadd.f32 %v3801_v23, %v3347_v10  ;;  %v7363_v52 = vmax.f32 %v5648_v30, %v13036_v62  ;;  %v7355_v23 = vmax.f32 %v5614_v13, %v13028_v60  ;;  %v7556_v10 = vmax.f32 %v7356_v50, %v7364_v7  ;;  %v21075_v7 = vld [vmem:[#allocation21_spill] sm:$0xff] }
 0x452   :  { %3230 = vperm.xlu0 %14469, %v18197_v11   ;;  %v13031_v30 = vrot.slane %v5623_v57, 9  ;;  %v7357_v62 = vmax.f32 %v5621_v24, %v13030_v1  ;;  %v18223_v13 = vmul.f32 %v18032_v4, %v21072_v29  ;;  %v18227_v50 = vmul.f32 %v18032_v4, %v21073_v43  ;;  %v21083_v29 = vld [vmem:[#allocation24_spill] sm:$0xff] }
 0x453   :  { %v4628_v12 = vpop.permute.xlu0 %4627  ;;  %3240 = vperm.xlu1 %14470, %v18202_v20   ;;  %v4382_v11 = vadd.f32 %v4318_v42, %v3865_v40  ;;  %v7555_v25 = vmax.f32 %v7355_v23, %v7363_v52  ;;  %v7366_v24 = vmax.f32 %v5657_v18, %v13039_v56  ;;  %v8028_v42 = vrot.slane %v7556_v10, %v16643_v33 }
 0x454   :  { %v4833_v58 = vmul.f32 %v18211_v14, %v4628_v12  ;;  %v4638_v31 = vpop.permute.xlu1 %4637  ;;  %v7557_v52 = vmax.f32 %v7357_v62, %v7365_v28  ;;  %v18256_v28 = vld [vmem:[#allocation2 + $0x309] sm:$0xff]  ;;  %v18261_v43 = vmul.f32 %v18032_v4, %v21083_v29 }
 0x455   :  { %v4835_v46 = vmul.f32 %v18211_v14, %v4638_v31  ;;  %v8024_v23 = vrot.slane %v7555_v25, %v16643_v33  ;;  %21082 = vst [vmem:[#allocation9_spill] sm:$0xff] %v18256_v28 }
 0x456   :  { %v4897_v6 = vadd.f32 %v4833_v58, %v4380_v39  ;;  %4190 = vperm.xlu0 %14469, %v3943_v53   ;;  %v21078_v53 = vld [vmem:[#allocation22_spill] sm:$0xff] }
 0x457   :  { %v4899_v20 = vadd.f32 %v4835_v46, %v4382_v11  ;;  %4200 = vperm.xlu1 %14470, %v17950_v59   ;;  %v18217_v12 = vpop.permute.xlu0 %4662  ;;  %v21074_v59 = vld [vmem:[#allocation20_spill] sm:$0xff]  ;;  %v18236_v11 = vmul.f32 %v18032_v4, %v21075_v7  ;;  %v18247_v1 = vmul.f32 %v18032_v4, %v21078_v53  ;;  %v21079_v46 = vld [vmem:[#allocation23_spill] sm:$0xff] }
 0x458   :  { %v4968_v5 = vadd.f32 %v17793_v3, %v4897_v6  ;;  %v18219_v40 = vpop.permute.xlu1 %4672  ;;  %v18232_v60 = vmul.f32 %v18032_v4, %v21074_v59  ;;  %v18251_v18 = vmul.f32 %v18032_v4, %v21079_v46 }
 0x459   :  { %v4970_v31 = vadd.f32 %v17793_v3, %v4899_v20  ;;  %v18243_v20 = vld [vmem:[#allocation2 + $0x2f1] sm:$0xff] }
 0x45a   :  { %v5032_v6 = vmax.f32 %v4968_v5, 0.0  ;;  %4225 = vperm.xlu0 %14469, %v3950_v19   ;;  %21077 = vst [vmem:[#allocation242_spill] sm:$0xff] %v18243_v20  ;;  %21080 = vst [vmem:[#allocation254_spill] sm:$0xff] %v18251_v18  ;;  %v7358_v19 = vmax.f32 %v5623_v57, %v13031_v30  ;;  %v8365_v30 = vsel %vm8309_vm4, %v8028_v42, %v8024_v23 }
 0x45b   :  { %v5034_v58 = vmax.f32 %v4970_v31, 0.0  ;;  %4235 = vperm.xlu1 %14470, %v17964_v38   ;;  %v18241_v3 = vpop.permute.xlu0 %2141  ;;  %v8032_v31 = vrot.slane %v7557_v52, %v16643_v33  ;;  %v21086_v52 = vld [vmem:[#allocation25_spill] sm:$0xff] }
 0x45c   :  { %v5624_v32 = vcombine.high %v5032_v6, %v5032_v6  ;;  %v5631_v39 = vrot.slane %v5032_v6, %v16606_v8  ;;  %21076 = vst [vmem:[#allocation232_spill] sm:$0xff] %v18241_v3  ;;  %v18254_v56 = vpop.permute.xlu1 %2151  ;;  %v7558_v6 = vmax.f32 %v7358_v19, %v7366_v24 }
 0x45d   :  { %21081 = vst [vmem:[#allocation46_spill] sm:$0xff] %v18254_v56  ;;  %v5658_v62 = vcombine.high %v5034_v58, %v5034_v58  ;;  %v5665_v57 = vrot.slane %v5034_v58, %v16606_v8  ;;  %v18275_v58 = vmul.f32 %v18032_v4, %v21086_v52 }
 0x45e   :  { %v5638_v38 = vrot.slane %v5624_v32, %v16606_v8  ;;  %v5639_v10 = vcombine.high %v5631_v39, %v5631_v39  ;;  %v13032_v5 = vrot.slane %v5631_v39, 9  ;;  %2698 = vperm.xlu0 %14469, %v18243_v20  }
 0x45f   :  { %2708 = vperm.xlu1 %14470, %v18256_v28   ;;  %v18268_v32 = vpop.permute.xlu0 %2176  ;;  %v5672_v46 = vrot.slane %v5658_v62, %v16606_v8  ;;  %v5673_v29 = vcombine.high %v5665_v57, %v5665_v57  ;;  %v13040_v24 = vrot.slane %v5665_v57, 9  ;;  %21087 = vst [vmem:[#allocation60_spill] sm:$0xff] %v18275_v58  ;;  %v8036_v62 = vrot.slane %v7558_v6, %v16643_v33  ;;  %v21126_v8 = vld [vmem:[#allocation95_spill] sm:$0xff] }
 0x460   :  { %v5640_v25 = vcombine.high %v5638_v38, %v5638_v38  ;;  %v13033_v59 = vrot.slane %v5639_v10, 9  ;;  %v13034_v7 = vrot.slane %v5638_v38, 9  ;;  %21084 = vst [vmem:[#allocation255_spill] sm:$0xff] %v18268_v32  ;;  %v7359_v53 = vmax.f32 %v5631_v39, %v13032_v5  ;;  %v18271_v19 = vpop.permute.xlu1 %2186  ;;  %v21088_v39 = vld [vmem:[#allocation26_spill] sm:$0xff] }
 0x461   :  { %21085 = vst [vmem:[#allocation52_spill] sm:$0xff] %v18271_v19  ;;  %v5674_v56 = vcombine.high %v5672_v46, %v5672_v46  ;;  %v13041_v20 = vrot.slane %v5673_v29, 9  ;;  %v13042_v3 = vrot.slane %v5672_v46, 9  ;;  %v7367_v28 = vmax.f32 %v5665_v57, %v13040_v24 }
 0x462   :  { %v13035_v18 = vrot.slane %v5640_v25, 9  ;;  %v7360_v42 = vmax.f32 %v5639_v10, %v13033_v59  ;;  %v7361_v23 = vmax.f32 %v5638_v38, %v13034_v7  ;;  %3693 = vperm.xlu0 %14469, %v14529_v35   ;;  %v18279_v5 = vmul.f32 %v18032_v4, %v21088_v39  ;;  %v21091_v35 = vld [vmem:[#allocation27_spill] sm:$0xff]  ;;  %v21093_v39 = vld [vmem:[#allocation28_spill] sm:$0xff] }
 0x463   :  { %v8366_v19 = vsel %vm8311_vm5, %v8032_v31, %v8365_v30  ;;  %3703 = vperm.xlu1 %14470, %v17871_v15   ;;  %v18284_v52 = vpop.permute.xlu0 %3135  ;;  %v13043_v38 = vrot.slane %v5674_v56, 9  ;;  %v7368_v10 = vmax.f32 %v5673_v29, %v13041_v20  ;;  %v7369_v59 = vmax.f32 %v5672_v46, %v13042_v3  ;;  %v21094_v31 = vld [vmem:[#allocation29_spill] sm:$0xff]  ;;  %v21096_v15 = vld [vmem:[#allocation30_spill] sm:$0xff]  ;;  %v21097_v46 = vld [vmem:[#allocation31_spill] sm:$0xff] }
 0x464   :  { %v7362_v32 = vmax.f32 %v5640_v25, %v13035_v18  ;;  %21089 = vst [vmem:[#allocation47_spill] sm:$0xff] %v18284_v52  ;;  %v7559_v7 = vmax.f32 %v7359_v53, %v7367_v28  ;;  %v18286_v57 = vpop.permute.xlu1 %3145  ;;  %v18290_v24 = vmul.f32 %v18032_v4, %v21091_v35  ;;  %v18294_v6 = vmul.f32 %v18032_v4, %v21093_v39  ;;  %v14530_v53 = vld [vmem:[#allocation2 + $0x300] sm:$0xff] }
 0x465   :  { %21090 = vst [vmem:[#allocation48_spill] sm:$0xff] %v18286_v57  ;;  %v18298_v18 = vmul.f32 %v18032_v4, %v21094_v31  ;;  %v18302_v30 = vmul.f32 %v18032_v4, %v21096_v15  ;;  %v7370_v3 = vmax.f32 %v5674_v56, %v13043_v38  ;;  %v7560_v20 = vmax.f32 %v7360_v42, %v7368_v10  ;;  %v21098_v35 = vld [vmem:[#allocation32_spill] sm:$0xff]  ;;  %v21099_v31 = vld [vmem:[#allocation33_spill] sm:$0xff] }
 0x466   :  { %21092 = vst [vmem:[#allocation53_spill] sm:$0xff] %v18290_v24  ;;  %v7561_v28 = vmax.f32 %v7361_v23, %v7369_v59  ;;  %v8040_v25 = vrot.slane %v7559_v7, %v16643_v33  ;;  %3728 = vperm.xlu0 %14469, %v14530_v53   ;;  %v716_v29 = vmul.f32 %v18032_v4, %v21097_v46  ;;  %v21102_v7 = vld [vmem:[#allocation34_spill] sm:$0xff]  ;;  %v21103_v46 = vld [vmem:[#allocation35_spill] sm:$0xff] }
 0x467   :  { %21095 = vst [vmem:[#allocation64_spill] sm:$0xff] %v18298_v18  ;;  %v18309_v39 = vmul.f32 %v18032_v4, %v21098_v35  ;;  %v18313_v57 = vmul.f32 %v18032_v4, %v21099_v31  ;;  %v8367_v15 = vsel %vm8313_vm6, %v8036_v62, %v8366_v19  ;;  %3738 = vperm.xlu1 %14470, %v17889_v51   ;;  %v21104_v51 = vld [vmem:[#allocation36_spill] sm:$0xff]  ;;  %v21111_v18 = vld [vmem:[#allocation82_spill] sm:$0xff] }
 0x468   :  { %v18317_v56 = vpop.permute.xlu0 %3170  ;;  %v7562_v42 = vmax.f32 %v7362_v32, %v7370_v3  ;;  %v8044_v23 = vrot.slane %v7560_v20, %v16643_v33  ;;  %v8048_v38 = vrot.slane %v7561_v28, %v16643_v33  ;;  %v8368_v10 = vsel %vm8315_vm7, %v8040_v25, %v8367_v15  ;;  %v18322_v59 = vpop.permute.xlu1 %3180  ;;  %v21105_v32 = vld [vmem:[#allocation37_spill] sm:$0xff]  ;;  %v21106_v20 = vld [vmem:[#allocation38_spill] sm:$0xff]  ;;  %v21107_v25 = vld [vmem:[#allocation39_spill] sm:$0xff] }
 0x469   :  { %21100 = vst [vmem:[#allocation256_spill] sm:$0xff] %v18317_v56  ;;  %21101 = vst [vmem:[#allocation50_spill] sm:$0xff] %v18322_v59  ;;  %v18326_v53 = vmul.f32 %v18032_v4, %v21102_v7  ;;  %v18330_v19 = vmul.f32 %v18032_v4, %v21103_v46  ;;  %v18334_v62 = vmul.f32 %v18032_v4, %v21104_v51  ;;  %v14531_v7 = vld [vmem:[#allocation2 + $0x24a] sm:$0xff]  ;;  %v21109_v46 = vld [vmem:[#allocation40_spill] sm:$0xff] }
 0x46a   :  { %v18338_v3 = vmul.f32 %v18032_v4, %v21105_v32  ;;  %v18342_v28 = vmul.f32 %v18032_v4, %v21106_v20  ;;  %v18346_v35 = vmul.f32 %v18032_v4, %v21107_v25  ;;  %v8052_v31 = vrot.slane %v7562_v42, %v16643_v33  ;;  %4687 = vperm.xlu0 %14469, %v14531_v7   ;;  %v21110_v32 = vld [vmem:[#allocation81_spill] sm:$0xff]  ;;  %v21113_v42 = vld [vmem:[#allocation83_spill] sm:$0xff] }
 0x46b   :  { %v8369_v15 = vsel %vm8317_vm8, %v8044_v23, %v8368_v10  ;;  %v18352_v51 = vmul.f32 %v18032_v4, %v21109_v46  ;;  %v1220_v52 = vmul.f32 %v18023_v54, %v21110_v32  ;;  %v1221_v20 = vmul.f32 %v18023_v54, %v21111_v18  ;;  %4697 = vperm.xlu1 %14470, %v17900_v27   ;;  %v21114_v10 = vld [vmem:[#allocation84_spill] sm:$0xff]  ;;  %v21115_v46 = vld [vmem:[#allocation85_spill] sm:$0xff]  ;;  %v21119_v27 = vld [vmem:[#allocation42_spill] sm:$0xff] }
 0x46c   :  { %21108 = vst [vmem:[#allocation51_spill] sm:$0xff] %v18346_v35  ;;  %v8370_v24 = vsel %vm8319_vm9, %v8048_v38, %v8369_v15  ;;  %v18360_v25 = vpop.permute.xlu0 %4165  ;;  %v1222_v23 = vmul.f32 %v18023_v54, %v21113_v42  ;;  %v1223_v7 = vmul.f32 %v18023_v54, %v21114_v10  ;;  %v1224_v35 = vmul.f32 %v18023_v54, %v21115_v46  ;;  %v21117_v18 = vld [vmem:[#allocation41_spill] sm:$0xff]  ;;  %v21120_v33 = vld [vmem:[#allocation87_spill] sm:$0xff]  ;;  %v21122_v46 = vld [vmem:[#allocation44_spill] sm:$0xff] }
 0x46d   :  { %21112 = vst [vmem:[#allocation16_spill] sm:$0xff] %v18360_v25  ;;  %v8371_v32 = vsel %vm8321_vm10, %v8052_v31, %v8370_v24  ;;  %v18369_v58 = vpop.permute.xlu1 %4175  ;;  %v18373_v38 = vmul.f32 %v18032_v4, %v21117_v18  ;;  %v18377_v15 = vmul.f32 %v18032_v4, %v21119_v27  ;;  %v1226_v42 = vmul.f32 %v18023_v54, %v21120_v33  ;;  %v21121_v59 = vld [vmem:[#allocation89_spill] sm:$0xff]  ;;  %v21123_v31 = vld [vmem:[#allocation91_spill] sm:$0xff] }
 0x46e   :  { %21116 = vst [vmem:[#allocation17_spill] sm:$0xff] %v18369_v58  ;;  %v1228_v10 = vmul.f32 %v18023_v54, %v21121_v59  ;;  %8452 = vst.msk [vmem:[#allocation3 + $0x81] sm:$0xff] %vm7627_vm2, %v8371_v32  ;;  %v729_v24 = vmul.f32 %v18032_v4, %v21122_v46  ;;  %v1230_v56 = vmul.f32 %v18023_v54, %v21123_v31  ;;  %v21124_v18 = vld [vmem:[#allocation93_spill] sm:$0xff]  ;;  %v21125_v58 = vld [vmem:[#allocation94_spill] sm:$0xff] }
 0x46f   :  { %21118 = vst [vmem:[#allocation61_spill] sm:$0xff] %v18373_v38  ;;  %v1232_v38 = vmul.f32 %v18023_v54, %v21124_v18  ;;  %v1233_v27 = vmul.f32 %v18023_v54, %v21125_v58  ;;  %v14532_v25 = vld [vmem:[#allocation2 + $0x2a2] sm:$0xff]  ;;  %v1284_v33 = vadd.f32 %v1220_v52, %v18223_v13  ;;  %v1285_v59 = vadd.f32 %v1221_v20, %v18227_v50  ;;  %v21129_v13 = vld [vmem:[#allocation86_spill] sm:$0xff] }
 0x470   :  { %4722 = vperm.xlu0 %14469, %v14532_v25   ;;  %v1234_v32 = vmul.f32 %v18023_v54, %v21126_v8  ;;  %v1235_v4 = vmul.f32 %v18023_v54, %v21127_v45  ;;  %4732 = vperm.xlu1 %14470, %v17913_v16   ;;  %v18399_v46 = vld [vmem:[#allocation2 + $0x321] sm:$0xff]  ;;  %v1286_v31 = vadd.f32 %v1222_v23, %v18232_v60  ;;  %v18412_v8 = vld [vmem:[#allocation2 + $0x339] sm:$0xff]  ;;  %v21133_v20 = vld [vmem:[#allocation98_spill] sm:$0xff] }
 0x471   :  { %21128 = vst [vmem:[#allocation63_spill] sm:$0xff] %v18399_v46  ;;  %v1287_v58 = vadd.f32 %v1223_v7, %v18236_v11  ;;  %v18404_v25 = vadd.f32 %v1224_v35, %v18247_v1  ;;  %v18408_v50 = vmul.f32 %v18023_v54, %v21129_v13  ;;  %v18410_v52 = vpop.permute.xlu0 %2161  ;;  %21131 = vst [vmem:[#allocation49_spill] sm:$0xff] %v18412_v8  ;;  %v21132_v60 = vld [vmem:[#allocation97_spill] sm:$0xff]  ;;  %v18424_v35 = vpop.permute.xlu1 %2171  ;;  %v21135_v13 = vld [vmem:[#allocation100_spill] sm:$0xff] }
 0x472   :  { %v18415_v45 = vadd.f32 %v1226_v42, %v18261_v43  ;;  %v18418_v16 = vadd.f32 %v1228_v10, %v18279_v5  ;;  %v1236_v11 = vmul.f32 %v18023_v54, %v21132_v60  ;;  %v1237_v1 = vmul.f32 %v18023_v54, %v21133_v20  ;;  %v21134_v43 = vld [vmem:[#allocation99_spill] sm:$0xff]  ;;  %v21139_v20 = vld [vmem:[#allocation105_spill] sm:$0xff] }
 0x473   :  { %21130 = vst [vmem:[#allocation58_spill] sm:$0xff] %v18408_v50  ;;  %v18427_v23 = vadd.f32 %v1230_v56, %v18294_v6  ;;  %v18430_v7 = vadd.f32 %v1232_v38, %v18302_v30  ;;  %v18432_v18 = vadd.f32 %v1233_v27, %v716_v29  ;;  %v1238_v5 = vmul.f32 %v18023_v54, %v21134_v43  ;;  %v21136_v56 = vld [vmem:[#allocation145_spill] sm:$0xff]  ;;  %v21138_v27 = vld [vmem:[#allocation103_spill] sm:$0xff] }
 0x474   :  { %2718 = vperm.xlu0 %14469, %v18399_v46   ;;  %v18438_v42 = vadd.f32 %v1234_v32, %v18309_v39  ;;  %v18441_v10 = vadd.f32 %v1235_v4, %v18313_v57  ;;  %v1239_v6 = vmul.f32 %v18023_v54, %v21135_v13  ;;  %v1737_v30 = vmul.f32 %v18041_v17, %v21136_v56  ;;  %v21137_v29 = vld [vmem:[#allocation101_spill] sm:$0xff]  ;;  %v21140_v32 = vld [vmem:[#allocation107_spill] sm:$0xff]  ;;  %v21146_v46 = vld [vmem:[#allocation146_spill] sm:$0xff] }
 0x475   :  { %2728 = vperm.xlu1 %14470, %v18412_v8   ;;  %v1240_v38 = vmul.f32 %v18023_v54, %v21137_v29  ;;  %v1242_v60 = vmul.f32 %v18023_v54, %v21138_v27  ;;  %v1244_v39 = vmul.f32 %v18023_v54, %v21139_v20  ;;  %v1246_v57 = vmul.f32 %v18023_v54, %v21140_v32  ;;  %v18456_v4 = vpop.permute.xlu0 %2196  ;;  %v9117_v43 = vld [vmem:[#allocation3 + $0x80] sm:$0xff]  ;;  %v21142_v50 = vld [vmem:[#allocation147_spill] sm:$0xff]  ;;  %v18469_v20 = vpop.permute.xlu1 %2206 }
 0x476   :  { %v18459_v13 = vadd.f32 %v1236_v11, %v18326_v53  ;;  %v18462_v56 = vadd.f32 %v1237_v1, %v18330_v19  ;;  %v1739_v29 = vmul.f32 %v18041_v17, %v21142_v50  ;;  %v21143_v8 = vld [vmem:[#allocation211_spill] sm:$0xff]  ;;  %13821 = vmatmul.mubr.msk.f32.gmra.mrb[6].mxu0 %vm7627_vm2, %v9117_v43  ;;  %21144 = vst [vmem:[#allocation55_spill] sm:$0xff] %v18469_v20  ;;  %v21147_v11 = vld [vmem:[#allocation148_spill] sm:$0xff]  ;;  %v21148_v43 = vld [vmem:[#allocation213_spill] sm:$0xff] }
 0x477   :  { %v2254_v27 = vmul.f32 %v18055_v44, %v21143_v8  ;;  %v9118_v54 = vld [vmem:[#allocation3 + $0xb0] sm:$0xff]  ;;  %v18472_v32 = vadd.f32 %v1238_v5, %v18334_v62  ;;  %v1738_v53 = vmul.f32 %v18041_v17, %v21146_v46  ;;  %v1740_v19 = vmul.f32 %v18041_v17, %v21147_v11  ;;  %v14533_v1 = vld [vmem:[#allocation2 + $0x2d8] sm:$0xff] }
 0x478   :  { %21141 = vst [vmem:[#allocation54_spill] sm:$0xff] %v18459_v13  ;;  %3713 = vperm.xlu0 %14469, %v14533_v1   ;;  %13823 = vmatprep.mubr.msk.f32.mxu0 %vm7627_vm2, %v9118_v54  ;;  %v18480_v50 = vadd.f32 %v1239_v6, %v18338_v3  ;;  %v1801_v8 = vadd.f32 %v1737_v30, %v1284_v33  ;;  %v3443_v6 = vld [vmem:[#allocation2 + $0x348] sm:$0xff] }
 0x479   :  { %21145 = vst [vmem:[#allocation56_spill] sm:$0xff] %v18472_v32  ;;  %v2256_v13 = vmul.f32 %v18055_v44, %v21148_v43  ;;  %v2771_v62 = vmul.f32 %v18066_v36, %v17858_v49  ;;  %3723 = vperm.xlu1 %14470, %v18089_v47   ;;  %v18488_v46 = vadd.f32 %v1240_v38, %v18342_v28  ;;  %v18498_v33 = vpop.permute.xlu0 %3155  ;;  %v18504_v28 = vpop.permute.xlu1 %3165 }
 0x47a   :  { %v18491_v5 = vadd.f32 %v1242_v60, %v18352_v51  ;;  %v18494_v54 = vadd.f32 %v1244_v39, %v18377_v15  ;;  %v18496_v3 = vadd.f32 %v1246_v57, %v729_v24  ;;  %21149 = vst [vmem:[#allocation57_spill] sm:$0xff] %v18498_v33  ;;  %v1803_v30 = vadd.f32 %v1739_v29, %v1286_v31  ;;  %v21151_v15 = vld [vmem:[#allocation149_spill] sm:$0xff]  ;;  %v21152_v60 = vld [vmem:[#allocation151_spill] sm:$0xff] }
 0x47b   :  { %v2318_v11 = vadd.f32 %v2254_v27, %v1801_v8  ;;  %v2773_v49 = vmul.f32 %v18066_v36, %v17860_v2  ;;  %v3288_v47 = vmul.f32 %v18082_v22, %v17902_v9  ;;  %21150 = vst [vmem:[#allocation14_spill] sm:$0xff] %v18504_v28  ;;  %v18506_v51 = vadd.f32 %v1738_v53, %v1285_v59  ;;  %v14534_v31 = vld [vmem:[#allocation2 + $0x330] sm:$0xff]  ;;  %v18519_v9 = vld [vmem:[%s20368_s1 + $0x6] ss:$0 sm:$0xff] }
 0x47c   :  { %v18508_v38 = vadd.f32 %v1740_v19, %v1287_v58  ;;  %v1741_v24 = vmul.f32 %v18041_v17, %v21151_v15  ;;  %v1743_v39 = vmul.f32 %v18041_v17, %v21152_v60  ;;  %3748 = vperm.xlu0 %14469, %v14534_v31   ;;  %v2320_v57 = vadd.f32 %v2256_v13, %v1803_v30  ;;  %v21154_v58 = vld [vmem:[#allocation153_spill] sm:$0xff]  ;;  %v21155_v53 = vld [vmem:[#allocation155_spill] sm:$0xff]  ;;  %v21157_v8 = vld [vmem:[#allocation158_spill] sm:$0xff] }
 0x47d   :  { %v2835_v29 = vadd.f32 %v2771_v62, %v2318_v11  ;;  %v3290_v2 = vmul.f32 %v18082_v22, %v17911_v48  ;;  %21153 = vst [vmem:[#allocation65_spill] sm:$0xff] %v18519_v9  ;;  %v3806_v59 = vmul.f32 %v18519_v9, %v17975_v0  ;;  %3758 = vperm.xlu1 %14470, %v3443_v6   ;;  %v21156_v13 = vld [vmem:[#allocation157_spill] sm:$0xff]  ;;  %v18535_v6 = vpop.permute.xlu0 %3190  ;;  %v21159_v60 = vld [vmem:[#allocation159_spill] sm:$0xff] }
 0x47e   :  { %v1745_v27 = vmul.f32 %v18041_v17, %v21154_v58  ;;  %v1747_v19 = vmul.f32 %v18041_v17, %v21155_v53  ;;  %v1749_v1 = vmul.f32 %v18041_v17, %v21156_v13  ;;  %v1750_v48 = vmul.f32 %v18041_v17, %v21157_v8  ;;  %21158 = vst [vmem:[#allocation66_spill] sm:$0xff] %v18535_v6  ;;  %v21160_v58 = vld [vmem:[#allocation160_spill] sm:$0xff]  ;;  %v21195_v6 = vld [vmem:[#allocation218_spill] sm:$0xff] }
 0x47f   :  { %v2837_v43 = vadd.f32 %v2773_v49, %v2320_v57  ;;  %v3352_v62 = vadd.f32 %v3288_v47, %v2835_v29  ;;  %v3808_v30 = vmul.f32 %v18519_v9, %v17977_v37  ;;  %v4323_v0 = vmul.f32 %v18192_v34, %v18077_v55  ;;  %v21161_v49 = vld [vmem:[#allocation184_spill] sm:$0xff]  ;;  %v18544_v47 = vpop.permute.xlu1 %3200 }
 0x480   :  { %v1805_v11 = vadd.f32 %v1741_v24, %v18404_v25  ;;  %v1807_v15 = vadd.f32 %v1743_v39, %v18415_v45  ;;  %v1751_v31 = vmul.f32 %v18041_v17, %v21159_v60  ;;  %v1752_v53 = vmul.f32 %v18041_v17, %v21160_v58  ;;  %4707 = vperm.xlu0 %14469, %v21161_v49  }
 0x481   :  { %21162 = vst [vmem:[#allocation15_spill] sm:$0xff] %v18544_v47  ;;  %v3354_v37 = vadd.f32 %v3290_v2, %v2837_v43  ;;  %v3870_v57 = vadd.f32 %v3806_v59, %v3352_v62  ;;  %v4325_v55 = vmul.f32 %v18192_v34, %v18091_v21  ;;  %v4840_v25 = vmul.f32 %v18211_v14, %v18217_v12  ;;  %v21163_v2 = vld [vmem:[#allocation162_spill] sm:$0xff]  ;;  %v18563_v8 = vpop.permute.xlu0 %4150  ;;  %v21168_v43 = vld [vmem:[#allocation169_spill] sm:$0xff] }
 0x482   :  { %4717 = vperm.xlu1 %14470, %v18107_v41   ;;  %v1809_v45 = vadd.f32 %v1745_v27, %v18418_v16  ;;  %v1811_v24 = vadd.f32 %v1747_v19, %v18427_v23  ;;  %v18554_v39 = vadd.f32 %v1749_v1, %v18430_v7  ;;  %v18557_v29 = vadd.f32 %v1750_v48, %v18432_v18  ;;  %v21164_v23 = vld [vmem:[#allocation164_spill] sm:$0xff]  ;;  %v21165_v18 = vld [vmem:[#allocation165_spill] sm:$0xff]  ;;  %v21167_v48 = vld [vmem:[#allocation167_spill] sm:$0xff] }
 0x483   :  { %v1754_v59 = vmul.f32 %v18041_v17, %v21163_v2  ;;  %v3872_v13 = vadd.f32 %v3808_v30, %v3354_v37  ;;  %v4387_v21 = vadd.f32 %v4323_v0, %v3870_v57  ;;  %v4842_v12 = vmul.f32 %v18211_v14, %v18219_v40  ;;  %v21166_v19 = vld [vmem:[#allocation185_spill] sm:$0xff]  ;;  %v18576_v1 = vpop.permute.xlu1 %4160  ;;  %v21169_v0 = vld [vmem:[#allocation171_spill] sm:$0xff] }
 0x484   :  { %v18566_v41 = vadd.f32 %v1751_v31, %v18438_v42  ;;  %v18569_v16 = vadd.f32 %v1752_v53, %v18441_v10  ;;  %v1756_v7 = vmul.f32 %v18041_v17, %v21164_v23  ;;  %v1757_v27 = vmul.f32 %v18041_v17, %v21165_v18  ;;  %4742 = vperm.xlu0 %14469, %v21166_v19   ;;  %v18583_v10 = vld [vmem:[#allocation2 + $0x2f2] sm:$0xff]  ;;  %v21170_v31 = vld [vmem:[#allocation212_spill] sm:$0xff]  ;;  %v18593_v2 = vld [vmem:[#allocation2 + $0x30a] sm:$0xff] }
 0x485   :  { %v1759_v40 = vmul.f32 %v18041_v17, %v21167_v48  ;;  %v1761_v42 = vmul.f32 %v18041_v17, %v21168_v43  ;;  %v4389_v62 = vadd.f32 %v4325_v55, %v3872_v13  ;;  %v4904_v30 = vadd.f32 %v4840_v25, %v4387_v21  ;;  %v21171_v53 = vld [vmem:[#allocation214_spill] sm:$0xff]  ;;  %v21172_v37 = vld [vmem:[#allocation215_spill] sm:$0xff]  ;;  %21173 = vst [vmem:[#allocation71_spill] sm:$0xff] %v18593_v2  ;;  %v21174_v55 = vld [vmem:[#allocation161_spill] sm:$0xff]  ;;  %v18606_v18 = vpop.permute.xlu0 %4185 }
 0x486   :  { %4752 = vperm.xlu1 %14470, %v18119_v26   ;;  %v1763_v60 = vmul.f32 %v18041_v17, %v21169_v0  ;;  %v2255_v58 = vmul.f32 %v18055_v44, %v21170_v31  ;;  %v2257_v49 = vmul.f32 %v18055_v44, %v21171_v53  ;;  %v2258_v57 = vmul.f32 %v18055_v44, %v21172_v37  ;;  %v21176_v13 = vld [vmem:[#allocation163_spill] sm:$0xff]  ;;  %v21183_v37 = vld [vmem:[#allocation186_spill] sm:$0xff]  ;;  %v21194_v47 = vld [vmem:[#allocation209_spill] sm:$0xff] }
 0x487   :  { %v18597_v25 = vmul.f32 %v18041_v17, %v21174_v55  ;;  %v18600_v26 = vadd.f32 %v1754_v59, %v18462_v56  ;;  %v18604_v21 = vmul.f32 %v18041_v17, %v21176_v13  ;;  %v4906_v23 = vadd.f32 %v4842_v12, %v4389_v62  ;;  %v21178_v43 = vld [vmem:[#allocation219_spill] sm:$0xff]  ;;  %v18619_v59 = vpop.permute.xlu1 %4195 }
 0x488   :  { %v18609_v19 = vadd.f32 %v1756_v7, %v18480_v50  ;;  %v18612_v48 = vadd.f32 %v1757_v27, %v18488_v46  ;;  %v2260_v0 = vmul.f32 %v18055_v44, %v21178_v43  ;;  %v21179_v31 = vld [vmem:[#allocation223_spill] sm:$0xff]  ;;  %3215 = vperm.xlu0 %14469, %v18583_v10   ;;  %v18622_v17 = vadd.f32 %v1759_v40, %v18491_v5  ;;  %v21181_v50 = vld [vmem:[#allocation221_spill] sm:$0xff]  ;;  %v18632_v7 = vld [vmem:[%s20369_s2] ss:$0 sm:$0xff] }
 0x489   :  { %21175 = vst [vmem:[#allocation59_spill] sm:$0xff] %v18597_v25  ;;  %21177 = vst [vmem:[#allocation67_spill] sm:$0xff] %v18604_v21  ;;  %v2262_v56 = vmul.f32 %v18055_v44, %v21179_v31  ;;  %v18625_v12 = vadd.f32 %v1761_v42, %v18494_v54  ;;  %v2264_v46 = vmul.f32 %v18055_v44, %v21181_v50  ;;  %v18648_v13 = vpop.permute.xlu0 %2658  ;;  %v21184_v43 = vld [vmem:[#allocation187_spill] sm:$0xff]  ;;  %v21188_v31 = vld [vmem:[#allocation192_spill] sm:$0xff] }
 0x48a   :  { %v4975_v27 = vadd.f32 %v18632_v7, %v4904_v30  ;;  %3225 = vperm.xlu1 %14470, %v18593_v2   ;;  %v18637_v62 = vadd.f32 %v1763_v60, %v18496_v3  ;;  %v2319_v5 = vadd.f32 %v2255_v58, %v18506_v51  ;;  %v2321_v54 = vadd.f32 %v2257_v49, %v18508_v38  ;;  %v21185_v38 = vld [vmem:[#allocation188_spill] sm:$0xff]  ;;  %v21186_v58 = vld [vmem:[#allocation189_spill] sm:$0xff]  ;;  %v21187_v49 = vld [vmem:[#allocation190_spill] sm:$0xff] }
 0x48b   :  { %21180 = vst [vmem:[#allocation78_spill] sm:$0xff] %v18625_v12  ;;  %v2322_v40 = vadd.f32 %v2258_v57, %v1805_v11  ;;  %v2775_v42 = vmul.f32 %v18066_v36, %v17933_v61  ;;  %v2777_v53 = vmul.f32 %v18066_v36, %v17936_v63  ;;  %v2772_v55 = vmul.f32 %v18066_v36, %v21183_v37  ;;  %v18655_v61 = vpop.permute.xlu1 %2668  ;;  %v21196_v21 = vld [vmem:[#allocation191_spill] sm:$0xff] }
 0x48c   :  { %21182 = vst [vmem:[#allocation80_spill] sm:$0xff] %v18637_v62  ;;  %v4977_v30 = vadd.f32 %v18632_v7, %v4906_v23  ;;  %v2324_v3 = vadd.f32 %v2260_v0, %v1807_v15  ;;  %v2326_v60 = vadd.f32 %v2262_v56, %v1809_v45  ;;  %v2774_v51 = vmul.f32 %v18066_v36, %v21184_v43  ;;  %v21189_v15 = vld [vmem:[#allocation194_spill] sm:$0xff]  ;;  %v21190_v45 = vld [vmem:[#allocation193_spill] sm:$0xff]  ;;  %v21191_v56 = vld [vmem:[#allocation195_spill] sm:$0xff] }
 0x48d   :  { %v2779_v11 = vmul.f32 %v18066_v36, %v21185_v38  ;;  %4210 = vperm.xlu0 %14469, %v21186_v58   ;;  %v2328_v63 = vadd.f32 %v2264_v46, %v1811_v24  ;;  %v2781_v57 = vmul.f32 %v18066_v36, %v21187_v49  ;;  %v2266_v23 = vmul.f32 %v18055_v44, %v21188_v31  ;;  %v21192_v43 = vld [vmem:[#allocation197_spill] sm:$0xff]  ;;  %v21193_v58 = vld [vmem:[#allocation207_spill] sm:$0xff]  ;;  %v18670_v31 = vpop.permute.xlu0 %2693  ;;  %v21215_v62 = vld [vmem:[#allocation196_spill] sm:$0xff] }
 0x48e   :  { %v5039_v50 = vmax.f32 %v4975_v27, 0.0  ;;  %4220 = vperm.xlu1 %14470, %v21189_v15   ;;  %v2268_v0 = vmul.f32 %v18055_v44, %v21190_v45  ;;  %v3292_v37 = vmul.f32 %v18082_v22, %v21191_v56  ;;  %v3294_v38 = vmul.f32 %v18082_v22, %v21192_v43  ;;  %v21205_v25 = vld [vmem:[#allocation231_spill] sm:$0xff] }
 0x48f   :  { %v3289_v24 = vmul.f32 %v18082_v22, %v21193_v58  ;;  %v2839_v46 = vadd.f32 %v2775_v42, %v2322_v40  ;;  %v2841_v49 = vadd.f32 %v2777_v53, %v2324_v3  ;;  %v2836_v28 = vadd.f32 %v2772_v55, %v2319_v5  ;;  %v18677_v43 = vpop.permute.xlu1 %2703  ;;  %v21197_v42 = vld [vmem:[#allocation250_spill] sm:$0xff] }
 0x490   :  { %v5041_v33 = vmax.f32 %v4977_v30, 0.0  ;;  %v2838_v27 = vadd.f32 %v2774_v51, %v2321_v54  ;;  %v2843_v15 = vadd.f32 %v2779_v11, %v2326_v60  ;;  %v3291_v45 = vmul.f32 %v18082_v22, %v21194_v47  ;;  %v21198_v55 = vld [vmem:[#allocation198_spill] sm:$0xff]  ;;  %v18683_v54 = vld [vmem:[#allocation2 + $0x322] sm:$0xff]  ;;  %v18686_v60 = vld [vmem:[#allocation2 + $0x33a] sm:$0xff] }
 0x491   :  { %v3296_v56 = vmul.f32 %v18082_v22, %v21195_v6  ;;  %4245 = vperm.xlu0 %14469, %v21196_v21   ;;  %v2845_v32 = vadd.f32 %v2781_v57, %v2328_v63  ;;  %v2330_v40 = vadd.f32 %v2266_v23, %v18554_v39  ;;  %v3298_v5 = vmul.f32 %v18082_v22, %v21197_v42  ;;  %v21201_v21 = vld [vmem:[#allocation222_spill] sm:$0xff]  ;;  %v21202_v11 = vld [vmem:[#allocation228_spill] sm:$0xff]  ;;  %v21203_v63 = vld [vmem:[#allocation77_spill] sm:$0xff]  ;;  %v18693_v58 = vpop.permute.xlu0 %3653 }
 0x492   :  { %v5743_v53 = vcombine.high %v5039_v50, %v5039_v50  ;;  %4255 = vperm.xlu1 %14470, %v21198_v55   ;;  %21199 = vst [vmem:[#allocation120_spill] sm:$0xff] %v18683_v54  ;;  %v2332_v47 = vadd.f32 %v2268_v0, %v18566_v41  ;;  %v3356_v30 = vadd.f32 %v3292_v37, %v2839_v46  ;;  %21200 = vst [vmem:[#allocation121_spill] sm:$0xff] %v18686_v60 }
 0x493   :  { %v3358_v3 = vadd.f32 %v3294_v38, %v2841_v49  ;;  %v3353_v6 = vadd.f32 %v3289_v24, %v2836_v28  ;;  %v2783_v51 = vmul.f32 %v18066_v36, %v21201_v21  ;;  %v2785_v39 = vmul.f32 %v18066_v36, %v21202_v11  ;;  %21204 = vst [vmem:[#allocation122_spill] sm:$0xff] %v18693_v58  ;;  %v18699_v0 = vpop.permute.xlu1 %3663  ;;  %v21207_v38 = vld [vmem:[#allocation235_spill] sm:$0xff]  ;;  %v21208_v24 = vld [vmem:[#allocation246_spill] sm:$0xff]  ;;  %v21209_v49 = vld [vmem:[#allocation229_spill] sm:$0xff] }
 0x494   :  { %v5750_v57 = vrot.slane %v5039_v50, %v21203_v63  ;;  %v5777_v23 = vcombine.high %v5041_v33, %v5041_v33  ;;  %v3355_v42 = vadd.f32 %v3291_v45, %v2838_v27  ;;  %v3360_v55 = vadd.f32 %v3296_v56, %v2843_v15  ;;  %21206 = vst [vmem:[#allocation123_spill] sm:$0xff] %v18699_v0  ;;  %v21210_v27 = vld [vmem:[#allocation251_spill] sm:$0xff]  ;;  %v21211_v15 = vld [vmem:[#allocation252_spill] sm:$0xff] }
 0x495   :  { %v3810_v41 = vmul.f32 %v18519_v9, %v21205_v25  ;;  %v5784_v28 = vrot.slane %v5041_v33, %v21203_v63  ;;  %3235 = vperm.xlu0 %14469, %v18683_v54   ;;  %v3362_v37 = vadd.f32 %v3298_v5, %v2845_v32  ;;  %v3812_v36 = vmul.f32 %v18519_v9, %v21207_v38  ;;  %v21212_v32 = vld [vmem:[#allocation232_spill] sm:$0xff]  ;;  %v18720_v38 = vpop.permute.xlu0 %3688  ;;  %v21221_v54 = vld [vmem:[#allocation255_spill] sm:$0xff] }
 0x496   :  { %v3807_v50 = vmul.f32 %v18519_v9, %v21208_v24  ;;  %v5757_v46 = vrot.slane %v5743_v53, %v21203_v63  ;;  %3245 = vperm.xlu1 %14470, %v18686_v60   ;;  %v3809_v25 = vmul.f32 %v18519_v9, %v21209_v49  ;;  %v3814_v33 = vmul.f32 %v18519_v9, %v21210_v27  ;;  %v21214_v58 = vld [vmem:[#allocation16_spill] sm:$0xff] }
 0x497   :  { %v3816_v45 = vmul.f32 %v18519_v9, %v21211_v15  ;;  %v2267_v56 = vmul.f32 %v18055_v44, %v21212_v32  ;;  %v18715_v5 = vadd.f32 %v2783_v51, %v2330_v40  ;;  %v18717_v21 = vadd.f32 %v2785_v39, %v2332_v47  ;;  %21213 = vst [vmem:[#allocation70_spill] sm:$0xff] %v18720_v38  ;;  %v18725_v15 = vpop.permute.xlu1 %3698  ;;  %v21217_v51 = vld [vmem:[#allocation17_spill] sm:$0xff]  ;;  %v21224_v38 = vld [vmem:[#allocation50_spill] sm:$0xff] }
 0x498   :  { %v5758_v11 = vcombine.high %v5750_v57, %v5750_v57  ;;  %v5791_v53 = vrot.slane %v5777_v23, %v21203_v63  ;;  %v3874_v24 = vadd.f32 %v3810_v41, %v3356_v30  ;;  %v13060_v49 = vrot.slane %v5750_v57, 9  ;;  %21216 = vst [vmem:[#allocation72_spill] sm:$0xff] %v18725_v15  ;;  %v21218_v23 = vld [vmem:[#allocation242_spill] sm:$0xff] }
 0x499   :  { %v5792_v0 = vcombine.high %v5784_v28, %v5784_v28  ;;  %v4327_v27 = vmul.f32 %v18192_v34, %v21214_v58  ;;  %4230 = vperm.xlu0 %14469, %v21215_v62   ;;  %v3876_v32 = vadd.f32 %v3812_v36, %v3358_v3  ;;  %v18727_v40 = vadd.f32 %v3807_v50, %v3353_v6  ;;  %v3960_v62 = vld [vmem:[#allocation2 + $0x349] sm:$0xff]  ;;  %v4683_v50 = vpop.permute.xlu0 %4682 }
 0x49a   :  { %v5759_v47 = vcombine.high %v5757_v46, %v5757_v46  ;;  %v4329_v39 = vmul.f32 %v18192_v34, %v21217_v51  ;;  %4240 = vperm.xlu1 %14470, %v21218_v23   ;;  %v18732_v12 = vadd.f32 %v3809_v25, %v3355_v42  ;;  %v18734_v30 = vadd.f32 %v3814_v33, %v3360_v55  ;;  %v14537_v25 = vld [vmem:[#allocation2 + $0x331] sm:$0xff] }
 0x49b   :  { %v18736_v41 = vadd.f32 %v3816_v45, %v3362_v37  ;;  %v18739_v58 = vadd.f32 %v2267_v56, %v18557_v29  ;;  %v13061_v20 = vrot.slane %v5758_v11, 9  ;;  %v13062_v3 = vrot.slane %v5757_v46, 9  ;;  %v4693_v55 = vpop.permute.xlu1 %4692  ;;  %v21220_v56 = vld [vmem:[#allocation46_spill] sm:$0xff] }
 0x49c   :  { %v5793_v6 = vcombine.high %v5791_v53, %v5791_v53  ;;  %v13068_v36 = vrot.slane %v5784_v28, 9  ;;  %v18741_v60 = vmax.f32 %v5750_v57, %v13060_v49  ;;  %v13069_v51 = vrot.slane %v5792_v0, 9  ;;  %v21222_v49 = vld [vmem:[#allocation52_spill] sm:$0xff] }
 0x49d   :  { %21219 = vst [vmem:[#allocation124_spill] sm:$0xff] %v18739_v58  ;;  %v4391_v15 = vadd.f32 %v4327_v27, %v3874_v24  ;;  %v4844_v42 = vmul.f32 %v18211_v14, %v4683_v50  ;;  %4265 = vperm.xlu0 %14469, %v14537_v25   ;;  %v13063_v37 = vrot.slane %v5759_v47, 9  ;;  %v13070_v33 = vrot.slane %v5791_v53, 9  ;;  %v21223_v25 = vld [vmem:[#allocation256_spill] sm:$0xff]  ;;  %v21225_v58 = vld [vmem:[#allocation210_spill] sm:$0xff] }
 0x49e   :  { %v4393_v45 = vadd.f32 %v4329_v39, %v3876_v32  ;;  %v4846_v29 = vmul.f32 %v18211_v14, %v4693_v55  ;;  %4275 = vperm.xlu1 %14470, %v3960_v62   ;;  %v2269_v23 = vmul.f32 %v18055_v44, %v21220_v56  ;;  %v2274_v57 = vmul.f32 %v18055_v44, %v21221_v54  ;;  %v18755_v39 = vpop.permute.xlu0 %2678 }
 0x49f   :  { %v2276_v24 = vmul.f32 %v18055_v44, %v21222_v49  ;;  %v4908_v27 = vadd.f32 %v4844_v42, %v4391_v15  ;;  %v13071_v50 = vrot.slane %v5793_v6, 9  ;;  %v18751_v2 = vmax.f32 %v5784_v28, %v13068_v36  ;;  %v18761_v44 = vpop.permute.xlu1 %2688 }
 0x4a0   :  { %v3300_v9 = vmul.f32 %v18082_v22, %v21223_v25  ;;  %v4910_v32 = vadd.f32 %v4846_v29, %v4393_v45  ;;  %v7388_v62 = vmax.f32 %v5758_v11, %v13061_v20  ;;  %v7396_v55 = vmax.f32 %v5792_v0, %v13069_v51  ;;  %v21226_v45 = vld [vmem:[#allocation240_spill] sm:$0xff] }
 0x4a1   :  { %v3302_v56 = vmul.f32 %v18082_v22, %v21224_v38  ;;  %v4979_v54 = vadd.f32 %v18632_v7, %v4908_v27  ;;  %3733 = vperm.xlu0 %14469, %v21225_v58   ;;  %v18763_v15 = vmax.f32 %v5757_v46, %v13062_v3  ;;  %v18765_v28 = vmax.f32 %v5759_v47, %v13063_v37 }
 0x4a2   :  { %v7397_v36 = vmax.f32 %v5791_v53, %v13070_v33  ;;  %v4981_v42 = vadd.f32 %v18632_v7, %v4910_v32  ;;  %3743 = vperm.xlu1 %14470, %v21226_v45   ;;  %v18770_v20 = vadd.f32 %v2269_v23, %v18569_v16  ;;  %v18773_v22 = vadd.f32 %v2274_v57, %v18612_v48  ;;  %v18783_v58 = vpop.permute.xlu0 %2713  ;;  %v21232_v45 = vld [vmem:[#allocation239_spill] sm:$0xff] }
 0x4a3   :  { %v18776_v0 = vadd.f32 %v2276_v24, %v18622_v17  ;;  %v5043_v11 = vmax.f32 %v4979_v54, 0.0  ;;  %v7398_v38 = vmax.f32 %v5793_v6, %v13071_v50  ;;  %v7571_v46 = vmax.f32 %v18741_v60, %v18751_v2  ;;  %v21227_v17 = vld [vmem:[#allocation227_spill] sm:$0xff]  ;;  %v18790_v37 = vpop.permute.xlu1 %2723 }
 0x4a4   :  { %v18781_v53 = vadd.f32 %v3300_v9, %v18715_v5  ;;  %v5045_v47 = vmax.f32 %v4981_v42, 0.0  ;;  %v7572_v3 = vmax.f32 %v7388_v62, %v7396_v55  ;;  %v18786_v16 = vadd.f32 %v3302_v56, %v18717_v21  ;;  %v18796_v9 = vld [vmem:[%s20368_s1 + $0x3] ss:$0 sm:$0xff]  ;;  %v21228_v21 = vld [vmem:[#allocation247_spill] sm:$0xff]  ;;  %v21230_v56 = vld [vmem:[#allocation230_spill] sm:$0xff] }
 0x4a5   :  { %v5811_v48 = vcombine.high %v5043_v11, %v5043_v11  ;;  %v5818_v51 = vrot.slane %v5043_v11, %v21203_v63  ;;  %4727 = vperm.xlu0 %14469, %v21227_v17   ;;  %v7573_v6 = vmax.f32 %v18763_v15, %v7397_v36  ;;  %v2271_v2 = vmul.f32 %v18796_v9, %v18410_v52  ;;  %v3444_v17 = vld [vmem:[#allocation2 + $0x350] sm:$0xff] }
 0x4a6   :  { %v5845_v60 = vcombine.high %v5045_v47, %v5045_v47  ;;  %v5852_v5 = vrot.slane %v5045_v47, %v21203_v63  ;;  %4737 = vperm.xlu1 %14470, %v21228_v21   ;;  %v2273_v33 = vmul.f32 %v18796_v9, %v18424_v35  ;;  %v7574_v49 = vmax.f32 %v18765_v28, %v7398_v38  ;;  %v18807_v25 = vpop.permute.xlu0 %3673  ;;  %v21233_v28 = vld [vmem:[#allocation110_spill] sm:$0xff] }
 0x4a7   :  { %v5825_v29 = vrot.slane %v5811_v48, %v21203_v63  ;;  %v5826_v23 = vcombine.high %v5818_v51, %v5818_v51  ;;  %v13076_v57 = vrot.slane %v5818_v51, 9  ;;  %21229 = vst [vmem:[#allocation68_spill] sm:$0xff] %v18807_v25  ;;  %v18810_v54 = vpop.permute.xlu1 %3683  ;;  %v8092_v11 = vrot.slane %v7572_v3, %v21233_v28  ;;  %v21234_v3 = vld [vmem:[#allocation245_spill] sm:$0xff] }
 0x4a8   :  { %v5859_v24 = vrot.slane %v5845_v60, %v21203_v63  ;;  %v5860_v27 = vcombine.high %v5852_v5, %v5852_v5  ;;  %v13084_v50 = vrot.slane %v5852_v5, 9  ;;  %21231 = vst [vmem:[#allocation112_spill] sm:$0xff] %v18810_v54  ;;  %v4324_v54 = vmul.f32 %v18192_v34, %v18563_v8 }
 0x4a9   :  { %v5827_v52 = vcombine.high %v5825_v29, %v5825_v29  ;;  %v13077_v32 = vrot.slane %v5826_v23, 9  ;;  %v13078_v62 = vrot.slane %v5825_v29, 9  ;;  %v7403_v55 = vmax.f32 %v5818_v51, %v13076_v57  ;;  %4762 = vperm.xlu0 %14469, %v21230_v56  }
 0x4aa   :  { %v5861_v35 = vcombine.high %v5859_v24, %v5859_v24  ;;  %v13085_v15 = vrot.slane %v5860_v27, 9  ;;  %v13086_v36 = vrot.slane %v5859_v24, 9  ;;  %v7411_v42 = vmax.f32 %v5852_v5, %v13084_v50  ;;  %4772 = vperm.xlu1 %14470, %v21232_v45   ;;  %v18814_v57 = vpop.permute.xlu0 %3708 }
 0x4ab   :  { %v13079_v38 = vrot.slane %v5827_v52, 9  ;;  %v7404_v47 = vmax.f32 %v5826_v23, %v13077_v32  ;;  %v7405_v48 = vmax.f32 %v5825_v29, %v13078_v62  ;;  %v8088_v56 = vrot.slane %v7571_v46, %v21233_v28  ;;  %v18822_v23 = vpop.permute.xlu1 %3718 }
 0x4ac   :  { %v13087_v60 = vrot.slane %v5861_v35, 9  ;;  %v7412_v21 = vmax.f32 %v5860_v27, %v13085_v15  ;;  %v7413_v25 = vmax.f32 %v5859_v24, %v13086_v36  ;;  %v7579_v51 = vmax.f32 %v7403_v55, %v7411_v42 }
 0x4ad   :  { %v4326_v5 = vmul.f32 %v18192_v34, %v18576_v1  ;;  %v7406_v50 = vmax.f32 %v5827_v52, %v13079_v38  ;;  %3753 = vperm.xlu0 %14469, %v21234_v3   ;;  %v8096_v29 = vrot.slane %v7573_v6, %v21233_v28  ;;  %v8100_v62 = vrot.slane %v7574_v49, %v21233_v28  ;;  %v21237_v3 = vld [vmem:[#allocation124_spill] sm:$0xff] }
 0x4ae   :  { %v7414_v27 = vmax.f32 %v5861_v35, %v13087_v60  ;;  %v7580_v24 = vmax.f32 %v7404_v47, %v7412_v21  ;;  %v7581_v32 = vmax.f32 %v7405_v48, %v7413_v25  ;;  %3763 = vperm.xlu1 %14470, %v3444_v17   ;;  %v8379_v46 = vsel %vm8309_vm4, %v8092_v11, %v8088_v56  ;;  %v4668_v35 = vpop.permute.xlu0 %4667  ;;  %v21236_v56 = vld [vmem:[#allocation253_spill] sm:$0xff] }
 0x4af   :  { %v18828_v8 = vadd.f32 %v2271_v2, %v18600_v26  ;;  %v18831_v1 = vadd.f32 %v2273_v33, %v18609_v19  ;;  %v8120_v55 = vrot.slane %v7579_v51, %v21233_v28  ;;  %v4388_v25 = vadd.f32 %v4324_v54, %v18727_v40  ;;  %v21235_v2 = vld [vmem:[#allocation248_spill] sm:$0xff]  ;;  %v4678_v19 = vpop.permute.xlu1 %4677  ;;  %v4477_v54 = vld [vmem:[#allocation2 + $0x34a] sm:$0xff] }
 0x4b0   :  { %v7582_v52 = vmax.f32 %v7406_v50, %v7414_v27  ;;  %v8124_v15 = vrot.slane %v7580_v24, %v21233_v28  ;;  %v8128_v6 = vrot.slane %v7581_v32, %v21233_v28  ;;  %v4390_v49 = vadd.f32 %v4326_v5, %v18732_v12 }
 0x4b1   :  { %v4331_v36 = vmul.f32 %v18192_v34, %v18606_v18  ;;  %v4841_v26 = vmul.f32 %v18211_v14, %v4668_v35  ;;  %4747 = vperm.xlu0 %14469, %v21235_v2   ;;  %v4333_v33 = vmul.f32 %v18192_v34, %v18619_v59  ;;  %v4843_v11 = vmul.f32 %v18211_v14, %v4678_v19  ;;  %v18852_v18 = vld [vmem:[%s20368_s1 + $0x4] ss:$0 sm:$0xff] }
 0x4b2   :  { %v8132_v42 = vrot.slane %v7582_v52, %v21233_v28  ;;  %v8386_v45 = vsel %vm8309_vm4, %v8124_v15, %v8120_v55  ;;  %4757 = vperm.xlu1 %14470, %v18583_v10   ;;  %v8380_v12 = vsel %vm8311_vm5, %v8096_v29, %v8379_v46  ;;  %v2784_v40 = vmul.f32 %v18852_v18, %v18648_v13  ;;  %v4703_v48 = vpop.permute.xlu0 %4702 }
 0x4b3   :  { %v8387_v34 = vsel %vm8311_vm5, %v8128_v6, %v8386_v45  ;;  %v4905_v59 = vadd.f32 %v4841_v26, %v4388_v25  ;;  %v2786_v38 = vmul.f32 %v18852_v18, %v18655_v61  ;;  %v2791_v10 = vmul.f32 %v18852_v18, %v18670_v31  ;;  %v4713_v61 = vpop.permute.xlu1 %4712  ;;  %v21238_v6 = vld [vmem:[#allocation9_spill] sm:$0xff]  ;;  %v3961_v45 = vld [vmem:[#allocation2 + $0x351] sm:$0xff] }
 0x4b4   :  { %v4907_v47 = vadd.f32 %v4843_v11, %v4390_v49  ;;  %v18862_v17 = vsel %vm8313_vm6, %v8132_v42, %v8387_v34  ;;  %v4395_v60 = vadd.f32 %v4331_v36, %v18734_v30  ;;  %v2793_v13 = vmul.f32 %v18852_v18, %v18677_v43  ;;  %v21240_v25 = vld [vmem:[#allocation65_spill] sm:$0xff] }
 0x4b5   :  { %v4976_v21 = vadd.f32 %v18632_v7, %v4905_v59  ;;  %v4848_v51 = vmul.f32 %v18211_v14, %v4703_v48  ;;  %4782 = vperm.xlu0 %14469, %v21236_v56   ;;  %v18872_v31 = vmul.f32 %v18796_v9, %v18456_v4  ;;  %v4397_v5 = vadd.f32 %v4333_v33, %v18736_v41  ;;  %v21242_v48 = vld [vmem:[#allocation49_spill] sm:$0xff] }
 0x4b6   :  { %v4978_v50 = vadd.f32 %v18632_v7, %v4907_v47  ;;  %v4850_v30 = vmul.f32 %v18211_v14, %v4713_v61  ;;  %4792 = vperm.xlu1 %14470, %v4477_v54   ;;  %v18878_v43 = vadd.f32 %v2784_v40, %v21237_v3  ;;  %v18881_v27 = vsel %vm8313_vm6, %v8100_v62, %v8380_v12  ;;  %v18889_v52 = vpop.permute.xlu0 %2181 }
 0x4b7   :  { %v5040_v29 = vmax.f32 %v4976_v21, 0.0  ;;  %v4912_v24 = vadd.f32 %v4848_v51, %v4395_v60  ;;  %v18884_v32 = vadd.f32 %v2786_v38, %v18770_v20  ;;  %v18887_v4 = vadd.f32 %v2791_v10, %v18773_v22  ;;  %v18897_v35 = vpop.permute.xlu1 %2191  ;;  %v21239_v20 = vld [vmem:[#allocation70_spill] sm:$0xff] }
 0x4b8   :  { %v5042_v41 = vmax.f32 %v4978_v50, 0.0  ;;  %v4914_v46 = vadd.f32 %v4850_v30, %v4397_v5  ;;  %v18892_v14 = vadd.f32 %v2793_v13, %v18776_v0  ;;  %v18901_v22 = vmul.f32 %v21240_v25, %v21239_v20  ;;  %v21241_v0 = vld [vmem:[#allocation63_spill] sm:$0xff] }
 0x4b9   :  { %v5760_v55 = vcombine.high %v5040_v29, %v5040_v29  ;;  %v5767_v15 = vrot.slane %v5040_v29, %v21203_v63  ;;  %v4983_v62 = vadd.f32 %v18632_v7, %v4912_v24  ;;  %4250 = vperm.xlu0 %14469, %v21238_v6   ;;  %v21243_v20 = vld [vmem:[#allocation71_spill] sm:$0xff] }
 0x4ba   :  { %v5794_v49 = vcombine.high %v5042_v41, %v5042_v41  ;;  %v5801_v36 = vrot.slane %v5042_v41, %v21203_v63  ;;  %v4985_v26 = vadd.f32 %v18632_v7, %v4914_v46  ;;  %4260 = vperm.xlu1 %14470, %v21241_v0   ;;  %v18908_v59 = vpop.permute.xlu0 %3175 }
 0x4bb   :  { %v5774_v2 = vrot.slane %v5760_v55, %v21203_v63  ;;  %v5775_v19 = vcombine.high %v5767_v15, %v5767_v15  ;;  %v13064_v33 = vrot.slane %v5767_v15, 9  ;;  %v5047_v42 = vmax.f32 %v4983_v62, 0.0  ;;  %v3186_v60 = vpop.permute.xlu1 %3185 }
 0x4bc   :  { %v5808_v11 = vrot.slane %v5794_v49, %v21203_v63  ;;  %v5809_v12 = vcombine.high %v5801_v36, %v5801_v36  ;;  %v13072_v40 = vrot.slane %v5801_v36, 9  ;;  %v5049_v34 = vmax.f32 %v4985_v26, 0.0 }
 0x4bd   :  { %v5776_v54 = vcombine.high %v5774_v2, %v5774_v2  ;;  %v13065_v38 = vrot.slane %v5775_v19, 9  ;;  %v13066_v10 = vrot.slane %v5774_v2, 9  ;;  %v7391_v47 = vmax.f32 %v5767_v15, %v13064_v33  ;;  %4270 = vperm.xlu0 %14469, %v21242_v48   ;;  %v21245_v48 = vld [vmem:[#allocation72_spill] sm:$0xff] }
 0x4be   :  { %v5810_v13 = vcombine.high %v5808_v11, %v5808_v11  ;;  %v13073_v21 = vrot.slane %v5809_v12, 9  ;;  %v13074_v51 = vrot.slane %v5808_v11, 9  ;;  %v7399_v56 = vmax.f32 %v5801_v36, %v13072_v40  ;;  %4280 = vperm.xlu1 %14470, %v3961_v45   ;;  %v3211_v46 = vpop.permute.xlu0 %3210  ;;  %v4478_v40 = vld [vmem:[#allocation2 + $0x352] sm:$0xff] }
 0x4bf   :  { %v13067_v61 = vrot.slane %v5776_v54, 9  ;;  %v7392_v5 = vmax.f32 %v5775_v19, %v13065_v38  ;;  %v7393_v50 = vmax.f32 %v5774_v2, %v13066_v10  ;;  %v5879_v30 = vcombine.high %v5047_v42, %v5047_v42  ;;  %v3221_v49 = vpop.permute.xlu1 %3220  ;;  %v21244_v19 = vld [vmem:[#allocation120_spill] sm:$0xff] }
 0x4c0   :  { %v13075_v3 = vrot.slane %v5810_v13, 9  ;;  %v7400_v29 = vmax.f32 %v5809_v12, %v13073_v21  ;;  %v7401_v24 = vmax.f32 %v5808_v11, %v13074_v51  ;;  %v7575_v41 = vmax.f32 %v7391_v47, %v7399_v56 }
 0x4c1   :  { %v7394_v55 = vmax.f32 %v5776_v54, %v13067_v61  ;;  %v5886_v15 = vrot.slane %v5047_v42, %v21203_v63  ;;  %v5893_v62 = vrot.slane %v5879_v30, %v21203_v63  ;;  %v5913_v6 = vcombine.high %v5049_v34, %v5049_v34  ;;  %4767 = vperm.xlu0 %14469, %v21243_v20   ;;  %v21246_v61 = vld [vmem:[#allocation121_spill] sm:$0xff] }
 0x4c2   :  { %v7402_v36 = vmax.f32 %v5810_v13, %v13075_v3  ;;  %v7576_v26 = vmax.f32 %v7392_v5, %v7400_v29  ;;  %v7577_v0 = vmax.f32 %v7393_v50, %v7401_v24  ;;  %v8104_v2 = vrot.slane %v7575_v41, %v21233_v28  ;;  %4777 = vperm.xlu1 %14470, %v21244_v19   ;;  %v18920_v47 = vpop.permute.xlu0 %4170 }
 0x4c3   :  { %v5894_v33 = vcombine.high %v5886_v15, %v5886_v15  ;;  %v5895_v45 = vcombine.high %v5893_v62, %v5893_v62  ;;  %v13092_v11 = vrot.slane %v5886_v15, 9  ;;  %v13094_v12 = vrot.slane %v5893_v62, 9  ;;  %v18927_v5 = vpop.permute.xlu1 %4180 }
 0x4c4   :  { %v7578_v54 = vmax.f32 %v7394_v55, %v7402_v36  ;;  %v8108_v42 = vrot.slane %v7576_v26, %v21233_v28  ;;  %v8112_v38 = vrot.slane %v7577_v0, %v21233_v28  ;;  %v8382_v10 = vsel %vm8315_vm7, %v8104_v2, %v18881_v27 }
 0x4c5   :  { %v3820_v13 = vmul.f32 %v21240_v25, %v21245_v48  ;;  %v2788_v21 = vmul.f32 %v18852_v18, %v18755_v39  ;;  %v13093_v51 = vrot.slane %v5894_v33, 9  ;;  %v13095_v56 = vrot.slane %v5895_v45, 9  ;;  %4787 = vperm.xlu0 %14469, %v21246_v61  }
 0x4c6   :  { %v8116_v50 = vrot.slane %v7578_v54, %v21233_v28  ;;  %v8383_v30 = vsel %vm8317_vm8, %v8108_v42, %v8382_v10  ;;  %v5920_v27 = vrot.slane %v5049_v34, %v21203_v63  ;;  %v5927_v3 = vrot.slane %v5913_v6, %v21203_v63  ;;  %4797 = vperm.xlu1 %14470, %v4478_v40   ;;  %v4206_v0 = vpop.permute.xlu0 %4205  ;;  %v18939_v34 = vld [vmem:[%s20368_s1 + $0x5] ss:$0 sm:$0xff] }
 0x4c7   :  { %v8384_v29 = vsel %vm8319_vm9, %v8112_v38, %v8383_v30  ;;  %v7419_v24 = vmax.f32 %v5886_v15, %v13092_v11  ;;  %v7420_v41 = vmax.f32 %v5894_v33, %v13093_v51  ;;  %v7421_v39 = vmax.f32 %v5893_v62, %v13094_v12  ;;  %v4216_v6 = vpop.permute.xlu1 %4215 }
 0x4c8   :  { %v8385_v55 = vsel %vm8321_vm10, %v8116_v50, %v8384_v29  ;;  %v5928_v20 = vcombine.high %v5920_v27, %v5920_v27  ;;  %v5929_v36 = vcombine.high %v5927_v3, %v5927_v3  ;;  %v13100_v26 = vrot.slane %v5920_v27, 9 }
 0x4c9   :  { %8454 = vst.msk [vmem:[#allocation3 + $0xc1] sm:$0xff] %vm7627_vm2, %v8385_v55  ;;  %v7422_v2 = vmax.f32 %v5895_v45, %v13095_v56  ;;  %v13102_v19 = vrot.slane %v5927_v3, 9  ;;  %v3301_v15 = vmul.f32 %v18939_v34, %v18908_v59  ;;  %v3303_v62 = vmul.f32 %v18939_v34, %v3186_v60  ;;  %v21247_v56 = vld [vmem:[#allocation55_spill] sm:$0xff] }
 0x4ca   :  { %v13101_v33 = vrot.slane %v5928_v20, 9  ;;  %v13103_v11 = vrot.slane %v5929_v36, 9  ;;  %v7427_v12 = vmax.f32 %v5920_v27, %v13100_v26  ;;  %v3308_v40 = vmul.f32 %v18939_v34, %v3211_v46  ;;  %v18955_v51 = vpop.permute.xlu0 %2201  ;;  %v18971_v27 = vld [vmem:[%s20368_s1 + $0x7] ss:$0 sm:$0xff] }
 0x4cb   :  { %v7429_v54 = vmax.f32 %v5927_v3, %v13102_v19  ;;  %v18946_v45 = vadd.f32 %v3301_v15, %v18878_v43  ;;  %v18949_v42 = vadd.f32 %v3303_v62, %v18884_v32  ;;  %v3310_v38 = vmul.f32 %v18939_v34, %v3221_v49  ;;  %v18964_v50 = vpop.permute.xlu1 %2211  ;;  %v21248_v15 = vld [vmem:[#allocation201_spill] sm:$0xff]  ;;  %v21249_v62 = vld [vmem:[#allocation78_spill] sm:$0xff] }
 0x4cc   :  { %v7428_v10 = vmax.f32 %v5928_v20, %v13101_v33  ;;  %v7430_v48 = vmax.f32 %v5929_v36, %v13103_v11  ;;  %v7587_v59 = vmax.f32 %v7419_v24, %v7427_v12  ;;  %v18953_v60 = vadd.f32 %v3308_v40, %v18887_v4  ;;  %v21250_v12 = vld [vmem:[#allocation206_spill] sm:$0xff]  ;;  %v21251_v40 = vld [vmem:[#allocation80_spill] sm:$0xff] }
 0x4cd   :  { %v2280_v46 = vmul.f32 %v18796_v9, %v21247_v56  ;;  %v3882_v43 = vadd.f32 %v18901_v22, %v18781_v53  ;;  %v7589_v61 = vmax.f32 %v7421_v39, %v7429_v54  ;;  %v18962_v32 = vadd.f32 %v3310_v38, %v18892_v14 }
 0x4ce   :  { %v2790_v49 = vmul.f32 %v18852_v18, %v18761_v44  ;;  %v7588_v30 = vmax.f32 %v7420_v41, %v7428_v10  ;;  %v7590_v4 = vmax.f32 %v7422_v2, %v7430_v48  ;;  %v4335_v3 = vmul.f32 %v18971_v27, %v4206_v0  ;;  %v3196_v55 = vpop.permute.xlu0 %3195  ;;  %v21252_v48 = vld [vmem:[#allocation54_spill] sm:$0xff] }
 0x4cf   :  { %v3884_v53 = vadd.f32 %v3820_v13, %v18786_v16  ;;  %v2852_v22 = vadd.f32 %v2788_v21, %v18828_v8  ;;  %v8160_v14 = vrot.slane %v7589_v61, %v21233_v28  ;;  %v4337_v29 = vmul.f32 %v18971_v27, %v4216_v6  ;;  %v3206_v21 = vpop.permute.xlu1 %3205 }
 0x4d0   :  { %v8152_v24 = vrot.slane %v7587_v59, %v21233_v28  ;;  %v8156_v44 = vrot.slane %v7588_v30, %v21233_v28  ;;  %v8164_v41 = vrot.slane %v7590_v4, %v21233_v28  ;;  %v18981_v39 = vadd.f32 %v4335_v3, %v3882_v43  ;;  %v8489_v20 = vld [vmem:[#allocation3 + $0xc1] sm:$0xff]  ;;  %v21253_v59 = vld [vmem:[#allocation59_spill] sm:$0xff]  ;;  %v21254_v43 = vld [vmem:[#allocation238_spill] sm:$0xff] }
 0x4d1   :  { %v9119_v36 = vld [vmem:[#allocation3 + $0xc0] sm:$0xff]  ;;  %v2795_v16 = vmul.f32 %v18852_v18, %v18783_v58  ;;  %v18985_v13 = vadd.f32 %v4337_v29, %v3884_v53  ;;  %v3305_v8 = vmul.f32 %v18939_v34, %v3196_v55  ;;  %13742 = vmatprep.mubr.msk.f32.mxu1 %vm7627_vm2, %v8489_v20  ;;  %v2854_v26 = vadd.f32 %v2790_v49, %v18831_v1  ;;  %v21256_v3 = vld [vmem:[#allocation67_spill] sm:$0xff]  ;;  %v21259_v20 = vld [vmem:[#allocation66_spill] sm:$0xff] }
 0x4d2   :  { %13824 = vmatmul.mubr.msk.f32.gmra.mrb[8].mxu0 %vm7627_vm2, %v9119_v36  ;;  %v2797_v0 = vmul.f32 %v18852_v18, %v18790_v37  ;;  %v8393_v2 = vsel %vm8309_vm4, %v8156_v44, %v8152_v24  ;;  %v3307_v19 = vmul.f32 %v18939_v34, %v3206_v21  ;;  %v2270_v58 = vmul.f32 %v18796_v9, %v21248_v15  ;;  %v3231_v38 = vpop.permute.xlu0 %3230  ;;  %v21255_v4 = vld [vmem:[#allocation56_spill] sm:$0xff] }
 0x4d3   :  { %v2342_v6 = vadd.f32 %v18872_v31, %v21249_v62  ;;  %v8394_v33 = vsel %vm8311_vm5, %v8160_v14, %v8393_v2  ;;  %v19000_v11 = vadd.f32 %v3305_v8, %v2852_v22  ;;  %v2272_v1 = vmul.f32 %v18796_v9, %v21250_v12  ;;  %v3241_v30 = vpop.permute.xlu1 %3240  ;;  %v14542_v24 = vld [vmem:[%s20368_s1 + $0x1] ss:$0 sm:$0xff]  ;;  %v21260_v8 = vld [vmem:[#allocation90_spill] sm:$0xff]  ;;  %v21261_v2 = vld [vmem:[#allocation15_spill] sm:$0xff] }
 0x4d4   :  { %v2344_v54 = vadd.f32 %v2280_v46, %v21251_v40  ;;  %v19005_v37 = vadd.f32 %v3307_v19, %v2854_v26  ;;  %v19008_v10 = vsel %vm8313_vm6, %v8164_v41, %v8394_v33  ;;  %v1817_v56 = vadd.f32 %v21253_v59, %v21252_v48  ;;  %v21257_v46 = vld [vmem:[#allocation241_spill] sm:$0xff]  ;;  %v21258_v44 = vld [vmem:[#allocation88_spill] sm:$0xff]  ;;  %v21263_v33 = vld [vmem:[#allocation102_spill] sm:$0xff] }
 0x4d5   :  { %v2787_v31 = vmul.f32 %v18852_v18, %v21254_v43  ;;  %v2859_v61 = vadd.f32 %v2795_v16, %v2342_v6  ;;  %v3312_v49 = vmul.f32 %v18939_v34, %v3231_v38  ;;  %v1819_v53 = vadd.f32 %v21256_v3, %v21255_v4  ;;  %v14543_v62 = vld [vmem:[%s20368_s1] ss:$0 sm:$0xff]  ;;  %v21264_v38 = vld [vmem:[#allocation45_spill] sm:$0xff] }
 0x4d6   :  { %v2789_v22 = vmul.f32 %v18852_v18, %v21257_v46  ;;  %v2861_v14 = vadd.f32 %v2797_v0, %v2344_v54  ;;  %v3314_v29 = vmul.f32 %v18939_v34, %v3241_v30  ;;  %v1227_v41 = vmul.f32 %v14542_v24, %v21258_v44  ;;  %v19033_v15 = vpop.permute.xlu0 %4190  ;;  %v21265_v59 = vld [vmem:[#allocation104_spill] sm:$0xff]  ;;  %v21267_v30 = vld [vmem:[#allocation58_spill] sm:$0xff] }
 0x4d7   :  { %v2334_v55 = vadd.f32 %v2270_v58, %v1817_v56  ;;  %v3304_v36 = vmul.f32 %v18939_v34, %v21259_v20  ;;  %v19026_v16 = vadd.f32 %v3312_v49, %v2859_v61  ;;  %v1229_v21 = vmul.f32 %v14542_v24, %v21260_v8  ;;  %v21262_v58 = vld [vmem:[#allocation43_spill] sm:$0xff]  ;;  %v21266_v49 = vld [vmem:[#allocation254_spill] sm:$0xff]  ;;  %v21268_v3 = vld [vmem:[#allocation60_spill] sm:$0xff] }
 0x4d8   :  { %v2336_v26 = vadd.f32 %v2272_v1, %v1819_v53  ;;  %v3306_v0 = vmul.f32 %v18939_v34, %v21261_v2  ;;  %v19031_v19 = vadd.f32 %v3314_v29, %v2861_v14  ;;  %v728_v6 = vmul.f32 %v14543_v62, %v21262_v58  ;;  %v19042_v1 = vpop.permute.xlu1 %4200  ;;  %v21270_v29 = vld [vmem:[#allocation53_spill] sm:$0xff] }
 0x4d9   :  { %v1241_v12 = vmul.f32 %v14542_v24, %v21263_v33  ;;  %v2851_v40 = vadd.f32 %v2787_v31, %v2334_v55  ;;  %v3822_v54 = vmul.f32 %v21240_v25, %v18814_v57  ;;  %v730_v48 = vmul.f32 %v14543_v62, %v21264_v38  ;;  %v14544_v31 = vld [vmem:[%s20368_s1 + $0x2] ss:$0 sm:$0xff]  ;;  %v21269_v57 = vld [vmem:[#allocation166_spill] sm:$0xff]  ;;  %v21274_v38 = vld [vmem:[#allocation61_spill] sm:$0xff] }
 0x4da   :  { %v1243_v56 = vmul.f32 %v14542_v24, %v21265_v59  ;;  %v2853_v43 = vadd.f32 %v2789_v22, %v2336_v26  ;;  %v3824_v61 = vmul.f32 %v21240_v25, %v18822_v23  ;;  %v1289_v4 = vadd.f32 %v21267_v30, %v21266_v49  ;;  %v21271_v55 = vld [vmem:[#allocation92_spill] sm:$0xff]  ;;  %v4226_v23 = vpop.permute.xlu0 %4225  ;;  %v21273_v25 = vld [vmem:[#allocation51_spill] sm:$0xff]  ;;  %v21275_v49 = vld [vmem:[#allocation106_spill] sm:$0xff] }
 0x4db   :  { %v1291_v53 = vadd.f32 %v1227_v41, %v21268_v3  ;;  %v1758_v46 = vmul.f32 %v14544_v31, %v21269_v57  ;;  %v3368_v14 = vadd.f32 %v3304_v36, %v2851_v40  ;;  %v1293_v44 = vadd.f32 %v1229_v21, %v21270_v29  ;;  %v21272_v22 = vld [vmem:[#allocation168_spill] sm:$0xff] }
 0x4dc   :  { %v1231_v20 = vmul.f32 %v14542_v24, %v21271_v55  ;;  %v1760_v8 = vmul.f32 %v14544_v31, %v21272_v22  ;;  %v3370_v26 = vadd.f32 %v3306_v0, %v2853_v43  ;;  %v1305_v2 = vadd.f32 %v1241_v12, %v21273_v25  ;;  %v4236_v33 = vpop.permute.xlu1 %4235  ;;  %v21276_v43 = vld [vmem:[#allocation150_spill] sm:$0xff]  ;;  %v21277_v3 = vld [vmem:[#allocation108_spill] sm:$0xff] }
 0x4dd   :  { %v3886_v62 = vadd.f32 %v3822_v54, %v3368_v14  ;;  %v2275_v41 = vmul.f32 %v18796_v9, %v18889_v52  ;;  %v4339_v58 = vmul.f32 %v18971_v27, %v4226_v23  ;;  %v1307_v59 = vadd.f32 %v1243_v56, %v21274_v38  ;;  %v21278_v57 = vld [vmem:[#allocation152_spill] sm:$0xff] }
 0x4de   :  { %v3888_v36 = vadd.f32 %v3824_v61, %v3370_v26  ;;  %v2277_v21 = vmul.f32 %v18796_v9, %v18897_v35  ;;  %v4341_v40 = vmul.f32 %v18971_v27, %v4236_v33  ;;  %v1245_v0 = vmul.f32 %v14542_v24, %v21275_v49  ;;  %v2699_v56 = vpop.permute.xlu0 %2698  ;;  %v21279_v61 = vld [vmem:[#allocation154_spill] sm:$0xff]  ;;  %v21280_v35 = vld [vmem:[#allocation216_spill] sm:$0xff] }
 0x4df   :  { %v1742_v30 = vmul.f32 %v14544_v31, %v21276_v43  ;;  %v1822_v12 = vadd.f32 %v1758_v46, %v1305_v2  ;;  %v19068_v54 = vadd.f32 %v4339_v58, %v3886_v62  ;;  %v1247_v52 = vmul.f32 %v14542_v24, %v21277_v3  ;;  %v21281_v46 = vld [vmem:[#allocation156_spill] sm:$0xff]  ;;  %v21285_v3 = vld [vmem:[#allocation226_spill] sm:$0xff] }
 0x4e0   :  { %v1744_v14 = vmul.f32 %v14544_v31, %v21278_v57  ;;  %v1824_v29 = vadd.f32 %v1760_v8, %v1307_v59  ;;  %v19072_v55 = vadd.f32 %v4341_v40, %v3888_v36  ;;  %v1746_v22 = vmul.f32 %v14544_v31, %v21279_v61  ;;  %v2709_v33 = vpop.permute.xlu1 %2708  ;;  %v21282_v62 = vld [vmem:[#allocation220_spill] sm:$0xff]  ;;  %v21284_v40 = vld [vmem:[#allocation225_spill] sm:$0xff] }
 0x4e1   :  { %v2259_v26 = vmul.f32 %v18796_v9, %v21280_v35  ;;  %v2339_v23 = vadd.f32 %v2275_v41, %v1822_v12  ;;  %v2792_v25 = vmul.f32 %v18852_v18, %v2699_v56  ;;  %v1748_v2 = vmul.f32 %v14544_v31, %v21281_v46  ;;  %v21283_v38 = vld [vmem:[#allocation64_spill] sm:$0xff] }
 0x4e2   :  { %v2261_v24 = vmul.f32 %v18796_v9, %v21282_v62  ;;  %v2341_v58 = vadd.f32 %v2277_v21, %v1824_v29  ;;  %v2794_v8 = vmul.f32 %v18852_v18, %v2709_v33  ;;  %v1295_v59 = vadd.f32 %v1231_v20, %v21283_v38  ;;  %v19091_v61 = vpop.permute.xlu0 %3693  ;;  %v21286_v33 = vld [vmem:[#allocation47_spill] sm:$0xff]  ;;  %v21290_v62 = vld [vmem:[#allocation200_spill] sm:$0xff] }
 0x4e3   :  { %v1806_v36 = vadd.f32 %v1742_v30, %v1289_v4  ;;  %v2776_v49 = vmul.f32 %v18852_v18, %v21284_v40  ;;  %v19085_v43 = vadd.f32 %v2792_v25, %v2339_v23  ;;  %v1309_v41 = vadd.f32 %v1245_v0, %v728_v6  ;;  %v21287_v25 = vld [vmem:[#allocation224_spill] sm:$0xff] }
 0x4e4   :  { %v1808_v12 = vadd.f32 %v1744_v14, %v1291_v53  ;;  %v2778_v57 = vmul.f32 %v18852_v18, %v21285_v3  ;;  %v19089_v56 = vadd.f32 %v2794_v8, %v2341_v58  ;;  %v1311_v21 = vadd.f32 %v1247_v52, %v730_v48  ;;  %v19095_v20 = vpop.permute.xlu1 %3703  ;;  %v21288_v53 = vld [vmem:[#allocation48_spill] sm:$0xff]  ;;  %v21289_v14 = vld [vmem:[#allocation170_spill] sm:$0xff]  ;;  %v19107_v52 = vld [vmem:[%s20368_s1 + $0x6] ss:$0 sm:$0xff] }
 0x4e5   :  { %v1810_v29 = vadd.f32 %v1746_v22, %v1293_v44  ;;  %v2323_v35 = vadd.f32 %v2259_v26, %v1806_v36  ;;  %v3293_v4 = vmul.f32 %v18939_v34, %v21286_v33  ;;  %v1812_v30 = vadd.f32 %v1748_v2, %v1295_v59  ;;  %v21291_v22 = vld [vmem:[#allocation122_spill] sm:$0xff]  ;;  %v21292_v2 = vld [vmem:[#allocation172_spill] sm:$0xff]  ;;  %v21294_v59 = vld [vmem:[#allocation123_spill] sm:$0xff] }
 0x4e6   :  { %v2325_v23 = vadd.f32 %v2261_v24, %v1808_v12  ;;  %v2263_v6 = vmul.f32 %v18796_v9, %v21287_v25  ;;  %v3295_v0 = vmul.f32 %v18939_v34, %v21288_v53  ;;  %v1762_v46 = vmul.f32 %v14544_v31, %v21289_v14  ;;  %v21293_v8 = vld [vmem:[#allocation236_spill] sm:$0xff]  ;;  %v3729_v40 = vpop.permute.xlu0 %3728  ;;  %v21295_v12 = vld [vmem:[#allocation237_spill] sm:$0xff] }
 0x4e7   :  { %v2265_v48 = vmul.f32 %v18796_v9, %v21290_v62  ;;  %v2840_v44 = vadd.f32 %v2776_v49, %v2323_v35  ;;  %v3811_v26 = vmul.f32 %v19107_v52, %v21291_v22  ;;  %v1764_v24 = vmul.f32 %v14544_v31, %v21292_v2  ;;  %v21296_v62 = vld [vmem:[#allocation57_spill] sm:$0xff] }
 0x4e8   :  { %v2842_v58 = vadd.f32 %v2778_v57, %v2325_v23  ;;  %v2780_v38 = vmul.f32 %v18852_v18, %v21293_v8  ;;  %v3813_v36 = vmul.f32 %v19107_v52, %v21294_v59  ;;  %v2782_v49 = vmul.f32 %v18852_v18, %v21295_v12  ;;  %v3739_v25 = vpop.permute.xlu1 %3738 }
 0x4e9   :  { %v3357_v3 = vadd.f32 %v3293_v4, %v2840_v44  ;;  %v4328_v35 = vmul.f32 %v18971_v27, %v18920_v47  ;;  %v3826_v33 = vmul.f32 %v19107_v52, %v3729_v40  ;;  %v2327_v53 = vadd.f32 %v2263_v6, %v1810_v29  ;;  %v21297_v47 = vld [vmem:[#allocation14_spill] sm:$0xff] }
 0x4ea   :  { %v3359_v31 = vadd.f32 %v3295_v0, %v2842_v58  ;;  %v4330_v57 = vmul.f32 %v18971_v27, %v18927_v5  ;;  %v3828_v23 = vmul.f32 %v19107_v52, %v3739_v25  ;;  %v2329_v14 = vadd.f32 %v2265_v48, %v1812_v30  ;;  %v4688_v6 = vpop.permute.xlu0 %4687  ;;  %v21299_v0 = vld [vmem:[#allocation68_spill] sm:$0xff] }
 0x4eb   :  { %v3297_v22 = vmul.f32 %v18939_v34, %v21296_v62  ;;  %v3875_v2 = vadd.f32 %v3811_v26, %v3357_v3  ;;  %v19127_v4 = vadd.f32 %v3826_v33, %v18953_v60  ;;  %v2844_v44 = vadd.f32 %v2780_v38, %v2327_v53  ;;  %v19139_v26 = vld [vmem:[%s20368_s1 + $0x8] ss:$0 sm:$0xff]  ;;  %v21300_v38 = vld [vmem:[#allocation112_spill] sm:$0xff] }
 0x4ec   :  { %v3299_v8 = vmul.f32 %v18939_v34, %v21297_v47  ;;  %v3877_v59 = vadd.f32 %v3813_v36, %v3359_v31  ;;  %v19132_v29 = vadd.f32 %v3828_v23, %v18962_v32  ;;  %v2846_v5 = vadd.f32 %v2782_v49, %v2329_v14  ;;  %v4698_v58 = vpop.permute.xlu1 %4697 }
 0x4ed   :  { %v3815_v30 = vmul.f32 %v19107_v52, %v21299_v0  ;;  %v4392_v48 = vadd.f32 %v4328_v35, %v3875_v2  ;;  %v4845_v60 = vmul.f32 %v19139_v26, %v4688_v6  ;;  %v3817_v36 = vmul.f32 %v19107_v52, %v21300_v38 }
 0x4ee   :  { %21298 = vst [vmem:[#allocation125_spill] sm:$0xff] %v19132_v29  ;;  %v4394_v40 = vadd.f32 %v4330_v57, %v3877_v59  ;;  %v2279_v32 = vmul.f32 %v18796_v9, %v18955_v51  ;;  %v4847_v12 = vmul.f32 %v19139_v26, %v4698_v58  ;;  %v3361_v49 = vadd.f32 %v3297_v22, %v2844_v44 }
 0x4ef   :  { %v2281_v3 = vmul.f32 %v18796_v9, %v18964_v50  ;;  %v4332_v35 = vmul.f32 %v18971_v27, %v19033_v15  ;;  %v4909_v33 = vadd.f32 %v4845_v60, %v4392_v48  ;;  %v1826_v25 = vadd.f32 %v1762_v46, %v1309_v41  ;;  %v4723_v57 = vpop.permute.xlu0 %4722 }
 0x4f0   :  { %v3363_v53 = vadd.f32 %v3299_v8, %v2846_v5  ;;  %v4334_v31 = vmul.f32 %v18971_v27, %v19042_v1  ;;  %v4911_v23 = vadd.f32 %v4847_v12, %v4394_v40  ;;  %v1828_v14 = vadd.f32 %v1764_v24, %v1311_v21  ;;  %v4733_v2 = vpop.permute.xlu1 %4732 }
 0x4f1   :  { %v3879_v62 = vadd.f32 %v3815_v30, %v3361_v49  ;;  %v4980_v51 = vadd.f32 %v18632_v7, %v4909_v33  ;;  %v4852_v22 = vmul.f32 %v19139_v26, %v4723_v57  ;;  %v19155_v9 = vadd.f32 %v2279_v32, %v1826_v25 }
 0x4f2   :  { %v3881_v44 = vadd.f32 %v3817_v36, %v3363_v53  ;;  %v4982_v50 = vadd.f32 %v18632_v7, %v4911_v23  ;;  %v4854_v15 = vmul.f32 %v19139_v26, %v4733_v2  ;;  %v19159_v41 = vadd.f32 %v2281_v3, %v1828_v14 }
 0x4f3   :  { %v19161_v46 = vadd.f32 %v4332_v35, %v3879_v62  ;;  %v5044_v1 = vmax.f32 %v4980_v51, 0.0  ;;  %v4916_v21 = vadd.f32 %v4852_v22, %v18981_v39  ;;  %v3819_v47 = vmul.f32 %v19107_v52, %v19091_v61  ;;  %v2719_v6 = vpop.permute.xlu0 %2718  ;;  %v19177_v39 = vld [vmem:[%s20369_s2] ss:$0 sm:$0xff] }
 0x4f4   :  { %v19164_v24 = vadd.f32 %v4334_v31, %v3881_v44  ;;  %v5046_v8 = vmax.f32 %v4982_v50, 0.0  ;;  %v4918_v59 = vadd.f32 %v4854_v15, %v18985_v13  ;;  %v19171_v7 = vmul.f32 %v19107_v52, %v19095_v20  ;;  %v2729_v48 = vpop.permute.xlu1 %2728 }
 0x4f5   :  { %v5828_v5 = vcombine.high %v5044_v1, %v5044_v1  ;;  %v5835_v0 = vrot.slane %v5044_v1, %v21203_v63  ;;  %v4987_v30 = vadd.f32 %v19177_v39, %v4916_v21  ;;  %v2796_v58 = vmul.f32 %v18852_v18, %v2719_v6 }
 0x4f6   :  { %v5862_v61 = vcombine.high %v5046_v8, %v5046_v8  ;;  %v5869_v60 = vrot.slane %v5046_v8, %v21203_v63  ;;  %v4989_v13 = vadd.f32 %v19177_v39, %v4918_v59 }
 0x4f7   :  { %v5842_v20 = vrot.slane %v5828_v5, %v21203_v63  ;;  %v5843_v38 = vcombine.high %v5835_v0, %v5835_v0  ;;  %v13080_v36 = vrot.slane %v5835_v0, 9  ;;  %v5051_v40 = vmax.f32 %v4987_v30, 0.0  ;;  %v19185_v35 = vpop.permute.xlu0 %3713 }
 0x4f8   :  { %v5876_v32 = vrot.slane %v5862_v61, %v21203_v63  ;;  %v5877_v12 = vcombine.high %v5869_v60, %v5869_v60  ;;  %v13088_v49 = vrot.slane %v5869_v60, 9  ;;  %v5053_v3 = vmax.f32 %v4989_v13, 0.0  ;;  %v19187_v23 = vpop.permute.xlu1 %3723 }
 0x4f9   :  { %v5844_v33 = vcombine.high %v5842_v20, %v5842_v20  ;;  %v13081_v25 = vrot.slane %v5843_v38, 9  ;;  %v13082_v53 = vrot.slane %v5842_v20, 9  ;;  %v7407_v31 = vmax.f32 %v5835_v0, %v13080_v36 }
 0x4fa   :  { %v5878_v57 = vcombine.high %v5876_v32, %v5876_v32  ;;  %v13089_v14 = vrot.slane %v5877_v12, 9  ;;  %v13090_v62 = vrot.slane %v5876_v32, 9  ;;  %v7415_v51 = vmax.f32 %v5869_v60, %v13088_v49 }
 0x4fb   :  { %v13083_v22 = vrot.slane %v5844_v33, 9  ;;  %v7408_v2 = vmax.f32 %v5843_v38, %v13081_v25  ;;  %v7409_v44 = vmax.f32 %v5842_v20, %v13082_v53  ;;  %v5947_v50 = vcombine.high %v5051_v40, %v5051_v40  ;;  %v3749_v59 = vpop.permute.xlu0 %3748 }
 0x4fc   :  { %v13091_v15 = vrot.slane %v5878_v57, 9  ;;  %v7416_v1 = vmax.f32 %v5877_v12, %v13089_v14  ;;  %v7417_v21 = vmax.f32 %v5876_v32, %v13090_v62  ;;  %v7583_v8 = vmax.f32 %v7407_v31, %v7415_v51  ;;  %v3759_v61 = vpop.permute.xlu1 %3758 }
 0x4fd   :  { %v7410_v6 = vmax.f32 %v5844_v33, %v13083_v22  ;;  %v5954_v5 = vrot.slane %v5051_v40, %v21203_v63  ;;  %v5961_v0 = vrot.slane %v5947_v50, %v21203_v63  ;;  %v5981_v30 = vcombine.high %v5053_v3, %v5053_v3 }
 0x4fe   :  { %v7418_v13 = vmax.f32 %v5878_v57, %v13091_v15  ;;  %v7584_v36 = vmax.f32 %v7408_v2, %v7416_v1  ;;  %v7585_v29 = vmax.f32 %v7409_v44, %v7417_v21  ;;  %v8136_v60 = vrot.slane %v7583_v8, %v21233_v28 }
 0x4ff   :  { %v5962_v38 = vcombine.high %v5954_v5, %v5954_v5  ;;  %v5963_v20 = vcombine.high %v5961_v0, %v5961_v0  ;;  %v13108_v49 = vrot.slane %v5954_v5, 9  ;;  %v13110_v25 = vrot.slane %v5961_v0, 9  ;;  %v4708_v53 = vpop.permute.xlu0 %4707 }
 0x500   :  { %v7586_v12 = vmax.f32 %v7410_v6, %v7418_v13  ;;  %v8140_v32 = vrot.slane %v7584_v36, %v21233_v28  ;;  %v8144_v33 = vrot.slane %v7585_v29, %v21233_v28  ;;  %v8389_v40 = vsel %vm8315_vm7, %v8136_v60, %v18862_v17 }
 0x501   :  { %v19197_v31 = vadd.f32 %v3819_v47, %v18946_v45  ;;  %v13109_v57 = vrot.slane %v5962_v38, 9  ;;  %v13111_v14 = vrot.slane %v5963_v20, 9  ;;  %v2798_v62 = vmul.f32 %v18852_v18, %v2729_v48  ;;  %v4718_v51 = vpop.permute.xlu1 %4717 }
 0x502   :  { %v8148_v22 = vrot.slane %v7586_v12, %v21233_v28  ;;  %v8390_v2 = vsel %vm8317_vm8, %v8140_v32, %v8389_v40  ;;  %v5988_v44 = vrot.slane %v5053_v3, %v21203_v63  ;;  %v5995_v29 = vrot.slane %v5981_v30, %v21203_v63 }
 0x503   :  { %v8391_v50 = vsel %vm8319_vm9, %v8144_v33, %v8390_v2  ;;  %v7435_v17 = vmax.f32 %v5954_v5, %v13108_v49  ;;  %v7437_v15 = vmax.f32 %v5961_v0, %v13110_v25  ;;  %v19206_v45 = vadd.f32 %v2796_v58, %v19155_v9  ;;  %v4743_v21 = vpop.permute.xlu0 %4742 }
 0x504   :  { %v8392_v47 = vsel %vm8321_vm10, %v8148_v22, %v8391_v50  ;;  %v5996_v1 = vcombine.high %v5988_v44, %v5988_v44  ;;  %v5997_v18 = vcombine.high %v5995_v29, %v5995_v29  ;;  %v13116_v48 = vrot.slane %v5988_v44, 9 }
 0x505   :  { %8455 = vst.msk [vmem:[#allocation3 + $0xd1] sm:$0xff] %vm7627_vm2, %v8392_v47  ;;  %v7436_v8 = vmax.f32 %v5962_v38, %v13109_v57  ;;  %v7438_v6 = vmax.f32 %v5963_v20, %v13111_v14  ;;  %v13118_v3 = vrot.slane %v5995_v29, 9  ;;  %v19211_v30 = vadd.f32 %v2798_v62, %v19159_v41  ;;  %v4753_v13 = vpop.permute.xlu1 %4752 }
 0x506   :  { %v13117_v5 = vrot.slane %v5996_v1, 9  ;;  %v13119_v0 = vrot.slane %v5997_v18, 9  ;;  %v7443_v36 = vmax.f32 %v5988_v44, %v13116_v48  ;;  %v3830_v9 = vmul.f32 %v19107_v52, %v3749_v59 }
 0x507   :  { %v19216_v58 = vadd.f32 %v19171_v7, %v18949_v42  ;;  %v7445_v60 = vmax.f32 %v5995_v29, %v13118_v3  ;;  %v3823_v49 = vmul.f32 %v19107_v52, %v19185_v35  ;;  %v3832_v38 = vmul.f32 %v19107_v52, %v3759_v61  ;;  %v3216_v32 = vpop.permute.xlu0 %3215 }
 0x508   :  { %v7444_v20 = vmax.f32 %v5996_v1, %v13117_v5  ;;  %v7446_v25 = vmax.f32 %v5997_v18, %v13119_v0  ;;  %v7595_v41 = vmax.f32 %v7435_v17, %v7443_v36  ;;  %v19222_v12 = vadd.f32 %v3830_v9, %v19026_v16 }
 0x509   :  { %v7597_v33 = vmax.f32 %v7437_v15, %v7445_v60  ;;  %v19225_v59 = vadd.f32 %v3832_v38, %v19031_v19  ;;  %v4849_v42 = vmul.f32 %v19139_v26, %v4708_v53  ;;  %v4851_v7 = vmul.f32 %v19139_v26, %v4718_v51  ;;  %v3226_v40 = vpop.permute.xlu1 %3225 }
 0x50a   :  { %v7596_v57 = vmax.f32 %v7436_v8, %v7444_v20  ;;  %v7598_v35 = vmax.f32 %v7438_v6, %v7446_v25  ;;  %v3825_v61 = vmul.f32 %v19107_v52, %v19187_v23  ;;  %v4856_v14 = vmul.f32 %v19139_v26, %v4743_v21 }
 0x50b   :  { %v8192_v16 = vrot.slane %v7597_v33, %v21233_v28  ;;  %v4913_v62 = vadd.f32 %v4849_v42, %v19161_v46  ;;  %v4915_v22 = vadd.f32 %v4851_v7, %v19164_v24  ;;  %v4858_v19 = vmul.f32 %v19139_v26, %v4753_v13 }
 0x50c   :  { %v8184_v53 = vrot.slane %v7595_v41, %v21233_v28  ;;  %v8188_v51 = vrot.slane %v7596_v57, %v21233_v28  ;;  %v4920_v2 = vadd.f32 %v4856_v14, %v19068_v54  ;;  %v3309_v44 = vmul.f32 %v18939_v34, %v3216_v32  ;;  %v4211_v29 = vpop.permute.xlu0 %4210  ;;  %v8490_v23 = vld [vmem:[#allocation3 + $0xd1] sm:$0xff] }
 0x50d   :  { %v9120_v50 = vld [vmem:[#allocation3 + $0xd0] sm:$0xff]  ;;  %v4984_v17 = vadd.f32 %v19177_v39, %v4913_v62  ;;  %v4986_v15 = vadd.f32 %v19177_v39, %v4915_v22  ;;  %v4922_v46 = vadd.f32 %v4858_v19, %v19072_v55  ;;  %v3311_v24 = vmul.f32 %v18939_v34, %v3226_v40  ;;  %13743 = vmatmul.mubr.msk.f32.gmra.mrb[10].mxu1 %vm7627_vm2, %v8490_v23  ;;  %v19245_v47 = vpop.permute.xlu1 %4220 }
 0x50e   :  { %v8400_v1 = vsel %vm8309_vm4, %v8188_v51, %v8184_v53  ;;  %v19249_v54 = vadd.f32 %v3823_v49, %v19000_v11  ;;  %v4991_v18 = vadd.f32 %v19177_v39, %v4920_v2  ;;  %v19253_v48 = vadd.f32 %v3309_v44, %v19085_v43  ;;  %13826 = vmatprep.mubr.msk.f32.mxu0 %vm7627_vm2, %v9120_v50 }
 0x50f   :  { %v19257_v55 = vsel %vm8311_vm5, %v8192_v16, %v8400_v1  ;;  %v5048_v21 = vmax.f32 %v4984_v17, 0.0  ;;  %v5050_v8 = vmax.f32 %v4986_v15, 0.0  ;;  %v4993_v6 = vadd.f32 %v19177_v39, %v4922_v46 }
 0x510   :  { %v19261_v3 = vrot.slane %v7598_v35, %v21233_v28  ;;  %v19264_v11 = vadd.f32 %v3825_v61, %v19005_v37  ;;  %v5055_v13 = vmax.f32 %v4991_v18, 0.0  ;;  %v19267_v5 = vadd.f32 %v3311_v24, %v19089_v56  ;;  %v19269_v43 = vpop.permute.xlu0 %4245 }
 0x511   :  { %v5896_v0 = vcombine.high %v5048_v21, %v5048_v21  ;;  %v5903_v36 = vrot.slane %v5048_v21, %v21203_v63  ;;  %v5930_v9 = vcombine.high %v5050_v8, %v5050_v8  ;;  %v5937_v60 = vrot.slane %v5050_v8, %v21203_v63  ;;  %v19273_v49 = vpop.permute.xlu1 %4255 }
 0x512   :  { %v6015_v38 = vcombine.high %v5055_v13, %v5055_v13  ;;  %v6022_v20 = vrot.slane %v5055_v13, %v21203_v63  ;;  %v5057_v25 = vmax.f32 %v4993_v6, 0.0  ;;  %v4336_v37 = vmul.f32 %v18971_v27, %v4211_v29 }
 0x513   :  { %v5910_v41 = vrot.slane %v5896_v0, %v21203_v63  ;;  %v5911_v56 = vcombine.high %v5903_v36, %v5903_v36  ;;  %v13096_v32 = vrot.slane %v5903_v36, 9  ;;  %v5944_v33 = vrot.slane %v5930_v9, %v21203_v63 }
 0x514   :  { %v5945_v42 = vcombine.high %v5937_v60, %v5937_v60  ;;  %v13104_v7 = vrot.slane %v5937_v60, 9  ;;  %v6029_v40 = vrot.slane %v6015_v38, %v21203_v63  ;;  %v6030_v57 = vcombine.high %v6022_v20, %v6022_v20  ;;  %v3236_v35 = vpop.permute.xlu0 %3235 }
 0x515   :  { %v5912_v61 = vcombine.high %v5910_v41, %v5910_v41  ;;  %v13097_v14 = vrot.slane %v5911_v56, 9  ;;  %v13098_v16 = vrot.slane %v5910_v41, 9  ;;  %v7423_v62 = vmax.f32 %v5903_v36, %v13096_v32  ;;  %v3246_v22 = vpop.permute.xlu1 %3245 }
 0x516   :  { %v5946_v19 = vcombine.high %v5944_v33, %v5944_v33  ;;  %v13105_v53 = vrot.slane %v5945_v42, 9  ;;  %v13106_v51 = vrot.slane %v5944_v33, 9  ;;  %v7431_v2 = vmax.f32 %v5937_v60, %v13104_v7 }
 0x517   :  { %v13099_v44 = vrot.slane %v5912_v61, 9  ;;  %v7424_v29 = vmax.f32 %v5911_v56, %v13097_v14  ;;  %v7425_v23 = vmax.f32 %v5910_v41, %v13098_v16  ;;  %v6031_v50 = vcombine.high %v6029_v40, %v6029_v40 }
 0x518   :  { %v13107_v17 = vrot.slane %v5946_v19, 9  ;;  %v7432_v15 = vmax.f32 %v5945_v42, %v13105_v53  ;;  %v7433_v46 = vmax.f32 %v5944_v33, %v13106_v51  ;;  %v7591_v24 = vmax.f32 %v7423_v62, %v7431_v2  ;;  %v4231_v1 = vpop.permute.xlu0 %4230 }
 0x519   :  { %v7426_v18 = vmax.f32 %v5912_v61, %v13099_v44  ;;  %v13124_v21 = vrot.slane %v6022_v20, 9  ;;  %v13125_v8 = vrot.slane %v6030_v57, 9  ;;  %v13126_v6 = vrot.slane %v6029_v40, 9  ;;  %v4241_v13 = vpop.permute.xlu1 %4240 }
 0x51a   :  { %v7434_v0 = vmax.f32 %v5946_v19, %v13107_v17  ;;  %v7592_v36 = vmax.f32 %v7424_v29, %v7432_v15  ;;  %v7593_v9 = vmax.f32 %v7425_v23, %v7433_v46  ;;  %v8168_v38 = vrot.slane %v7591_v24, %v21233_v28 }
 0x51b   :  { %v13127_v60 = vrot.slane %v6031_v50, 9  ;;  %v7451_v32 = vmax.f32 %v6022_v20, %v13124_v21  ;;  %v19282_v41 = vadd.f32 %v4336_v37, %v19197_v31  ;;  %v4338_v56 = vmul.f32 %v18971_v27, %v19245_v47 }
 0x51c   :  { %v7594_v33 = vmax.f32 %v7426_v18, %v7434_v0  ;;  %v8172_v42 = vrot.slane %v7592_v36, %v21233_v28  ;;  %v8176_v7 = vrot.slane %v7593_v9, %v21233_v28  ;;  %v8396_v61 = vsel %vm8315_vm7, %v8168_v38, %v19008_v10  ;;  %v4266_v14 = vpop.permute.xlu0 %4265  ;;  %v21301_v38 = vld [vmem:[#allocation125_spill] sm:$0xff] }
 0x51d   :  { %v7452_v16 = vmax.f32 %v6030_v57, %v13125_v8  ;;  %v7453_v62 = vmax.f32 %v6029_v40, %v13126_v6  ;;  %v6049_v19 = vcombine.high %v5057_v25, %v5057_v25  ;;  %v6056_v20 = vrot.slane %v5057_v25, %v21203_v63  ;;  %v4276_v53 = vpop.permute.xlu1 %4275 }
 0x51e   :  { %v8180_v31 = vrot.slane %v7594_v33, %v21233_v28  ;;  %v8397_v37 = vsel %vm8317_vm8, %v8172_v42, %v8396_v61  ;;  %v7454_v47 = vmax.f32 %v6031_v50, %v13127_v60  ;;  %v3313_v51 = vmul.f32 %v18939_v34, %v3236_v35 }
 0x51f   :  { %v8398_v2 = vsel %vm8319_vm9, %v8176_v7, %v8397_v37  ;;  %v6063_v44 = vrot.slane %v6049_v19, %v21203_v63  ;;  %v6064_v29 = vcombine.high %v6056_v20, %v6056_v20  ;;  %v13132_v10 = vrot.slane %v6056_v20, 9 }
 0x520   :  { %v8399_v57 = vsel %vm8321_vm10, %v8180_v31, %v8398_v2  ;;  %v4343_v40 = vmul.f32 %v18971_v27, %v19269_v43  ;;  %v4345_v25 = vmul.f32 %v18971_v27, %v19273_v49  ;;  %v19302_v23 = vadd.f32 %v3313_v51, %v19206_v45  ;;  %v3734_v50 = vpop.permute.xlu0 %3733 }
 0x521   :  { %8456 = vst.msk [vmem:[#allocation3 + $0xe1] sm:$0xff] %vm7627_vm2, %v8399_v57  ;;  %v6065_v35 = vcombine.high %v6063_v44, %v6063_v44  ;;  %v13133_v17 = vrot.slane %v6064_v29, 9  ;;  %v13134_v15 = vrot.slane %v6063_v44, 9  ;;  %v7459_v46 = vmax.f32 %v6056_v20, %v13132_v10  ;;  %v3744_v24 = vpop.permute.xlu1 %3743 }
 0x522   :  { %v3315_v18 = vmul.f32 %v18939_v34, %v3246_v22  ;;  %v4340_v21 = vmul.f32 %v18971_v27, %v4231_v1  ;;  %v4342_v43 = vmul.f32 %v18971_v27, %v4241_v13  ;;  %v4347_v8 = vmul.f32 %v18971_v27, %v4266_v14 }
 0x523   :  { %v13135_v49 = vrot.slane %v6065_v35, 9  ;;  %v7460_v6 = vmax.f32 %v6064_v29, %v13133_v17  ;;  %v7461_v45 = vmax.f32 %v6063_v44, %v13134_v15  ;;  %v7603_v0 = vmax.f32 %v7451_v32, %v7459_v46  ;;  %v9581_v44 = vld [vmem:[%s20370_s3 + $0x58] sm:$0xff] }
 0x524   :  { %v4402_v36 = vadd.f32 %v4338_v56, %v19216_v58  ;;  %v4407_v9 = vadd.f32 %v4343_v40, %v19127_v4  ;;  %v4409_v60 = vadd.f32 %v4345_v25, %v21301_v38  ;;  %v19313_v33 = vadd.f32 %v3315_v18, %v19211_v30  ;;  %v4728_v34 = vpop.permute.xlu0 %4727 }
 0x525   :  { %v7462_v22 = vmax.f32 %v6065_v35, %v13135_v49  ;;  %v7604_v1 = vmax.f32 %v7452_v16, %v7460_v6  ;;  %v7605_v42 = vmax.f32 %v7453_v62, %v7461_v45  ;;  %v19316_v13 = vadd.f32 %v4340_v21, %v19249_v54  ;;  %v4738_v7 = vpop.permute.xlu1 %4737  ;;  %v8477_v16 = vld [vmem:[%s20370_s3] sm:$0xff] }
 0x526   :  { %v8216_v61 = vrot.slane %v7603_v0, %v21233_v28  ;;  %v19320_v32 = vadd.f32 %v4342_v43, %v19264_v11  ;;  %v19323_v4 = vadd.f32 %v4347_v8, %v19222_v12  ;;  %v4853_v58 = vmul.f32 %v19139_v26, %v4728_v34  ;;  %v9353_v11 = vld [vmem:[%s20370_s3 + $0x40] sm:$0xff]  ;;  %v9354_v12 = vld [vmem:[%s20370_s3 + $0x48] sm:$0xff] }
 0x527   :  { %v7606_v30 = vmax.f32 %v7454_v47, %v7462_v22  ;;  %v8220_v56 = vrot.slane %v7604_v1, %v21233_v28  ;;  %v8224_v14 = vrot.slane %v7605_v42, %v21233_v28  ;;  %v19331_v54 = vsel %vm8313_vm6, %v19261_v3, %v19257_v55  ;;  %v8478_v47 = vld [vmem:[%s20370_s3 + $0x8] sm:$0xff] }
 0x528   :  { %v4349_v62 = vmul.f32 %v18971_v27, %v4276_v53  ;;  %v3827_v19 = vmul.f32 %v19107_v52, %v3734_v50  ;;  %v19344_v20 = vld [vmem:[#allocation3 + $0xe1] sm:$0xff]  ;;  %v3829_v3 = vmul.f32 %v19107_v52, %v3744_v24  ;;  %v4917_v31 = vadd.f32 %v4853_v58, %v19282_v41  ;;  %v4763_v37 = vpop.permute.xlu0 %4762  ;;  %v9580_v41 = vld [vmem:[%s20370_s3 + $0x50] sm:$0xff] }
 0x529   :  { %v19346_v55 = vld [vmem:[#allocation3 + $0xe0] sm:$0xff]  ;;  %v8228_v51 = vrot.slane %v7606_v30, %v21233_v28  ;;  %v8407_v2 = vsel %vm8309_vm4, %v8220_v56, %v8216_v61  ;;  %13745 = vmatprep.mubr.msk.f32.mxu1 %vm7627_vm2, %v19344_v20  ;;  %v4855_v27 = vmul.f32 %v19139_v26, %v4738_v7  ;;  %v4773_v53 = vpop.permute.xlu1 %4772  ;;  %v4860_v57 = vmul.f32 %v19139_v26, %v4763_v37 }
 0x52a   :  { %13827 = vmatmul.mubr.msk.f32.gmra.mrb[10].mxu0 %vm7627_vm2, %v19346_v55  ;;  %v8408_v29 = vsel %vm8311_vm5, %v8224_v14, %v8407_v2  ;;  %v4988_v10 = vadd.f32 %v19177_v39, %v4917_v31  ;;  %v4862_v40 = vmul.f32 %v19139_v26, %v4773_v53  ;;  %v14152_v35 = vpack.c.bf16 %v9354_v12, %v9353_v11  ;;  %v21302_v61 = vld [vmem:[#allocation249_spill] sm:$0xff] }
 0x52b   :  { %v4919_v25 = vadd.f32 %v4855_v27, %v4402_v36  ;;  %v19371_v50 = vsel %vm8313_vm6, %v8228_v51, %v8408_v29  ;;  %v14140_v17 = vpack.c.bf16 %v8478_v47, %v8477_v16  ;;  %v4924_v46 = vadd.f32 %v4860_v57, %v4407_v9 }
 0x52c   :  { %v5052_v15 = vmax.f32 %v4988_v10, 0.0  ;;  %v4926_v24 = vadd.f32 %v4862_v40, %v4409_v60  ;;  %v3754_v18 = vpop.permute.xlu0 %3753  ;;  %v19373_v21 = vpack.c.bf16 %v9581_v44, %v9580_v41  ;;  %v19376_v43 = vadd.f32 %v4349_v62, %v19225_v59  ;;  %14153 = vmatprep.subr.bf16.mxu0 %v14152_v35 }
 0x52d   :  { %v4990_v8 = vadd.f32 %v19177_v39, %v4919_v25  ;;  %v3831_v49 = vmul.f32 %v19107_v52, %v3754_v18  ;;  %14141 = vmatprep.subr.bf16.mxu1 %v14140_v17  ;;  %v4995_v0 = vadd.f32 %v19177_v39, %v4924_v46  ;;  %v3764_v9 = vpop.permute.xlu1 %3763  ;;  %14155 = vmatpush3.bf16.msra.mxu0 %v14152_v35 }
 0x52e   :  { %v5964_v6 = vcombine.high %v5052_v15, %v5052_v15  ;;  %v5971_v45 = vrot.slane %v5052_v15, %v21203_v63  ;;  %v4997_v36 = vadd.f32 %v19177_v39, %v4926_v24  ;;  %v19384_v38 = vadd.f32 %v3827_v19, %v19253_v48  ;;  %14143 = vmatpush3.bf16.msra.mxu1 %v14140_v17 }
 0x52f   :  { %v19387_v59 = vadd.f32 %v3829_v3, %v19267_v5  ;;  %v5054_v60 = vmax.f32 %v4990_v8, 0.0  ;;  %v19390_v34 = vadd.f32 %v3831_v49, %v19302_v23  ;;  %14157 = vmatprep.subr.bf16.mxu0 %v19373_v21  ;;  %v5059_v7 = vmax.f32 %v4995_v0, 0.0  ;;  %14300 = vmatprep.subr.bf16.mxu1 %v21302_v61 }
 0x530   :  { %v5978_v22 = vrot.slane %v5964_v6, %v21203_v63  ;;  %v5979_v1 = vcombine.high %v5971_v45, %v5971_v45  ;;  %v13112_v42 = vrot.slane %v5971_v45, 9  ;;  %v5061_v30 = vmax.f32 %v4997_v36, 0.0  ;;  %v4748_v51 = vpop.permute.xlu0 %4747 }
 0x531   :  { %v5998_v58 = vcombine.high %v5054_v60, %v5054_v60  ;;  %v6005_v48 = vrot.slane %v5054_v60, %v21203_v63  ;;  %v19397_v5 = vmul.f32 %v19107_v52, %v3764_v9  ;;  %v6083_v19 = vcombine.high %v5059_v7, %v5059_v7  ;;  %v4758_v17 = vpop.permute.xlu1 %4757 }
 0x532   :  { %v5980_v56 = vcombine.high %v5978_v22, %v5978_v22  ;;  %v13113_v23 = vrot.slane %v5979_v1, 9  ;;  %v13114_v14 = vrot.slane %v5978_v22, 9  ;;  %v7439_v11 = vmax.f32 %v5971_v45, %v13112_v42 }
 0x533   :  { %v6012_v12 = vrot.slane %v5998_v58, %v21203_v63  ;;  %v6013_v16 = vcombine.high %v6005_v48, %v6005_v48  ;;  %v13120_v62 = vrot.slane %v6005_v48, 9  ;;  %v6090_v47 = vrot.slane %v5059_v7, %v21203_v63 }
 0x534   :  { %v13115_v3 = vrot.slane %v5980_v56, 9  ;;  %v7440_v31 = vmax.f32 %v5979_v1, %v13113_v23  ;;  %v7441_v37 = vmax.f32 %v5978_v22, %v13114_v14  ;;  %v6097_v44 = vrot.slane %v6083_v19, %v21203_v63  ;;  %v4783_v22 = vpop.permute.xlu0 %4782 }
 0x535   :  { %v6014_v2 = vcombine.high %v6012_v12, %v6012_v12  ;;  %v13121_v27 = vrot.slane %v6013_v16, 9  ;;  %v13122_v53 = vrot.slane %v6012_v12, 9  ;;  %v7447_v52 = vmax.f32 %v6005_v48, %v13120_v62  ;;  %v4793_v19 = vpop.permute.xlu1 %4792 }
 0x536   :  { %v7442_v41 = vmax.f32 %v5980_v56, %v13115_v3  ;;  %v6098_v29 = vcombine.high %v6090_v47, %v6090_v47  ;;  %v13140_v10 = vrot.slane %v6090_v47, 9  ;;  %v6099_v15 = vcombine.high %v6097_v44, %v6097_v44 }
 0x537   :  { %v13123_v57 = vrot.slane %v6014_v2, 9  ;;  %v7448_v40 = vmax.f32 %v6013_v16, %v13121_v27  ;;  %v7449_v25 = vmax.f32 %v6012_v12, %v13122_v53  ;;  %v7599_v35 = vmax.f32 %v7439_v11, %v7447_v52 }
 0x538   :  { %v13141_v46 = vrot.slane %v6098_v29, 9  ;;  %v13142_v24 = vrot.slane %v6097_v44, 9  ;;  %v7467_v18 = vmax.f32 %v6090_v47, %v13140_v10  ;;  %v13143_v0 = vrot.slane %v6099_v15, 9 }
 0x539   :  { %v7450_v8 = vmax.f32 %v6014_v2, %v13123_v57  ;;  %v7600_v49 = vmax.f32 %v7440_v31, %v7448_v40  ;;  %v7601_v6 = vmax.f32 %v7441_v37, %v7449_v25  ;;  %v8200_v45 = vrot.slane %v7599_v35, %v21233_v28 }
 0x53a   :  { %v7468_v36 = vmax.f32 %v6098_v29, %v13141_v46  ;;  %v7469_v9 = vmax.f32 %v6097_v44, %v13142_v24  ;;  %v6117_v60 = vcombine.high %v5061_v30, %v5061_v30  ;;  %v19407_v48 = vmax.f32 %v6099_v15, %v13143_v0  ;;  %v19432_v24 = vpop.permute.xlu1 %4260 }
 0x53b   :  { %v7602_v1 = vmax.f32 %v7442_v41, %v7450_v8  ;;  %v8204_v42 = vrot.slane %v7600_v49, %v21233_v28  ;;  %v8208_v7 = vrot.slane %v7601_v6, %v21233_v28  ;;  %v8403_v58 = vsel %vm8315_vm7, %v8200_v45, %v19331_v54 }
 0x53c   :  { %v6124_v56 = vrot.slane %v5061_v30, %v21203_v63  ;;  %v6131_v23 = vrot.slane %v6117_v60, %v21203_v63  ;;  %v4857_v14 = vmul.f32 %v19139_v26, %v4748_v51  ;;  %v4859_v16 = vmul.f32 %v19139_v26, %v4758_v17 }
 0x53d   :  { %v8212_v11 = vrot.slane %v7602_v1, %v21233_v28  ;;  %v8404_v12 = vsel %vm8317_vm8, %v8204_v42, %v8403_v58  ;;  %v4864_v62 = vmul.f32 %v19139_v26, %v4783_v22  ;;  %v4866_v57 = vmul.f32 %v19139_v26, %v4793_v19 }
 0x53e   :  { %v8405_v3 = vsel %vm8319_vm9, %v8208_v7, %v8404_v12  ;;  %v6132_v54 = vcombine.high %v6124_v56, %v6124_v56  ;;  %v6133_v31 = vcombine.high %v6131_v23, %v6131_v23  ;;  %v13148_v37 = vrot.slane %v6124_v56, 9 }
 0x53f   :  { %v8406_v30 = vsel %vm8321_vm10, %v8212_v11, %v8405_v3  ;;  %v13150_v47 = vrot.slane %v6131_v23, 9  ;;  %v4921_v2 = vadd.f32 %v4857_v14, %v19316_v13  ;;  %v4923_v51 = vadd.f32 %v4859_v16, %v19320_v32  ;;  %v19426_v32 = vpop.permute.xlu0 %4250 }
 0x540   :  { %8457 = vst.msk [vmem:[#allocation3 + $0xf1] sm:$0xff] %vm7627_vm2, %v8406_v30  ;;  %v13149_v27 = vrot.slane %v6132_v54, 9  ;;  %v13151_v53 = vrot.slane %v6133_v31, 9  ;;  %v7475_v52 = vmax.f32 %v6124_v56, %v13148_v37  ;;  %v4928_v41 = vadd.f32 %v4864_v62, %v19323_v4 }
 0x541   :  { %v7477_v44 = vmax.f32 %v6131_v23, %v13150_v47  ;;  %v4992_v29 = vadd.f32 %v19177_v39, %v4921_v2  ;;  %v4994_v10 = vadd.f32 %v19177_v39, %v4923_v51  ;;  %v19430_v15 = vadd.f32 %v19397_v5, %v19313_v33 }
 0x542   :  { %v7476_v40 = vmax.f32 %v6132_v54, %v13149_v27  ;;  %v7478_v25 = vmax.f32 %v6133_v31, %v13151_v53  ;;  %v7611_v35 = vmax.f32 %v7467_v18, %v7475_v52  ;;  %v4999_v13 = vadd.f32 %v19177_v39, %v4928_v41  ;;  %v4281_v54 = vpop.permute.xlu1 %4280 }
 0x543   :  { %v7613_v17 = vmax.f32 %v7469_v9, %v7477_v44  ;;  %v5056_v4 = vmax.f32 %v4992_v29, 0.0  ;;  %v5058_v46 = vmax.f32 %v4994_v10, 0.0  ;;  %v4930_v45 = vadd.f32 %v4866_v57, %v19376_v43  ;;  %v4271_v12 = vpop.permute.xlu0 %4270 }
 0x544   :  { %v7612_v8 = vmax.f32 %v7468_v36, %v7476_v40  ;;  %v7614_v49 = vmax.f32 %v19407_v48, %v7478_v25  ;;  %v5063_v6 = vmax.f32 %v4999_v13, 0.0  ;;  %v8248_v22 = vrot.slane %v7611_v35, %v21233_v28 }
 0x545   :  { %v8256_v18 = vrot.slane %v7613_v17, %v21233_v28  ;;  %v6032_v0 = vcombine.high %v5056_v4, %v5056_v4  ;;  %v6039_v60 = vrot.slane %v5056_v4, %v21203_v63  ;;  %v6066_v9 = vcombine.high %v5058_v46, %v5058_v46 }
 0x546   :  { %v8252_v33 = vrot.slane %v7612_v8, %v21233_v28  ;;  %v6073_v5 = vrot.slane %v5058_v46, %v21203_v63  ;;  %v6151_v1 = vcombine.high %v5063_v6, %v5063_v6  ;;  %v6158_v11 = vrot.slane %v5063_v6, %v21203_v63 }
 0x547   :  { %v6046_v36 = vrot.slane %v6032_v0, %v21203_v63  ;;  %v6047_v42 = vcombine.high %v6039_v60, %v6039_v60  ;;  %v13128_v7 = vrot.slane %v6039_v60, 9  ;;  %v6080_v58 = vrot.slane %v6066_v9, %v21203_v63  ;;  %v19443_v43 = vld [vmem:[#allocation3 + $0xf1] sm:$0xff]  ;;  %v4768_v46 = vpop.permute.xlu0 %4767 }
 0x548   :  { %v19445_v48 = vld [vmem:[#allocation3 + $0xf0] sm:$0xff]  ;;  %v8414_v56 = vsel %vm8309_vm4, %v8252_v33, %v8248_v22  ;;  %v6081_v23 = vcombine.high %v6073_v5, %v6073_v5  ;;  %v13136_v14 = vrot.slane %v6073_v5, 9  ;;  %13746 = vmatmul.mubr.msk.f32.gmra.mrb[12].mxu1 %vm7627_vm2, %v19443_v43  ;;  %v6165_v29 = vrot.slane %v6151_v1, %v21203_v63 }
 0x549   :  { %13829 = vmatprep.mubr.msk.f32.mxu0 %vm7627_vm2, %v19445_v48  ;;  %v8415_v16 = vsel %vm8311_vm5, %v8256_v18, %v8414_v56  ;;  %v6048_v62 = vcombine.high %v6046_v36, %v6046_v36  ;;  %v13129_v19 = vrot.slane %v6047_v42, 9  ;;  %v13130_v3 = vrot.slane %v6046_v36, 9 }
 0x54a   :  { %v7455_v31 = vmax.f32 %v6039_v60, %v13128_v7  ;;  %v6082_v37 = vcombine.high %v6080_v58, %v6080_v58  ;;  %v13137_v30 = vrot.slane %v6081_v23, 9  ;;  %v13138_v47 = vrot.slane %v6080_v58, 9  ;;  %v4778_v60 = vpop.permute.xlu1 %4777 }
 0x54b   :  { %v13131_v2 = vrot.slane %v6048_v62, 9  ;;  %v7456_v51 = vmax.f32 %v6047_v42, %v13129_v19  ;;  %v7457_v27 = vmax.f32 %v6046_v36, %v13130_v3  ;;  %v7463_v53 = vmax.f32 %v6073_v5, %v13136_v14 }
 0x54c   :  { %v13139_v52 = vrot.slane %v6082_v37, 9  ;;  %v7464_v41 = vmax.f32 %v6081_v23, %v13137_v30  ;;  %v7465_v44 = vmax.f32 %v6080_v58, %v13138_v47  ;;  %v6166_v40 = vcombine.high %v6158_v11, %v6158_v11  ;;  %v14548_v23 = vld [vmem:[%s20368_s1 + $0x7] ss:$0 sm:$0xff]  ;;  %v4788_v30 = vpop.permute.xlu0 %4787 }
 0x54d   :  { %v7458_v10 = vmax.f32 %v6048_v62, %v13131_v2  ;;  %v7607_v57 = vmax.f32 %v7455_v31, %v7463_v53  ;;  %v13156_v25 = vrot.slane %v6158_v11, 9  ;;  %v6167_v4 = vcombine.high %v6165_v29, %v6165_v29 }
 0x54e   :  { %v7466_v35 = vmax.f32 %v6082_v37, %v13139_v52  ;;  %v7608_v13 = vmax.f32 %v7456_v51, %v7464_v41  ;;  %v7609_v17 = vmax.f32 %v7457_v27, %v7465_v44  ;;  %v8260_v8 = vrot.slane %v7614_v49, %v21233_v28  ;;  %v4798_v27 = vpop.permute.xlu1 %4797 }
 0x54f   :  { %v8232_v6 = vrot.slane %v7607_v57, %v21233_v28  ;;  %v13157_v18 = vrot.slane %v6166_v40, 9  ;;  %v13158_v0 = vrot.slane %v6165_v29, 9  ;;  %v7483_v5 = vmax.f32 %v6158_v11, %v13156_v25 }
 0x550   :  { %v7610_v9 = vmax.f32 %v7458_v10, %v7466_v35  ;;  %v8236_v22 = vrot.slane %v7608_v13, %v21233_v28  ;;  %v8240_v33 = vrot.slane %v7609_v17, %v21233_v28  ;;  %v13159_v36 = vrot.slane %v6167_v4, 9 }
 0x551   :  { %v8410_v1 = vsel %vm8315_vm7, %v8232_v6, %v19371_v50  ;;  %v19461_v42 = vmax.f32 %v6166_v40, %v13157_v18  ;;  %v5001_v7 = vadd.f32 %v19177_v39, %v4930_v45  ;;  %v7485_v56 = vmax.f32 %v6165_v29, %v13158_v0 }
 0x552   :  { %v8244_v49 = vrot.slane %v7610_v9, %v21233_v28  ;;  %v8411_v58 = vsel %vm8317_vm8, %v8236_v22, %v8410_v1  ;;  %v4344_v14 = vmul.f32 %v14548_v23, %v19426_v32  ;;  %v4346_v50 = vmul.f32 %v14548_v23, %v19432_v24 }
 0x553   :  { %v8412_v11 = vsel %vm8319_vm9, %v8240_v33, %v8411_v58  ;;  %v5065_v62 = vmax.f32 %v5001_v7, 0.0  ;;  %v4348_v19 = vmul.f32 %v14548_v23, %v4271_v12  ;;  %v4350_v31 = vmul.f32 %v14548_v23, %v4281_v54 }
 0x554   :  { %v8413_v3 = vsel %vm8321_vm10, %v8244_v49, %v8412_v11  ;;  %v4408_v45 = vadd.f32 %v4344_v14, %v19384_v38  ;;  %v4861_v37 = vmul.f32 %v19139_v26, %v4768_v46  ;;  %v7486_v47 = vmax.f32 %v6167_v4, %v13159_v36 }
 0x555   :  { %8458 = vst.msk [vmem:[#allocation3 + $0x101] sm:$0xff] %vm7627_vm2, %v8413_v3  ;;  %v6185_v2 = vcombine.high %v5065_v62, %v5065_v62  ;;  %v6192_v32 = vrot.slane %v5065_v62, %v21203_v63  ;;  %v4410_v51 = vadd.f32 %v4346_v50, %v19387_v59  ;;  %v4412_v24 = vadd.f32 %v4348_v19, %v19390_v34 }
 0x556   :  { %v4925_v12 = vadd.f32 %v4861_v37, %v4408_v45  ;;  %v19480_v53 = vsel %vm8313_vm6, %v8260_v8, %v8415_v16  ;;  %v4863_v38 = vmul.f32 %v19139_v26, %v4778_v60  ;;  %v4865_v44 = vmul.f32 %v19139_v26, %v4788_v30 }
 0x557   :  { %v6199_v54 = vrot.slane %v6185_v2, %v21203_v63  ;;  %v6200_v52 = vcombine.high %v6192_v32, %v6192_v32  ;;  %v13164_v41 = vrot.slane %v6192_v32, 9  ;;  %v4414_v29 = vadd.f32 %v4350_v31, %v19430_v15 }
 0x558   :  { %v4996_v10 = vadd.f32 %v19177_v39, %v4925_v12  ;;  %v4927_v59 = vadd.f32 %v4863_v38, %v4410_v51  ;;  %v4867_v57 = vmul.f32 %v19139_v26, %v4798_v27  ;;  %v4929_v17 = vadd.f32 %v4865_v44, %v4412_v24 }
 0x559   :  { %v6201_v34 = vcombine.high %v6199_v54, %v6199_v54  ;;  %v13165_v40 = vrot.slane %v6200_v52, 9  ;;  %v13166_v25 = vrot.slane %v6199_v54, 9  ;;  %v7491_v16 = vmax.f32 %v6192_v32, %v13164_v41  ;;  %v14549_v41 = vld [vmem:[%s20369_s2] ss:$0 sm:$0xff] }
 0x55a   :  { %v5060_v35 = vmax.f32 %v4996_v10, 0.0  ;;  %v4998_v13 = vadd.f32 %v19177_v39, %v4927_v59  ;;  %v4931_v4 = vadd.f32 %v4867_v57, %v4414_v29  ;;  %v5000_v9 = vadd.f32 %v19177_v39, %v4929_v17 }
 0x55b   :  { %v13167_v46 = vrot.slane %v6201_v34, 9  ;;  %v7492_v8 = vmax.f32 %v6200_v52, %v13165_v40  ;;  %v7493_v6 = vmax.f32 %v6199_v54, %v13166_v25  ;;  %v7619_v18 = vmax.f32 %v7483_v5, %v7491_v16 }
 0x55c   :  { %v6100_v0 = vcombine.high %v5060_v35, %v5060_v35  ;;  %v6107_v15 = vrot.slane %v5060_v35, %v21203_v63  ;;  %v5062_v60 = vmax.f32 %v4998_v13, 0.0  ;;  %v19491_v26 = vld [vmem:[#allocation3 + $0x101] sm:$0xff]  ;;  %v5064_v54 = vmax.f32 %v5000_v9, 0.0 }
 0x55d   :  { %v19493_v22 = vld [vmem:[#allocation3 + $0x100] sm:$0xff]  ;;  %v7494_v33 = vmax.f32 %v6201_v34, %v13167_v46  ;;  %v7620_v1 = vmax.f32 %v19461_v42, %v7492_v8  ;;  %v7621_v36 = vmax.f32 %v7485_v56, %v7493_v6  ;;  %v8280_v7 = vrot.slane %v7619_v18, %v21233_v28  ;;  %13748 = vmatprep.mubr.msk.f32.mxu1 %vm7627_vm2, %v19491_v26 }
 0x55e   :  { %v6114_v5 = vrot.slane %v6100_v0, %v21203_v63  ;;  %v6115_v49 = vcombine.high %v6107_v15, %v6107_v15  ;;  %v13144_v58 = vrot.slane %v6107_v15, 9  ;;  %v6134_v23 = vcombine.high %v5062_v60, %v5062_v60  ;;  %13830 = vmatmul.mubr.msk.f32.gmra.mrb[12].mxu0 %vm7627_vm2, %v19493_v22 }
 0x55f   :  { %v7622_v39 = vmax.f32 %v7486_v47, %v7494_v33  ;;  %v8284_v14 = vrot.slane %v7620_v1, %v21233_v28  ;;  %v8288_v11 = vrot.slane %v7621_v36, %v21233_v28  ;;  %v6141_v42 = vrot.slane %v5062_v60, %v21203_v63 }
 0x560   :  { %v6116_v56 = vcombine.high %v6114_v5, %v6114_v5  ;;  %v13145_v62 = vrot.slane %v6115_v49, 9  ;;  %v13146_v50 = vrot.slane %v6114_v5, 9  ;;  %v7471_v19 = vmax.f32 %v6107_v15, %v13144_v58 }
 0x561   :  { %v8292_v3 = vrot.slane %v7622_v39, %v21233_v28  ;;  %v8421_v45 = vsel %vm8309_vm4, %v8284_v14, %v8280_v7  ;;  %v6148_v31 = vrot.slane %v6134_v23, %v21203_v63  ;;  %v6149_v37 = vcombine.high %v6141_v42, %v6141_v42 }
 0x562   :  { %v8422_v30 = vsel %vm8311_vm5, %v8288_v11, %v8421_v45  ;;  %v13147_v47 = vrot.slane %v6116_v56, 9  ;;  %v7472_v2 = vmax.f32 %v6115_v49, %v13145_v62  ;;  %v7473_v32 = vmax.f32 %v6114_v5, %v13146_v50 }
 0x563   :  { %v6150_v51 = vcombine.high %v6148_v31, %v6148_v31  ;;  %v13152_v27 = vrot.slane %v6141_v42, 9  ;;  %v13153_v24 = vrot.slane %v6149_v37, 9  ;;  %v13154_v12 = vrot.slane %v6148_v31, 9 }
 0x564   :  { %v7474_v38 = vmax.f32 %v6116_v56, %v13147_v47  ;;  %v8423_v52 = vsel %vm8313_vm6, %v8292_v3, %v8422_v30  ;;  %v5002_v44 = vadd.f32 %v14549_v41, %v4931_v4  ;;  %v6168_v34 = vcombine.high %v5064_v54, %v5064_v54 }
 0x565   :  { %v13155_v29 = vrot.slane %v6150_v51, 9  ;;  %v7479_v10 = vmax.f32 %v6141_v42, %v13152_v27  ;;  %v7480_v59 = vmax.f32 %v6149_v37, %v13153_v24  ;;  %v7481_v57 = vmax.f32 %v6148_v31, %v13154_v12 }
 0x566   :  { %v6175_v40 = vrot.slane %v5064_v54, %v21203_v63  ;;  %v5066_v25 = vmax.f32 %v5002_v44, 0.0  ;;  %v6182_v46 = vrot.slane %v6168_v34, %v21203_v63 }
 0x567   :  { %v7482_v16 = vmax.f32 %v6150_v51, %v13155_v29  ;;  %v7615_v35 = vmax.f32 %v7471_v19, %v7479_v10  ;;  %v7616_v13 = vmax.f32 %v7472_v2, %v7480_v59  ;;  %v7617_v17 = vmax.f32 %v7473_v32, %v7481_v57  ;;  %v8461_v29 = vld [vmem:[#allocation3] sm:$0xff] }
 0x568   :  { %v6183_v8 = vcombine.high %v6175_v40, %v6175_v40  ;;  %v13160_v6 = vrot.slane %v6175_v40, 9  ;;  %v6202_v18 = vcombine.high %v5066_v25, %v5066_v25  ;;  %v6184_v9 = vcombine.high %v6182_v46, %v6182_v46 }
 0x569   :  { %v7618_v0 = vmax.f32 %v7474_v38, %v7482_v16  ;;  %v8264_v4 = vrot.slane %v7615_v35, %v21233_v28  ;;  %v8268_v15 = vrot.slane %v7616_v13, %v21233_v28  ;;  %v8272_v60 = vrot.slane %v7617_v17, %v21233_v28  ;;  %v19551_v16 = vld [vmem:[#allocation3 + $0x30] sm:$0xff]  ;;  %v19555_v35 = vld [vmem:[#allocation3 + $0x40] sm:$0xff] }
 0x56a   :  { %v13161_v33 = vrot.slane %v6183_v8, 9  ;;  %v13162_v1 = vrot.slane %v6182_v46, 9  ;;  %v6209_v5 = vrot.slane %v5066_v25, %v21203_v63  ;;  %v6216_v49 = vrot.slane %v6202_v18, %v21203_v63  ;;  %v19546_v25 = vld [vmem:[#allocation3 + $0x20] sm:$0xff] }
 0x56b   :  { %v8276_v36 = vrot.slane %v7618_v0, %v21233_v28  ;;  %v8417_v7 = vsel %vm8315_vm7, %v8264_v4, %v19480_v53  ;;  %v13163_v23 = vrot.slane %v6184_v9, 9  ;;  %v7487_v39 = vmax.f32 %v6175_v40, %v13160_v6  ;;  %v9808_v17 = vld [vmem:[%s20370_s3 + $0x60] sm:$0xff]  ;;  %v19582_v4 = vld [vmem:[#allocation3 + $0x31] sm:$0xff] }
 0x56c   :  { %v8418_v58 = vsel %vm8317_vm8, %v8268_v15, %v8417_v7  ;;  %v6217_v11 = vcombine.high %v6209_v5, %v6209_v5  ;;  %v6218_v42 = vcombine.high %v6216_v49, %v6216_v49  ;;  %v13168_v56 = vrot.slane %v6209_v5, 9  ;;  %v19574_v6 = vld [vmem:[#allocation3 + $0x60] sm:$0xff]  ;;  %v19609_v7 = vld [vmem:[#allocation3 + $0x71] sm:$0xff] }
 0x56d   :  { %v8419_v14 = vsel %vm8319_vm9, %v8272_v60, %v8418_v58  ;;  %v7488_v50 = vmax.f32 %v6183_v8, %v13161_v33  ;;  %v7489_v19 = vmax.f32 %v6182_v46, %v13162_v1  ;;  %v13170_v3 = vrot.slane %v6216_v49, 9  ;;  %v9337_v46 = vld [vmem:[#allocation3 + $0x11] sm:$0xff]  ;;  %v19578_v0 = vld [vmem:[#allocation3 + $0x21] sm:$0xff] }
 0x56e   :  { %v8420_v62 = vsel %vm8321_vm10, %v8276_v36, %v8419_v14  ;;  %v7490_v53 = vmax.f32 %v6184_v9, %v13163_v23  ;;  %v13169_v45 = vrot.slane %v6217_v11, 9  ;;  %v13171_v31 = vrot.slane %v6218_v42, 9  ;;  %v19569_v8 = vld [vmem:[#allocation3 + $0x50] sm:$0xff]  ;;  %v8469_v15 = vld [vmem:[#allocation3 + $0xa0] sm:$0xff] }
 0x56f   :  { %8459 = vst.msk [vmem:[#allocation3 + $0x111] sm:$0xff] %vm7627_vm2, %v8420_v62  ;;  %v7495_v37 = vmax.f32 %v6209_v5, %v13168_v56  ;;  %v7497_v30 = vmax.f32 %v6216_v49, %v13170_v3  ;;  %v19587_v60 = vld [vmem:[#allocation3 + $0x70] sm:$0xff]  ;;  %v19591_v9 = vld [vmem:[#allocation3 + $0x41] sm:$0xff] }
 0x570   :  { %v7496_v47 = vmax.f32 %v6217_v11, %v13169_v45  ;;  %v7498_v2 = vmax.f32 %v6218_v42, %v13171_v31  ;;  %v19596_v33 = vld [vmem:[#allocation3 + $0x51] sm:$0xff]  ;;  %v19601_v1 = vld [vmem:[#allocation3 + $0xc0] sm:$0xff] }
 0x571   :  { %v7623_v32 = vmax.f32 %v7487_v39, %v7495_v37  ;;  %v7625_v51 = vmax.f32 %v7489_v19, %v7497_v30  ;;  %v19603_v36 = vld [vmem:[#allocation3 + $0x61] sm:$0xff]  ;;  %v14550_v5 = vld [vmem:[#allocation3 + $0xd0] sm:$0xff]  ;;  %v10036_v19 = vld [vmem:[%s20370_s3 + $0x78] sm:$0xff] }
 0x572   :  { %v7624_v27 = vmax.f32 %v7488_v50, %v7496_v47  ;;  %v7626_v24 = vmax.f32 %v7490_v53, %v7498_v2  ;;  %v19614_v49 = vld [vmem:[#allocation3 + $0x81] sm:$0xff]  ;;  %v9345_v58 = vld [vmem:[#allocation3 + $0xb1] sm:$0xff] }
 0x573   :  { %v8296_v12 = vrot.slane %v7623_v32, %v21233_v28  ;;  %v8304_v38 = vrot.slane %v7625_v51, %v21233_v28  ;;  %v19623_v23 = vld [vmem:[#allocation3 + $0xc1] sm:$0xff]  ;;  %v14551_v39 = vld [vmem:[#allocation3 + $0xd1] sm:$0xff] }
 0x574   :  { %v8300_v54 = vrot.slane %v7624_v27, %v21233_v28  ;;  %v8308_v41 = vrot.slane %v7626_v24, %v21233_v28  ;;  %v19632_v14 = vld [vmem:[#allocation3 + $0xc2] sm:$0xff]  ;;  %v19640_v11 = vld [vmem:[#allocation3 + $0xd2] sm:$0xff] }
 0x575   :  { %v8424_v44 = vsel %vm8315_vm7, %v8296_v12, %v8423_v52  ;;  %v8462_v52 = vld [vmem:[#allocation3 + $0x10] sm:$0xff]  ;;  %v19644_v42 = vld [vmem:[#allocation3 + $0xe2] sm:$0xff] }
 0x576   :  { %v19532_v10 = vld [vmem:[#allocation3 + $0x111] sm:$0xff]  ;;  %v8425_v57 = vsel %vm8317_vm8, %v8300_v54, %v8424_v44  ;;  %v19656_v56 = vld [vmem:[#allocation3 + $0x102] sm:$0xff] }
 0x577   :  { %v19534_v59 = vld [vmem:[#allocation3 + $0x110] sm:$0xff]  ;;  %13749 = vmatmul.mubr.msk.f32.gmra.mrb[14].mxu1 %vm7627_vm2, %v19532_v10  ;;  %v8426_v34 = vsel %vm8319_vm9, %v8304_v38, %v8425_v57  ;;  %v19675_v31 = vld [vmem:[#allocation3 + $0x22] sm:$0xff] }
 0x578   :  { %13832 = vmatprep.mubr.msk.f32.mxu0 %vm7627_vm2, %v19534_v59  ;;  %13755 = vmatprep.mubr.msk.f32.mxu1 %vm7627_vm2, %v8461_v29  ;;  %v8427_v40 = vsel %vm8321_vm10, %v8308_v41, %v8426_v34  ;;  %v10035_v50 = vld [vmem:[%s20370_s3 + $0x70] sm:$0xff]  ;;  %v19683_v30 = vld [vmem:[#allocation3 + $0x42] sm:$0xff] }
 0x579   :  { %8460 = vst.msk [vmem:[#allocation3 + $0x121] sm:$0xff] %vm7627_vm2, %v8427_v40  ;;  %v9564_v3 = vld [vmem:[#allocation3 + $0x12] sm:$0xff]  ;;  %v14164_v45 = vpack.c.bf16 %v10036_v19, %v10035_v50  ;;  %v19691_v2 = vld [vmem:[#allocation3 + $0x62] sm:$0xff] }
 0x57a   :  { %v19671_v53 = vld [vmem:[#allocation3 + $0x112] sm:$0xff]  ;;  %v19699_v51 = vld [vmem:[#allocation3 + $0x82] sm:$0xff] }
 0x57b   :  { %13756 = vmatmul.mubr.msk.f32.vlgmr.msra.gmra.mrb[0].mxu1 %vm7627_vm2, %v8462_v52  ;;  %v19679_v37 = vld [vmem:[#allocation3 + $0x32] sm:$0xff]  ;;  %v10262_v12 = vld [vmem:[%s20370_s3 + $0x80] sm:$0xff]  ;;  %v10263_v38 = vld [vmem:[%s20370_s3 + $0x88] sm:$0xff] }
 0x57c   :  { %13758 = vmatprep.mubr.msk.f32.mxu1 %vm7627_vm2, %v19546_v25  ;;  %14301 = vmatpush3.bf16.msra.mxu1 %v21302_v61  ;;  %v9809_v61 = vld [vmem:[%s20370_s3 + $0x68] sm:$0xff]  ;;  %v19687_v47 = vld [vmem:[#allocation3 + $0x52] sm:$0xff]  ;;  %v14168_v54 = vpack.c.bf16 %v10263_v38, %v10262_v12  ;;  %v9798_v41 = vld [vmem:[#allocation3 + $0x80] sm:$0xff] }
 0x57d   :  { %v14160_v18 = vpack.c.bf16 %v9809_v61, %v9808_v17  ;;  %v19695_v32 = vld [vmem:[#allocation3 + $0x72] sm:$0xff] }
 0x57e   :  { %v9572_v27 = vld [vmem:[#allocation3 + $0xb2] sm:$0xff] }
 0x57f   :  { %13759 = vmatmul.mubr.msk.f32.gmra.mrb[2].mxu1 %vm7627_vm2, %v19551_v16  ;;  %v9799_v44 = vld [vmem:[#allocation3 + $0x90] sm:$0xff]  ;;  %v11378_v50 = vld [vmem:[%s20372_s5 + $0x18] sm:$0xff] }
 0x580   :  { %13761 = vmatprep.mubr.msk.f32.mxu1 %vm7627_vm2, %v19555_v35  ;;  %v19559_v13 = vld [vmem:[#allocation3 + $0x120] sm:$0xff]  ;;  %v9801_v29 = vld [vmem:[#allocation3 + $0xd0] sm:$0xff] }
 0x581   :  { %13833 = vmatmul.mubr.msk.f32.gmra.mrb[14].mxu0 %vm7627_vm2, %v19559_v13  ;;  %v19658_v62 = vld [vmem:[#allocation3 + $0x121] sm:$0xff]  ;;  %v9807_v57 = vld [vmem:[#allocation3 + $0x130] sm:$0xff] }
 0x582   :  { %13839 = vmatprep.mubr.msk.f32.mxu0 %vm7627_vm2, %v9337_v46  ;;  %v19716_v24 = vld [vmem:[#allocation3 + $0x122] sm:$0xff]  ;;  %v21303_v46 = vmov 0.0  }
 0x583   :  { %13762 = vmatmul.mubr.msk.f32.gmra.mrb[4].mxu1 %vm7627_vm2, %v19569_v8  ;;  %11154 = vst.msk [vmem:[#allocation4 + $0x8] sm:$0x3f] %vm11152_vm11, %v21303_v46  ;;  %11153 = vst.msk [vmem:[#allocation4] sm:$0x3f] %vm11152_vm11, %v21303_v46 }
 0x584   :  { %13764 = vmatprep.mubr.msk.f32.mxu1 %vm7627_vm2, %v19574_v6  ;;  %11155 = vst.msk [vmem:[#allocation4 + $0x10] sm:$0x3f] %vm11152_vm11, %v21303_v46  ;;  %11156 = vst.msk [vmem:[#allocation4 + $0x18] sm:$0x3f] %vm11152_vm11, %v21303_v46 }
 0x585   :  { %13840 = vmatmul.mubr.msk.f32.vlgmr.msra.gmra.mrb[0].mxu0 %vm7627_vm2, %v19578_v0  ;;  %11157 = vst.msk [vmem:[#allocation4 + $0x20] sm:$0x3f] %vm11152_vm11, %v21303_v46  ;;  %11158 = vst.msk [vmem:[#allocation4 + $0x28] sm:$0x3f] %vm11152_vm11, %v21303_v46 }
 0x586   :  { %14159 = vmatpush3.bf16.msra.mxu0 %v19373_v21  ;;  %13842 = vmatprep.mubr.msk.f32.mxu0 %vm7627_vm2, %v19582_v4  ;;  %v8470_v21 = vld [vmem:[#allocation3 + $0xb0] sm:$0xff]  ;;  %11159 = vst.msk [vmem:[#allocation4 + $0x30] sm:$0x3f] %vm11152_vm11, %v21303_v46  ;;  %11160 = vst.msk [vmem:[#allocation4 + $0x38] sm:$0x3f] %vm11152_vm11, %v21303_v46 }
 0x587   :  { %13765 = vmatmul.mubr.msk.f32.gmra.mrb[6].mxu1 %vm7627_vm2, %v19587_v60  ;;  %14161 = vmatprep.subr.bf16.mxu0 %v14160_v18  ;;  %11161 = vst.msk [vmem:[#allocation4 + $0x40] sm:$0x3f] %vm11152_vm11, %v21303_v46  ;;  %11162 = vst.msk [vmem:[#allocation4 + $0x48] sm:$0x3f] %vm11152_vm11, %v21303_v46 }
 0x588   :  { %13767 = vmatprep.mubr.msk.f32.mxu1 %vm7627_vm2, %v8469_v15  ;;  %11163 = vst.msk [vmem:[#allocation4 + $0x50] sm:$0x3f] %vm11152_vm11, %v21303_v46  ;;  %11164 = vst.msk [vmem:[#allocation4 + $0x58] sm:$0x3f] %vm11152_vm11, %v21303_v46 }
 0x589   :  { %13843 = vmatmul.mubr.msk.f32.gmra.mrb[2].mxu0 %vm7627_vm2, %v19591_v9 }
 0x58a   :  { %13845 = vmatprep.mubr.msk.f32.mxu0 %vm7627_vm2, %v19596_v33 }
 0x58b   :  { %13768 = vmatmul.mubr.msk.f32.gmra.mrb[8].mxu1 %vm7627_vm2, %v8470_v21  ;;  %v11389_v21 = vld [vmem:[%s20372_s5 + $0x30] sm:$0xff] }
 0x58c   :  { %13770 = vmatprep.mubr.msk.f32.mxu1 %vm7627_vm2, %v19601_v1 }
 0x58d   :  { %13846 = vmatmul.mubr.msk.f32.gmra.mrb[4].mxu0 %vm7627_vm2, %v19603_v36 }
 0x58e   :  { %13848 = vmatprep.mubr.msk.f32.mxu0 %vm7627_vm2, %v19609_v7 }
 0x58f   :  { %13771 = vmatmul.mubr.msk.f32.gmra.mrb[10].mxu1 %vm7627_vm2, %v14550_v5  ;;  %v11376_v5 = vld [vmem:[%s20372_s5 + $0x8] sm:$0xff] }
 0x590   :  { %13773 = vmatprep.mubr.msk.f32.mxu1 %vm7627_vm2, %v19346_v55 }
 0x591   :  { %13849 = vmatmul.mubr.msk.f32.gmra.mrb[6].mxu0 %vm7627_vm2, %v19614_v49 }
 0x592   :  { %13851 = vmatprep.mubr.msk.f32.mxu0 %vm7627_vm2, %v9345_v58 }
 0x593   :  { %13774 = vmatmul.mubr.msk.f32.gmra.mrb[12].mxu1 %vm7627_vm2, %v19445_v48 }
 0x594   :  { %13776 = vmatprep.mubr.msk.f32.mxu1 %vm7627_vm2, %v19493_v22 }
 0x595   :  { %13852 = vmatmul.mubr.msk.f32.gmra.mrb[8].mxu0 %vm7627_vm2, %v19623_v23 }
 0x596   :  { %13854 = vmatprep.mubr.msk.f32.mxu0 %vm7627_vm2, %v14551_v39 }
 0x597   :  { %13777 = vmatmul.mubr.msk.f32.gmra.mrb[14].mxu1 %vm7627_vm2, %v19534_v59 }
 0x598   :  { %13798 = vmatprep.mubr.msk.f32.mxu1 %vm7627_vm2, %v19632_v14 }
 0x599   :  { %13855 = vmatmul.mubr.msk.f32.gmra.mrb[10].mxu0 %vm7627_vm2, %v19344_v20  ;;  %v19652_v20 = vld [vmem:[#allocation3 + $0xf2] sm:$0xff] }
 0x59a   :  { %13857 = vmatprep.mubr.msk.f32.mxu0 %vm7627_vm2, %v19443_v43 }
 0x59b   :  { %13799 = vmatmul.mubr.msk.f32.vlgmr.msra.gmra.mrb[10].mxu1 %vm7627_vm2, %v19640_v11 }
 0x59c   :  { %13801 = vmatprep.mubr.msk.f32.mxu1 %vm7627_vm2, %v19644_v42 }
 0x59d   :  { %13858 = vmatmul.mubr.msk.f32.gmra.mrb[12].mxu0 %vm7627_vm2, %v19491_v26 }
 0x59e   :  { %13860 = vmatprep.mubr.msk.f32.mxu0 %vm7627_vm2, %v19532_v10 }
 0x59f   :  { %13802 = vmatmul.mubr.msk.f32.gmra.mrb[12].mxu1 %vm7627_vm2, %v19652_v20 }
 0x5a0   :  { %13804 = vmatprep.mubr.msk.f32.mxu1 %vm7627_vm2, %v19656_v56 }
 0x5a1   :  { %13861 = vmatmul.mubr.msk.f32.gmra.mrb[14].mxu0 %vm7627_vm2, %v19658_v62 }
 0x5a2   :  { %13867 = vmatprep.mubr.msk.f32.mxu0 %vm7627_vm2, %v9564_v3 }
 0x5a3   :  { %13805 = vmatmul.mubr.msk.f32.gmra.mrb[14].mxu1 %vm7627_vm2, %v19671_v53 }
 0x5a5   :  { %13868 = vmatmul.mubr.msk.f32.vlgmr.msra.gmra.mrb[0].mxu0 %vm7627_vm2, %v19675_v31 }
 0x5a6   :  { %14163 = vmatpush3.bf16.msra.mxu0 %v14160_v18  ;;  %13870 = vmatprep.mubr.msk.f32.mxu0 %vm7627_vm2, %v19679_v37 }
 0x5a7   :  { %14165 = vmatprep.subr.bf16.mxu0 %v14164_v45 }
 0x5a9   :  { %13871 = vmatmul.mubr.msk.f32.gmra.mrb[2].mxu0 %vm7627_vm2, %v19683_v30 }
 0x5aa   :  { %13873 = vmatprep.mubr.msk.f32.mxu0 %vm7627_vm2, %v19687_v47 }
 0x5ad   :  { %13874 = vmatmul.mubr.msk.f32.gmra.mrb[4].mxu0 %vm7627_vm2, %v19691_v2 }
 0x5ae   :  { %13876 = vmatprep.mubr.msk.f32.mxu0 %vm7627_vm2, %v19695_v32 }
 0x5b1   :  { %13877 = vmatmul.mubr.msk.f32.gmra.mrb[6].mxu0 %vm7627_vm2, %v19699_v51 }
 0x5b2   :  { %13879 = vmatprep.mubr.msk.f32.mxu0 %vm7627_vm2, %v9572_v27 }
 0x5b5   :  { %13880 = vmatmul.mubr.msk.f32.gmra.mrb[8].mxu0 %vm7627_vm2, %v19632_v14 }
 0x5b6   :  { %13882 = vmatprep.mubr.msk.f32.mxu0 %vm7627_vm2, %v19640_v11 }
 0x5b9   :  { %13883 = vmatmul.mubr.msk.f32.gmra.mrb[10].mxu0 %vm7627_vm2, %v19644_v42 }
 0x5ba   :  { %13885 = vmatprep.mubr.msk.f32.mxu0 %vm7627_vm2, %v19652_v20 }
 0x5bd   :  { %13886 = vmatmul.mubr.msk.f32.gmra.mrb[12].mxu0 %vm7627_vm2, %v19656_v56 }
 0x5be   :  { %13888 = vmatprep.mubr.msk.f32.mxu0 %vm7627_vm2, %v19671_v53 }
 0x5c1   :  { %13889 = vmatmul.mubr.msk.f32.gmra.mrb[14].mxu0 %vm7627_vm2, %v19716_v24 }
 0x5c2   :  { %13895 = vmatprep.mubr.msk.f32.mxu0 %vm7627_vm2, %v19546_v25 }
 0x5c5   :  { %13896 = vmatmul.mubr.msk.f32.vlgmr.msra.gmra.mrb[0].mxu0 %vm7627_vm2, %v19551_v16 }
 0x5c6   :  { %14167 = vmatpush3.bf16.msra.mxu0 %v14164_v45  ;;  %13898 = vmatprep.mubr.msk.f32.mxu0 %vm7627_vm2, %v19555_v35  ;;  %v11610_v45 = vld [vmem:[%s20372_s5 + $0x40] sm:$0xff] }
 0x5c7   :  { %14169 = vmatprep.subr.bf16.mxu0 %v14168_v54 }
 0x5c9   :  { %13899 = vmatmul.mubr.msk.f32.gmra.mrb[2].mxu0 %vm7627_vm2, %v19569_v8 }
 0x5ca   :  { %13901 = vmatprep.mubr.msk.f32.mxu0 %vm7627_vm2, %v19574_v6 }
 0x5cd   :  { %13902 = vmatmul.mubr.msk.f32.gmra.mrb[4].mxu0 %vm7627_vm2, %v19587_v60  ;;  %v11387_v60 = vld [vmem:[%s20372_s5 + $0x20] sm:$0xff] }
 0x5ce   :  { %13904 = vmatprep.mubr.msk.f32.mxu0 %vm7627_vm2, %v9798_v41 }
 0x5d1   :  { %13905 = vmatmul.mubr.msk.f32.gmra.mrb[6].mxu0 %vm7627_vm2, %v9799_v44 }
 0x5d2   :  { %13907 = vmatprep.mubr.msk.f32.mxu0 %vm7627_vm2, %v19601_v1  ;;  %v11390_v1 = vld [vmem:[%s20372_s5 + $0x38] sm:$0xff] }
 0x5d5   :  { %13908 = vmatmul.mubr.msk.f32.gmra.mrb[8].mxu0 %vm7627_vm2, %v9801_v29 }
 0x5d6   :  { %13910 = vmatprep.mubr.msk.f32.mxu0 %vm7627_vm2, %v19346_v55  ;;  %v10026_v55 = vld [vmem:[#allocation3 + $0x91] sm:$0xff] }
 0x5d9   :  { %13911 = vmatmul.mubr.msk.f32.gmra.mrb[10].mxu0 %vm7627_vm2, %v19445_v48  ;;  %v10028_v48 = vld [vmem:[#allocation3 + $0xd1] sm:$0xff] }
 0x5da   :  { %13913 = vmatprep.mubr.msk.f32.mxu0 %vm7627_vm2, %v19493_v22  ;;  %v10029_v22 = vld [vmem:[#allocation3 + $0xe1] sm:$0xff] }
 0x5dd   :  { %13914 = vmatmul.mubr.msk.f32.gmra.mrb[12].mxu0 %vm7627_vm2, %v19534_v59  ;;  %v10034_v59 = vld [vmem:[#allocation3 + $0x131] sm:$0xff] }
 0x5de   :  { %13916 = vmatprep.mubr.msk.f32.mxu0 %vm7627_vm2, %v19559_v13 }
 0x5e1   :  { %13917 = vmatmul.mubr.msk.f32.gmra.mrb[14].mxu0 %vm7627_vm2, %v9807_v57 }
 0x5e2   :  { %13923 = vmatprep.mubr.msk.f32.mxu0 %vm7627_vm2, %v19578_v0 }
 0x5e5   :  { %13924 = vmatmul.mubr.msk.f32.vlgmr.msra.gmra.mrb[0].mxu0 %vm7627_vm2, %v19582_v4 }
 0x5e6   :  { %14171 = vmatpush3.bf16.msra.mxu0 %v14168_v54  ;;  %13926 = vmatprep.mubr.msk.f32.mxu0 %vm7627_vm2, %v19591_v9  ;;  %v11388_v9 = vld [vmem:[%s20372_s5 + $0x28] sm:$0xff] }
 0x5e9   :  { %13927 = vmatmul.mubr.msk.f32.gmra.mrb[2].mxu0 %vm7627_vm2, %v19596_v33  ;;  %v14172_v33 = vpack.c.bf16 %v11388_v9, %v11387_v60 }
 0x5ea   :  { %13929 = vmatprep.mubr.msk.f32.mxu0 %vm7627_vm2, %v19603_v36  ;;  %v14176_v36 = vpack.c.bf16 %v11390_v1, %v11389_v21 }
 0x5eb   :  { %14173 = vmatprep.subr.bf16.mxu1 %v14172_v33 }
 0x5ec   :  { %14175 = vmatpush3.bf16.msra.mxu1 %v14172_v33 }
 0x5ed   :  { %13930 = vmatmul.mubr.msk.f32.gmra.mrb[4].mxu0 %vm7627_vm2, %v19609_v7  ;;  %14177 = vmatprep.subr.bf16.mxu1 %v14176_v36  ;;  %v11375_v7 = vld [vmem:[%s20372_s5] sm:$0xff] }
 0x5ee   :  { %13932 = vmatprep.mubr.msk.f32.mxu0 %vm7627_vm2, %v19614_v49  ;;  %v19866_v49 = vpack.c.bf16 %v11376_v5, %v11375_v7 }
 0x5f0   :  { %14179 = vmatpush3.bf16.msra.mxu1 %v14176_v36 }
 0x5f1   :  { %13933 = vmatmul.mubr.msk.f32.gmra.mrb[6].mxu0 %vm7627_vm2, %v10026_v55  ;;  %14181 = vmatprep.subr.bf16.mxu1 %v19866_v49 }
 0x5f2   :  { %13935 = vmatprep.mubr.msk.f32.mxu0 %vm7627_vm2, %v19623_v23  ;;  %v19872_v23 = vld [vmem:[%s20371_s4] ss:$0 sm:$0xff] }
 0x5f5   :  { %13936 = vmatmul.mubr.msk.f32.gmra.mrb[8].mxu0 %vm7627_vm2, %v10028_v48 }
 0x5f6   :  { %13938 = vmatprep.mubr.msk.f32.mxu0 %vm7627_vm2, %v10029_v22 }
 0x5f9   :  { %13939 = vmatmul.mubr.msk.f32.gmra.mrb[10].mxu0 %vm7627_vm2, %v19443_v43  ;;  %v10253_v43 = vld [vmem:[#allocation3 + $0x92] sm:$0xff] }
 0x5fa   :  { %13941 = vmatprep.mubr.msk.f32.mxu0 %vm7627_vm2, %v19491_v26  ;;  %v10261_v26 = vld [vmem:[#allocation3 + $0x132] sm:$0xff] }
 0x5fd   :  { %13942 = vmatmul.mubr.msk.f32.gmra.mrb[12].mxu0 %vm7627_vm2, %v19532_v10 }
 0x5fe   :  { %13944 = vmatprep.mubr.msk.f32.mxu0 %vm7627_vm2, %v19658_v62  ;;  %v11377_v62 = vld [vmem:[%s20372_s5 + $0x10] sm:$0xff] }
 0x601   :  { %13945 = vmatmul.mubr.msk.f32.gmra.mrb[14].mxu0 %vm7627_vm2, %v10034_v59 }
 0x602   :  { %13951 = vmatprep.mubr.msk.f32.mxu0 %vm7627_vm2, %v19675_v31  ;;  %v11611_v31 = vld [vmem:[%s20372_s5 + $0x48] sm:$0xff] }
 0x603   :  { %v19896_v54 = vpack.c.bf16 %v11611_v31, %v11610_v45 }
 0x605   :  { %13952 = vmatmul.mubr.msk.f32.vlgmr.msra.gmra.mrb[0].mxu0 %vm7627_vm2, %v19679_v37 }
 0x606   :  { %13954 = vmatprep.mubr.msk.f32.mxu0 %vm7627_vm2, %v19683_v30 }
 0x609   :  { %13955 = vmatmul.mubr.msk.f32.gmra.mrb[2].mxu0 %vm7627_vm2, %v19687_v47 }
 0x60a   :  { %13957 = vmatprep.mubr.msk.f32.mxu0 %vm7627_vm2, %v19691_v2 }
 0x60d   :  { %13958 = vmatmul.mubr.msk.f32.gmra.mrb[4].mxu0 %vm7627_vm2, %v19695_v32 }
 0x60e   :  { %13960 = vmatprep.mubr.msk.f32.mxu0 %vm7627_vm2, %v19699_v51  ;;  %v19890_v51 = vpack.c.bf16 %v11378_v50, %v11377_v62 }
 0x611   :  { %13961 = vmatmul.mubr.msk.f32.gmra.mrb[6].mxu0 %vm7627_vm2, %v10253_v43 }
 0x612   :  { %13963 = vmatprep.mubr.msk.f32.mxu0 %vm7627_vm2, %v19632_v14 }
 0x615   :  { %13964 = vmatmul.mubr.msk.f32.gmra.mrb[8].mxu0 %vm7627_vm2, %v19640_v11 }
 0x616   :  { %13966 = vmatprep.mubr.msk.f32.mxu0 %vm7627_vm2, %v19644_v42 }
 0x619   :  { %13967 = vmatmul.mubr.msk.f32.gmra.mrb[10].mxu0 %vm7627_vm2, %v19652_v20 }
 0x61a   :  { %13969 = vmatprep.mubr.msk.f32.mxu0 %vm7627_vm2, %v19656_v56 }
 0x61d   :  { %13970 = vmatmul.mubr.msk.f32.gmra.mrb[12].mxu0 %vm7627_vm2, %v19671_v53 }
 0x61e   :  { %13972 = vmatprep.mubr.msk.f32.mxu0 %vm7627_vm2, %v19716_v24 }
 0x621   :  { %13973 = vmatmul.mubr.msk.f32.gmra.mrb[14].mxu0 %vm7627_vm2, %v10261_v26 }
 0x64e   :  { %v13757_v10 = vpop.f32.mrb[0].mxu1 }
 0x64f   :  { %v8804_v34 = vpop.f32.mrb[1].mxu1 }
 0x652   :  { %v13760_v40 = vpop.f32.mrb[2].mxu1 }
 0x653   :  { %v8814_v52 = vpop.f32.mrb[3].mxu1 }
 0x656   :  { %v19812_v25 = vpop.f32.mrb[4].mxu1 }
 0x657   :  { %v19814_v16 = vpop.f32.mrb[5].mxu1 }
 0x65a   :  { %v19816_v35 = vpop.f32.mrb[6].mxu1 }
 0x65b   :  { %v19818_v13 = vpop.f32.mrb[7].mxu1 }
 0x65e   :  { %v19820_v17 = vpop.f32.mrb[8].mxu1 }
 0x65f   :  { %v19822_v61 = vpop.f32.mrb[9].mxu1 }
 0x66e   :  { %v19836_v8 = vpop.f32.mrb[10].mxu1 }
 0x66f   :  { %v19838_v6 = vpop.f32.mrb[11].mxu1 }
 0x672   :  { %v19840_v18 = vpop.f32.mrb[12].mxu1 }
 0x673   :  { %v19842_v0 = vpop.f32.mrb[13].mxu1 }
 0x676   :  { %v19844_v4 = vpop.f32.mrb[14].mxu1 }
 0x677   :  { %v19846_v15 = vpop.f32.mrb[15].mxu1 }
 0x6d8   :  { %v13953_v58 = vpop.f32.mrb[0].mxu0 }
 0x6d9   :  { %v14302_v39 = vadd.f32 %v13953_v58, %v13757_v10  ;;  %v10378_v14 = vpop.f32.mrb[1].mxu0 }
 0x6da   :  { %v14303_v11 = vadd.f32 %v10378_v14, %v8804_v34 }
 0x6db   :  { %v10481_v42 = vadd.f32 %v14302_v39, %v19872_v23 }
 0x6dc   :  { %v10480_v20 = vadd.f32 %v14303_v11, %v19872_v23  ;;  %v13956_v56 = vpop.f32.mrb[2].mxu0 }
 0x6dd   :  { %v10497_v19 = vmax.f32 %v10481_v42, 0.0  ;;  %v14304_v3 = vadd.f32 %v13956_v56, %v13760_v40  ;;  %v10388_v53 = vpop.f32.mrb[3].mxu0 }
 0x6de   :  { %v10496_v37 = vmax.f32 %v10480_v20, 0.0  ;;  %v14305_v30 = vadd.f32 %v10388_v53, %v8814_v52 }
 0x6df   :  { %v10545_v47 = vcombine.high %v10497_v19, %v10497_v19  ;;  %v10552_v2 = vrot.slane %v10497_v19, %v21203_v63  ;;  %v10483_v32 = vadd.f32 %v14304_v3, %v19872_v23 }
 0x6e0   :  { %v10528_v27 = vcombine.high %v10496_v37, %v10496_v37  ;;  %v10535_v24 = vrot.slane %v10496_v37, %v21203_v63  ;;  %v10482_v12 = vadd.f32 %v14305_v30, %v19872_v23  ;;  %v19894_v38 = vpop.f32.mrb[4].mxu0 }
 0x6e1   :  { %v10559_v41 = vrot.slane %v10545_v47, %v21203_v63  ;;  %v10560_v44 = vcombine.high %v10552_v2, %v10552_v2  ;;  %v13321_v29 = vrot.slane %v10552_v2, 9  ;;  %v10499_v57 = vmax.f32 %v10483_v32, 0.0  ;;  %v19899_v55 = vpop.f32.mrb[5].mxu0 }
 0x6e2   :  { %v10542_v48 = vrot.slane %v10528_v27, %v21203_v63  ;;  %v10543_v22 = vcombine.high %v10535_v24, %v10535_v24  ;;  %v13317_v59 = vrot.slane %v10535_v24, 9  ;;  %v10498_v43 = vmax.f32 %v10482_v12, 0.0 }
 0x6e3   :  { %v10561_v26 = vcombine.high %v10559_v41, %v10559_v41  ;;  %v13322_v10 = vrot.slane %v10560_v44, 9  ;;  %v13323_v34 = vrot.slane %v10559_v41, 9  ;;  %v11060_v40 = vmax.f32 %v10552_v2, %v13321_v29 }
 0x6e4   :  { %v10544_v52 = vcombine.high %v10542_v48, %v10542_v48  ;;  %v13318_v60 = vrot.slane %v10543_v22, 9  ;;  %v13319_v9 = vrot.slane %v10542_v48, 9  ;;  %v11056_v33 = vmax.f32 %v10535_v24, %v13317_v59  ;;  %v13962_v21 = vpop.f32.mrb[6].mxu0 }
 0x6e5   :  { %v13324_v1 = vrot.slane %v10561_v26, 9  ;;  %v11061_v36 = vmax.f32 %v10560_v44, %v13322_v10  ;;  %v11062_v7 = vmax.f32 %v10559_v41, %v13323_v34  ;;  %v10579_v5 = vcombine.high %v10499_v57, %v10499_v57  ;;  %v10408_v58 = vpop.f32.mrb[7].mxu0 }
 0x6e6   :  { %v13320_v39 = vrot.slane %v10544_v52, 9  ;;  %v11057_v14 = vmax.f32 %v10543_v22, %v13318_v60  ;;  %v11058_v11 = vmax.f32 %v10542_v48, %v13319_v9  ;;  %v11120_v42 = vmax.f32 %v11056_v33, %v11060_v40 }
 0x6e7   :  { %v11063_v20 = vmax.f32 %v10561_v26, %v13324_v1  ;;  %v10586_v56 = vrot.slane %v10499_v57, %v21203_v63  ;;  %v10593_v62 = vrot.slane %v10579_v5, %v21203_v63  ;;  %v10562_v50 = vcombine.high %v10498_v43, %v10498_v43 }
 0x6e8   :  { %v11059_v19 = vmax.f32 %v10544_v52, %v13320_v39  ;;  %v11121_v3 = vmax.f32 %v11057_v14, %v11061_v36  ;;  %v11122_v53 = vmax.f32 %v11058_v11, %v11062_v7  ;;  %v11200_v45 = vrot.slane %v11120_v42, %v21233_v28  ;;  %v19905_v31 = vpop.f32.mrb[8].mxu0 }
 0x6e9   :  { %v10594_v37 = vcombine.high %v10586_v56, %v10586_v56  ;;  %v10595_v30 = vcombine.high %v10593_v62, %v10593_v62  ;;  %v13329_v47 = vrot.slane %v10586_v56, 9  ;;  %v13331_v2 = vrot.slane %v10593_v62, 9  ;;  %v19907_v32 = vpop.f32.mrb[9].mxu0 }
 0x6ea   :  { %v11123_v27 = vmax.f32 %v11059_v19, %v11063_v20  ;;  %v11204_v24 = vrot.slane %v11121_v3, %v21233_v28  ;;  %v11208_v12 = vrot.slane %v11122_v53, %v21233_v28  ;;  %v10569_v41 = vrot.slane %v10498_v43, %v21203_v63 }
 0x6eb   :  { %v13330_v44 = vrot.slane %v10594_v37, 9  ;;  %v13332_v29 = vrot.slane %v10595_v30, 9  ;;  %v11068_v57 = vmax.f32 %v10586_v56, %v13329_v47  ;;  %v11070_v48 = vmax.f32 %v10593_v62, %v13331_v2 }
 0x6ec   :  { %v11212_v22 = vrot.slane %v11123_v27, %v21233_v28  ;;  %v11325_v59 = vsel %vm8309_vm4, %v11204_v24, %v11200_v45  ;;  %v10576_v26 = vrot.slane %v10562_v50, %v21203_v63  ;;  %v10577_v10 = vcombine.high %v10569_v41, %v10569_v41  ;;  %v19915_v34 = vpop.f32.mrb[10].mxu0 }
 0x6ed   :  { %v11326_v40 = vsel %vm8311_vm5, %v11208_v12, %v11325_v59  ;;  %v11069_v52 = vmax.f32 %v10594_v37, %v13330_v44  ;;  %v11071_v60 = vmax.f32 %v10595_v30, %v13332_v29  ;;  %v13325_v9 = vrot.slane %v10569_v41, 9  ;;  %v19918_v33 = vpop.f32.mrb[11].mxu0 }
 0x6ee   :  { %v11327_v43 = vsel %vm8313_vm6, %v11212_v22, %v11326_v40  ;;  %v10578_v1 = vcombine.high %v10576_v26, %v10576_v26  ;;  %v13326_v36 = vrot.slane %v10577_v10, 9  ;;  %v13327_v7 = vrot.slane %v10576_v26, 9 }
 0x6ef   :  { %11359 = vst.msk [vmem:[#allocation4 + $0x9] sm:$0xf] %vm11358_vm12, %v11327_v43  ;;  %v11064_v5 = vmax.f32 %v10569_v41, %v13325_v9  ;;  %v14306_v39 = vadd.f32 %v19894_v38, %v19812_v25  ;;  %v14307_v14 = vadd.f32 %v19899_v55, %v19814_v16  ;;  %v14308_v11 = vadd.f32 %v13962_v21, %v19816_v35 }
 0x6f0   :  { %v13328_v42 = vrot.slane %v10578_v1, 9  ;;  %v11065_v20 = vmax.f32 %v10577_v10, %v13326_v36  ;;  %v11066_v56 = vmax.f32 %v10576_v26, %v13327_v7  ;;  %v14309_v62 = vadd.f32 %v10408_v58, %v19818_v13  ;;  %v19928_v50 = vpop.f32.mrb[12].mxu0 }
 0x6f1   :  { %v11124_v19 = vmax.f32 %v11064_v5, %v11068_v57  ;;  %v10485_v3 = vadd.f32 %v14306_v39, %v19872_v23  ;;  %v10484_v53 = vadd.f32 %v14307_v14, %v19872_v23  ;;  %v10487_v45 = vadd.f32 %v14308_v11, %v19872_v23  ;;  %v19933_v25 = vpop.f32.mrb[13].mxu0 }
 0x6f2   :  { %v11067_v38 = vmax.f32 %v10578_v1, %v13328_v42  ;;  %v11125_v16 = vmax.f32 %v11065_v20, %v11069_v52  ;;  %v11126_v55 = vmax.f32 %v11066_v56, %v11070_v48  ;;  %v10486_v35 = vadd.f32 %v14309_v62, %v19872_v23 }
 0x6f3   :  { %v11216_v21 = vrot.slane %v11124_v19, %v21233_v28  ;;  %v10501_v37 = vmax.f32 %v10485_v3, 0.0  ;;  %v10500_v13 = vmax.f32 %v10484_v53, 0.0  ;;  %v10503_v58 = vmax.f32 %v10487_v45, 0.0 }
 0x6f4   :  { %v11127_v30 = vmax.f32 %v11067_v38, %v11071_v60  ;;  %v11220_v47 = vrot.slane %v11125_v16, %v21233_v28  ;;  %v11224_v2 = vrot.slane %v11126_v55, %v21233_v28  ;;  %v10502_v27 = vmax.f32 %v10486_v35, 0.0  ;;  %v19939_v24 = vpop.f32.mrb[14].mxu0 }
 0x6f5   :  { %v10613_v12 = vcombine.high %v10501_v37, %v10501_v37  ;;  %v10620_v41 = vrot.slane %v10501_v37, %v21203_v63  ;;  %v10596_v44 = vcombine.high %v10500_v13, %v10500_v13  ;;  %v10603_v29 = vrot.slane %v10500_v13, %v21203_v63  ;;  %v19943_v57 = vpop.f32.mrb[15].mxu0 }
 0x6f6   :  { %v11228_v48 = vrot.slane %v11127_v30, %v21233_v28  ;;  %v11328_v22 = vsel %vm8309_vm4, %v11220_v47, %v11216_v21  ;;  %v10647_v59 = vcombine.high %v10503_v58, %v10503_v58  ;;  %v10654_v26 = vrot.slane %v10503_v58, %v21203_v63  ;;  %v14471_v10 = vld [vmem:[#allocation4 + $0x1] ss:$8 sps:$4 sm:$0xff]  }
 0x6f7   :  { %v11329_v40 = vsel %vm8311_vm5, %v11224_v2, %v11328_v22  ;;  %v10627_v52 = vrot.slane %v10613_v12, %v21203_v63  ;;  %v10628_v60 = vcombine.high %v10620_v41, %v10620_v41  ;;  %v13337_v9 = vrot.slane %v10620_v41, 9  ;;  %13983 = vmatprep.mubr.msk.f32.mxu1 %vm11403_vm13, %v14471_v10 }
 0x6f8   :  { %v11330_v43 = vsel %vm8313_vm6, %v11228_v48, %v11329_v40  ;;  %v10610_v1 = vrot.slane %v10596_v44, %v21203_v63  ;;  %v10611_v36 = vcombine.high %v10603_v29, %v10603_v29  ;;  %v13333_v7 = vrot.slane %v10603_v29, 9 }
 0x6f9   :  { %11360 = vst.msk [vmem:[#allocation4 + $0x11] sm:$0xf] %vm11358_vm12, %v11330_v43  ;;  %v10629_v5 = vcombine.high %v10627_v52, %v10627_v52  ;;  %v13338_v39 = vrot.slane %v10628_v60, 9  ;;  %v13339_v14 = vrot.slane %v10627_v52, 9  ;;  %v11076_v11 = vmax.f32 %v10620_v41, %v13337_v9 }
 0x6fa   :  { %v10612_v42 = vcombine.high %v10610_v1, %v10610_v1  ;;  %v13334_v20 = vrot.slane %v10611_v36, 9  ;;  %v13335_v56 = vrot.slane %v10610_v1, 9  ;;  %v11072_v62 = vmax.f32 %v10603_v29, %v13333_v7 }
 0x6fb   :  { %v13340_v19 = vrot.slane %v10629_v5, 9  ;;  %v11077_v3 = vmax.f32 %v10628_v60, %v13338_v39  ;;  %v11078_v53 = vmax.f32 %v10627_v52, %v13339_v14  ;;  %v10661_v45 = vrot.slane %v10647_v59, %v21203_v63 }
 0x6fc   :  { %v13336_v38 = vrot.slane %v10612_v42, 9  ;;  %v11073_v16 = vmax.f32 %v10611_v36, %v13334_v20  ;;  %v11074_v55 = vmax.f32 %v10610_v1, %v13335_v56  ;;  %v11128_v35 = vmax.f32 %v11072_v62, %v11076_v11 }
 0x6fd   :  { %v11079_v21 = vmax.f32 %v10629_v5, %v13340_v19  ;;  %v10662_v37 = vcombine.high %v10654_v26, %v10654_v26  ;;  %v10663_v13 = vcombine.high %v10661_v45, %v10661_v45  ;;  %v13345_v58 = vrot.slane %v10654_v26, 9 }
 0x6fe   :  { %v11075_v30 = vmax.f32 %v10612_v42, %v13336_v38  ;;  %v11129_v47 = vmax.f32 %v11073_v16, %v11077_v3  ;;  %v11130_v2 = vmax.f32 %v11074_v55, %v11078_v53  ;;  %v11232_v12 = vrot.slane %v11128_v35, %v21233_v28 }
 0x6ff   :  { %v13346_v41 = vrot.slane %v10662_v37, 9  ;;  %v13347_v44 = vrot.slane %v10661_v45, 9  ;;  %v13348_v29 = vrot.slane %v10663_v13, 9  ;;  %v11084_v48 = vmax.f32 %v10654_v26, %v13345_v58 }
 0x700   :  { %v11131_v22 = vmax.f32 %v11075_v30, %v11079_v21  ;;  %v11236_v59 = vrot.slane %v11129_v47, %v21233_v28  ;;  %v11240_v10 = vrot.slane %v11130_v2, %v21233_v28  ;;  %v10630_v40 = vcombine.high %v10502_v27, %v10502_v27 }
 0x701   :  { %v11085_v52 = vmax.f32 %v10662_v37, %v13346_v41  ;;  %v11086_v60 = vmax.f32 %v10661_v45, %v13347_v44  ;;  %v11087_v9 = vmax.f32 %v10663_v13, %v13348_v29  ;;  %v10637_v43 = vrot.slane %v10502_v27, %v21203_v63 }
 0x702   :  { %v11244_v1 = vrot.slane %v11131_v22, %v21233_v28  ;;  %v11331_v36 = vsel %vm8309_vm4, %v11236_v59, %v11232_v12  ;;  %v10644_v7 = vrot.slane %v10630_v40, %v21203_v63  ;;  %v14310_v26 = vadd.f32 %v19905_v31, %v19820_v17 }
 0x703   :  { %v11332_v5 = vsel %vm8311_vm5, %v11240_v10, %v11331_v36  ;;  %v10645_v39 = vcombine.high %v10637_v43, %v10637_v43  ;;  %v13341_v14 = vrot.slane %v10637_v43, 9  ;;  %v14311_v11 = vadd.f32 %v19907_v32, %v19822_v61 }
 0x704   :  { %v11333_v42 = vsel %vm8313_vm6, %v11244_v1, %v11332_v5  ;;  %v10646_v20 = vcombine.high %v10644_v7, %v10644_v7  ;;  %v13343_v27 = vrot.slane %v10644_v7, 9  ;;  %v10489_v56 = vadd.f32 %v14310_v26, %v19872_v23 }
 0x705   :  { %11361 = vst.msk [vmem:[#allocation4 + $0x19] sm:$0xf] %vm11358_vm12, %v11333_v42  ;;  %v13342_v62 = vrot.slane %v10645_v39, 9  ;;  %v11080_v19 = vmax.f32 %v10637_v43, %v13341_v14  ;;  %v10488_v3 = vadd.f32 %v14311_v11, %v19872_v23  ;;  %v14312_v17 = vadd.f32 %v19915_v34, %v19836_v8 }
 0x706   :  { %v13344_v31 = vrot.slane %v10646_v20, 9  ;;  %v11082_v53 = vmax.f32 %v10644_v7, %v13343_v27  ;;  %v10505_v45 = vmax.f32 %v10489_v56, 0.0  ;;  %v14313_v61 = vadd.f32 %v19918_v33, %v19838_v6 }
 0x707   :  { %v11081_v32 = vmax.f32 %v10645_v39, %v13342_v62  ;;  %v11132_v38 = vmax.f32 %v11080_v19, %v11084_v48  ;;  %v10504_v16 = vmax.f32 %v10488_v3, 0.0  ;;  %v10491_v55 = vadd.f32 %v14312_v17, %v19872_v23 }
 0x708   :  { %v11083_v35 = vmax.f32 %v10646_v20, %v13344_v31  ;;  %v11134_v21 = vmax.f32 %v11082_v53, %v11086_v60  ;;  %v10681_v37 = vcombine.high %v10505_v45, %v10505_v45  ;;  %v10688_v13 = vrot.slane %v10505_v45, %v21203_v63 }
 0x709   :  { %v11133_v58 = vmax.f32 %v11081_v32, %v11085_v52  ;;  %v11248_v30 = vrot.slane %v11132_v38, %v21233_v28  ;;  %v10664_v8 = vcombine.high %v10504_v16, %v10504_v16  ;;  %v10671_v34 = vrot.slane %v10504_v16, %v21203_v63 }
 0x70a   :  { %v11135_v47 = vmax.f32 %v11083_v35, %v11087_v9  ;;  %v11256_v2 = vrot.slane %v11134_v21, %v21233_v28  ;;  %v10695_v6 = vrot.slane %v10681_v37, %v21203_v63  ;;  %v10696_v33 = vcombine.high %v10688_v13, %v10688_v13 }
 0x70b   :  { %v11252_v12 = vrot.slane %v11133_v58, %v21233_v28  ;;  %v13353_v41 = vrot.slane %v10688_v13, 9  ;;  %v10678_v44 = vrot.slane %v10664_v8, %v21203_v63  ;;  %v10679_v29 = vcombine.high %v10671_v34, %v10671_v34 }
 0x70c   :  { %v11260_v48 = vrot.slane %v11135_v47, %v21233_v28  ;;  %v10697_v22 = vcombine.high %v10695_v6, %v10695_v6  ;;  %v13354_v59 = vrot.slane %v10696_v33, 9  ;;  %v13355_v10 = vrot.slane %v10695_v6, 9  ;;  %v14472_v40 = vld [vmem:[#allocation4 + $0x11] ss:$8 sps:$4 sm:$0xff]  }
 0x70d   :  { %v11334_v52 = vsel %vm8309_vm4, %v11252_v12, %v11248_v30  ;;  %v11092_v60 = vmax.f32 %v10688_v13, %v13353_v41  ;;  %v10680_v9 = vcombine.high %v10678_v44, %v10678_v44  ;;  %v13349_v43 = vrot.slane %v10671_v34, 9  ;;  %13984 = vmatmul.mubr.msk.f32.vlgmr.msra.gmra.mrb[16].mxu1 %vm11403_vm13, %v14472_v40 }
 0x70e   :  { %v11335_v1 = vsel %vm8311_vm5, %v11256_v2, %v11334_v52  ;;  %v13356_v36 = vrot.slane %v10697_v22, 9  ;;  %v11093_v7 = vmax.f32 %v10696_v33, %v13354_v59  ;;  %v11094_v26 = vmax.f32 %v10695_v6, %v13355_v10  ;;  %14183 = vmatpush3.bf16.msra.mxu1 %v19866_v49 }
 0x70f   :  { %v11336_v5 = vsel %vm8313_vm6, %v11260_v48, %v11335_v1  ;;  %v13350_v39 = vrot.slane %v10679_v29, 9  ;;  %v13351_v14 = vrot.slane %v10678_v44, 9  ;;  %v13352_v11 = vrot.slane %v10680_v9, 9  ;;  %14185 = vmatprep.subr.bf16.mxu1 %v19890_v51 }
 0x710   :  { %11362 = vst.msk [vmem:[#allocation4 + $0x21] sm:$0xf] %vm11358_vm12, %v11336_v5  ;;  %v11095_v42 = vmax.f32 %v10697_v22, %v13356_v36  ;;  %v11088_v20 = vmax.f32 %v10671_v34, %v13349_v43  ;;  %v10507_v27 = vmax.f32 %v10491_v55, 0.0  ;;  %v10490_v56 = vadd.f32 %v14313_v61, %v19872_v23 }
 0x711   :  { %v11089_v62 = vmax.f32 %v10679_v29, %v13350_v39  ;;  %v11090_v19 = vmax.f32 %v10678_v44, %v13351_v14  ;;  %v11091_v3 = vmax.f32 %v10680_v9, %v13352_v11  ;;  %v14314_v17 = vadd.f32 %v19928_v50, %v19840_v18 }
 0x712   :  { %v11136_v31 = vmax.f32 %v11088_v20, %v11092_v60  ;;  %v10715_v53 = vcombine.high %v10507_v27, %v10507_v27  ;;  %v10722_v45 = vrot.slane %v10507_v27, %v21203_v63  ;;  %v10506_v49 = vmax.f32 %v10490_v56, 0.0  ;;  %14187 = vmatpush3.bf16.msra.mxu1 %v19890_v51 }
 0x713   :  { %v11137_v32 = vmax.f32 %v11089_v62, %v11093_v7  ;;  %v11138_v38 = vmax.f32 %v11090_v19, %v11094_v26  ;;  %v11139_v16 = vmax.f32 %v11091_v3, %v11095_v42  ;;  %v10493_v55 = vadd.f32 %v14314_v17, %v19872_v23  ;;  %14189 = vmatprep.subr.bf16.mxu1 %v19896_v54 }
 0x714   :  { %v11264_v61 = vrot.slane %v11136_v31, %v21233_v28  ;;  %v10729_v35 = vrot.slane %v10715_v53, %v21203_v63  ;;  %v10730_v21 = vcombine.high %v10722_v45, %v10722_v45  ;;  %v13361_v37 = vrot.slane %v10722_v45, 9 }
 0x715   :  { %v11268_v18 = vrot.slane %v11137_v32, %v21233_v28  ;;  %v11272_v50 = vrot.slane %v11138_v38, %v21233_v28  ;;  %v11276_v13 = vrot.slane %v11139_v16, %v21233_v28  ;;  %v10698_v58 = vcombine.high %v10506_v49, %v10506_v49 }
 0x716   :  { %v10731_v30 = vcombine.high %v10729_v35, %v10729_v35  ;;  %v13362_v8 = vrot.slane %v10730_v21, 9  ;;  %v13363_v34 = vrot.slane %v10729_v35, 9  ;;  %v11100_v47 = vmax.f32 %v10722_v45, %v13361_v37 }
 0x717   :  { %v11337_v51 = vsel %vm8309_vm4, %v11268_v18, %v11264_v61  ;;  %v10705_v2 = vrot.slane %v10506_v49, %v21203_v63  ;;  %v10712_v6 = vrot.slane %v10698_v58, %v21203_v63  ;;  %v10509_v33 = vmax.f32 %v10493_v55, 0.0 }
 0x718   :  { %v11338_v12 = vsel %vm8311_vm5, %v11272_v50, %v11337_v51  ;;  %v13364_v41 = vrot.slane %v10731_v30, 9  ;;  %v11101_v44 = vmax.f32 %v10730_v21, %v13362_v8  ;;  %v11102_v29 = vmax.f32 %v10729_v35, %v13363_v34 }
 0x719   :  { %v11339_v48 = vsel %vm8313_vm6, %v11276_v13, %v11338_v12  ;;  %v10713_v22 = vcombine.high %v10705_v2, %v10705_v2  ;;  %v10714_v59 = vcombine.high %v10712_v6, %v10712_v6  ;;  %v13357_v10 = vrot.slane %v10705_v2, 9 }
 0x71a   :  { %11363 = vst.msk [vmem:[#allocation4 + $0x39] sm:$0xf] %vm11358_vm12, %v11339_v48  ;;  %v11103_v40 = vmax.f32 %v10731_v30, %v13364_v41  ;;  %v13359_v52 = vrot.slane %v10712_v6, 9  ;;  %v10749_v60 = vcombine.high %v10509_v33, %v10509_v33  ;;  %v10756_v9 = vrot.slane %v10509_v33, %v21203_v63 }
 0x71b   :  { %v13358_v43 = vrot.slane %v10713_v22, 9  ;;  %v13360_v1 = vrot.slane %v10714_v59, 9  ;;  %v11096_v36 = vmax.f32 %v10705_v2, %v13357_v10  ;;  %v14315_v7 = vadd.f32 %v19933_v25, %v19842_v0 }
 0x71c   :  { %v11098_v26 = vmax.f32 %v10712_v6, %v13359_v52  ;;  %v10763_v5 = vrot.slane %v10749_v60, %v21203_v63  ;;  %v10764_v39 = vcombine.high %v10756_v9, %v10756_v9  ;;  %v13369_v31 = vrot.slane %v10756_v9, 9 }
 0x71d   :  { %v11097_v14 = vmax.f32 %v10713_v22, %v13358_v43  ;;  %v11099_v11 = vmax.f32 %v10714_v59, %v13360_v1  ;;  %v11140_v42 = vmax.f32 %v11096_v36, %v11100_v47  ;;  %v10492_v20 = vadd.f32 %v14315_v7, %v19872_v23 }
 0x71e   :  { %v11142_v27 = vmax.f32 %v11098_v26, %v11102_v29  ;;  %v10765_v56 = vcombine.high %v10763_v5, %v10763_v5  ;;  %v13370_v53 = vrot.slane %v10764_v39, 9  ;;  %v14316_v49 = vadd.f32 %v19939_v24, %v19844_v4 }
 0x71f   :  { %v11141_v62 = vmax.f32 %v11097_v14, %v11101_v44  ;;  %v11143_v19 = vmax.f32 %v11099_v11, %v11103_v40  ;;  %v11280_v3 = vrot.slane %v11140_v42, %v21233_v28  ;;  %v10508_v45 = vmax.f32 %v10492_v20, 0.0 }
 0x720   :  { %v11288_v17 = vrot.slane %v11142_v27, %v21233_v28  ;;  %v13371_v38 = vrot.slane %v10763_v5, 9  ;;  %v13372_v16 = vrot.slane %v10765_v56, 9  ;;  %v14317_v55 = vadd.f32 %v19943_v57, %v19846_v15 }
 0x721   :  { %v11284_v0 = vrot.slane %v11141_v62, %v21233_v28  ;;  %v11292_v25 = vrot.slane %v11143_v19, %v21233_v28  ;;  %v14473_v32 = vld [vmem:[#allocation4 + $0x31] ss:$8 sps:$4 sm:$0xff]   ;;  %v10732_v35 = vcombine.high %v10508_v45, %v10508_v45  ;;  %v10739_v21 = vrot.slane %v10508_v45, %v21203_v63 }
 0x722   :  { %v10495_v37 = vadd.f32 %v14316_v49, %v19872_v23  ;;  %13986 = vmatprep.mubr.msk.f32.mxu1 %vm11403_vm13, %v14473_v32  ;;  %v11108_v50 = vmax.f32 %v10756_v9, %v13369_v31  ;;  %v11109_v13 = vmax.f32 %v10764_v39, %v13370_v53  ;;  %v10494_v4 = vadd.f32 %v14317_v55, %v19872_v23 }
 0x723   :  { %v11340_v61 = vsel %vm8309_vm4, %v11284_v0, %v11280_v3  ;;  %v10746_v58 = vrot.slane %v10732_v35, %v21203_v63  ;;  %v10747_v15 = vcombine.high %v10739_v21, %v10739_v21  ;;  %v13365_v57 = vrot.slane %v10739_v21, 9 }
 0x724   :  { %v11341_v18 = vsel %vm8311_vm5, %v11288_v17, %v11340_v61  ;;  %v11110_v30 = vmax.f32 %v10763_v5, %v13371_v38  ;;  %v11111_v8 = vmax.f32 %v10765_v56, %v13372_v16  ;;  %v10511_v34 = vmax.f32 %v10495_v37, 0.0 }
 0x725   :  { %v11342_v24 = vsel %vm8313_vm6, %v11292_v25, %v11341_v18  ;;  %v10510_v47 = vmax.f32 %v10494_v4, 0.0  ;;  %v10748_v51 = vcombine.high %v10746_v58, %v10746_v58  ;;  %v13366_v2 = vrot.slane %v10747_v15, 9 }
 0x726   :  { %11364 = vst.msk [vmem:[#allocation4 + $0x41] sm:$0xf] %vm11358_vm12, %v11342_v24  ;;  %v13367_v6 = vrot.slane %v10746_v58, 9  ;;  %v11104_v33 = vmax.f32 %v10739_v21, %v13365_v57  ;;  %v10783_v12 = vcombine.high %v10511_v34, %v10511_v34  ;;  %v10790_v41 = vrot.slane %v10511_v34, %v21203_v63  ;;  %v11612_v57 = vld [vmem:[%s20372_s5 + $0x50] sm:$0xff]  ;;  %v14475_v34 = vld [vmem:[#allocation4] ss:$8 sps:$4 sm:$0xff]  }
 0x727   :  { %v10766_v23 = vcombine.high %v10510_v47, %v10510_v47  ;;  %v10773_v44 = vrot.slane %v10510_v47, %v21203_v63  ;;  %v13368_v29 = vrot.slane %v10748_v51, 9  ;;  %v11105_v48 = vmax.f32 %v10747_v15, %v13366_v2  ;;  %v11613_v47 = vld [vmem:[%s20372_s5 + $0x58] sm:$0xff] }
 0x728   :  { %v11106_v22 = vmax.f32 %v10746_v58, %v13367_v6  ;;  %v11144_v59 = vmax.f32 %v11104_v33, %v11108_v50  ;;  %v10797_v10 = vrot.slane %v10783_v12, %v21203_v63  ;;  %v10798_v40 = vcombine.high %v10790_v41, %v10790_v41  ;;  %v14477_v2 = vld [vmem:[#allocation4 + $0x30] ss:$8 sps:$4 sm:$0xff]   ;;  %v11731_v6 = vld [vmem:[%s20372_s5 + $0x60] sm:$0xff]  ;;  %v11732_v33 = vld [vmem:[%s20372_s5 + $0x68] sm:$0xff] }
 0x729   :  { %v13377_v52 = vrot.slane %v10790_v41, 9  ;;  %v10780_v60 = vrot.slane %v10766_v23, %v21203_v63  ;;  %v11107_v9 = vmax.f32 %v10748_v51, %v13368_v29  ;;  %v11145_v43 = vmax.f32 %v11105_v48, %v11109_v13  ;;  %v11733_v12 = vld [vmem:[%s20372_s5 + $0x70] sm:$0xff]  ;;  %v11734_v29 = vld [vmem:[%s20372_s5 + $0x78] sm:$0xff] }
 0x72a   :  { %v11146_v1 = vmax.f32 %v11106_v22, %v11110_v30  ;;  %v11296_v36 = vrot.slane %v11144_v59, %v21233_v28  ;;  %v10799_v7 = vcombine.high %v10797_v10, %v10797_v10  ;;  %v13378_v26 = vrot.slane %v10798_v40, 9  ;;  %v14481_v22 = vld [vmem:[#allocation4 + $0x32] ss:$8 sps:$4 sm:$0xff]   ;;  %v11852_v59 = vld [vmem:[%s20372_s5 + $0x80] sm:$0xff] }
 0x72b   :  { %v13379_v5 = vrot.slane %v10797_v10, 9  ;;  %v11116_v39 = vmax.f32 %v10790_v41, %v13377_v52  ;;  %v11147_v14 = vmax.f32 %v11107_v9, %v11111_v8  ;;  %v11300_v11 = vrot.slane %v11145_v43, %v21233_v28  ;;  %v11854_v9 = vld [vmem:[%s20372_s5 + $0x90] sm:$0xff]  ;;  %v11855_v43 = vld [vmem:[%s20372_s5 + $0x98] sm:$0xff] }
 0x72c   :  { %v11304_v42 = vrot.slane %v11146_v1, %v21233_v28  ;;  %v10781_v20 = vcombine.high %v10773_v44, %v10773_v44  ;;  %v13380_v27 = vrot.slane %v10799_v7, 9  ;;  %v11117_v56 = vmax.f32 %v10798_v40, %v13378_v26  ;;  %v14484_v1 = vld [vmem:[#allocation4 + $0x18] ss:$8 sps:$4 sm:$0xff]  }
 0x72d   :  { %v11118_v62 = vmax.f32 %v10797_v10, %v13379_v5  ;;  %v10782_v19 = vcombine.high %v10780_v60, %v10780_v60  ;;  %v11308_v3 = vrot.slane %v11147_v14, %v21233_v28  ;;  %v11343_v17 = vsel %vm8309_vm4, %v11300_v11, %v11296_v36  ;;  %v11853_v10 = vld [vmem:[%s20372_s5 + $0x88] sm:$0xff]  ;;  %v11973_v26 = vld [vmem:[%s20372_s5 + $0xa0] sm:$0xff] }
 0x72e   :  { %v13373_v31 = vrot.slane %v10773_v44, 9  ;;  %v13374_v53 = vrot.slane %v10781_v20, 9  ;;  %v11344_v0 = vsel %vm8311_vm5, %v11304_v42, %v11343_v17  ;;  %v11119_v25 = vmax.f32 %v10799_v7, %v13380_v27  ;;  %v14485_v7 = vld [vmem:[#allocation4 + $0x38] ss:$8 sps:$4 sm:$0xff]   ;;  %v11974_v5 = vld [vmem:[%s20372_s5 + $0xa8] sm:$0xff]  ;;  %v11975_v42 = vld [vmem:[%s20372_s5 + $0xb0] sm:$0xff] }
 0x72f   :  { %v13375_v45 = vrot.slane %v10780_v60, 9  ;;  %v13376_v49 = vrot.slane %v10782_v19, 9  ;;  %v11345_v32 = vsel %vm8313_vm6, %v11308_v3, %v11344_v0  ;;  %v14192_v51 = vpack.c.bf16 %v11613_v47, %v11612_v57  ;;  %v14487_v11 = vld [vmem:[#allocation4 + $0x9] ss:$8 sps:$4 sm:$0xff]   ;;  %v14488_v27 = vld [vmem:[#allocation4 + $0x19] ss:$8 sps:$4 sm:$0xff]  }
 0x730   :  { %v11112_v38 = vmax.f32 %v10773_v44, %v13373_v31  ;;  %v11113_v16 = vmax.f32 %v10781_v20, %v13374_v53  ;;  %11365 = vst.msk [vmem:[#allocation4 + $0x49] sm:$0xf] %vm11358_vm12, %v11345_v32  ;;  %v14196_v23 = vpack.c.bf16 %v11732_v33, %v11731_v6  ;;  %v14479_v44 = vld [vmem:[#allocation4 + $0x2] ss:$8 sps:$4 sm:$0xff]   ;;  %v14200_v48 = vpack.c.bf16 %v11734_v29, %v11733_v12  ;;  %v11976_v20 = vld [vmem:[%s20372_s5 + $0xb8] sm:$0xff]  ;;  %v12097_v0 = vld [vmem:[%s20372_s5 + $0xd0] sm:$0xff] }
 0x731   :  { %v11114_v55 = vmax.f32 %v10780_v60, %v13375_v45  ;;  %v11115_v61 = vmax.f32 %v10782_v19, %v13376_v49  ;;  %v14204_v52 = vpack.c.bf16 %v11853_v10, %v11852_v59  ;;  %v14483_v60 = vld [vmem:[#allocation4 + $0x8] ss:$8 sps:$4 sm:$0xff]   ;;  %v14208_v36 = vpack.c.bf16 %v11855_v43, %v11854_v9  ;;  %v12095_v19 = vld [vmem:[%s20372_s5 + $0xc0] sm:$0xff] }
 0x732   :  { %v11148_v35 = vmax.f32 %v11112_v38, %v11116_v39  ;;  %v11149_v21 = vmax.f32 %v11113_v16, %v11117_v56  ;;  %v14212_v14 = vpack.c.bf16 %v11974_v5, %v11973_v26  ;;  %v14216_v56 = vpack.c.bf16 %v11976_v20, %v11975_v42  ;;  %v12096_v3 = vld [vmem:[%s20372_s5 + $0xc8] sm:$0xff]  ;;  %v14492_v45 = vld [vmem:[#allocation4 + $0x1a] ss:$8 sps:$4 sm:$0xff]   ;;  %v12698_v26 = vld [vmem:[%s20374_s7 + $0xb0] sm:$0xff] }
 0x733   :  { %v11150_v37 = vmax.f32 %v11114_v55, %v11118_v62  ;;  %v11151_v18 = vmax.f32 %v11115_v61, %v11119_v25  ;;  %v14489_v62 = vld [vmem:[#allocation4 + $0x39] ss:$8 sps:$4 sm:$0xff]   ;;  %v14220_v31 = vpack.c.bf16 %v12096_v3, %v12095_v19  ;;  %v14491_v53 = vld [vmem:[#allocation4 + $0xa] ss:$8 sps:$4 sm:$0xff]  }
 0x734   :  { %v11312_v50 = vrot.slane %v11148_v35, %v21233_v28  ;;  %v11316_v13 = vrot.slane %v11149_v21, %v21233_v28  ;;  %v12098_v25 = vld [vmem:[%s20372_s5 + $0xd8] sm:$0xff]  ;;  %v12216_v38 = vld [vmem:[%s20372_s5 + $0xe0] sm:$0xff]  ;;  %v12217_v16 = vld [vmem:[%s20372_s5 + $0xe8] sm:$0xff] }
 0x735   :  { %v11320_v4 = vrot.slane %v11150_v37, %v21233_v28  ;;  %v11324_v24 = vrot.slane %v11151_v18, %v21233_v28  ;;  %v14476_v28 = vld [vmem:[#allocation4 + $0x10] ss:$8 sps:$4 sm:$0xff]   ;;  %v14224_v49 = vpack.c.bf16 %v12098_v25, %v12097_v0  ;;  %v14228_v61 = vpack.c.bf16 %v12217_v16, %v12216_v38  ;;  %v14496_v18 = vld [vmem:[#allocation4 + $0x20] ss:$8 sps:$4 sm:$0xff]  }
 0x736   :  { %v11346_v58 = vsel %vm8309_vm4, %v11316_v13, %v11312_v50  ;;  %v14493_v32 = vld [vmem:[#allocation4 + $0x3a] ss:$8 sps:$4 sm:$0xff]   ;;  %v12218_v21 = vld [vmem:[%s20372_s5 + $0xf0] sm:$0xff]  ;;  %v12697_v9 = vld [vmem:[%s20374_s7 + $0xa8] sm:$0xff] }
 0x737   :  { %v11347_v15 = vsel %vm8311_vm5, %v11320_v4, %v11346_v58  ;;  %v14474_v8 = vld [vmem:[#allocation4 + $0x41] ss:$8 sps:$4 sm:$0xff]   ;;  %v14495_v35 = vld [vmem:[#allocation4 + $0x10] ss:$8 sps:$4 sm:$0xff]  }
 0x738   :  { %v11348_v30 = vsel %vm8313_vm6, %v11324_v24, %v11347_v15  ;;  %13987 = vmatmul.mubr.msk.f32.gmra.mrb[18].mxu1 %vm11403_vm13, %v14474_v8  ;;  %v14478_v41 = vld [vmem:[#allocation4 + $0x40] ss:$8 sps:$4 sm:$0xff]   ;;  %v12219_v37 = vld [vmem:[%s20372_s5 + $0xf8] sm:$0xff] }
 0x739   :  { %11366 = vst.msk [vmem:[#allocation4 + $0x51] sm:$0xf] %vm11358_vm12, %v11348_v30  ;;  %13997 = vmatprep.mubr.msk.f32.mxu1 %vm11403_vm13, %v14475_v34  ;;  %v14482_v40 = vld [vmem:[#allocation4 + $0x42] ss:$8 sps:$4 sm:$0xff]   ;;  %v14232_v50 = vpack.c.bf16 %v12219_v37, %v12218_v21  ;;  %v14499_v57 = vld [vmem:[#allocation4 + $0x11] ss:$8 sps:$4 sm:$0xff]  }
 0x73a   :  { %v14497_v13 = vld [vmem:[#allocation4 + $0x40] ss:$8 sps:$4 sm:$0xff]   ;;  %v12339_v30 = vld [vmem:[%s20372_s5 + $0x110] sm:$0xff]  ;;  %v12340_v8 = vld [vmem:[%s20372_s5 + $0x118] sm:$0xff] }
 0x73b   :  { %v12337_v4 = vld [vmem:[%s20372_s5 + $0x100] sm:$0xff]  ;;  %v12338_v24 = vld [vmem:[%s20372_s5 + $0x108] sm:$0xff]  ;;  %v14240_v47 = vpack.c.bf16 %v12340_v8, %v12339_v30  ;;  %v12699_v5 = vld [vmem:[%s20374_s7 + $0xb8] sm:$0xff] }
 0x73c   :  { %13998 = vmatmul.mubr.msk.f32.vlgmr.msra.gmra.mrb[16].mxu1 %vm11403_vm13, %v14476_v28  ;;  %v14236_v15 = vpack.c.bf16 %v12338_v24, %v12337_v4  ;;  %v14500_v34 = vld [vmem:[#allocation4 + $0x21] ss:$8 sps:$4 sm:$0xff]   ;;  %v12683_v42 = vld [vmem:[%s20374_s7 + $0x38] sm:$0xff] }
 0x73d   :  { %14191 = vmatpush3.bf16.msra.mxu1 %v19896_v54  ;;  %14000 = vmatprep.mubr.msk.f32.mxu1 %vm11403_vm13, %v14477_v2  ;;  %v14480_v54 = vld [vmem:[#allocation4 + $0x12] ss:$8 sps:$4 sm:$0xff]   ;;  %v14501_v28 = vld [vmem:[#allocation4 + $0x41] ss:$8 sps:$4 sm:$0xff]  }
 0x73e   :  { %14193 = vmatprep.subr.bf16.mxu1 %v14192_v51  ;;  %v14503_v2 = vld [vmem:[#allocation4 + $0x12] ss:$8 sps:$4 sm:$0xff]   ;;  %v14504_v6 = vld [vmem:[#allocation4 + $0x22] ss:$8 sps:$4 sm:$0xff]  }
 0x73f   :  { %v14505_v33 = vld [vmem:[#allocation4 + $0x42] ss:$8 sps:$4 sm:$0xff]  }
 0x740   :  { %14001 = vmatmul.mubr.msk.f32.gmra.mrb[18].mxu1 %vm11403_vm13, %v14478_v41  ;;  %v14486_v39 = vld [vmem:[#allocation4 + $0x48] ss:$8 sps:$4 sm:$0xff]   ;;  %v12692_v41 = vld [vmem:[%s20374_s7 + $0x80] sm:$0xff] }
 0x741   :  { %14195 = vmatpush3.bf16.msra.mxu1 %v14192_v51  ;;  %14011 = vmatprep.mubr.msk.f32.mxu1 %vm11403_vm13, %v14479_v44  ;;  %v14490_v17 = vld [vmem:[#allocation4 + $0x49] ss:$8 sps:$4 sm:$0xff]   ;;  %v12676_v44 = vld [vmem:[%s20374_s7] sm:$0xff] }
 0x742   :  { %14197 = vmatprep.subr.bf16.mxu1 %v14196_v23  ;;  %v14494_v55 = vld [vmem:[#allocation4 + $0x4a] ss:$8 sps:$4 sm:$0xff]   ;;  %v12700_v20 = vld [vmem:[%s20374_s7 + $0xc0] sm:$0xff] }
 0x743   :  { %v14498_v58 = vld [vmem:[#allocation4 + $0x50] ss:$8 sps:$4 sm:$0xff]   ;;  %v12684_v19 = vld [vmem:[%s20374_s7 + $0x40] sm:$0xff]  ;;  %v12685_v3 = vld [vmem:[%s20374_s7 + $0x48] sm:$0xff] }
 0x744   :  { %14012 = vmatmul.mubr.msk.f32.vlgmr.msra.gmra.mrb[16].mxu1 %vm11403_vm13, %v14480_v54  ;;  %v14502_v51 = vld [vmem:[#allocation4 + $0x51] ss:$8 sps:$4 sm:$0xff]   ;;  %v12677_v54 = vld [vmem:[%s20374_s7 + $0x8] sm:$0xff] }
 0x745   :  { %14199 = vmatpush3.bf16.msra.mxu1 %v14196_v23  ;;  %14014 = vmatprep.mubr.msk.f32.mxu1 %vm11403_vm13, %v14481_v22  ;;  %v14506_v12 = vld [vmem:[#allocation4 + $0x52] ss:$8 sps:$4 sm:$0xff]   ;;  %v12693_v23 = vld [vmem:[%s20374_s7 + $0x88] sm:$0xff]  ;;  %v14246_v59 = vpack.c.bf16 %v12677_v54, %v12676_v44 }
 0x746   :  { %14201 = vmatprep.subr.bf16.mxu1 %v14200_v48  ;;  %v14244_v29 = vpack.c.bf16 %v12693_v23, %v12692_v41  ;;  %v12695_v22 = vld [vmem:[%s20374_s7 + $0x98] sm:$0xff] }
 0x748   :  { %14015 = vmatmul.mubr.msk.f32.gmra.mrb[18].mxu1 %vm11403_vm13, %v14482_v40  ;;  %v12678_v40 = vld [vmem:[%s20374_s7 + $0x10] sm:$0xff] }
 0x749   :  { %14203 = vmatpush3.bf16.msra.mxu1 %v14200_v48  ;;  %14025 = vmatprep.mubr.msk.f32.mxu1 %vm11403_vm13, %v14483_v60  ;;  %v12694_v48 = vld [vmem:[%s20374_s7 + $0x90] sm:$0xff]  ;;  %v12696_v60 = vld [vmem:[%s20374_s7 + $0xa0] sm:$0xff] }
 0x74a   :  { %14205 = vmatprep.subr.bf16.mxu1 %v14204_v52  ;;  %v14248_v10 = vpack.c.bf16 %v12695_v22, %v12694_v48 }
 0x74c   :  { %14026 = vmatmul.mubr.msk.f32.vlgmr.msra.gmra.mrb[16].mxu1 %vm11403_vm13, %v14484_v1  ;;  %v14252_v1 = vpack.c.bf16 %v12697_v9, %v12696_v60 }
 0x74d   :  { %14207 = vmatpush3.bf16.msra.mxu1 %v14204_v52  ;;  %14028 = vmatprep.mubr.msk.f32.mxu1 %vm11403_vm13, %v14485_v7  ;;  %v12679_v52 = vld [vmem:[%s20374_s7 + $0x18] sm:$0xff]  ;;  %v12681_v7 = vld [vmem:[%s20374_s7 + $0x28] sm:$0xff] }
 0x74e   :  { %14209 = vmatprep.subr.bf16.mxu1 %v14208_v36  ;;  %v14250_v43 = vpack.c.bf16 %v12679_v52, %v12678_v40 }
 0x750   :  { %14029 = vmatmul.mubr.msk.f32.gmra.mrb[18].mxu1 %vm11403_vm13, %v14486_v39 }
 0x751   :  { %14211 = vmatpush3.bf16.msra.mxu1 %v14208_v36  ;;  %14039 = vmatprep.mubr.msk.f32.mxu1 %vm11403_vm13, %v14487_v11  ;;  %v12680_v36 = vld [vmem:[%s20374_s7 + $0x20] sm:$0xff]  ;;  %v12682_v11 = vld [vmem:[%s20374_s7 + $0x30] sm:$0xff] }
 0x752   :  { %14213 = vmatprep.subr.bf16.mxu1 %v14212_v14  ;;  %v14254_v39 = vpack.c.bf16 %v12681_v7, %v12680_v36 }
 0x754   :  { %14040 = vmatmul.mubr.msk.f32.vlgmr.msra.gmra.mrb[16].mxu1 %vm11403_vm13, %v14488_v27  ;;  %v12701_v27 = vld [vmem:[%s20374_s7 + $0xc8] sm:$0xff] }
 0x755   :  { %14215 = vmatpush3.bf16.msra.mxu1 %v14212_v14  ;;  %14042 = vmatprep.mubr.msk.f32.mxu1 %vm11403_vm13, %v14489_v62  ;;  %v14256_v14 = vpack.c.bf16 %v12699_v5, %v12698_v26  ;;  %v14260_v62 = vpack.c.bf16 %v12701_v27, %v12700_v20  ;;  %v12702_v5 = vld [vmem:[%s20374_s7 + $0xd0] sm:$0xff] }
 0x756   :  { %14217 = vmatprep.subr.bf16.mxu1 %v14216_v56 }
 0x758   :  { %14043 = vmatmul.mubr.msk.f32.gmra.mrb[18].mxu1 %vm11403_vm13, %v14490_v17  ;;  %v14262_v17 = vpack.c.bf16 %v12685_v3, %v12684_v19 }
 0x759   :  { %14219 = vmatpush3.bf16.msra.mxu1 %v14216_v56  ;;  %14053 = vmatprep.mubr.msk.f32.mxu1 %vm11403_vm13, %v14491_v53  ;;  %v14258_v56 = vpack.c.bf16 %v12683_v42, %v12682_v11 }
 0x75a   :  { %14221 = vmatprep.subr.bf16.mxu1 %v14220_v31 }
 0x75c   :  { %14054 = vmatmul.mubr.msk.f32.vlgmr.msra.gmra.mrb[16].mxu1 %vm11403_vm13, %v14492_v45 }
 0x75d   :  { %14223 = vmatpush3.bf16.msra.mxu1 %v14220_v31  ;;  %14056 = vmatprep.mubr.msk.f32.mxu1 %vm11403_vm13, %v14493_v32  ;;  %v13417_v31 = vld [vmem:[%s20373_s6] ss:$0 sm:$0xff] }
 0x75e   :  { %14225 = vmatprep.subr.bf16.mxu1 %v14224_v49 }
 0x760   :  { %14057 = vmatmul.mubr.msk.f32.gmra.mrb[18].mxu1 %vm11403_vm13, %v14494_v55 }
 0x761   :  { %14227 = vmatpush3.bf16.msra.mxu1 %v14224_v49  ;;  %14067 = vmatprep.mubr.msk.f32.mxu1 %vm11403_vm13, %v14495_v35 }
 0x762   :  { %14229 = vmatprep.subr.bf16.mxu1 %v14228_v61 }
 0x764   :  { %14068 = vmatmul.mubr.msk.f32.vlgmr.msra.gmra.mrb[16].mxu1 %vm11403_vm13, %v14496_v18 }
 0x765   :  { %14231 = vmatpush3.bf16.msra.mxu1 %v14228_v61  ;;  %14070 = vmatprep.mubr.msk.f32.mxu1 %vm11403_vm13, %v14497_v13 }
 0x766   :  { %14233 = vmatprep.subr.bf16.mxu1 %v14232_v50 }
 0x768   :  { %14071 = vmatmul.mubr.msk.f32.gmra.mrb[18].mxu1 %vm11403_vm13, %v14498_v58 }
 0x769   :  { %14235 = vmatpush3.bf16.msra.mxu1 %v14232_v50  ;;  %14081 = vmatprep.mubr.msk.f32.mxu1 %vm11403_vm13, %v14499_v57 }
 0x76a   :  { %14237 = vmatprep.subr.bf16.mxu1 %v14236_v15 }
 0x76c   :  { %14082 = vmatmul.mubr.msk.f32.vlgmr.msra.gmra.mrb[16].mxu1 %vm11403_vm13, %v14500_v34 }
 0x76d   :  { %14239 = vmatpush3.bf16.msra.mxu1 %v14236_v15  ;;  %14084 = vmatprep.mubr.msk.f32.mxu1 %vm11403_vm13, %v14501_v28 }
 0x76e   :  { %14241 = vmatprep.subr.bf16.mxu1 %v14240_v47 }
 0x770   :  { %14085 = vmatmul.mubr.msk.f32.gmra.mrb[18].mxu1 %vm11403_vm13, %v14502_v51 }
 0x771   :  { %14243 = vmatpush3.bf16.msra.mxu1 %v14240_v47  ;;  %14095 = vmatprep.mubr.msk.f32.mxu1 %vm11403_vm13, %v14503_v2 }
 0x772   :  { %14245 = vmatprep.subr.bf16.mxu1 %v14244_v29 }
 0x774   :  { %14096 = vmatmul.mubr.msk.f32.vlgmr.msra.gmra.mrb[16].mxu1 %vm11403_vm13, %v14504_v6 }
 0x775   :  { %14098 = vmatprep.mubr.msk.f32.mxu1 %vm11403_vm13, %v14505_v33  ;;  %14247 = vmatpush3.bf16.msra.mxu1 %v14246_v59 }
 0x776   :  { %14249 = vmatprep.subr.bf16.mxu1 %v14248_v10 }
 0x778   :  { %14099 = vmatmul.mubr.msk.f32.gmra.mrb[18].mxu1 %vm11403_vm13, %v14506_v12 }
 0x779   :  { %14251 = vmatpush3.bf16.msra.mxu1 %v14250_v43 }
 0x77a   :  { %14253 = vmatprep.subr.bf16.mxu1 %v14252_v1 }
 0x77d   :  { %14255 = vmatpush3.bf16.msra.mxu1 %v14254_v39  ;;  %v12703_v39 = vld [vmem:[%s20374_s7 + $0xd8] sm:$0xff] }
 0x77e   :  { %14257 = vmatprep.subr.bf16.mxu1 %v14256_v14  ;;  %v14264_v19 = vpack.c.bf16 %v12703_v39, %v12702_v5  ;;  %v12797_v39 = vld [vmem:[%s20376_s9] sm:$0xff] }
 0x781   :  { %14259 = vmatpush3.bf16.msra.mxu1 %v14258_v56 }
 0x782   :  { %14261 = vmatprep.subr.bf16.mxu1 %v14260_v62 }
 0x785   :  { %14263 = vmatpush3.bf16.msra.mxu1 %v14262_v17 }
 0x786   :  { %14265 = vmatprep.subr.bf16.mxu1 %v14264_v19  ;;  %v12801_v19 = vld [vmem:[%s20376_s9 + $0x20] sm:$0xff] }
 0x847   :  { %v14097_v53 = vpop.f32.mrb[16].mxu1 }
 0x848   :  { %v12458_v0 = vadd.f32 %v14097_v53, %v13417_v31  ;;  %v12427_v25 = vpop.f32.mrb[17].mxu1  ;;  %v12686_v53 = vld [vmem:[%s20374_s7 + $0x50] sm:$0xff] }
 0x849   :  { %v12457_v45 = vadd.f32 %v13417_v31, %v12427_v25  ;;  %v12704_v25 = vld [vmem:[%s20374_s7 + $0xe0] sm:$0xff] }
 0x84a   :  { %v12462_v49 = vmax.f32 %v12458_v0, 0.0  ;;  %v12687_v0 = vld [vmem:[%s20374_s7 + $0x58] sm:$0xff] }
 0x84b   :  { %v12461_v32 = vmax.f32 %v12457_v45, 0.0  ;;  %v14100_v38 = vpop.f32.mrb[18].mxu1 }
 0x84c   :  { %v12486_v16 = vcombine.high %v12462_v49, %v12462_v49  ;;  %v12493_v55 = vrot.slane %v12462_v49, %v21203_v63  ;;  %v12460_v61 = vadd.f32 %v14100_v38, %v13417_v31  ;;  %v12437_v35 = vpop.f32.mrb[19].mxu1  ;;  %v14266_v38 = vpack.c.bf16 %v12687_v0, %v12686_v53  ;;  %v12805_v0 = vld [vmem:[%s20376_s9 + $0x40] sm:$0xff] }
 0x84d   :  { %v12469_v21 = vcombine.high %v12461_v32, %v12461_v32  ;;  %v12476_v37 = vrot.slane %v12461_v32, %v21203_v63  ;;  %v12459_v18 = vadd.f32 %v13417_v31, %v12437_v35 }
 0x84e   :  { %v12500_v50 = vrot.slane %v12486_v16, %v21203_v63  ;;  %v12501_v13 = vcombine.high %v12493_v55, %v12493_v55  ;;  %v12464_v4 = vmax.f32 %v12460_v61, 0.0  ;;  %v13422_v24 = vrot.slane %v12493_v55, 9  ;;  %v12705_v16 = vld [vmem:[%s20374_s7 + $0xe8] sm:$0xff]  ;;  %14267 = vmatpush3.bf16.msra.mxu1 %v14266_v38 }
 0x84f   :  { %v12483_v58 = vrot.slane %v12469_v21, %v21203_v63  ;;  %v12484_v15 = vcombine.high %v12476_v37, %v12476_v37  ;;  %v13418_v57 = vrot.slane %v12476_v37, 9  ;;  %v12463_v47 = vmax.f32 %v12459_v18, 0.0  ;;  %v12689_v61 = vld [vmem:[%s20374_s7 + $0x68] sm:$0xff] }
 0x850   :  { %v12502_v30 = vcombine.high %v12500_v50, %v12500_v50  ;;  %v13423_v8 = vrot.slane %v12501_v13, 9  ;;  %v13424_v34 = vrot.slane %v12500_v50, 9  ;;  %v12520_v6 = vcombine.high %v12464_v4, %v12464_v4 }
 0x851   :  { %v12485_v28 = vcombine.high %v12483_v58, %v12483_v58  ;;  %v13419_v51 = vrot.slane %v12484_v15, 9  ;;  %v13420_v2 = vrot.slane %v12483_v58, 9  ;;  %v12605_v12 = vmax.f32 %v12493_v55, %v13422_v24  ;;  %v12688_v55 = vld [vmem:[%s20374_s7 + $0x60] sm:$0xff] }
 0x852   :  { %v13425_v33 = vrot.slane %v12502_v30, 9  ;;  %v20230_v41 = vmax.f32 %v12476_v37, %v13418_v57  ;;  %v12527_v23 = vrot.slane %v12464_v4, %v21203_v63  ;;  %v20233_v44 = vmax.f32 %v12501_v13, %v13423_v8  ;;  %v12707_v13 = vld [vmem:[%s20374_s7 + $0xf8] sm:$0xff]  ;;  %v12690_v57 = vld [vmem:[%s20374_s7 + $0x70] sm:$0xff] }
 0x853   :  { %v12607_v29 = vmax.f32 %v12500_v50, %v13424_v34  ;;  %v12534_v54 = vrot.slane %v12520_v6, %v21203_v63  ;;  %v12503_v48 = vcombine.high %v12463_v47, %v12463_v47  ;;  %v13421_v22 = vrot.slane %v12485_v28, 9  ;;  %v12706_v50 = vld [vmem:[%s20374_s7 + $0xf0] sm:$0xff] }
 0x854   :  { %v20236_v59 = vmax.f32 %v12484_v15, %v13419_v51  ;;  %v12535_v10 = vcombine.high %v12527_v23, %v12527_v23  ;;  %v13430_v40 = vrot.slane %v12527_v23, 9  ;;  %v20238_v52 = vmax.f32 %v12483_v58, %v13420_v2 }
 0x855   :  { %v12536_v60 = vcombine.high %v12534_v54, %v12534_v54  ;;  %v13432_v9 = vrot.slane %v12534_v54, 9  ;;  %v12510_v43 = vrot.slane %v12463_v47, %v21203_v63  ;;  %v12608_v1 = vmax.f32 %v12502_v30, %v13425_v33  ;;  %v12691_v30 = vld [vmem:[%s20374_s7 + $0x78] sm:$0xff]  ;;  %s14579_s7 = smov 64  }
 0x856   :  { %v13431_v36 = vrot.slane %v12535_v10, 9  ;;  %v12613_v7 = vmax.f32 %v12527_v23, %v13430_v40  ;;  %v12517_v26 = vrot.slane %v12503_v48, %v21203_v63  ;;  %v12619_v27 = vmax.f32 %v12605_v12, %v12607_v29 }
 0x857   :  { %v13433_v14 = vrot.slane %v12536_v60, 9  ;;  %v12615_v11 = vmax.f32 %v12534_v54, %v13432_v9  ;;  %v12518_v42 = vcombine.high %v12510_v43, %v12510_v43  ;;  %v13426_v20 = vrot.slane %v12510_v43, 9 }
 0x858   :  { %v12519_v56 = vcombine.high %v12517_v26, %v12517_v26  ;;  %v13428_v62 = vrot.slane %v12517_v26, 9  ;;  %v12614_v3 = vmax.f32 %v12535_v10, %v13431_v36  ;;  %v12604_v35 = vmax.f32 %v12485_v28, %v13421_v22 }
 0x859   :  { %v12616_v17 = vmax.f32 %v12536_v60, %v13433_v14  ;;  %v12623_v63 = vmax.f32 %v12613_v7, %v12615_v11  ;;  %v13427_v31 = vrot.slane %v12518_v42, 9  ;;  %v12609_v49 = vmax.f32 %v12510_v43, %v13426_v20  ;;  %v12798_v14 = vld [vmem:[%s20376_s9 + $0x8] sm:$0xff] }
 0x85a   :  { %v13429_v45 = vrot.slane %v12519_v56, 9  ;;  %v12611_v32 = vmax.f32 %v12517_v26, %v13428_v62  ;;  %v14268_v18 = vpack.c.bf16 %v12705_v16, %v12704_v25  ;;  %v14270_v15 = vpack.c.bf16 %v12689_v61, %v12688_v55  ;;  %v12806_v25 = vld [vmem:[%s20376_s9 + $0x48] sm:$0xff]  ;;  %v12809_v16 = vld [vmem:[%s20376_s9 + $0x60] sm:$0xff] }
 0x85b   :  { %v12624_v21 = vmax.f32 %v12614_v3, %v12616_v17  ;;  %v12655_v37 = vrot.slane %v12623_v63, 7  ;;  %v12610_v4 = vmax.f32 %v12518_v42, %v13427_v31  ;;  %v12620_v8 = vmax.f32 %v20233_v44, %v12608_v1  ;;  %v12802_v3 = vld [vmem:[%s20376_s9 + $0x28] sm:$0xff]  ;;  %v12803_v63 = vld [vmem:[%s20376_s9 + $0x30] sm:$0xff]  ;;  %v12804_v31 = vld [vmem:[%s20376_s9 + $0x38] sm:$0xff] }
 0x85c   :  { %v12612_v24 = vmax.f32 %v12519_v56, %v13429_v45  ;;  %v12621_v58 = vmax.f32 %v12609_v49, %v12611_v32  ;;  %14269 = vmatprep.subr.bf16.mxu1 %v14268_v18  ;;  %v14272_v28 = vpack.c.bf16 %v12707_v13, %v12706_v50  ;;  %v12617_v51 = vmax.f32 %v20230_v41, %v20238_v52  ;;  %v12800_v56 = vld [vmem:[%s20376_s9 + $0x18] sm:$0xff]  ;;  %v12807_v49 = vld [vmem:[%s20376_s9 + $0x50] sm:$0xff]  ;;  %v12810_v55 = vld [vmem:[%s20376_s9 + $0x68] sm:$0xff] }
 0x85d   :  { %v12666_v34 = vrot.slane %v12624_v21, 7  ;;  %v12656_v47 = vsel %vm8309_vm4, %v12655_v37, %v12619_v27  ;;  %v12618_v12 = vmax.f32 %v20236_v59, %v12604_v35  ;;  %v14274_v54 = vpack.c.bf16 %v12691_v30, %v12690_v57  ;;  %14271 = vmatpush3.bf16.msra.mxu1 %v14270_v15  ;;  %v12799_v27 = vld [vmem:[%s20376_s9 + $0x10] sm:$0xff]  ;;  %v12808_v32 = vld [vmem:[%s20376_s9 + $0x58] sm:$0xff]  ;;  %v13434_v50 = vld [vmem:[%s20375_s8] ss:$0 sm:$0xff] }
 0x85e   :  { %v12622_v2 = vmax.f32 %v12610_v4, %v12612_v24  ;;  %v12629_v6 = vrot.slane %v12621_v58, 7  ;;  %v12657_v33 = vsel %vm8313_vm6, %v12655_v37, %v12656_v47  ;;  %14273 = vmatprep.subr.bf16.mxu1 %v14272_v28  ;;  %v14580_v7 = vmov 0.0|0.0   ;;  %v12811_v35 = vld [vmem:[%s20376_s9 + $0x70] sm:$0xff]  ;;  %v12812_v21 = vld [vmem:[%s20376_s9 + $0x78] sm:$0xff]  ;;  %v13436_v15 = vld [vmem:[%s20377_s10] ss:$0 sm:$0xff] }
 0x85f   :  { %v12667_v23 = vsel %vm8309_vm4, %v12666_v34, %v12620_v8  ;;  %v12658_v29 = vsel %vm8317_vm8, %v12655_v37, %v12657_v33  ;;  %v14277_v20 = vpack.c.bf16 %v12798_v14, %v12797_v39  ;;  %v14280_v62 = vpack.c.bf16 %v12800_v56, %v12799_v27  ;;  %s14582_s9 = smov [#allocation6]  }
 0x860   :  { %v12668_v44 = vsel %vm8313_vm6, %v12666_v34, %v12667_v23  ;;  %v12641_v48 = vrot.slane %v12622_v2, 7  ;;  %v12659_v22 = vsel %vm8321_vm10, %v12655_v37, %v12658_v29  ;;  %v12630_v10 = vsel %vm8309_vm4, %v12629_v6, %v12617_v51  ;;  %s12898_s3 = sshll.u32 %s14582_s9, 4  ;;  %s12899_s3 = int_to_ptr.vmem [resolvable:$true] %s12898_s3 }
 0x861   :  { %v12669_v41 = vsel %vm8317_vm8, %v12666_v34, %v12668_v44  ;;  %12661 = vst.msk [vmem:[#allocation5 + $0x2] sm:$0x3] %vm12635_vm14, %v12659_v22  ;;  %v12631_v40 = vsel %vm8313_vm6, %v12629_v6, %v12630_v10  ;;  %14275 = vmatpush3.bf16.msra.mxu1 %v14274_v54  ;;  %v14283_v17 = vpack.c.bf16 %v12802_v3, %v12801_v19  ;;  %s14552_s14 = scalar_lea.vmem %s12899_s3, 32  ;;  %p14557_p1 = scmp.lt.s32.totalorder %s12899_s3, %s12899_s3 }
 0x862   :  { %v12670_v59 = vsel %vm8321_vm10, %v12666_v34, %v12669_v41  ;;  %v12642_v52 = vsel %vm8309_vm4, %v12641_v48, %v12618_v12  ;;  %v12632_v60 = vsel %vm8317_vm8, %v12629_v6, %v12631_v40  ;;  %14276 = vmatprep.subr.bf16.mxu1 %v14580_v7  ;;  %v14286_v53 = vpack.c.bf16 %v12804_v31, %v12803_v63  ;;  %p14553_p0 = scmp.ne.s32.totalorder %s12899_s3, %s14552_s14  ;;  %p14558_p2 = scmp.lt.s32.totalorder %s14552_s14, %s14552_s14 }
 0x863   :  { %12671 = vrot.lane.b32.xlu1 %v12670_v59, %s14579_s7  ;;  %v12643_v9 = vsel %vm8313_vm6, %v12641_v48, %v12642_v52  ;;  %v12633_v43 = vsel %vm8321_vm10, %v12629_v6, %v12632_v60  ;;  %v14289_v45 = vpack.c.bf16 %v12806_v25, %v12805_v0  ;;  %v14292_v38 = vpack.c.bf16 %v12808_v32, %v12807_v49 }
 0x864   :  { %v12644_v1 = vsel %vm8317_vm8, %v12641_v48, %v12643_v9  ;;  %12636 = vst.msk [vmem:[#allocation5] sm:$0x3] %vm12635_vm14, %v12633_v43  ;;  %v14295_v61 = vpack.c.bf16 %v12810_v55, %v12809_v16  ;;  %v14298_v37 = vpack.c.bf16 %v12812_v21, %v12811_v35  ;;  %p14559_p3 = por %p14558_p2, %p14557_p1 }
 0x865   :  { %v12645_v36 = vsel %vm8321_vm10, %v12641_v48, %v12644_v1 }
 0x866   :  { %12646 = vrot.lane.b32.xlu0 %v12645_v36, %s14579_s7  ;;  %p14560_p4 = pnand %p14559_p3, %p14553_p0 }
 0x8d5   :  { %v12672_v26 = vpop.permute.xlu1 %12671 }
 0x8d6   :  { %12674 = vst.msk [vmem:[#allocation5 + $0x2] sm:$0x3] %vm12649_vm15, %v12672_v26 }
 0x8d8   :  { %v12647_v5 = vpop.permute.xlu0 %12646 }
 0x8d9   :  { %12650 = vst.msk [vmem:[#allocation5] sm:$0x3] %vm12649_vm15, %v12647_v5 }
 0x8e0   :  { %v13435_v11 = vld.sshfl [vmem:[#allocation5] sm:$0x33 pattern:$0x76325410] }
 0x8e1   :  { %v12723_v42 = vcombine.high %v13435_v11, %v13435_v11 }
 0x8e3   :  { %12790 = vmatprep.mubr.f32.mxu1 %v12723_v42 }
 0x8e4   :  { %12791 = vmatmul.mubr.f32.vlgmr.msra.gmra.mrb[20].mxu1 %v13435_v11 }
 0x8e5   :  { %14278 = vmatpush3.bf16.msra.mxu1 %v14277_v20  ;;  %14133 = vmatprep.mubr.msk.f32.mxu1 %vm14581_vm0, %v21303_v46 }
 0x8e6   :  { %14279 = vmatprep.subr.bf16.mxu1 %v14580_v7 }
 0x8e9   :  { %14281 = vmatpush3.bf16.msra.mxu1 %v14280_v62 }
 0x8ea   :  { %14282 = vmatprep.subr.bf16.mxu1 %v14580_v7 }
 0x8ed   :  { %14284 = vmatpush3.bf16.msra.mxu1 %v14283_v17 }
 0x8ee   :  { %14285 = vmatprep.subr.bf16.mxu1 %v14580_v7 }
 0x8f1   :  { %14287 = vmatpush3.bf16.msra.mxu1 %v14286_v53 }
 0x8f2   :  { %14288 = vmatprep.subr.bf16.mxu1 %v14580_v7 }
 0x8f5   :  { %14290 = vmatpush3.bf16.msra.mxu1 %v14289_v45 }
 0x8f6   :  { %14291 = vmatprep.subr.bf16.mxu1 %v14580_v7 }
 0x8f9   :  { %14293 = vmatpush3.bf16.msra.mxu1 %v14292_v38 }
 0x8fa   :  { %14294 = vmatprep.subr.bf16.mxu1 %v14580_v7 }
 0x8fd   :  { %14296 = vmatpush3.bf16.msra.mxu1 %v14295_v61 }
 0x8fe   :  { %14297 = vmatprep.subr.bf16.mxu1 %v14580_v7 }
 0x901   :  { %14299 = vmatpush3.bf16.msra.mxu1 %v14298_v37 }
 0x9b7   :  { %v13703_v18 = vpop.f32.mrb[20].mxu1 }
 0x9b8   :  { %v13704_v13 = vpop.f32.mrb[21].mxu1 }
 0x9b9   :  { %v13705_v4 = vadd.f32 %v13704_v13, %v13703_v18 }
 0x9bb   :  { %v12793_v24 = vadd.f32 %v13705_v4, %v13434_v50 }
 0x9bd   :  { %v12796_v58 = vmax.f32 %v12793_v24, 0.0 }
 0x9bf   :  { %14134 = vmatmul.mubr.f32.vlgmr.msra.gmra.mrb[22].mxu1 %v12796_v58 }
 0xa92   :  { %v12886_v57 = vpop.f32.mrb[22].mxu1 }
 0xa93   :  { %v12887_v46 = vadd.f32 %v13436_v15, %v12886_v57  ;;  %v14135_v30 = vpop.f32.mrb[23].mxu1 }
 0xa95   :  { %12891 = vst.msk [vmem:[#allocation6] sm:$0x3] %vm12890_vm1, %v12887_v46 }
 0xa96   :  { %14563 = shalt.err (!%p14560_p4)
}
 0xa97   :  { %s14564_s15 = scalar_lea.hbm %s20378_s11, 32 }
 0xa98   :  { %p14565_p5 = scmp.ne.s32.totalorder %s20378_s11, %s14564_s15  ;;  %p14568_p6 = scmp.lt.u32.totalorder %s14564_s15, %s20378_s11 }
 0xa9a   :  { %p14570_p7 = pnand %p14568_p6, %p14565_p5 }
 0xa9c   :  { %14573 = shalt.err (!%p14570_p7)
}
 0xa9d   :  { %12901 = dma.vmem_to_hbm [thread:$0]  %s12899_s3, 32, %s20378_s11, [#allocation7]  }
 0xa9e   :  { %14574 = dma.done.wait [#allocation7], 32  }
 0xa9f   :  { %14575 = vsyncadd [#allocation7], 4294967264 }
 0xaa0   :  { %12905 = vsyncpa [#allocation7], 1 }

</bundles_post_ra>
